<compile_context>
chip_gen: v5e
topology: v5e:2x2
jax: 0.10.0
libtpu: 0.0.40
codegen_flags: <defaults>
</compile_context>

<pallas_src>
import functools

import numpy as np
import jax
import jax.numpy as jnp
from jax.experimental import pallas as pl
from jax.experimental.pallas import tpu as pltpu


# ----------------------------------------------------------------------------
# Host-side helpers (touch only the raw input / parameters, never intermediates)
# ----------------------------------------------------------------------------
def _sel_matrix(wout, wpad, dtype):
    """[3*wout, wpad] 0/1 matrix; row kj*wout + i picks padded column kj + 2*i.

    Used inside the kernel to do the stride-2 width selection of im2col as a
    tiny exact matmul (keeps everything as plain 2-D dots + contiguous stores).
    """
    m = np.zeros((3 * wout, wpad), np.float32)
    for kj in range(3):
        for i in range(wout):
            m[kj * wout + i, kj + 2 * i] = 1.0
    return jnp.asarray(m, dtype=dtype)


def _conv0_patches(x_nchw, cdt):
    """NCHW input -> conv0 im2col patches [B*196, 32] (K padded 27 -> 32)."""
    B = x_nchw.shape[0]
    x = jnp.transpose(x_nchw, (0, 2, 3, 1)).astype(cdt)          # [B,28,28,3]
    xp = jnp.pad(x, ((0, 0), (1, 1), (1, 1), (0, 0)))            # [B,30,30,3]
    cols = []
    for ki in range(3):
        for kj in range(3):
            cols.append(xp[:, ki:ki + 28:2, kj:kj + 28:2, :])    # [B,14,14,3]
    p = jnp.stack(cols, axis=-2).reshape(B * 196, 27)            # rows=(b,oh,ow)
    return jnp.pad(p, ((0, 0), (0, 5)))                          # K 27 -> 32


def init_params(key, style_dim, class_dim, factorized):
    """Deterministic PyTorch-shaped raw parameters."""
    hidden = style_dim + class_dim

    def u(key, shape, fan_in):
        bound = 1.0 / jnp.sqrt(fan_in)
        return jax.random.uniform(key, shape, jnp.float32, -bound, bound)

    keys = jax.random.split(key, 20)
    p = {
        "conv0_w": u(keys[0], (32, 3, 3, 3), 3 * 9),
        "conv0_b": u(keys[1], (32,), 3 * 9),
        "conv1_w": u(keys[2], (64, 32, 3, 3), 32 * 9),
        "conv1_b": u(keys[3], (64,), 32 * 9),
        "conv2_w": u(keys[4], (128, 64, 3, 3), 64 * 9),
        "conv2_b": u(keys[5], (128,), 64 * 9),
        "fc_w": u(keys[6], (hidden, 2048), 2048),      # PyTorch Linear: [out, in]
        "fc_b": u(keys[7], (hidden,), 2048),
        "cmu_w": u(keys[8], (class_dim, hidden), hidden),
        "cmu_b": u(keys[9], (class_dim,), hidden),
        "clv_w": u(keys[10], (class_dim, hidden), hidden),
        "clv_b": u(keys[11], (class_dim,), hidden),
    }
    if factorized:
        p.update({
            "smu_w": u(keys[12], (style_dim, hidden), hidden),
            "smu_b": u(keys[13], (style_dim,), hidden),
            "slv_w": u(keys[14], (style_dim, hidden), hidden),
            "slv_b": u(keys[15], (style_dim,), hidden),
        })
    return p


def pack_params(p, style_dim, class_dim, factorized, compute_dtype):
    """Pre-pack weights once (transpose / permute / pad) so the per-forward
    path has no XLA weight transposes."""
    hidden = style_dim + class_dim
    cdt = compute_dtype
    f32 = jnp.float32

    def conv_w(w):  # [Cout, Cin, 3, 3] -> [9*Cin, Cout]  (im2col col order ki,kj,ci)
        return jnp.transpose(w, (2, 3, 1, 0)).reshape(-1, w.shape[0])

    w0 = jnp.pad(conv_w(p["conv0_w"]), ((0, 5), (0, 0)))          # [32, 32]
    w1 = conv_w(p["conv1_w"])                                      # [288, 64]
    w2 = conv_w(p["conv2_w"])                                      # [576, 128]

    # fc: PyTorch flatten index k = c*16 + (oh*4+ow); kernel-internal flatten
    # index k_int = (oh*4+ow)*128 + c.  Fold the permutation into the weight.
    wfc = p["fc_w"].T.reshape(128, 16, hidden).transpose(1, 0, 2).reshape(2048, hidden)

    # heads fused into one lane-dense [hidden, 128] weight (zero padded).
    heads_w = [p["cmu_w"], p["clv_w"]] + ([p["smu_w"], p["slv_w"]] if factorized else [])
    heads_b = [p["cmu_b"], p["clv_b"]] + ([p["smu_b"], p["slv_b"]] if factorized else [])
    wh = jnp.concatenate([w.T for w in heads_w], axis=1)           # [hidden, used]
    bh = jnp.concatenate(heads_b)
    used = wh.shape[1]
    wh = jnp.pad(wh, ((0, 0), (0, 128 - used)))
    bh = jnp.pad(bh, (0, 128 - used))

    return {
        "w0": w0.astype(cdt), "b0": p["conv0_b"].reshape(1, -1).astype(f32),
        "w1": w1.astype(cdt), "b1": p["conv1_b"].reshape(1, -1).astype(f32),
        "w2": w2.astype(cdt), "b2": p["conv2_b"].reshape(1, -1).astype(f32),
        "wfc": wfc.astype(cdt), "bfc": p["fc_b"].reshape(1, -1).astype(f32),
        "wh": wh.astype(cdt), "bh": bh.reshape(1, -1).astype(f32),
    }


# ----------------------------------------------------------------------------
# The single fused Pallas kernel
# ----------------------------------------------------------------------------
def _fused_kernel(p0, sel1, sel2, w0, b0, w1, b1, w2, b2, wfc, bfc, wh, bh,
                  out, act1, pat1, act2, pat2, flat, *, tb, cdt):
    f32 = jnp.float32

    # Zero padded activation scratches (borders implement the conv padding).
    act1[...] = jnp.zeros(act1.shape, act1.dtype)
    act2[...] = jnp.zeros(act2.shape, act2.dtype)

    s1 = sel1[...]                                   # [21, 16]
    s2 = sel2[...]                                   # [12, 9]

    # ---- conv0: [tb*196, 32] @ [32, 32] + bias, ReLU ------------------------
    o0 = jnp.dot(p0[...], w0[...], preferred_element_type=f32) + b0[...]
    o0 = jnp.maximum(o0, 0.0)                        # [tb*196, 32] f32
    # scatter rows (b, oh, ow) into padded NHWC activation act1[tb,16,16,32]
    for b in range(tb):
        for oh in range(14):
            r0 = (b * 14 + oh) * 14
            act1[b, 1 + oh, pl.ds(1, 14), :] = o0[r0:r0 + 14, :]

    # ---- in-VMEM im2col for conv1: pat1[tb*49, 288] -------------------------
    for b in range(tb):
        for oh in range(7):
            dst = (b * 7 + oh) * 7
            for ki in range(3):
                row = act1[b, 2 * oh + ki, :, :].astype(cdt)         # [16, 32]
                ext = jnp.dot(s1, row, preferred_element_type=f32).astype(cdt)
                for kj in range(3):                                   # [21, 32]
                    pat1[pl.ds(dst, 7), pl.ds((ki * 3 + kj) * 32, 32)] = (
                        ext[kj * 7:(kj + 1) * 7, :])

    # ---- conv1: [tb*49, 288] @ [288, 64] + bias, ReLU ------------------------
    o1 = jnp.dot(pat1[...], w1[...], preferred_element_type=f32) + b1[...]
    o1 = jnp.maximum(o1, 0.0)                        # [tb*49, 64] f32
    for b in range(tb):
        for oh in range(7):
            r0 = (b * 7 + oh) * 7
            act2[b, 1 + oh, pl.ds(1, 7), :] = o1[r0:r0 + 7, :]

    # ---- in-VMEM im2col for conv2: pat2[tb*16, 576] --------------------------
    for b in range(tb):
        for oh in range(4):
            dst = (b * 4 + oh) * 4
            for ki in range(3):
                row = act2[b, 2 * oh + ki, :, :].astype(cdt)         # [9, 64]
                ext = jnp.dot(s2, row, preferred_element_type=f32).astype(cdt)
                for kj in range(3):                                   # [12, 64]
                    pat2[pl.ds(dst, 4), pl.ds((ki * 3 + kj) * 64, 64)] = (
                        ext[kj * 4:(kj + 1) * 4, :])

    # ---- conv2: [tb*16, 576] @ [576, 128] + bias, ReLU -----------------------
    o2 = jnp.dot(pat2[...], w2[...], preferred_element_type=f32) + b2[...]
    o2 = jnp.maximum(o2, 0.0).astype(cdt)            # [tb*16, 128]

    # ---- flatten (internal order k = (oh*4+ow)*128 + c; wfc pre-permuted) ----
    for b in range(tb):
        for p in range(16):
            flat[pl.ds(b, 1), pl.ds(p * 128, 128)] = o2[b * 16 + p:b * 16 + p + 1, :]

    # ---- fc + ReLU: [tb, 2048] @ [2048, hidden] ------------------------------
    hs = jnp.dot(flat[...], wfc[...], preferred_element_type=f32) + bfc[...]
    hs = jnp.maximum(hs, 0.0).astype(cdt)

    # ---- fused heads: [tb, hidden] @ [hidden, 128] (lane-dense output) -------
    out[...] = (jnp.dot(hs, wh[...], preferred_element_type=f32)
                + bh[...]).astype(out.dtype)


# ----------------------------------------------------------------------------
# Public forward (Pallas-backed)
# ----------------------------------------------------------------------------
def encoder_img_forward(packed, x_nchw, style_dim, class_dim, factorized,
                        compute_dtype=jnp.bfloat16):
    B, C, H, W = x_nchw.shape
    assert (C, H, W) == (3, 28, 28), "EncoderImg expects 3x28x28 CMNIST images"
    hidden = style_dim + class_dim
    cdt = compute_dtype

    p0 = _conv0_patches(x_nchw, cdt)                 # [B*196, 32]
    sel1 = _sel_matrix(7, 16, cdt)                   # [21, 16]
    sel2 = _sel_matrix(4, 9, cdt)                    # [12, 9]

    # Batch tile: single block for small B; multiples of 8 otherwise so the
    # M-parallel grid shards across cores and per-block VMEM stays bounded.
    tb = B if (B <= 8 or B % 8 != 0) else 8
    grid = (B // tb,)

    kernel = functools.partial(_fused_kernel, tb=tb, cdt=cdt)

    def bcast(a):  # full-array, grid-invariant block
        return pl.BlockSpec(a.shape, lambda i: (0, 0))

    consts = [sel1, sel2, packed["w0"], packed["b0"], packed["w1"], packed["b1"],
              packed["w2"], packed["b2"], packed["wfc"], packed["bfc"],
              packed["wh"], packed["bh"]]

    out = pl.pallas_call(
        kernel,
        out_shape=jax.ShapeDtypeStruct((B, 128), jnp.float32),
        grid=grid,
        in_specs=[pl.BlockSpec((tb * 196, 32), lambda i: (i, 0))]
                 + [bcast(a) for a in consts],
        out_specs=pl.BlockSpec((tb, 128), lambda i: (i, 0)),
        scratch_shapes=[
            pltpu.VMEM((tb, 16, 16, 32), jnp.float32),   # padded conv0 output
            pltpu.VMEM((tb * 49, 288), cdt),             # conv1 im2col patches
            pltpu.VMEM((tb, 9, 9, 64), jnp.float32),     # padded conv1 output
            pltpu.VMEM((tb * 16, 576), cdt),             # conv2 im2col patches
            pltpu.VMEM((tb, 2048), cdt),                 # flattened conv2 output
        ],
        compiler_params=pltpu.CompilerParams(
            dimension_semantics=("parallel",)),
    )(p0, *consts)

    class_mu = out[:, :class_dim]
    class_lv = out[:, class_dim:2 * class_dim]
    if factorized:
        s0 = 2 * class_dim
        style_mu = out[:, s0:s0 + style_dim]
        style_lv = out[:, s0 + style_dim:s0 + 2 * style_dim]
        return style_mu, style_lv, class_mu, class_lv
    return None, None, class_mu, class_lv


# ----------------------------------------------------------------------------
# Pure-JAX reference (same compute-dtype casting) for numerical verification
# ----------------------------------------------------------------------------
def reference_forward(params, x_nchw, factorized, compute_dtype=jnp.bfloat16):
    cdt = compute_dtype
    f32 = jnp.float32
    h = x_nchw.astype(cdt)
    for i in range(3):
        h = jax.lax.conv_general_dilated(
            h, params[f"conv{i}_w"].astype(cdt), window_strides=(2, 2),
            padding=((1, 1), (1, 1)),
            dimension_numbers=("NCHW", "OIHW", "NCHW"),
            preferred_element_type=f32)
        h = jax.nn.relu(h + params[f"conv{i}_b"].reshape(1, -1, 1, 1)).astype(cdt)
    flat = h.reshape(h.shape[0], -1)
    hs = jax.nn.relu(
        jnp.dot(flat, params["fc_w"].T.astype(cdt), preferred_element_type=f32)
        + params["fc_b"]).astype(cdt)

    def head(wn, bn):
        return (jnp.dot(hs, params[wn].T.astype(cdt), preferred_element_type=f32)
                + params[bn])

    class_mu, class_lv = head("cmu_w", "cmu_b"), head("clv_w", "clv_b")
    if factorized:
        return head("smu_w", "smu_b"), head("slv_w", "slv_b"), class_mu, class_lv
    return None, None, class_mu, class_lv


if __name__ == "__main__":
    # CMNIST images are 3x28x28 (28 -> 14 -> 7 -> 4 spatial, 128*4*4 = 2048).
    B, STYLE_DIM, CLASS_DIM = 2, 16, 32
    FACTORIZED = True

    key = jax.random.PRNGKey(0)
    kx, kp = jax.random.split(key)
    x = jax.random.normal(kx, (B, 3, 28, 28), jnp.float32)
    raw = init_params(kp, STYLE_DIM, CLASS_DIM, FACTORIZED)

    fwd = jax.jit(encoder_img_forward, static_argnums=(2, 3, 4, 5))

    # f32 run = strict correctness check; bf16 run = default MXU-friendly path.
    for cdt, tol in ((jnp.float32, 1e-3), (jnp.bfloat16, 2e-2)):
        packed = pack_params(raw, STYLE_DIM, CLASS_DIM, FACTORIZED, cdt)
        outs = fwd(packed, x, STYLE_DIM, CLASS_DIM, FACTORIZED, cdt)
        outs = jax.block_until_ready(outs)
        refs = jax.block_until_ready(
            reference_forward(raw, x, FACTORIZED, cdt))
        for o, r in zip(outs, refs):
            if o is None:
                continue
            assert o.shape == r.shape and o.dtype == r.dtype
            assert jnp.allclose(o, r, atol=tol, rtol=tol), \
                f"mismatch vs reference ({jnp.dtype(cdt).name})"

    print("KERNEL_OK")
</pallas_src>

<mosaic_0001>
module attributes {stable_mosaic.version = 11 : i64} {
  func.func @_fused_kernel(%arg0: i32, %arg1: memref<392x32xf32, #tpu.memory_space<vmem>>, %arg2: memref<21x16xf32, #tpu.memory_space<vmem>>, %arg3: memref<12x9xf32, #tpu.memory_space<vmem>>, %arg4: memref<32x32xf32, #tpu.memory_space<vmem>>, %arg5: memref<1x32xf32, #tpu.memory_space<vmem>>, %arg6: memref<288x64xf32, #tpu.memory_space<vmem>>, %arg7: memref<1x64xf32, #tpu.memory_space<vmem>>, %arg8: memref<576x128xf32, #tpu.memory_space<vmem>>, %arg9: memref<1x128xf32, #tpu.memory_space<vmem>>, %arg10: memref<2048x48xf32, #tpu.memory_space<vmem>>, %arg11: memref<1x48xf32, #tpu.memory_space<vmem>>, %arg12: memref<48x128xf32, #tpu.memory_space<vmem>>, %arg13: memref<1x128xf32, #tpu.memory_space<vmem>>, %arg14: memref<2x128xf32, #tpu.memory_space<vmem>>, %arg15: memref<2x16x16x32xf32, #tpu.memory_space<vmem>>, %arg16: memref<98x288xf32, #tpu.memory_space<vmem>>, %arg17: memref<2x9x9x64xf32, #tpu.memory_space<vmem>>, %arg18: memref<32x576xf32, #tpu.memory_space<vmem>>, %arg19: memref<2x2048xf32, #tpu.memory_space<vmem>>) attributes {dimension_semantics = [#tpu.dimension_semantics<parallel>], iteration_bounds = array<i64: 1>, scalar_prefetch = 0 : i64, scratch_operands = 5 : i64, tpu.core_type = #tpu.core_type<tc>, window_params = [{transform_indices = @transform_0, window_bounds = array<i64: 392, 32>}, {pipeline_mode = #tpu.pipeline_mode<synchronous>, transform_indices = @transform_1, window_bounds = array<i64: 21, 16>}, {pipeline_mode = #tpu.pipeline_mode<synchronous>, transform_indices = @transform_2, window_bounds = array<i64: 12, 9>}, {pipeline_mode = #tpu.pipeline_mode<synchronous>, transform_indices = @transform_3, window_bounds = array<i64: 32, 32>}, {pipeline_mode = #tpu.pipeline_mode<synchronous>, transform_indices = @transform_4, window_bounds = array<i64: 1, 32>}, {pipeline_mode = #tpu.pipeline_mode<synchronous>, transform_indices = @transform_5, window_bounds = array<i64: 288, 64>}, {pipeline_mode = #tpu.pipeline_mode<synchronous>, transform_indices = @transform_6, window_bounds = array<i64: 1, 64>}, {pipeline_mode = #tpu.pipeline_mode<synchronous>, transform_indices = @transform_7, window_bounds = array<i64: 576, 128>}, {pipeline_mode = #tpu.pipeline_mode<synchronous>, transform_indices = @transform_8, window_bounds = array<i64: 1, 128>}, {pipeline_mode = #tpu.pipeline_mode<synchronous>, transform_indices = @transform_9, window_bounds = array<i64: 2048, 48>}, {pipeline_mode = #tpu.pipeline_mode<synchronous>, transform_indices = @transform_10, window_bounds = array<i64: 1, 48>}, {pipeline_mode = #tpu.pipeline_mode<synchronous>, transform_indices = @transform_11, window_bounds = array<i64: 48, 128>}, {pipeline_mode = #tpu.pipeline_mode<synchronous>, transform_indices = @transform_12, window_bounds = array<i64: 1, 128>}, {transform_indices = @transform_13, window_bounds = array<i64: 2, 128>}]} {
    %cst = arith.constant 0.000000e+00 : f32
    %0 = vector.broadcast %cst : f32 to vector<2x16x16x32xf32>
    %c0 = arith.constant 0 : index
    %c0_0 = arith.constant 0 : index
    %c0_1 = arith.constant 0 : index
    %c0_2 = arith.constant 0 : index
    %1 = vector.load %arg15[%c0, %c0_0, %c0_1, %c0_2] : memref<2x16x16x32xf32, #tpu.memory_space<vmem>>, vector<2x16x16x32xf32>
    tpu.vector_store %arg15[%c0, %c0_0, %c0_1, %c0_2], %0 {strides = array<i32>} : memref<2x16x16x32xf32, #tpu.memory_space<vmem>>, vector<2x16x16x32xf32>,
    %cst_3 = arith.constant 0.000000e+00 : f32
    %2 = vector.broadcast %cst_3 : f32 to vector<2x9x9x64xf32>
    %c0_4 = arith.constant 0 : index
    %c0_5 = arith.constant 0 : index
    %c0_6 = arith.constant 0 : index
    %c0_7 = arith.constant 0 : index
    %3 = vector.load %arg17[%c0_4, %c0_5, %c0_6, %c0_7] : memref<2x9x9x64xf32, #tpu.memory_space<vmem>>, vector<2x9x9x64xf32>
    tpu.vector_store %arg17[%c0_4, %c0_5, %c0_6, %c0_7], %2 {strides = array<i32>} : memref<2x9x9x64xf32, #tpu.memory_space<vmem>>, vector<2x9x9x64xf32>,
    %c0_8 = arith.constant 0 : index
    %c0_9 = arith.constant 0 : index
    %4 = vector.load %arg2[%c0_8, %c0_9] : memref<21x16xf32, #tpu.memory_space<vmem>>, vector<21x16xf32>
    %c0_10 = arith.constant 0 : index
    %c0_11 = arith.constant 0 : index
    %5 = vector.load %arg3[%c0_10, %c0_11] : memref<12x9xf32, #tpu.memory_space<vmem>>, vector<12x9xf32>
    %c0_12 = arith.constant 0 : index
    %c0_13 = arith.constant 0 : index
    %6 = vector.load %arg1[%c0_12, %c0_13] : memref<392x32xf32, #tpu.memory_space<vmem>>, vector<392x32xf32>
    %c0_14 = arith.constant 0 : index
    %c0_15 = arith.constant 0 : index
    %7 = vector.load %arg4[%c0_14, %c0_15] : memref<32x32xf32, #tpu.memory_space<vmem>>, vector<32x32xf32>
    %cst_16 = arith.constant dense<0.000000e+00> : vector<392x32xf32>
    %8 = tpu.matmul %6, %7, %cst_16 {dimension_numbers = #tpu.dot_dimension_numbers<[1], [0], [0], [1], [0, 0, 1, 1], [], []>} : vector<392x32xf32>, vector<32x32xf32>, vector<392x32xf32> -> vector<392x32xf32>
    %c0_17 = arith.constant 0 : index
    %c0_18 = arith.constant 0 : index
    %9 = vector.load %arg5[%c0_17, %c0_18] : memref<1x32xf32, #tpu.memory_space<vmem>>, vector<1x32xf32>
    %10 = vector.broadcast %9 : vector<1x32xf32> to vector<392x32xf32>
    %11 = arith.addf %8, %10 : vector<392x32xf32>
    %cst_19 = arith.constant 0.000000e+00 : f32
    %12 = vector.broadcast %cst_19 : f32 to vector<392x32xf32>
    %13 = arith.maximumf %11, %12 : vector<392x32xf32>
    %14 = vector.extract_strided_slice %13 {offsets = [0, 0], sizes = [14, 32], strides = [1, 1]} : vector<392x32xf32> to vector<14x32xf32>
    %c0_20 = arith.constant 0 : index
    %c1 = arith.constant 1 : index
    %c1_21 = arith.constant 1 : index
    %c0_22 = arith.constant 0 : index
    %15 = vector.load %arg15[%c0_20, %c1, %c1_21, %c0_22] : memref<2x16x16x32xf32, #tpu.memory_space<vmem>>, vector<1x1x14x32xf32>
    %16 = vector.shape_cast %15 : vector<1x1x14x32xf32> to vector<14x32xf32>
    %17 = vector.shape_cast %14 : vector<14x32xf32> to vector<1x1x14x32xf32>
    tpu.vector_store %arg15[%c0_20, %c1, %c1_21, %c0_22], %17 {strides = array<i32>} : memref<2x16x16x32xf32, #tpu.memory_space<vmem>>, vector<1x1x14x32xf32>,
    %18 = vector.extract_strided_slice %13 {offsets = [14, 0], sizes = [14, 32], strides = [1, 1]} : vector<392x32xf32> to vector<14x32xf32>
    %c0_23 = arith.constant 0 : index
    %c2 = arith.constant 2 : index
    %c1_24 = arith.constant 1 : index
    %c0_25 = arith.constant 0 : index
    %19 = vector.load %arg15[%c0_23, %c2, %c1_24, %c0_25] : memref<2x16x16x32xf32, #tpu.memory_space<vmem>>, vector<1x1x14x32xf32>
    %20 = vector.shape_cast %19 : vector<1x1x14x32xf32> to vector<14x32xf32>
    %21 = vector.shape_cast %18 : vector<14x32xf32> to vector<1x1x14x32xf32>
    tpu.vector_store %arg15[%c0_23, %c2, %c1_24, %c0_25], %21 {strides = array<i32>} : memref<2x16x16x32xf32, #tpu.memory_space<vmem>>, vector<1x1x14x32xf32>,
    %22 = vector.extract_strided_slice %13 {offsets = [28, 0], sizes = [14, 32], strides = [1, 1]} : vector<392x32xf32> to vector<14x32xf32>
    %c0_26 = arith.constant 0 : index
    %c3 = arith.constant 3 : index
    %c1_27 = arith.constant 1 : index
    %c0_28 = arith.constant 0 : index
    %23 = vector.load %arg15[%c0_26, %c3, %c1_27, %c0_28] : memref<2x16x16x32xf32, #tpu.memory_space<vmem>>, vector<1x1x14x32xf32>
    %24 = vector.shape_cast %23 : vector<1x1x14x32xf32> to vector<14x32xf32>
    %25 = vector.shape_cast %22 : vector<14x32xf32> to vector<1x1x14x32xf32>
    tpu.vector_store %arg15[%c0_26, %c3, %c1_27, %c0_28], %25 {strides = array<i32>} : memref<2x16x16x32xf32, #tpu.memory_space<vmem>>, vector<1x1x14x32xf32>,
    %26 = vector.extract_strided_slice %13 {offsets = [42, 0], sizes = [14, 32], strides = [1, 1]} : vector<392x32xf32> to vector<14x32xf32>
    %c0_29 = arith.constant 0 : index
    %c4 = arith.constant 4 : index
    %c1_30 = arith.constant 1 : index
    %c0_31 = arith.constant 0 : index
    %27 = vector.load %arg15[%c0_29, %c4, %c1_30, %c0_31] : memref<2x16x16x32xf32, #tpu.memory_space<vmem>>, vector<1x1x14x32xf32>
    %28 = vector.shape_cast %27 : vector<1x1x14x32xf32> to vector<14x32xf32>
    %29 = vector.shape_cast %26 : vector<14x32xf32> to vector<1x1x14x32xf32>
    tpu.vector_store %arg15[%c0_29, %c4, %c1_30, %c0_31], %29 {strides = array<i32>} : memref<2x16x16x32xf32, #tpu.memory_space<vmem>>, vector<1x1x14x32xf32>,
    %30 = vector.extract_strided_slice %13 {offsets = [56, 0], sizes = [14, 32], strides = [1, 1]} : vector<392x32xf32> to vector<14x32xf32>
    %c0_32 = arith.constant 0 : index
    %c5 = arith.constant 5 : index
    %c1_33 = arith.constant 1 : index
    %c0_34 = arith.constant 0 : index
    %31 = vector.load %arg15[%c0_32, %c5, %c1_33, %c0_34] : memref<2x16x16x32xf32, #tpu.memory_space<vmem>>, vector<1x1x14x32xf32>
    %32 = vector.shape_cast %31 : vector<1x1x14x32xf32> to vector<14x32xf32>
    %33 = vector.shape_cast %30 : vector<14x32xf32> to vector<1x1x14x32xf32>
    tpu.vector_store %arg15[%c0_32, %c5, %c1_33, %c0_34], %33 {strides = array<i32>} : memref<2x16x16x32xf32, #tpu.memory_space<vmem>>, vector<1x1x14x32xf32>,
    %34 = vector.extract_strided_slice %13 {offsets = [70, 0], sizes = [14, 32], strides = [1, 1]} : vector<392x32xf32> to vector<14x32xf32>
    %c0_35 = arith.constant 0 : index
    %c6 = arith.constant 6 : index
    %c1_36 = arith.constant 1 : index
    %c0_37 = arith.constant 0 : index
    %35 = vector.load %arg15[%c0_35, %c6, %c1_36, %c0_37] : memref<2x16x16x32xf32, #tpu.memory_space<vmem>>, vector<1x1x14x32xf32>
    %36 = vector.shape_cast %35 : vector<1x1x14x32xf32> to vector<14x32xf32>
    %37 = vector.shape_cast %34 : vector<14x32xf32> to vector<1x1x14x32xf32>
    tpu.vector_store %arg15[%c0_35, %c6, %c1_36, %c0_37], %37 {strides = array<i32>} : memref<2x16x16x32xf32, #tpu.memory_space<vmem>>, vector<1x1x14x32xf32>,
    %38 = vector.extract_strided_slice %13 {offsets = [84, 0], sizes = [14, 32], strides = [1, 1]} : vector<392x32xf32> to vector<14x32xf32>
    %c0_38 = arith.constant 0 : index
    %c7 = arith.constant 7 : index
    %c1_39 = arith.constant 1 : index
    %c0_40 = arith.constant 0 : index
    %39 = vector.load %arg15[%c0_38, %c7, %c1_39, %c0_40] : memref<2x16x16x32xf32, #tpu.memory_space<vmem>>, vector<1x1x14x32xf32>
    %40 = vector.shape_cast %39 : vector<1x1x14x32xf32> to vector<14x32xf32>
    %41 = vector.shape_cast %38 : vector<14x32xf32> to vector<1x1x14x32xf32>
    tpu.vector_store %arg15[%c0_38, %c7, %c1_39, %c0_40], %41 {strides = array<i32>} : memref<2x16x16x32xf32, #tpu.memory_space<vmem>>, vector<1x1x14x32xf32>,
    %42 = vector.extract_strided_slice %13 {offsets = [98, 0], sizes = [14, 32], strides = [1, 1]} : vector<392x32xf32> to vector<14x32xf32>
    %c0_41 = arith.constant 0 : index
    %c8 = arith.constant 8 : index
    %c1_42 = arith.constant 1 : index
    %c0_43 = arith.constant 0 : index
    %43 = vector.load %arg15[%c0_41, %c8, %c1_42, %c0_43] : memref<2x16x16x32xf32, #tpu.memory_space<vmem>>, vector<1x1x14x32xf32>
    %44 = vector.shape_cast %43 : vector<1x1x14x32xf32> to vector<14x32xf32>
    %45 = vector.shape_cast %42 : vector<14x32xf32> to vector<1x1x14x32xf32>
    tpu.vector_store %arg15[%c0_41, %c8, %c1_42, %c0_43], %45 {strides = array<i32>} : memref<2x16x16x32xf32, #tpu.memory_space<vmem>>, vector<1x1x14x32xf32>,
    %46 = vector.extract_strided_slice %13 {offsets = [112, 0], sizes = [14, 32], strides = [1, 1]} : vector<392x32xf32> to vector<14x32xf32>
    %c0_44 = arith.constant 0 : index
    %c9 = arith.constant 9 : index
    %c1_45 = arith.constant 1 : index
    %c0_46 = arith.constant 0 : index
    %47 = vector.load %arg15[%c0_44, %c9, %c1_45, %c0_46] : memref<2x16x16x32xf32, #tpu.memory_space<vmem>>, vector<1x1x14x32xf32>
    %48 = vector.shape_cast %47 : vector<1x1x14x32xf32> to vector<14x32xf32>
    %49 = vector.shape_cast %46 : vector<14x32xf32> to vector<1x1x14x32xf32>
    tpu.vector_store %arg15[%c0_44, %c9, %c1_45, %c0_46], %49 {strides = array<i32>} : memref<2x16x16x32xf32, #tpu.memory_space<vmem>>, vector<1x1x14x32xf32>,
    %50 = vector.extract_strided_slice %13 {offsets = [126, 0], sizes = [14, 32], strides = [1, 1]} : vector<392x32xf32> to vector<14x32xf32>
    %c0_47 = arith.constant 0 : index
    %c10 = arith.constant 10 : index
    %c1_48 = arith.constant 1 : index
    %c0_49 = arith.constant 0 : index
    %51 = vector.load %arg15[%c0_47, %c10, %c1_48, %c0_49] : memref<2x16x16x32xf32, #tpu.memory_space<vmem>>, vector<1x1x14x32xf32>
    %52 = vector.shape_cast %51 : vector<1x1x14x32xf32> to vector<14x32xf32>
    %53 = vector.shape_cast %50 : vector<14x32xf32> to vector<1x1x14x32xf32>
    tpu.vector_store %arg15[%c0_47, %c10, %c1_48, %c0_49], %53 {strides = array<i32>} : memref<2x16x16x32xf32, #tpu.memory_space<vmem>>, vector<1x1x14x32xf32>,
    %54 = vector.extract_strided_slice %13 {offsets = [140, 0], sizes = [14, 32], strides = [1, 1]} : vector<392x32xf32> to vector<14x32xf32>
    %c0_50 = arith.constant 0 : index
    %c11 = arith.constant 11 : index
    %c1_51 = arith.constant 1 : index
    %c0_52 = arith.constant 0 : index
    %55 = vector.load %arg15[%c0_50, %c11, %c1_51, %c0_52] : memref<2x16x16x32xf32, #tpu.memory_space<vmem>>, vector<1x1x14x32xf32>
    %56 = vector.shape_cast %55 : vector<1x1x14x32xf32> to vector<14x32xf32>
    %57 = vector.shape_cast %54 : vector<14x32xf32> to vector<1x1x14x32xf32>
    tpu.vector_store %arg15[%c0_50, %c11, %c1_51, %c0_52], %57 {strides = array<i32>} : memref<2x16x16x32xf32, #tpu.memory_space<vmem>>, vector<1x1x14x32xf32>,
    %58 = vector.extract_strided_slice %13 {offsets = [154, 0], sizes = [14, 32], strides = [1, 1]} : vector<392x32xf32> to vector<14x32xf32>
    %c0_53 = arith.constant 0 : index
    %c12 = arith.constant 12 : index
    %c1_54 = arith.constant 1 : index
    %c0_55 = arith.constant 0 : index
    %59 = vector.load %arg15[%c0_53, %c12, %c1_54, %c0_55] : memref<2x16x16x32xf32, #tpu.memory_space<vmem>>, vector<1x1x14x32xf32>
    %60 = vector.shape_cast %59 : vector<1x1x14x32xf32> to vector<14x32xf32>
    %61 = vector.shape_cast %58 : vector<14x32xf32> to vector<1x1x14x32xf32>
    tpu.vector_store %arg15[%c0_53, %c12, %c1_54, %c0_55], %61 {strides = array<i32>} : memref<2x16x16x32xf32, #tpu.memory_space<vmem>>, vector<1x1x14x32xf32>,
    %62 = vector.extract_strided_slice %13 {offsets = [168, 0], sizes = [14, 32], strides = [1, 1]} : vector<392x32xf32> to vector<14x32xf32>
    %c0_56 = arith.constant 0 : index
    %c13 = arith.constant 13 : index
    %c1_57 = arith.constant 1 : index
    %c0_58 = arith.constant 0 : index
    %63 = vector.load %arg15[%c0_56, %c13, %c1_57, %c0_58] : memref<2x16x16x32xf32, #tpu.memory_space<vmem>>, vector<1x1x14x32xf32>
    %64 = vector.shape_cast %63 : vector<1x1x14x32xf32> to vector<14x32xf32>
    %65 = vector.shape_cast %62 : vector<14x32xf32> to vector<1x1x14x32xf32>
    tpu.vector_store %arg15[%c0_56, %c13, %c1_57, %c0_58], %65 {strides = array<i32>} : memref<2x16x16x32xf32, #tpu.memory_space<vmem>>, vector<1x1x14x32xf32>,
    %66 = vector.extract_strided_slice %13 {offsets = [182, 0], sizes = [14, 32], strides = [1, 1]} : vector<392x32xf32> to vector<14x32xf32>
    %c0_59 = arith.constant 0 : index
    %c14 = arith.constant 14 : index
    %c1_60 = arith.constant 1 : index
    %c0_61 = arith.constant 0 : index
    %67 = vector.load %arg15[%c0_59, %c14, %c1_60, %c0_61] : memref<2x16x16x32xf32, #tpu.memory_space<vmem>>, vector<1x1x14x32xf32>
    %68 = vector.shape_cast %67 : vector<1x1x14x32xf32> to vector<14x32xf32>
    %69 = vector.shape_cast %66 : vector<14x32xf32> to vector<1x1x14x32xf32>
    tpu.vector_store %arg15[%c0_59, %c14, %c1_60, %c0_61], %69 {strides = array<i32>} : memref<2x16x16x32xf32, #tpu.memory_space<vmem>>, vector<1x1x14x32xf32>,
    %70 = vector.extract_strided_slice %13 {offsets = [196, 0], sizes = [14, 32], strides = [1, 1]} : vector<392x32xf32> to vector<14x32xf32>
    %c1_62 = arith.constant 1 : index
    %c1_63 = arith.constant 1 : index
    %c1_64 = arith.constant 1 : index
    %c0_65 = arith.constant 0 : index
    %71 = vector.load %arg15[%c1_62, %c1_63, %c1_64, %c0_65] : memref<2x16x16x32xf32, #tpu.memory_space<vmem>>, vector<1x1x14x32xf32>
    %72 = vector.shape_cast %71 : vector<1x1x14x32xf32> to vector<14x32xf32>
    %73 = vector.shape_cast %70 : vector<14x32xf32> to vector<1x1x14x32xf32>
    tpu.vector_store %arg15[%c1_62, %c1_63, %c1_64, %c0_65], %73 {strides = array<i32>} : memref<2x16x16x32xf32, #tpu.memory_space<vmem>>, vector<1x1x14x32xf32>,
    %74 = vector.extract_strided_slice %13 {offsets = [210, 0], sizes = [14, 32], strides = [1, 1]} : vector<392x32xf32> to vector<14x32xf32>
    %c1_66 = arith.constant 1 : index
    %c2_67 = arith.constant 2 : index
    %c1_68 = arith.constant 1 : index
    %c0_69 = arith.constant 0 : index
    %75 = vector.load %arg15[%c1_66, %c2_67, %c1_68, %c0_69] : memref<2x16x16x32xf32, #tpu.memory_space<vmem>>, vector<1x1x14x32xf32>
    %76 = vector.shape_cast %75 : vector<1x1x14x32xf32> to vector<14x32xf32>
    %77 = vector.shape_cast %74 : vector<14x32xf32> to vector<1x1x14x32xf32>
    tpu.vector_store %arg15[%c1_66, %c2_67, %c1_68, %c0_69], %77 {strides = array<i32>} : memref<2x16x16x32xf32, #tpu.memory_space<vmem>>, vector<1x1x14x32xf32>,
    %78 = vector.extract_strided_slice %13 {offsets = [224, 0], sizes = [14, 32], strides = [1, 1]} : vector<392x32xf32> to vector<14x32xf32>
    %c1_70 = arith.constant 1 : index
    %c3_71 = arith.constant 3 : index
    %c1_72 = arith.constant 1 : index
    %c0_73 = arith.constant 0 : index
    %79 = vector.load %arg15[%c1_70, %c3_71, %c1_72, %c0_73] : memref<2x16x16x32xf32, #tpu.memory_space<vmem>>, vector<1x1x14x32xf32>
    %80 = vector.shape_cast %79 : vector<1x1x14x32xf32> to vector<14x32xf32>
    %81 = vector.shape_cast %78 : vector<14x32xf32> to vector<1x1x14x32xf32>
    tpu.vector_store %arg15[%c1_70, %c3_71, %c1_72, %c0_73], %81 {strides = array<i32>} : memref<2x16x16x32xf32, #tpu.memory_space<vmem>>, vector<1x1x14x32xf32>,
    %82 = vector.extract_strided_slice %13 {offsets = [238, 0], sizes = [14, 32], strides = [1, 1]} : vector<392x32xf32> to vector<14x32xf32>
    %c1_74 = arith.constant 1 : index
    %c4_75 = arith.constant 4 : index
    %c1_76 = arith.constant 1 : index
    %c0_77 = arith.constant 0 : index
    %83 = vector.load %arg15[%c1_74, %c4_75, %c1_76, %c0_77] : memref<2x16x16x32xf32, #tpu.memory_space<vmem>>, vector<1x1x14x32xf32>
    %84 = vector.shape_cast %83 : vector<1x1x14x32xf32> to vector<14x32xf32>
    %85 = vector.shape_cast %82 : vector<14x32xf32> to vector<1x1x14x32xf32>
    tpu.vector_store %arg15[%c1_74, %c4_75, %c1_76, %c0_77], %85 {strides = array<i32>} : memref<2x16x16x32xf32, #tpu.memory_space<vmem>>, vector<1x1x14x32xf32>,
    %86 = vector.extract_strided_slice %13 {offsets = [252, 0], sizes = [14, 32], strides = [1, 1]} : vector<392x32xf32> to vector<14x32xf32>
    %c1_78 = arith.constant 1 : index
    %c5_79 = arith.constant 5 : index
    %c1_80 = arith.constant 1 : index
    %c0_81 = arith.constant 0 : index
    %87 = vector.load %arg15[%c1_78, %c5_79, %c1_80, %c0_81] : memref<2x16x16x32xf32, #tpu.memory_space<vmem>>, vector<1x1x14x32xf32>
    %88 = vector.shape_cast %87 : vector<1x1x14x32xf32> to vector<14x32xf32>
    %89 = vector.shape_cast %86 : vector<14x32xf32> to vector<1x1x14x32xf32>
    tpu.vector_store %arg15[%c1_78, %c5_79, %c1_80, %c0_81], %89 {strides = array<i32>} : memref<2x16x16x32xf32, #tpu.memory_space<vmem>>, vector<1x1x14x32xf32>,
    %90 = vector.extract_strided_slice %13 {offsets = [266, 0], sizes = [14, 32], strides = [1, 1]} : vector<392x32xf32> to vector<14x32xf32>
    %c1_82 = arith.constant 1 : index
    %c6_83 = arith.constant 6 : index
    %c1_84 = arith.constant 1 : index
    %c0_85 = arith.constant 0 : index
    %91 = vector.load %arg15[%c1_82, %c6_83, %c1_84, %c0_85] : memref<2x16x16x32xf32, #tpu.memory_space<vmem>>, vector<1x1x14x32xf32>
    %92 = vector.shape_cast %91 : vector<1x1x14x32xf32> to vector<14x32xf32>
    %93 = vector.shape_cast %90 : vector<14x32xf32> to vector<1x1x14x32xf32>
    tpu.vector_store %arg15[%c1_82, %c6_83, %c1_84, %c0_85], %93 {strides = array<i32>} : memref<2x16x16x32xf32, #tpu.memory_space<vmem>>, vector<1x1x14x32xf32>,
    %94 = vector.extract_strided_slice %13 {offsets = [280, 0], sizes = [14, 32], strides = [1, 1]} : vector<392x32xf32> to vector<14x32xf32>
    %c1_86 = arith.constant 1 : index
    %c7_87 = arith.constant 7 : index
    %c1_88 = arith.constant 1 : index
    %c0_89 = arith.constant 0 : index
    %95 = vector.load %arg15[%c1_86, %c7_87, %c1_88, %c0_89] : memref<2x16x16x32xf32, #tpu.memory_space<vmem>>, vector<1x1x14x32xf32>
    %96 = vector.shape_cast %95 : vector<1x1x14x32xf32> to vector<14x32xf32>
    %97 = vector.shape_cast %94 : vector<14x32xf32> to vector<1x1x14x32xf32>
    tpu.vector_store %arg15[%c1_86, %c7_87, %c1_88, %c0_89], %97 {strides = array<i32>} : memref<2x16x16x32xf32, #tpu.memory_space<vmem>>, vector<1x1x14x32xf32>,
    %98 = vector.extract_strided_slice %13 {offsets = [294, 0], sizes = [14, 32], strides = [1, 1]} : vector<392x32xf32> to vector<14x32xf32>
    %c1_90 = arith.constant 1 : index
    %c8_91 = arith.constant 8 : index
    %c1_92 = arith.constant 1 : index
    %c0_93 = arith.constant 0 : index
    %99 = vector.load %arg15[%c1_90, %c8_91, %c1_92, %c0_93] : memref<2x16x16x32xf32, #tpu.memory_space<vmem>>, vector<1x1x14x32xf32>
    %100 = vector.shape_cast %99 : vector<1x1x14x32xf32> to vector<14x32xf32>
    %101 = vector.shape_cast %98 : vector<14x32xf32> to vector<1x1x14x32xf32>
    tpu.vector_store %arg15[%c1_90, %c8_91, %c1_92, %c0_93], %101 {strides = array<i32>} : memref<2x16x16x32xf32, #tpu.memory_space<vmem>>, vector<1x1x14x32xf32>,
    %102 = vector.extract_strided_slice %13 {offsets = [308, 0], sizes = [14, 32], strides = [1, 1]} : vector<392x32xf32> to vector<14x32xf32>
    %c1_94 = arith.constant 1 : index
    %c9_95 = arith.constant 9 : index
    %c1_96 = arith.constant 1 : index
    %c0_97 = arith.constant 0 : index
    %103 = vector.load %arg15[%c1_94, %c9_95, %c1_96, %c0_97] : memref<2x16x16x32xf32, #tpu.memory_space<vmem>>, vector<1x1x14x32xf32>
    %104 = vector.shape_cast %103 : vector<1x1x14x32xf32> to vector<14x32xf32>
    %105 = vector.shape_cast %102 : vector<14x32xf32> to vector<1x1x14x32xf32>
    tpu.vector_store %arg15[%c1_94, %c9_95, %c1_96, %c0_97], %105 {strides = array<i32>} : memref<2x16x16x32xf32, #tpu.memory_space<vmem>>, vector<1x1x14x32xf32>,
    %106 = vector.extract_strided_slice %13 {offsets = [322, 0], sizes = [14, 32], strides = [1, 1]} : vector<392x32xf32> to vector<14x32xf32>
    %c1_98 = arith.constant 1 : index
    %c10_99 = arith.constant 10 : index
    %c1_100 = arith.constant 1 : index
    %c0_101 = arith.constant 0 : index
    %107 = vector.load %arg15[%c1_98, %c10_99, %c1_100, %c0_101] : memref<2x16x16x32xf32, #tpu.memory_space<vmem>>, vector<1x1x14x32xf32>
    %108 = vector.shape_cast %107 : vector<1x1x14x32xf32> to vector<14x32xf32>
    %109 = vector.shape_cast %106 : vector<14x32xf32> to vector<1x1x14x32xf32>
    tpu.vector_store %arg15[%c1_98, %c10_99, %c1_100, %c0_101], %109 {strides = array<i32>} : memref<2x16x16x32xf32, #tpu.memory_space<vmem>>, vector<1x1x14x32xf32>,
    %110 = vector.extract_strided_slice %13 {offsets = [336, 0], sizes = [14, 32], strides = [1, 1]} : vector<392x32xf32> to vector<14x32xf32>
    %c1_102 = arith.constant 1 : index
    %c11_103 = arith.constant 11 : index
    %c1_104 = arith.constant 1 : index
    %c0_105 = arith.constant 0 : index
    %111 = vector.load %arg15[%c1_102, %c11_103, %c1_104, %c0_105] : memref<2x16x16x32xf32, #tpu.memory_space<vmem>>, vector<1x1x14x32xf32>
    %112 = vector.shape_cast %111 : vector<1x1x14x32xf32> to vector<14x32xf32>
    %113 = vector.shape_cast %110 : vector<14x32xf32> to vector<1x1x14x32xf32>
    tpu.vector_store %arg15[%c1_102, %c11_103, %c1_104, %c0_105], %113 {strides = array<i32>} : memref<2x16x16x32xf32, #tpu.memory_space<vmem>>, vector<1x1x14x32xf32>,
    %114 = vector.extract_strided_slice %13 {offsets = [350, 0], sizes = [14, 32], strides = [1, 1]} : vector<392x32xf32> to vector<14x32xf32>
    %c1_106 = arith.constant 1 : index
    %c12_107 = arith.constant 12 : index
    %c1_108 = arith.constant 1 : index
    %c0_109 = arith.constant 0 : index
    %115 = vector.load %arg15[%c1_106, %c12_107, %c1_108, %c0_109] : memref<2x16x16x32xf32, #tpu.memory_space<vmem>>, vector<1x1x14x32xf32>
    %116 = vector.shape_cast %115 : vector<1x1x14x32xf32> to vector<14x32xf32>
    %117 = vector.shape_cast %114 : vector<14x32xf32> to vector<1x1x14x32xf32>
    tpu.vector_store %arg15[%c1_106, %c12_107, %c1_108, %c0_109], %117 {strides = array<i32>} : memref<2x16x16x32xf32, #tpu.memory_space<vmem>>, vector<1x1x14x32xf32>,
    %118 = vector.extract_strided_slice %13 {offsets = [364, 0], sizes = [14, 32], strides = [1, 1]} : vector<392x32xf32> to vector<14x32xf32>
    %c1_110 = arith.constant 1 : index
    %c13_111 = arith.constant 13 : index
    %c1_112 = arith.constant 1 : index
    %c0_113 = arith.constant 0 : index
    %119 = vector.load %arg15[%c1_110, %c13_111, %c1_112, %c0_113] : memref<2x16x16x32xf32, #tpu.memory_space<vmem>>, vector<1x1x14x32xf32>
    %120 = vector.shape_cast %119 : vector<1x1x14x32xf32> to vector<14x32xf32>
    %121 = vector.shape_cast %118 : vector<14x32xf32> to vector<1x1x14x32xf32>
    tpu.vector_store %arg15[%c1_110, %c13_111, %c1_112, %c0_113], %121 {strides = array<i32>} : memref<2x16x16x32xf32, #tpu.memory_space<vmem>>, vector<1x1x14x32xf32>,
    %122 = vector.extract_strided_slice %13 {offsets = [378, 0], sizes = [14, 32], strides = [1, 1]} : vector<392x32xf32> to vector<14x32xf32>
    %c1_114 = arith.constant 1 : index
    %c14_115 = arith.constant 14 : index
    %c1_116 = arith.constant 1 : index
    %c0_117 = arith.constant 0 : index
    %123 = vector.load %arg15[%c1_114, %c14_115, %c1_116, %c0_117] : memref<2x16x16x32xf32, #tpu.memory_space<vmem>>, vector<1x1x14x32xf32>
    %124 = vector.shape_cast %123 : vector<1x1x14x32xf32> to vector<14x32xf32>
    %125 = vector.shape_cast %122 : vector<14x32xf32> to vector<1x1x14x32xf32>
    tpu.vector_store %arg15[%c1_114, %c14_115, %c1_116, %c0_117], %125 {strides = array<i32>} : memref<2x16x16x32xf32, #tpu.memory_space<vmem>>, vector<1x1x14x32xf32>,
    %c0_118 = arith.constant 0 : index
    %c0_119 = arith.constant 0 : index
    %c0_120 = arith.constant 0 : index
    %c0_121 = arith.constant 0 : index
    %126 = vector.load %arg15[%c0_118, %c0_119, %c0_120, %c0_121] : memref<2x16x16x32xf32, #tpu.memory_space<vmem>>, vector<1x1x16x32xf32>
    %127 = vector.shape_cast %126 : vector<1x1x16x32xf32> to vector<16x32xf32>
    %cst_122 = arith.constant dense<0.000000e+00> : vector<21x32xf32>
    %128 = tpu.matmul %4, %127, %cst_122 {dimension_numbers = #tpu.dot_dimension_numbers<[1], [0], [0], [1], [0, 0, 1, 1], [], []>} : vector<21x16xf32>, vector<16x32xf32>, vector<21x32xf32> -> vector<21x32xf32>
    %129 = vector.extract_strided_slice %128 {offsets = [0, 0], sizes = [7, 32], strides = [1, 1]} : vector<21x32xf32> to vector<7x32xf32>
    %c0_123 = arith.constant 0 : index
    %c0_124 = arith.constant 0 : index
    %130 = vector.load %arg16[%c0_123, %c0_124] : memref<98x288xf32, #tpu.memory_space<vmem>>, vector<7x32xf32>
    tpu.vector_store %arg16[%c0_123, %c0_124], %129 {strides = array<i32>} : memref<98x288xf32, #tpu.memory_space<vmem>>, vector<7x32xf32>,
    %131 = vector.extract_strided_slice %128 {offsets = [7, 0], sizes = [7, 32], strides = [1, 1]} : vector<21x32xf32> to vector<7x32xf32>
    %c0_125 = arith.constant 0 : index
    %c32 = arith.constant 32 : index
    %132 = vector.load %arg16[%c0_125, %c32] : memref<98x288xf32, #tpu.memory_space<vmem>>, vector<7x32xf32>
    tpu.vector_store %arg16[%c0_125, %c32], %131 {strides = array<i32>} : memref<98x288xf32, #tpu.memory_space<vmem>>, vector<7x32xf32>,
    %133 = vector.extract_strided_slice %128 {offsets = [14, 0], sizes = [7, 32], strides = [1, 1]} : vector<21x32xf32> to vector<7x32xf32>
    %c0_126 = arith.constant 0 : index
    %c64 = arith.constant 64 : index
    %134 = vector.load %arg16[%c0_126, %c64] : memref<98x288xf32, #tpu.memory_space<vmem>>, vector<7x32xf32>
    tpu.vector_store %arg16[%c0_126, %c64], %133 {strides = array<i32>} : memref<98x288xf32, #tpu.memory_space<vmem>>, vector<7x32xf32>,
    %c0_127 = arith.constant 0 : index
    %c1_128 = arith.constant 1 : index
    %c0_129 = arith.constant 0 : index
    %c0_130 = arith.constant 0 : index
    %135 = vector.load %arg15[%c0_127, %c1_128, %c0_129, %c0_130] : memref<2x16x16x32xf32, #tpu.memory_space<vmem>>, vector<1x1x16x32xf32>
    %136 = vector.shape_cast %135 : vector<1x1x16x32xf32> to vector<16x32xf32>
    %cst_131 = arith.constant dense<0.000000e+00> : vector<21x32xf32>
    %137 = tpu.matmul %4, %136, %cst_131 {dimension_numbers = #tpu.dot_dimension_numbers<[1], [0], [0], [1], [0, 0, 1, 1], [], []>} : vector<21x16xf32>, vector<16x32xf32>, vector<21x32xf32> -> vector<21x32xf32>
    %138 = vector.extract_strided_slice %137 {offsets = [0, 0], sizes = [7, 32], strides = [1, 1]} : vector<21x32xf32> to vector<7x32xf32>
    %c0_132 = arith.constant 0 : index
    %c96 = arith.constant 96 : index
    %139 = vector.load %arg16[%c0_132, %c96] : memref<98x288xf32, #tpu.memory_space<vmem>>, vector<7x32xf32>
    tpu.vector_store %arg16[%c0_132, %c96], %138 {strides = array<i32>} : memref<98x288xf32, #tpu.memory_space<vmem>>, vector<7x32xf32>,
    %140 = vector.extract_strided_slice %137 {offsets = [7, 0], sizes = [7, 32], strides = [1, 1]} : vector<21x32xf32> to vector<7x32xf32>
    %c0_133 = arith.constant 0 : index
    %c128 = arith.constant 128 : index
    %141 = vector.load %arg16[%c0_133, %c128] : memref<98x288xf32, #tpu.memory_space<vmem>>, vector<7x32xf32>
    tpu.vector_store %arg16[%c0_133, %c128], %140 {strides = array<i32>} : memref<98x288xf32, #tpu.memory_space<vmem>>, vector<7x32xf32>,
    %142 = vector.extract_strided_slice %137 {offsets = [14, 0], sizes = [7, 32], strides = [1, 1]} : vector<21x32xf32> to vector<7x32xf32>
    %c0_134 = arith.constant 0 : index
    %c160 = arith.constant 160 : index
    %143 = vector.load %arg16[%c0_134, %c160] : memref<98x288xf32, #tpu.memory_space<vmem>>, vector<7x32xf32>
    tpu.vector_store %arg16[%c0_134, %c160], %142 {strides = array<i32>} : memref<98x288xf32, #tpu.memory_space<vmem>>, vector<7x32xf32>,
    %c0_135 = arith.constant 0 : index
    %c2_136 = arith.constant 2 : index
    %c0_137 = arith.constant 0 : index
    %c0_138 = arith.constant 0 : index
    %144 = vector.load %arg15[%c0_135, %c2_136, %c0_137, %c0_138] : memref<2x16x16x32xf32, #tpu.memory_space<vmem>>, vector<1x1x16x32xf32>
    %145 = vector.shape_cast %144 : vector<1x1x16x32xf32> to vector<16x32xf32>
    %cst_139 = arith.constant dense<0.000000e+00> : vector<21x32xf32>
    %146 = tpu.matmul %4, %145, %cst_139 {dimension_numbers = #tpu.dot_dimension_numbers<[1], [0], [0], [1], [0, 0, 1, 1], [], []>} : vector<21x16xf32>, vector<16x32xf32>, vector<21x32xf32> -> vector<21x32xf32>
    %147 = vector.extract_strided_slice %146 {offsets = [0, 0], sizes = [7, 32], strides = [1, 1]} : vector<21x32xf32> to vector<7x32xf32>
    %c0_140 = arith.constant 0 : index
    %c192 = arith.constant 192 : index
    %148 = vector.load %arg16[%c0_140, %c192] : memref<98x288xf32, #tpu.memory_space<vmem>>, vector<7x32xf32>
    tpu.vector_store %arg16[%c0_140, %c192], %147 {strides = array<i32>} : memref<98x288xf32, #tpu.memory_space<vmem>>, vector<7x32xf32>,
    %149 = vector.extract_strided_slice %146 {offsets = [7, 0], sizes = [7, 32], strides = [1, 1]} : vector<21x32xf32> to vector<7x32xf32>
    %c0_141 = arith.constant 0 : index
    %c224 = arith.constant 224 : index
    %150 = vector.load %arg16[%c0_141, %c224] : memref<98x288xf32, #tpu.memory_space<vmem>>, vector<7x32xf32>
    tpu.vector_store %arg16[%c0_141, %c224], %149 {strides = array<i32>} : memref<98x288xf32, #tpu.memory_space<vmem>>, vector<7x32xf32>,
    %151 = vector.extract_strided_slice %146 {offsets = [14, 0], sizes = [7, 32], strides = [1, 1]} : vector<21x32xf32> to vector<7x32xf32>
    %c0_142 = arith.constant 0 : index
    %c256 = arith.constant 256 : index
    %152 = vector.load %arg16[%c0_142, %c256] : memref<98x288xf32, #tpu.memory_space<vmem>>, vector<7x32xf32>
    tpu.vector_store %arg16[%c0_142, %c256], %151 {strides = array<i32>} : memref<98x288xf32, #tpu.memory_space<vmem>>, vector<7x32xf32>,
    %c0_143 = arith.constant 0 : index
    %c2_144 = arith.constant 2 : index
    %c0_145 = arith.constant 0 : index
    %c0_146 = arith.constant 0 : index
    %153 = vector.load %arg15[%c0_143, %c2_144, %c0_145, %c0_146] : memref<2x16x16x32xf32, #tpu.memory_space<vmem>>, vector<1x1x16x32xf32>
    %154 = vector.shape_cast %153 : vector<1x1x16x32xf32> to vector<16x32xf32>
    %cst_147 = arith.constant dense<0.000000e+00> : vector<21x32xf32>
    %155 = tpu.matmul %4, %154, %cst_147 {dimension_numbers = #tpu.dot_dimension_numbers<[1], [0], [0], [1], [0, 0, 1, 1], [], []>} : vector<21x16xf32>, vector<16x32xf32>, vector<21x32xf32> -> vector<21x32xf32>
    %156 = vector.extract_strided_slice %155 {offsets = [0, 0], sizes = [7, 32], strides = [1, 1]} : vector<21x32xf32> to vector<7x32xf32>
    %c7_148 = arith.constant 7 : index
    %c0_149 = arith.constant 0 : index
    %157 = vector.load %arg16[%c7_148, %c0_149] : memref<98x288xf32, #tpu.memory_space<vmem>>, vector<7x32xf32>
    tpu.vector_store %arg16[%c7_148, %c0_149], %156 {strides = array<i32>} : memref<98x288xf32, #tpu.memory_space<vmem>>, vector<7x32xf32>,
    %158 = vector.extract_strided_slice %155 {offsets = [7, 0], sizes = [7, 32], strides = [1, 1]} : vector<21x32xf32> to vector<7x32xf32>
    %c7_150 = arith.constant 7 : index
    %c32_151 = arith.constant 32 : index
    %159 = vector.load %arg16[%c7_150, %c32_151] : memref<98x288xf32, #tpu.memory_space<vmem>>, vector<7x32xf32>
    tpu.vector_store %arg16[%c7_150, %c32_151], %158 {strides = array<i32>} : memref<98x288xf32, #tpu.memory_space<vmem>>, vector<7x32xf32>,
    %160 = vector.extract_strided_slice %155 {offsets = [14, 0], sizes = [7, 32], strides = [1, 1]} : vector<21x32xf32> to vector<7x32xf32>
    %c7_152 = arith.constant 7 : index
    %c64_153 = arith.constant 64 : index
    %161 = vector.load %arg16[%c7_152, %c64_153] : memref<98x288xf32, #tpu.memory_space<vmem>>, vector<7x32xf32>
    tpu.vector_store %arg16[%c7_152, %c64_153], %160 {strides = array<i32>} : memref<98x288xf32, #tpu.memory_space<vmem>>, vector<7x32xf32>,
    %c0_154 = arith.constant 0 : index
    %c3_155 = arith.constant 3 : index
    %c0_156 = arith.constant 0 : index
    %c0_157 = arith.constant 0 : index
    %162 = vector.load %arg15[%c0_154, %c3_155, %c0_156, %c0_157] : memref<2x16x16x32xf32, #tpu.memory_space<vmem>>, vector<1x1x16x32xf32>
    %163 = vector.shape_cast %162 : vector<1x1x16x32xf32> to vector<16x32xf32>
    %cst_158 = arith.constant dense<0.000000e+00> : vector<21x32xf32>
    %164 = tpu.matmul %4, %163, %cst_158 {dimension_numbers = #tpu.dot_dimension_numbers<[1], [0], [0], [1], [0, 0, 1, 1], [], []>} : vector<21x16xf32>, vector<16x32xf32>, vector<21x32xf32> -> vector<21x32xf32>
    %165 = vector.extract_strided_slice %164 {offsets = [0, 0], sizes = [7, 32], strides = [1, 1]} : vector<21x32xf32> to vector<7x32xf32>
    %c7_159 = arith.constant 7 : index
    %c96_160 = arith.constant 96 : index
    %166 = vector.load %arg16[%c7_159, %c96_160] : memref<98x288xf32, #tpu.memory_space<vmem>>, vector<7x32xf32>
    tpu.vector_store %arg16[%c7_159, %c96_160], %165 {strides = array<i32>} : memref<98x288xf32, #tpu.memory_space<vmem>>, vector<7x32xf32>,
    %167 = vector.extract_strided_slice %164 {offsets = [7, 0], sizes = [7, 32], strides = [1, 1]} : vector<21x32xf32> to vector<7x32xf32>
    %c7_161 = arith.constant 7 : index
    %c128_162 = arith.constant 128 : index
    %168 = vector.load %arg16[%c7_161, %c128_162] : memref<98x288xf32, #tpu.memory_space<vmem>>, vector<7x32xf32>
    tpu.vector_store %arg16[%c7_161, %c128_162], %167 {strides = array<i32>} : memref<98x288xf32, #tpu.memory_space<vmem>>, vector<7x32xf32>,
    %169 = vector.extract_strided_slice %164 {offsets = [14, 0], sizes = [7, 32], strides = [1, 1]} : vector<21x32xf32> to vector<7x32xf32>
    %c7_163 = arith.constant 7 : index
    %c160_164 = arith.constant 160 : index
    %170 = vector.load %arg16[%c7_163, %c160_164] : memref<98x288xf32, #tpu.memory_space<vmem>>, vector<7x32xf32>
    tpu.vector_store %arg16[%c7_163, %c160_164], %169 {strides = array<i32>} : memref<98x288xf32, #tpu.memory_space<vmem>>, vector<7x32xf32>,
    %c0_165 = arith.constant 0 : index
    %c4_166 = arith.constant 4 : index
    %c0_167 = arith.constant 0 : index
    %c0_168 = arith.constant 0 : index
    %171 = vector.load %arg15[%c0_165, %c4_166, %c0_167, %c0_168] : memref<2x16x16x32xf32, #tpu.memory_space<vmem>>, vector<1x1x16x32xf32>
    %172 = vector.shape_cast %171 : vector<1x1x16x32xf32> to vector<16x32xf32>
    %cst_169 = arith.constant dense<0.000000e+00> : vector<21x32xf32>
    %173 = tpu.matmul %4, %172, %cst_169 {dimension_numbers = #tpu.dot_dimension_numbers<[1], [0], [0], [1], [0, 0, 1, 1], [], []>} : vector<21x16xf32>, vector<16x32xf32>, vector<21x32xf32> -> vector<21x32xf32>
    %174 = vector.extract_strided_slice %173 {offsets = [0, 0], sizes = [7, 32], strides = [1, 1]} : vector<21x32xf32> to vector<7x32xf32>
    %c7_170 = arith.constant 7 : index
    %c192_171 = arith.constant 192 : index
    %175 = vector.load %arg16[%c7_170, %c192_171] : memref<98x288xf32, #tpu.memory_space<vmem>>, vector<7x32xf32>
    tpu.vector_store %arg16[%c7_170, %c192_171], %174 {strides = array<i32>} : memref<98x288xf32, #tpu.memory_space<vmem>>, vector<7x32xf32>,
    %176 = vector.extract_strided_slice %173 {offsets = [7, 0], sizes = [7, 32], strides = [1, 1]} : vector<21x32xf32> to vector<7x32xf32>
    %c7_172 = arith.constant 7 : index
    %c224_173 = arith.constant 224 : index
    %177 = vector.load %arg16[%c7_172, %c224_173] : memref<98x288xf32, #tpu.memory_space<vmem>>, vector<7x32xf32>
    tpu.vector_store %arg16[%c7_172, %c224_173], %176 {strides = array<i32>} : memref<98x288xf32, #tpu.memory_space<vmem>>, vector<7x32xf32>,
    %178 = vector.extract_strided_slice %173 {offsets = [14, 0], sizes = [7, 32], strides = [1, 1]} : vector<21x32xf32> to vector<7x32xf32>
    %c7_174 = arith.constant 7 : index
    %c256_175 = arith.constant 256 : index
    %179 = vector.load %arg16[%c7_174, %c256_175] : memref<98x288xf32, #tpu.memory_space<vmem>>, vector<7x32xf32>
    tpu.vector_store %arg16[%c7_174, %c256_175], %178 {strides = array<i32>} : memref<98x288xf32, #tpu.memory_space<vmem>>, vector<7x32xf32>,
    %c0_176 = arith.constant 0 : index
    %c4_177 = arith.constant 4 : index
    %c0_178 = arith.constant 0 : index
    %c0_179 = arith.constant 0 : index
    %180 = vector.load %arg15[%c0_176, %c4_177, %c0_178, %c0_179] : memref<2x16x16x32xf32, #tpu.memory_space<vmem>>, vector<1x1x16x32xf32>
    %181 = vector.shape_cast %180 : vector<1x1x16x32xf32> to vector<16x32xf32>
    %cst_180 = arith.constant dense<0.000000e+00> : vector<21x32xf32>
    %182 = tpu.matmul %4, %181, %cst_180 {dimension_numbers = #tpu.dot_dimension_numbers<[1], [0], [0], [1], [0, 0, 1, 1], [], []>} : vector<21x16xf32>, vector<16x32xf32>, vector<21x32xf32> -> vector<21x32xf32>
    %183 = vector.extract_strided_slice %182 {offsets = [0, 0], sizes = [7, 32], strides = [1, 1]} : vector<21x32xf32> to vector<7x32xf32>
    %c14_181 = arith.constant 14 : index
    %c0_182 = arith.constant 0 : index
    %184 = vector.load %arg16[%c14_181, %c0_182] : memref<98x288xf32, #tpu.memory_space<vmem>>, vector<7x32xf32>
    tpu.vector_store %arg16[%c14_181, %c0_182], %183 {strides = array<i32>} : memref<98x288xf32, #tpu.memory_space<vmem>>, vector<7x32xf32>,
    %185 = vector.extract_strided_slice %182 {offsets = [7, 0], sizes = [7, 32], strides = [1, 1]} : vector<21x32xf32> to vector<7x32xf32>
    %c14_183 = arith.constant 14 : index
    %c32_184 = arith.constant 32 : index
    %186 = vector.load %arg16[%c14_183, %c32_184] : memref<98x288xf32, #tpu.memory_space<vmem>>, vector<7x32xf32>
    tpu.vector_store %arg16[%c14_183, %c32_184], %185 {strides = array<i32>} : memref<98x288xf32, #tpu.memory_space<vmem>>, vector<7x32xf32>,
    %187 = vector.extract_strided_slice %182 {offsets = [14, 0], sizes = [7, 32], strides = [1, 1]} : vector<21x32xf32> to vector<7x32xf32>
    %c14_185 = arith.constant 14 : index
    %c64_186 = arith.constant 64 : index
    %188 = vector.load %arg16[%c14_185, %c64_186] : memref<98x288xf32, #tpu.memory_space<vmem>>, vector<7x32xf32>
    tpu.vector_store %arg16[%c14_185, %c64_186], %187 {strides = array<i32>} : memref<98x288xf32, #tpu.memory_space<vmem>>, vector<7x32xf32>,
    %c0_187 = arith.constant 0 : index
    %c5_188 = arith.constant 5 : index
    %c0_189 = arith.constant 0 : index
    %c0_190 = arith.constant 0 : index
    %189 = vector.load %arg15[%c0_187, %c5_188, %c0_189, %c0_190] : memref<2x16x16x32xf32, #tpu.memory_space<vmem>>, vector<1x1x16x32xf32>
    %190 = vector.shape_cast %189 : vector<1x1x16x32xf32> to vector<16x32xf32>
    %cst_191 = arith.constant dense<0.000000e+00> : vector<21x32xf32>
    %191 = tpu.matmul %4, %190, %cst_191 {dimension_numbers = #tpu.dot_dimension_numbers<[1], [0], [0], [1], [0, 0, 1, 1], [], []>} : vector<21x16xf32>, vector<16x32xf32>, vector<21x32xf32> -> vector<21x32xf32>
    %192 = vector.extract_strided_slice %191 {offsets = [0, 0], sizes = [7, 32], strides = [1, 1]} : vector<21x32xf32> to vector<7x32xf32>
    %c14_192 = arith.constant 14 : index
    %c96_193 = arith.constant 96 : index
    %193 = vector.load %arg16[%c14_192, %c96_193] : memref<98x288xf32, #tpu.memory_space<vmem>>, vector<7x32xf32>
    tpu.vector_store %arg16[%c14_192, %c96_193], %192 {strides = array<i32>} : memref<98x288xf32, #tpu.memory_space<vmem>>, vector<7x32xf32>,
    %194 = vector.extract_strided_slice %191 {offsets = [7, 0], sizes = [7, 32], strides = [1, 1]} : vector<21x32xf32> to vector<7x32xf32>
    %c14_194 = arith.constant 14 : index
    %c128_195 = arith.constant 128 : index
    %195 = vector.load %arg16[%c14_194, %c128_195] : memref<98x288xf32, #tpu.memory_space<vmem>>, vector<7x32xf32>
    tpu.vector_store %arg16[%c14_194, %c128_195], %194 {strides = array<i32>} : memref<98x288xf32, #tpu.memory_space<vmem>>, vector<7x32xf32>,
    %196 = vector.extract_strided_slice %191 {offsets = [14, 0], sizes = [7, 32], strides = [1, 1]} : vector<21x32xf32> to vector<7x32xf32>
    %c14_196 = arith.constant 14 : index
    %c160_197 = arith.constant 160 : index
    %197 = vector.load %arg16[%c14_196, %c160_197] : memref<98x288xf32, #tpu.memory_space<vmem>>, vector<7x32xf32>
    tpu.vector_store %arg16[%c14_196, %c160_197], %196 {strides = array<i32>} : memref<98x288xf32, #tpu.memory_space<vmem>>, vector<7x32xf32>,
    %c0_198 = arith.constant 0 : index
    %c6_199 = arith.constant 6 : index
    %c0_200 = arith.constant 0 : index
    %c0_201 = arith.constant 0 : index
    %198 = vector.load %arg15[%c0_198, %c6_199, %c0_200, %c0_201] : memref<2x16x16x32xf32, #tpu.memory_space<vmem>>, vector<1x1x16x32xf32>
    %199 = vector.shape_cast %198 : vector<1x1x16x32xf32> to vector<16x32xf32>
    %cst_202 = arith.constant dense<0.000000e+00> : vector<21x32xf32>
    %200 = tpu.matmul %4, %199, %cst_202 {dimension_numbers = #tpu.dot_dimension_numbers<[1], [0], [0], [1], [0, 0, 1, 1], [], []>} : vector<21x16xf32>, vector<16x32xf32>, vector<21x32xf32> -> vector<21x32xf32>
    %201 = vector.extract_strided_slice %200 {offsets = [0, 0], sizes = [7, 32], strides = [1, 1]} : vector<21x32xf32> to vector<7x32xf32>
    %c14_203 = arith.constant 14 : index
    %c192_204 = arith.constant 192 : index
    %202 = vector.load %arg16[%c14_203, %c192_204] : memref<98x288xf32, #tpu.memory_space<vmem>>, vector<7x32xf32>
    tpu.vector_store %arg16[%c14_203, %c192_204], %201 {strides = array<i32>} : memref<98x288xf32, #tpu.memory_space<vmem>>, vector<7x32xf32>,
    %203 = vector.extract_strided_slice %200 {offsets = [7, 0], sizes = [7, 32], strides = [1, 1]} : vector<21x32xf32> to vector<7x32xf32>
    %c14_205 = arith.constant 14 : index
    %c224_206 = arith.constant 224 : index
    %204 = vector.load %arg16[%c14_205, %c224_206] : memref<98x288xf32, #tpu.memory_space<vmem>>, vector<7x32xf32>
    tpu.vector_store %arg16[%c14_205, %c224_206], %203 {strides = array<i32>} : memref<98x288xf32, #tpu.memory_space<vmem>>, vector<7x32xf32>,
    %205 = vector.extract_strided_slice %200 {offsets = [14, 0], sizes = [7, 32], strides = [1, 1]} : vector<21x32xf32> to vector<7x32xf32>
    %c14_207 = arith.constant 14 : index
    %c256_208 = arith.constant 256 : index
    %206 = vector.load %arg16[%c14_207, %c256_208] : memref<98x288xf32, #tpu.memory_space<vmem>>, vector<7x32xf32>
    tpu.vector_store %arg16[%c14_207, %c256_208], %205 {strides = array<i32>} : memref<98x288xf32, #tpu.memory_space<vmem>>, vector<7x32xf32>,
    %c0_209 = arith.constant 0 : index
    %c6_210 = arith.constant 6 : index
    %c0_211 = arith.constant 0 : index
    %c0_212 = arith.constant 0 : index
    %207 = vector.load %arg15[%c0_209, %c6_210, %c0_211, %c0_212] : memref<2x16x16x32xf32, #tpu.memory_space<vmem>>, vector<1x1x16x32xf32>
    %208 = vector.shape_cast %207 : vector<1x1x16x32xf32> to vector<16x32xf32>
    %cst_213 = arith.constant dense<0.000000e+00> : vector<21x32xf32>
    %209 = tpu.matmul %4, %208, %cst_213 {dimension_numbers = #tpu.dot_dimension_numbers<[1], [0], [0], [1], [0, 0, 1, 1], [], []>} : vector<21x16xf32>, vector<16x32xf32>, vector<21x32xf32> -> vector<21x32xf32>
    %210 = vector.extract_strided_slice %209 {offsets = [0, 0], sizes = [7, 32], strides = [1, 1]} : vector<21x32xf32> to vector<7x32xf32>
    %c21 = arith.constant 21 : index
    %c0_214 = arith.constant 0 : index
    %211 = vector.load %arg16[%c21, %c0_214] : memref<98x288xf32, #tpu.memory_space<vmem>>, vector<7x32xf32>
    tpu.vector_store %arg16[%c21, %c0_214], %210 {strides = array<i32>} : memref<98x288xf32, #tpu.memory_space<vmem>>, vector<7x32xf32>,
    %212 = vector.extract_strided_slice %209 {offsets = [7, 0], sizes = [7, 32], strides = [1, 1]} : vector<21x32xf32> to vector<7x32xf32>
    %c21_215 = arith.constant 21 : index
    %c32_216 = arith.constant 32 : index
    %213 = vector.load %arg16[%c21_215, %c32_216] : memref<98x288xf32, #tpu.memory_space<vmem>>, vector<7x32xf32>
    tpu.vector_store %arg16[%c21_215, %c32_216], %212 {strides = array<i32>} : memref<98x288xf32, #tpu.memory_space<vmem>>, vector<7x32xf32>,
    %214 = vector.extract_strided_slice %209 {offsets = [14, 0], sizes = [7, 32], strides = [1, 1]} : vector<21x32xf32> to vector<7x32xf32>
    %c21_217 = arith.constant 21 : index
    %c64_218 = arith.constant 64 : index
    %215 = vector.load %arg16[%c21_217, %c64_218] : memref<98x288xf32, #tpu.memory_space<vmem>>, vector<7x32xf32>
    tpu.vector_store %arg16[%c21_217, %c64_218], %214 {strides = array<i32>} : memref<98x288xf32, #tpu.memory_space<vmem>>, vector<7x32xf32>,
    %c0_219 = arith.constant 0 : index
    %c7_220 = arith.constant 7 : index
    %c0_221 = arith.constant 0 : index
    %c0_222 = arith.constant 0 : index
    %216 = vector.load %arg15[%c0_219, %c7_220, %c0_221, %c0_222] : memref<2x16x16x32xf32, #tpu.memory_space<vmem>>, vector<1x1x16x32xf32>
    %217 = vector.shape_cast %216 : vector<1x1x16x32xf32> to vector<16x32xf32>
    %cst_223 = arith.constant dense<0.000000e+00> : vector<21x32xf32>
    %218 = tpu.matmul %4, %217, %cst_223 {dimension_numbers = #tpu.dot_dimension_numbers<[1], [0], [0], [1], [0, 0, 1, 1], [], []>} : vector<21x16xf32>, vector<16x32xf32>, vector<21x32xf32> -> vector<21x32xf32>
    %219 = vector.extract_strided_slice %218 {offsets = [0, 0], sizes = [7, 32], strides = [1, 1]} : vector<21x32xf32> to vector<7x32xf32>
    %c21_224 = arith.constant 21 : index
    %c96_225 = arith.constant 96 : index
    %220 = vector.load %arg16[%c21_224, %c96_225] : memref<98x288xf32, #tpu.memory_space<vmem>>, vector<7x32xf32>
    tpu.vector_store %arg16[%c21_224, %c96_225], %219 {strides = array<i32>} : memref<98x288xf32, #tpu.memory_space<vmem>>, vector<7x32xf32>,
    %221 = vector.extract_strided_slice %218 {offsets = [7, 0], sizes = [7, 32], strides = [1, 1]} : vector<21x32xf32> to vector<7x32xf32>
    %c21_226 = arith.constant 21 : index
    %c128_227 = arith.constant 128 : index
    %222 = vector.load %arg16[%c21_226, %c128_227] : memref<98x288xf32, #tpu.memory_space<vmem>>, vector<7x32xf32>
    tpu.vector_store %arg16[%c21_226, %c128_227], %221 {strides = array<i32>} : memref<98x288xf32, #tpu.memory_space<vmem>>, vector<7x32xf32>,
    %223 = vector.extract_strided_slice %218 {offsets = [14, 0], sizes = [7, 32], strides = [1, 1]} : vector<21x32xf32> to vector<7x32xf32>
    %c21_228 = arith.constant 21 : index
    %c160_229 = arith.constant 160 : index
    %224 = vector.load %arg16[%c21_228, %c160_229] : memref<98x288xf32, #tpu.memory_space<vmem>>, vector<7x32xf32>
    tpu.vector_store %arg16[%c21_228, %c160_229], %223 {strides = array<i32>} : memref<98x288xf32, #tpu.memory_space<vmem>>, vector<7x32xf32>,
    %c0_230 = arith.constant 0 : index
    %c8_231 = arith.constant 8 : index
    %c0_232 = arith.constant 0 : index
    %c0_233 = arith.constant 0 : index
    %225 = vector.load %arg15[%c0_230, %c8_231, %c0_232, %c0_233] : memref<2x16x16x32xf32, #tpu.memory_space<vmem>>, vector<1x1x16x32xf32>
    %226 = vector.shape_cast %225 : vector<1x1x16x32xf32> to vector<16x32xf32>
    %cst_234 = arith.constant dense<0.000000e+00> : vector<21x32xf32>
    %227 = tpu.matmul %4, %226, %cst_234 {dimension_numbers = #tpu.dot_dimension_numbers<[1], [0], [0], [1], [0, 0, 1, 1], [], []>} : vector<21x16xf32>, vector<16x32xf32>, vector<21x32xf32> -> vector<21x32xf32>
    %228 = vector.extract_strided_slice %227 {offsets = [0, 0], sizes = [7, 32], strides = [1, 1]} : vector<21x32xf32> to vector<7x32xf32>
    %c21_235 = arith.constant 21 : index
    %c192_236 = arith.constant 192 : index
    %229 = vector.load %arg16[%c21_235, %c192_236] : memref<98x288xf32, #tpu.memory_space<vmem>>, vector<7x32xf32>
    tpu.vector_store %arg16[%c21_235, %c192_236], %228 {strides = array<i32>} : memref<98x288xf32, #tpu.memory_space<vmem>>, vector<7x32xf32>,
    %230 = vector.extract_strided_slice %227 {offsets = [7, 0], sizes = [7, 32], strides = [1, 1]} : vector<21x32xf32> to vector<7x32xf32>
    %c21_237 = arith.constant 21 : index
    %c224_238 = arith.constant 224 : index
    %231 = vector.load %arg16[%c21_237, %c224_238] : memref<98x288xf32, #tpu.memory_space<vmem>>, vector<7x32xf32>
    tpu.vector_store %arg16[%c21_237, %c224_238], %230 {strides = array<i32>} : memref<98x288xf32, #tpu.memory_space<vmem>>, vector<7x32xf32>,
    %232 = vector.extract_strided_slice %227 {offsets = [14, 0], sizes = [7, 32], strides = [1, 1]} : vector<21x32xf32> to vector<7x32xf32>
    %c21_239 = arith.constant 21 : index
    %c256_240 = arith.constant 256 : index
    %233 = vector.load %arg16[%c21_239, %c256_240] : memref<98x288xf32, #tpu.memory_space<vmem>>, vector<7x32xf32>
    tpu.vector_store %arg16[%c21_239, %c256_240], %232 {strides = array<i32>} : memref<98x288xf32, #tpu.memory_space<vmem>>, vector<7x32xf32>,
    %c0_241 = arith.constant 0 : index
    %c8_242 = arith.constant 8 : index
    %c0_243 = arith.constant 0 : index
    %c0_244 = arith.constant 0 : index
    %234 = vector.load %arg15[%c0_241, %c8_242, %c0_243, %c0_244] : memref<2x16x16x32xf32, #tpu.memory_space<vmem>>, vector<1x1x16x32xf32>
    %235 = vector.shape_cast %234 : vector<1x1x16x32xf32> to vector<16x32xf32>
    %cst_245 = arith.constant dense<0.000000e+00> : vector<21x32xf32>
    %236 = tpu.matmul %4, %235, %cst_245 {dimension_numbers = #tpu.dot_dimension_numbers<[1], [0], [0], [1], [0, 0, 1, 1], [], []>} : vector<21x16xf32>, vector<16x32xf32>, vector<21x32xf32> -> vector<21x32xf32>
    %237 = vector.extract_strided_slice %236 {offsets = [0, 0], sizes = [7, 32], strides = [1, 1]} : vector<21x32xf32> to vector<7x32xf32>
    %c28 = arith.constant 28 : index
    %c0_246 = arith.constant 0 : index
    %238 = vector.load %arg16[%c28, %c0_246] : memref<98x288xf32, #tpu.memory_space<vmem>>, vector<7x32xf32>
    tpu.vector_store %arg16[%c28, %c0_246], %237 {strides = array<i32>} : memref<98x288xf32, #tpu.memory_space<vmem>>, vector<7x32xf32>,
    %239 = vector.extract_strided_slice %236 {offsets = [7, 0], sizes = [7, 32], strides = [1, 1]} : vector<21x32xf32> to vector<7x32xf32>
    %c28_247 = arith.constant 28 : index
    %c32_248 = arith.constant 32 : index
    %240 = vector.load %arg16[%c28_247, %c32_248] : memref<98x288xf32, #tpu.memory_space<vmem>>, vector<7x32xf32>
    tpu.vector_store %arg16[%c28_247, %c32_248], %239 {strides = array<i32>} : memref<98x288xf32, #tpu.memory_space<vmem>>, vector<7x32xf32>,
    %241 = vector.extract_strided_slice %236 {offsets = [14, 0], sizes = [7, 32], strides = [1, 1]} : vector<21x32xf32> to vector<7x32xf32>
    %c28_249 = arith.constant 28 : index
    %c64_250 = arith.constant 64 : index
    %242 = vector.load %arg16[%c28_249, %c64_250] : memref<98x288xf32, #tpu.memory_space<vmem>>, vector<7x32xf32>
    tpu.vector_store %arg16[%c28_249, %c64_250], %241 {strides = array<i32>} : memref<98x288xf32, #tpu.memory_space<vmem>>, vector<7x32xf32>,
    %c0_251 = arith.constant 0 : index
    %c9_252 = arith.constant 9 : index
    %c0_253 = arith.constant 0 : index
    %c0_254 = arith.constant 0 : index
    %243 = vector.load %arg15[%c0_251, %c9_252, %c0_253, %c0_254] : memref<2x16x16x32xf32, #tpu.memory_space<vmem>>, vector<1x1x16x32xf32>
    %244 = vector.shape_cast %243 : vector<1x1x16x32xf32> to vector<16x32xf32>
    %cst_255 = arith.constant dense<0.000000e+00> : vector<21x32xf32>
    %245 = tpu.matmul %4, %244, %cst_255 {dimension_numbers = #tpu.dot_dimension_numbers<[1], [0], [0], [1], [0, 0, 1, 1], [], []>} : vector<21x16xf32>, vector<16x32xf32>, vector<21x32xf32> -> vector<21x32xf32>
    %246 = vector.extract_strided_slice %245 {offsets = [0, 0], sizes = [7, 32], strides = [1, 1]} : vector<21x32xf32> to vector<7x32xf32>
    %c28_256 = arith.constant 28 : index
    %c96_257 = arith.constant 96 : index
    %247 = vector.load %arg16[%c28_256, %c96_257] : memref<98x288xf32, #tpu.memory_space<vmem>>, vector<7x32xf32>
    tpu.vector_store %arg16[%c28_256, %c96_257], %246 {strides = array<i32>} : memref<98x288xf32, #tpu.memory_space<vmem>>, vector<7x32xf32>,
    %248 = vector.extract_strided_slice %245 {offsets = [7, 0], sizes = [7, 32], strides = [1, 1]} : vector<21x32xf32> to vector<7x32xf32>
    %c28_258 = arith.constant 28 : index
    %c128_259 = arith.constant 128 : index
    %249 = vector.load %arg16[%c28_258, %c128_259] : memref<98x288xf32, #tpu.memory_space<vmem>>, vector<7x32xf32>
    tpu.vector_store %arg16[%c28_258, %c128_259], %248 {strides = array<i32>} : memref<98x288xf32, #tpu.memory_space<vmem>>, vector<7x32xf32>,
    %250 = vector.extract_strided_slice %245 {offsets = [14, 0], sizes = [7, 32], strides = [1, 1]} : vector<21x32xf32> to vector<7x32xf32>
    %c28_260 = arith.constant 28 : index
    %c160_261 = arith.constant 160 : index
    %251 = vector.load %arg16[%c28_260, %c160_261] : memref<98x288xf32, #tpu.memory_space<vmem>>, vector<7x32xf32>
    tpu.vector_store %arg16[%c28_260, %c160_261], %250 {strides = array<i32>} : memref<98x288xf32, #tpu.memory_space<vmem>>, vector<7x32xf32>,
    %c0_262 = arith.constant 0 : index
    %c10_263 = arith.constant 10 : index
    %c0_264 = arith.constant 0 : index
    %c0_265 = arith.constant 0 : index
    %252 = vector.load %arg15[%c0_262, %c10_263, %c0_264, %c0_265] : memref<2x16x16x32xf32, #tpu.memory_space<vmem>>, vector<1x1x16x32xf32>
    %253 = vector.shape_cast %252 : vector<1x1x16x32xf32> to vector<16x32xf32>
    %cst_266 = arith.constant dense<0.000000e+00> : vector<21x32xf32>
    %254 = tpu.matmul %4, %253, %cst_266 {dimension_numbers = #tpu.dot_dimension_numbers<[1], [0], [0], [1], [0, 0, 1, 1], [], []>} : vector<21x16xf32>, vector<16x32xf32>, vector<21x32xf32> -> vector<21x32xf32>
    %255 = vector.extract_strided_slice %254 {offsets = [0, 0], sizes = [7, 32], strides = [1, 1]} : vector<21x32xf32> to vector<7x32xf32>
    %c28_267 = arith.constant 28 : index
    %c192_268 = arith.constant 192 : index
    %256 = vector.load %arg16[%c28_267, %c192_268] : memref<98x288xf32, #tpu.memory_space<vmem>>, vector<7x32xf32>
    tpu.vector_store %arg16[%c28_267, %c192_268], %255 {strides = array<i32>} : memref<98x288xf32, #tpu.memory_space<vmem>>, vector<7x32xf32>,
    %257 = vector.extract_strided_slice %254 {offsets = [7, 0], sizes = [7, 32], strides = [1, 1]} : vector<21x32xf32> to vector<7x32xf32>
    %c28_269 = arith.constant 28 : index
    %c224_270 = arith.constant 224 : index
    %258 = vector.load %arg16[%c28_269, %c224_270] : memref<98x288xf32, #tpu.memory_space<vmem>>, vector<7x32xf32>
    tpu.vector_store %arg16[%c28_269, %c224_270], %257 {strides = array<i32>} : memref<98x288xf32, #tpu.memory_space<vmem>>, vector<7x32xf32>,
    %259 = vector.extract_strided_slice %254 {offsets = [14, 0], sizes = [7, 32], strides = [1, 1]} : vector<21x32xf32> to vector<7x32xf32>
    %c28_271 = arith.constant 28 : index
    %c256_272 = arith.constant 256 : index
    %260 = vector.load %arg16[%c28_271, %c256_272] : memref<98x288xf32, #tpu.memory_space<vmem>>, vector<7x32xf32>
    tpu.vector_store %arg16[%c28_271, %c256_272], %259 {strides = array<i32>} : memref<98x288xf32, #tpu.memory_space<vmem>>, vector<7x32xf32>,
    %c0_273 = arith.constant 0 : index
    %c10_274 = arith.constant 10 : index
    %c0_275 = arith.constant 0 : index
    %c0_276 = arith.constant 0 : index
    %261 = vector.load %arg15[%c0_273, %c10_274, %c0_275, %c0_276] : memref<2x16x16x32xf32, #tpu.memory_space<vmem>>, vector<1x1x16x32xf32>
    %262 = vector.shape_cast %261 : vector<1x1x16x32xf32> to vector<16x32xf32>
    %cst_277 = arith.constant dense<0.000000e+00> : vector<21x32xf32>
    %263 = tpu.matmul %4, %262, %cst_277 {dimension_numbers = #tpu.dot_dimension_numbers<[1], [0], [0], [1], [0, 0, 1, 1], [], []>} : vector<21x16xf32>, vector<16x32xf32>, vector<21x32xf32> -> vector<21x32xf32>
    %264 = vector.extract_strided_slice %263 {offsets = [0, 0], sizes = [7, 32], strides = [1, 1]} : vector<21x32xf32> to vector<7x32xf32>
    %c35 = arith.constant 35 : index
    %c0_278 = arith.constant 0 : index
    %265 = vector.load %arg16[%c35, %c0_278] : memref<98x288xf32, #tpu.memory_space<vmem>>, vector<7x32xf32>
    tpu.vector_store %arg16[%c35, %c0_278], %264 {strides = array<i32>} : memref<98x288xf32, #tpu.memory_space<vmem>>, vector<7x32xf32>,
    %266 = vector.extract_strided_slice %263 {offsets = [7, 0], sizes = [7, 32], strides = [1, 1]} : vector<21x32xf32> to vector<7x32xf32>
    %c35_279 = arith.constant 35 : index
    %c32_280 = arith.constant 32 : index
    %267 = vector.load %arg16[%c35_279, %c32_280] : memref<98x288xf32, #tpu.memory_space<vmem>>, vector<7x32xf32>
    tpu.vector_store %arg16[%c35_279, %c32_280], %266 {strides = array<i32>} : memref<98x288xf32, #tpu.memory_space<vmem>>, vector<7x32xf32>,
    %268 = vector.extract_strided_slice %263 {offsets = [14, 0], sizes = [7, 32], strides = [1, 1]} : vector<21x32xf32> to vector<7x32xf32>
    %c35_281 = arith.constant 35 : index
    %c64_282 = arith.constant 64 : index
    %269 = vector.load %arg16[%c35_281, %c64_282] : memref<98x288xf32, #tpu.memory_space<vmem>>, vector<7x32xf32>
    tpu.vector_store %arg16[%c35_281, %c64_282], %268 {strides = array<i32>} : memref<98x288xf32, #tpu.memory_space<vmem>>, vector<7x32xf32>,
    %c0_283 = arith.constant 0 : index
    %c11_284 = arith.constant 11 : index
    %c0_285 = arith.constant 0 : index
    %c0_286 = arith.constant 0 : index
    %270 = vector.load %arg15[%c0_283, %c11_284, %c0_285, %c0_286] : memref<2x16x16x32xf32, #tpu.memory_space<vmem>>, vector<1x1x16x32xf32>
    %271 = vector.shape_cast %270 : vector<1x1x16x32xf32> to vector<16x32xf32>
    %cst_287 = arith.constant dense<0.000000e+00> : vector<21x32xf32>
    %272 = tpu.matmul %4, %271, %cst_287 {dimension_numbers = #tpu.dot_dimension_numbers<[1], [0], [0], [1], [0, 0, 1, 1], [], []>} : vector<21x16xf32>, vector<16x32xf32>, vector<21x32xf32> -> vector<21x32xf32>
    %273 = vector.extract_strided_slice %272 {offsets = [0, 0], sizes = [7, 32], strides = [1, 1]} : vector<21x32xf32> to vector<7x32xf32>
    %c35_288 = arith.constant 35 : index
    %c96_289 = arith.constant 96 : index
    %274 = vector.load %arg16[%c35_288, %c96_289] : memref<98x288xf32, #tpu.memory_space<vmem>>, vector<7x32xf32>
    tpu.vector_store %arg16[%c35_288, %c96_289], %273 {strides = array<i32>} : memref<98x288xf32, #tpu.memory_space<vmem>>, vector<7x32xf32>,
    %275 = vector.extract_strided_slice %272 {offsets = [7, 0], sizes = [7, 32], strides = [1, 1]} : vector<21x32xf32> to vector<7x32xf32>
    %c35_290 = arith.constant 35 : index
    %c128_291 = arith.constant 128 : index
    %276 = vector.load %arg16[%c35_290, %c128_291] : memref<98x288xf32, #tpu.memory_space<vmem>>, vector<7x32xf32>
    tpu.vector_store %arg16[%c35_290, %c128_291], %275 {strides = array<i32>} : memref<98x288xf32, #tpu.memory_space<vmem>>, vector<7x32xf32>,
    %277 = vector.extract_strided_slice %272 {offsets = [14, 0], sizes = [7, 32], strides = [1, 1]} : vector<21x32xf32> to vector<7x32xf32>
    %c35_292 = arith.constant 35 : index
    %c160_293 = arith.constant 160 : index
    %278 = vector.load %arg16[%c35_292, %c160_293] : memref<98x288xf32, #tpu.memory_space<vmem>>, vector<7x32xf32>
    tpu.vector_store %arg16[%c35_292, %c160_293], %277 {strides = array<i32>} : memref<98x288xf32, #tpu.memory_space<vmem>>, vector<7x32xf32>,
    %c0_294 = arith.constant 0 : index
    %c12_295 = arith.constant 12 : index
    %c0_296 = arith.constant 0 : index
    %c0_297 = arith.constant 0 : index
    %279 = vector.load %arg15[%c0_294, %c12_295, %c0_296, %c0_297] : memref<2x16x16x32xf32, #tpu.memory_space<vmem>>, vector<1x1x16x32xf32>
    %280 = vector.shape_cast %279 : vector<1x1x16x32xf32> to vector<16x32xf32>
    %cst_298 = arith.constant dense<0.000000e+00> : vector<21x32xf32>
    %281 = tpu.matmul %4, %280, %cst_298 {dimension_numbers = #tpu.dot_dimension_numbers<[1], [0], [0], [1], [0, 0, 1, 1], [], []>} : vector<21x16xf32>, vector<16x32xf32>, vector<21x32xf32> -> vector<21x32xf32>
    %282 = vector.extract_strided_slice %281 {offsets = [0, 0], sizes = [7, 32], strides = [1, 1]} : vector<21x32xf32> to vector<7x32xf32>
    %c35_299 = arith.constant 35 : index
    %c192_300 = arith.constant 192 : index
    %283 = vector.load %arg16[%c35_299, %c192_300] : memref<98x288xf32, #tpu.memory_space<vmem>>, vector<7x32xf32>
    tpu.vector_store %arg16[%c35_299, %c192_300], %282 {strides = array<i32>} : memref<98x288xf32, #tpu.memory_space<vmem>>, vector<7x32xf32>,
    %284 = vector.extract_strided_slice %281 {offsets = [7, 0], sizes = [7, 32], strides = [1, 1]} : vector<21x32xf32> to vector<7x32xf32>
    %c35_301 = arith.constant 35 : index
    %c224_302 = arith.constant 224 : index
    %285 = vector.load %arg16[%c35_301, %c224_302] : memref<98x288xf32, #tpu.memory_space<vmem>>, vector<7x32xf32>
    tpu.vector_store %arg16[%c35_301, %c224_302], %284 {strides = array<i32>} : memref<98x288xf32, #tpu.memory_space<vmem>>, vector<7x32xf32>,
    %286 = vector.extract_strided_slice %281 {offsets = [14, 0], sizes = [7, 32], strides = [1, 1]} : vector<21x32xf32> to vector<7x32xf32>
    %c35_303 = arith.constant 35 : index
    %c256_304 = arith.constant 256 : index
    %287 = vector.load %arg16[%c35_303, %c256_304] : memref<98x288xf32, #tpu.memory_space<vmem>>, vector<7x32xf32>
    tpu.vector_store %arg16[%c35_303, %c256_304], %286 {strides = array<i32>} : memref<98x288xf32, #tpu.memory_space<vmem>>, vector<7x32xf32>,
    %c0_305 = arith.constant 0 : index
    %c12_306 = arith.constant 12 : index
    %c0_307 = arith.constant 0 : index
    %c0_308 = arith.constant 0 : index
    %288 = vector.load %arg15[%c0_305, %c12_306, %c0_307, %c0_308] : memref<2x16x16x32xf32, #tpu.memory_space<vmem>>, vector<1x1x16x32xf32>
    %289 = vector.shape_cast %288 : vector<1x1x16x32xf32> to vector<16x32xf32>
    %cst_309 = arith.constant dense<0.000000e+00> : vector<21x32xf32>
    %290 = tpu.matmul %4, %289, %cst_309 {dimension_numbers = #tpu.dot_dimension_numbers<[1], [0], [0], [1], [0, 0, 1, 1], [], []>} : vector<21x16xf32>, vector<16x32xf32>, vector<21x32xf32> -> vector<21x32xf32>
    %291 = vector.extract_strided_slice %290 {offsets = [0, 0], sizes = [7, 32], strides = [1, 1]} : vector<21x32xf32> to vector<7x32xf32>
    %c42 = arith.constant 42 : index
    %c0_310 = arith.constant 0 : index
    %292 = vector.load %arg16[%c42, %c0_310] : memref<98x288xf32, #tpu.memory_space<vmem>>, vector<7x32xf32>
    tpu.vector_store %arg16[%c42, %c0_310], %291 {strides = array<i32>} : memref<98x288xf32, #tpu.memory_space<vmem>>, vector<7x32xf32>,
    %293 = vector.extract_strided_slice %290 {offsets = [7, 0], sizes = [7, 32], strides = [1, 1]} : vector<21x32xf32> to vector<7x32xf32>
    %c42_311 = arith.constant 42 : index
    %c32_312 = arith.constant 32 : index
    %294 = vector.load %arg16[%c42_311, %c32_312] : memref<98x288xf32, #tpu.memory_space<vmem>>, vector<7x32xf32>
    tpu.vector_store %arg16[%c42_311, %c32_312], %293 {strides = array<i32>} : memref<98x288xf32, #tpu.memory_space<vmem>>, vector<7x32xf32>,
    %295 = vector.extract_strided_slice %290 {offsets = [14, 0], sizes = [7, 32], strides = [1, 1]} : vector<21x32xf32> to vector<7x32xf32>
    %c42_313 = arith.constant 42 : index
    %c64_314 = arith.constant 64 : index
    %296 = vector.load %arg16[%c42_313, %c64_314] : memref<98x288xf32, #tpu.memory_space<vmem>>, vector<7x32xf32>
    tpu.vector_store %arg16[%c42_313, %c64_314], %295 {strides = array<i32>} : memref<98x288xf32, #tpu.memory_space<vmem>>, vector<7x32xf32>,
    %c0_315 = arith.constant 0 : index
    %c13_316 = arith.constant 13 : index
    %c0_317 = arith.constant 0 : index
    %c0_318 = arith.constant 0 : index
    %297 = vector.load %arg15[%c0_315, %c13_316, %c0_317, %c0_318] : memref<2x16x16x32xf32, #tpu.memory_space<vmem>>, vector<1x1x16x32xf32>
    %298 = vector.shape_cast %297 : vector<1x1x16x32xf32> to vector<16x32xf32>
    %cst_319 = arith.constant dense<0.000000e+00> : vector<21x32xf32>
    %299 = tpu.matmul %4, %298, %cst_319 {dimension_numbers = #tpu.dot_dimension_numbers<[1], [0], [0], [1], [0, 0, 1, 1], [], []>} : vector<21x16xf32>, vector<16x32xf32>, vector<21x32xf32> -> vector<21x32xf32>
    %300 = vector.extract_strided_slice %299 {offsets = [0, 0], sizes = [7, 32], strides = [1, 1]} : vector<21x32xf32> to vector<7x32xf32>
    %c42_320 = arith.constant 42 : index
    %c96_321 = arith.constant 96 : index
    %301 = vector.load %arg16[%c42_320, %c96_321] : memref<98x288xf32, #tpu.memory_space<vmem>>, vector<7x32xf32>
    tpu.vector_store %arg16[%c42_320, %c96_321], %300 {strides = array<i32>} : memref<98x288xf32, #tpu.memory_space<vmem>>, vector<7x32xf32>,
    %302 = vector.extract_strided_slice %299 {offsets = [7, 0], sizes = [7, 32], strides = [1, 1]} : vector<21x32xf32> to vector<7x32xf32>
    %c42_322 = arith.constant 42 : index
    %c128_323 = arith.constant 128 : index
    %303 = vector.load %arg16[%c42_322, %c128_323] : memref<98x288xf32, #tpu.memory_space<vmem>>, vector<7x32xf32>
    tpu.vector_store %arg16[%c42_322, %c128_323], %302 {strides = array<i32>} : memref<98x288xf32, #tpu.memory_space<vmem>>, vector<7x32xf32>,
    %304 = vector.extract_strided_slice %299 {offsets = [14, 0], sizes = [7, 32], strides = [1, 1]} : vector<21x32xf32> to vector<7x32xf32>
    %c42_324 = arith.constant 42 : index
    %c160_325 = arith.constant 160 : index
    %305 = vector.load %arg16[%c42_324, %c160_325] : memref<98x288xf32, #tpu.memory_space<vmem>>, vector<7x32xf32>
    tpu.vector_store %arg16[%c42_324, %c160_325], %304 {strides = array<i32>} : memref<98x288xf32, #tpu.memory_space<vmem>>, vector<7x32xf32>,
    %c0_326 = arith.constant 0 : index
    %c14_327 = arith.constant 14 : index
    %c0_328 = arith.constant 0 : index
    %c0_329 = arith.constant 0 : index
    %306 = vector.load %arg15[%c0_326, %c14_327, %c0_328, %c0_329] : memref<2x16x16x32xf32, #tpu.memory_space<vmem>>, vector<1x1x16x32xf32>
    %307 = vector.shape_cast %306 : vector<1x1x16x32xf32> to vector<16x32xf32>
    %cst_330 = arith.constant dense<0.000000e+00> : vector<21x32xf32>
    %308 = tpu.matmul %4, %307, %cst_330 {dimension_numbers = #tpu.dot_dimension_numbers<[1], [0], [0], [1], [0, 0, 1, 1], [], []>} : vector<21x16xf32>, vector<16x32xf32>, vector<21x32xf32> -> vector<21x32xf32>
    %309 = vector.extract_strided_slice %308 {offsets = [0, 0], sizes = [7, 32], strides = [1, 1]} : vector<21x32xf32> to vector<7x32xf32>
    %c42_331 = arith.constant 42 : index
    %c192_332 = arith.constant 192 : index
    %310 = vector.load %arg16[%c42_331, %c192_332] : memref<98x288xf32, #tpu.memory_space<vmem>>, vector<7x32xf32>
    tpu.vector_store %arg16[%c42_331, %c192_332], %309 {strides = array<i32>} : memref<98x288xf32, #tpu.memory_space<vmem>>, vector<7x32xf32>,
    %311 = vector.extract_strided_slice %308 {offsets = [7, 0], sizes = [7, 32], strides = [1, 1]} : vector<21x32xf32> to vector<7x32xf32>
    %c42_333 = arith.constant 42 : index
    %c224_334 = arith.constant 224 : index
    %312 = vector.load %arg16[%c42_333, %c224_334] : memref<98x288xf32, #tpu.memory_space<vmem>>, vector<7x32xf32>
    tpu.vector_store %arg16[%c42_333, %c224_334], %311 {strides = array<i32>} : memref<98x288xf32, #tpu.memory_space<vmem>>, vector<7x32xf32>,
    %313 = vector.extract_strided_slice %308 {offsets = [14, 0], sizes = [7, 32], strides = [1, 1]} : vector<21x32xf32> to vector<7x32xf32>
    %c42_335 = arith.constant 42 : index
    %c256_336 = arith.constant 256 : index
    %314 = vector.load %arg16[%c42_335, %c256_336] : memref<98x288xf32, #tpu.memory_space<vmem>>, vector<7x32xf32>
    tpu.vector_store %arg16[%c42_335, %c256_336], %313 {strides = array<i32>} : memref<98x288xf32, #tpu.memory_space<vmem>>, vector<7x32xf32>,
    %c1_337 = arith.constant 1 : index
    %c0_338 = arith.constant 0 : index
    %c0_339 = arith.constant 0 : index
    %c0_340 = arith.constant 0 : index
    %315 = vector.load %arg15[%c1_337, %c0_338, %c0_339, %c0_340] : memref<2x16x16x32xf32, #tpu.memory_space<vmem>>, vector<1x1x16x32xf32>
    %316 = vector.shape_cast %315 : vector<1x1x16x32xf32> to vector<16x32xf32>
    %cst_341 = arith.constant dense<0.000000e+00> : vector<21x32xf32>
    %317 = tpu.matmul %4, %316, %cst_341 {dimension_numbers = #tpu.dot_dimension_numbers<[1], [0], [0], [1], [0, 0, 1, 1], [], []>} : vector<21x16xf32>, vector<16x32xf32>, vector<21x32xf32> -> vector<21x32xf32>
    %318 = vector.extract_strided_slice %317 {offsets = [0, 0], sizes = [7, 32], strides = [1, 1]} : vector<21x32xf32> to vector<7x32xf32>
    %c49 = arith.constant 49 : index
    %c0_342 = arith.constant 0 : index
    %319 = vector.load %arg16[%c49, %c0_342] : memref<98x288xf32, #tpu.memory_space<vmem>>, vector<7x32xf32>
    tpu.vector_store %arg16[%c49, %c0_342], %318 {strides = array<i32>} : memref<98x288xf32, #tpu.memory_space<vmem>>, vector<7x32xf32>,
    %320 = vector.extract_strided_slice %317 {offsets = [7, 0], sizes = [7, 32], strides = [1, 1]} : vector<21x32xf32> to vector<7x32xf32>
    %c49_343 = arith.constant 49 : index
    %c32_344 = arith.constant 32 : index
    %321 = vector.load %arg16[%c49_343, %c32_344] : memref<98x288xf32, #tpu.memory_space<vmem>>, vector<7x32xf32>
    tpu.vector_store %arg16[%c49_343, %c32_344], %320 {strides = array<i32>} : memref<98x288xf32, #tpu.memory_space<vmem>>, vector<7x32xf32>,
    %322 = vector.extract_strided_slice %317 {offsets = [14, 0], sizes = [7, 32], strides = [1, 1]} : vector<21x32xf32> to vector<7x32xf32>
    %c49_345 = arith.constant 49 : index
    %c64_346 = arith.constant 64 : index
    %323 = vector.load %arg16[%c49_345, %c64_346] : memref<98x288xf32, #tpu.memory_space<vmem>>, vector<7x32xf32>
    tpu.vector_store %arg16[%c49_345, %c64_346], %322 {strides = array<i32>} : memref<98x288xf32, #tpu.memory_space<vmem>>, vector<7x32xf32>,
    %c1_347 = arith.constant 1 : index
    %c1_348 = arith.constant 1 : index
    %c0_349 = arith.constant 0 : index
    %c0_350 = arith.constant 0 : index
    %324 = vector.load %arg15[%c1_347, %c1_348, %c0_349, %c0_350] : memref<2x16x16x32xf32, #tpu.memory_space<vmem>>, vector<1x1x16x32xf32>
    %325 = vector.shape_cast %324 : vector<1x1x16x32xf32> to vector<16x32xf32>
    %cst_351 = arith.constant dense<0.000000e+00> : vector<21x32xf32>
    %326 = tpu.matmul %4, %325, %cst_351 {dimension_numbers = #tpu.dot_dimension_numbers<[1], [0], [0], [1], [0, 0, 1, 1], [], []>} : vector<21x16xf32>, vector<16x32xf32>, vector<21x32xf32> -> vector<21x32xf32>
    %327 = vector.extract_strided_slice %326 {offsets = [0, 0], sizes = [7, 32], strides = [1, 1]} : vector<21x32xf32> to vector<7x32xf32>
    %c49_352 = arith.constant 49 : index
    %c96_353 = arith.constant 96 : index
    %328 = vector.load %arg16[%c49_352, %c96_353] : memref<98x288xf32, #tpu.memory_space<vmem>>, vector<7x32xf32>
    tpu.vector_store %arg16[%c49_352, %c96_353], %327 {strides = array<i32>} : memref<98x288xf32, #tpu.memory_space<vmem>>, vector<7x32xf32>,
    %329 = vector.extract_strided_slice %326 {offsets = [7, 0], sizes = [7, 32], strides = [1, 1]} : vector<21x32xf32> to vector<7x32xf32>
    %c49_354 = arith.constant 49 : index
    %c128_355 = arith.constant 128 : index
    %330 = vector.load %arg16[%c49_354, %c128_355] : memref<98x288xf32, #tpu.memory_space<vmem>>, vector<7x32xf32>
    tpu.vector_store %arg16[%c49_354, %c128_355], %329 {strides = array<i32>} : memref<98x288xf32, #tpu.memory_space<vmem>>, vector<7x32xf32>,
    %331 = vector.extract_strided_slice %326 {offsets = [14, 0], sizes = [7, 32], strides = [1, 1]} : vector<21x32xf32> to vector<7x32xf32>
    %c49_356 = arith.constant 49 : index
    %c160_357 = arith.constant 160 : index
    %332 = vector.load %arg16[%c49_356, %c160_357] : memref<98x288xf32, #tpu.memory_space<vmem>>, vector<7x32xf32>
    tpu.vector_store %arg16[%c49_356, %c160_357], %331 {strides = array<i32>} : memref<98x288xf32, #tpu.memory_space<vmem>>, vector<7x32xf32>,
    %c1_358 = arith.constant 1 : index
    %c2_359 = arith.constant 2 : index
    %c0_360 = arith.constant 0 : index
    %c0_361 = arith.constant 0 : index
    %333 = vector.load %arg15[%c1_358, %c2_359, %c0_360, %c0_361] : memref<2x16x16x32xf32, #tpu.memory_space<vmem>>, vector<1x1x16x32xf32>
    %334 = vector.shape_cast %333 : vector<1x1x16x32xf32> to vector<16x32xf32>
    %cst_362 = arith.constant dense<0.000000e+00> : vector<21x32xf32>
    %335 = tpu.matmul %4, %334, %cst_362 {dimension_numbers = #tpu.dot_dimension_numbers<[1], [0], [0], [1], [0, 0, 1, 1], [], []>} : vector<21x16xf32>, vector<16x32xf32>, vector<21x32xf32> -> vector<21x32xf32>
    %336 = vector.extract_strided_slice %335 {offsets = [0, 0], sizes = [7, 32], strides = [1, 1]} : vector<21x32xf32> to vector<7x32xf32>
    %c49_363 = arith.constant 49 : index
    %c192_364 = arith.constant 192 : index
    %337 = vector.load %arg16[%c49_363, %c192_364] : memref<98x288xf32, #tpu.memory_space<vmem>>, vector<7x32xf32>
    tpu.vector_store %arg16[%c49_363, %c192_364], %336 {strides = array<i32>} : memref<98x288xf32, #tpu.memory_space<vmem>>, vector<7x32xf32>,
    %338 = vector.extract_strided_slice %335 {offsets = [7, 0], sizes = [7, 32], strides = [1, 1]} : vector<21x32xf32> to vector<7x32xf32>
    %c49_365 = arith.constant 49 : index
    %c224_366 = arith.constant 224 : index
    %339 = vector.load %arg16[%c49_365, %c224_366] : memref<98x288xf32, #tpu.memory_space<vmem>>, vector<7x32xf32>
    tpu.vector_store %arg16[%c49_365, %c224_366], %338 {strides = array<i32>} : memref<98x288xf32, #tpu.memory_space<vmem>>, vector<7x32xf32>,
    %340 = vector.extract_strided_slice %335 {offsets = [14, 0], sizes = [7, 32], strides = [1, 1]} : vector<21x32xf32> to vector<7x32xf32>
    %c49_367 = arith.constant 49 : index
    %c256_368 = arith.constant 256 : index
    %341 = vector.load %arg16[%c49_367, %c256_368] : memref<98x288xf32, #tpu.memory_space<vmem>>, vector<7x32xf32>
    tpu.vector_store %arg16[%c49_367, %c256_368], %340 {strides = array<i32>} : memref<98x288xf32, #tpu.memory_space<vmem>>, vector<7x32xf32>,
    %c1_369 = arith.constant 1 : index
    %c2_370 = arith.constant 2 : index
    %c0_371 = arith.constant 0 : index
    %c0_372 = arith.constant 0 : index
    %342 = vector.load %arg15[%c1_369, %c2_370, %c0_371, %c0_372] : memref<2x16x16x32xf32, #tpu.memory_space<vmem>>, vector<1x1x16x32xf32>
    %343 = vector.shape_cast %342 : vector<1x1x16x32xf32> to vector<16x32xf32>
    %cst_373 = arith.constant dense<0.000000e+00> : vector<21x32xf32>
    %344 = tpu.matmul %4, %343, %cst_373 {dimension_numbers = #tpu.dot_dimension_numbers<[1], [0], [0], [1], [0, 0, 1, 1], [], []>} : vector<21x16xf32>, vector<16x32xf32>, vector<21x32xf32> -> vector<21x32xf32>
    %345 = vector.extract_strided_slice %344 {offsets = [0, 0], sizes = [7, 32], strides = [1, 1]} : vector<21x32xf32> to vector<7x32xf32>
    %c56 = arith.constant 56 : index
    %c0_374 = arith.constant 0 : index
    %346 = vector.load %arg16[%c56, %c0_374] : memref<98x288xf32, #tpu.memory_space<vmem>>, vector<7x32xf32>
    tpu.vector_store %arg16[%c56, %c0_374], %345 {strides = array<i32>} : memref<98x288xf32, #tpu.memory_space<vmem>>, vector<7x32xf32>,
    %347 = vector.extract_strided_slice %344 {offsets = [7, 0], sizes = [7, 32], strides = [1, 1]} : vector<21x32xf32> to vector<7x32xf32>
    %c56_375 = arith.constant 56 : index
    %c32_376 = arith.constant 32 : index
    %348 = vector.load %arg16[%c56_375, %c32_376] : memref<98x288xf32, #tpu.memory_space<vmem>>, vector<7x32xf32>
    tpu.vector_store %arg16[%c56_375, %c32_376], %347 {strides = array<i32>} : memref<98x288xf32, #tpu.memory_space<vmem>>, vector<7x32xf32>,
    %349 = vector.extract_strided_slice %344 {offsets = [14, 0], sizes = [7, 32], strides = [1, 1]} : vector<21x32xf32> to vector<7x32xf32>
    %c56_377 = arith.constant 56 : index
    %c64_378 = arith.constant 64 : index
    %350 = vector.load %arg16[%c56_377, %c64_378] : memref<98x288xf32, #tpu.memory_space<vmem>>, vector<7x32xf32>
    tpu.vector_store %arg16[%c56_377, %c64_378], %349 {strides = array<i32>} : memref<98x288xf32, #tpu.memory_space<vmem>>, vector<7x32xf32>,
    %c1_379 = arith.constant 1 : index
    %c3_380 = arith.constant 3 : index
    %c0_381 = arith.constant 0 : index
    %c0_382 = arith.constant 0 : index
    %351 = vector.load %arg15[%c1_379, %c3_380, %c0_381, %c0_382] : memref<2x16x16x32xf32, #tpu.memory_space<vmem>>, vector<1x1x16x32xf32>
    %352 = vector.shape_cast %351 : vector<1x1x16x32xf32> to vector<16x32xf32>
    %cst_383 = arith.constant dense<0.000000e+00> : vector<21x32xf32>
    %353 = tpu.matmul %4, %352, %cst_383 {dimension_numbers = #tpu.dot_dimension_numbers<[1], [0], [0], [1], [0, 0, 1, 1], [], []>} : vector<21x16xf32>, vector<16x32xf32>, vector<21x32xf32> -> vector<21x32xf32>
    %354 = vector.extract_strided_slice %353 {offsets = [0, 0], sizes = [7, 32], strides = [1, 1]} : vector<21x32xf32> to vector<7x32xf32>
    %c56_384 = arith.constant 56 : index
    %c96_385 = arith.constant 96 : index
    %355 = vector.load %arg16[%c56_384, %c96_385] : memref<98x288xf32, #tpu.memory_space<vmem>>, vector<7x32xf32>
    tpu.vector_store %arg16[%c56_384, %c96_385], %354 {strides = array<i32>} : memref<98x288xf32, #tpu.memory_space<vmem>>, vector<7x32xf32>,
    %356 = vector.extract_strided_slice %353 {offsets = [7, 0], sizes = [7, 32], strides = [1, 1]} : vector<21x32xf32> to vector<7x32xf32>
    %c56_386 = arith.constant 56 : index
    %c128_387 = arith.constant 128 : index
    %357 = vector.load %arg16[%c56_386, %c128_387] : memref<98x288xf32, #tpu.memory_space<vmem>>, vector<7x32xf32>
    tpu.vector_store %arg16[%c56_386, %c128_387], %356 {strides = array<i32>} : memref<98x288xf32, #tpu.memory_space<vmem>>, vector<7x32xf32>,
    %358 = vector.extract_strided_slice %353 {offsets = [14, 0], sizes = [7, 32], strides = [1, 1]} : vector<21x32xf32> to vector<7x32xf32>
    %c56_388 = arith.constant 56 : index
    %c160_389 = arith.constant 160 : index
    %359 = vector.load %arg16[%c56_388, %c160_389] : memref<98x288xf32, #tpu.memory_space<vmem>>, vector<7x32xf32>
    tpu.vector_store %arg16[%c56_388, %c160_389], %358 {strides = array<i32>} : memref<98x288xf32, #tpu.memory_space<vmem>>, vector<7x32xf32>,
    %c1_390 = arith.constant 1 : index
    %c4_391 = arith.constant 4 : index
    %c0_392 = arith.constant 0 : index
    %c0_393 = arith.constant 0 : index
    %360 = vector.load %arg15[%c1_390, %c4_391, %c0_392, %c0_393] : memref<2x16x16x32xf32, #tpu.memory_space<vmem>>, vector<1x1x16x32xf32>
    %361 = vector.shape_cast %360 : vector<1x1x16x32xf32> to vector<16x32xf32>
    %cst_394 = arith.constant dense<0.000000e+00> : vector<21x32xf32>
    %362 = tpu.matmul %4, %361, %cst_394 {dimension_numbers = #tpu.dot_dimension_numbers<[1], [0], [0], [1], [0, 0, 1, 1], [], []>} : vector<21x16xf32>, vector<16x32xf32>, vector<21x32xf32> -> vector<21x32xf32>
    %363 = vector.extract_strided_slice %362 {offsets = [0, 0], sizes = [7, 32], strides = [1, 1]} : vector<21x32xf32> to vector<7x32xf32>
    %c56_395 = arith.constant 56 : index
    %c192_396 = arith.constant 192 : index
    %364 = vector.load %arg16[%c56_395, %c192_396] : memref<98x288xf32, #tpu.memory_space<vmem>>, vector<7x32xf32>
    tpu.vector_store %arg16[%c56_395, %c192_396], %363 {strides = array<i32>} : memref<98x288xf32, #tpu.memory_space<vmem>>, vector<7x32xf32>,
    %365 = vector.extract_strided_slice %362 {offsets = [7, 0], sizes = [7, 32], strides = [1, 1]} : vector<21x32xf32> to vector<7x32xf32>
    %c56_397 = arith.constant 56 : index
    %c224_398 = arith.constant 224 : index
    %366 = vector.load %arg16[%c56_397, %c224_398] : memref<98x288xf32, #tpu.memory_space<vmem>>, vector<7x32xf32>
    tpu.vector_store %arg16[%c56_397, %c224_398], %365 {strides = array<i32>} : memref<98x288xf32, #tpu.memory_space<vmem>>, vector<7x32xf32>,
    %367 = vector.extract_strided_slice %362 {offsets = [14, 0], sizes = [7, 32], strides = [1, 1]} : vector<21x32xf32> to vector<7x32xf32>
    %c56_399 = arith.constant 56 : index
    %c256_400 = arith.constant 256 : index
    %368 = vector.load %arg16[%c56_399, %c256_400] : memref<98x288xf32, #tpu.memory_space<vmem>>, vector<7x32xf32>
    tpu.vector_store %arg16[%c56_399, %c256_400], %367 {strides = array<i32>} : memref<98x288xf32, #tpu.memory_space<vmem>>, vector<7x32xf32>,
    %c1_401 = arith.constant 1 : index
    %c4_402 = arith.constant 4 : index
    %c0_403 = arith.constant 0 : index
    %c0_404 = arith.constant 0 : index
    %369 = vector.load %arg15[%c1_401, %c4_402, %c0_403, %c0_404] : memref<2x16x16x32xf32, #tpu.memory_space<vmem>>, vector<1x1x16x32xf32>
    %370 = vector.shape_cast %369 : vector<1x1x16x32xf32> to vector<16x32xf32>
    %cst_405 = arith.constant dense<0.000000e+00> : vector<21x32xf32>
    %371 = tpu.matmul %4, %370, %cst_405 {dimension_numbers = #tpu.dot_dimension_numbers<[1], [0], [0], [1], [0, 0, 1, 1], [], []>} : vector<21x16xf32>, vector<16x32xf32>, vector<21x32xf32> -> vector<21x32xf32>
    %372 = vector.extract_strided_slice %371 {offsets = [0, 0], sizes = [7, 32], strides = [1, 1]} : vector<21x32xf32> to vector<7x32xf32>
    %c63 = arith.constant 63 : index
    %c0_406 = arith.constant 0 : index
    %373 = vector.load %arg16[%c63, %c0_406] : memref<98x288xf32, #tpu.memory_space<vmem>>, vector<7x32xf32>
    tpu.vector_store %arg16[%c63, %c0_406], %372 {strides = array<i32>} : memref<98x288xf32, #tpu.memory_space<vmem>>, vector<7x32xf32>,
    %374 = vector.extract_strided_slice %371 {offsets = [7, 0], sizes = [7, 32], strides = [1, 1]} : vector<21x32xf32> to vector<7x32xf32>
    %c63_407 = arith.constant 63 : index
    %c32_408 = arith.constant 32 : index
    %375 = vector.load %arg16[%c63_407, %c32_408] : memref<98x288xf32, #tpu.memory_space<vmem>>, vector<7x32xf32>
    tpu.vector_store %arg16[%c63_407, %c32_408], %374 {strides = array<i32>} : memref<98x288xf32, #tpu.memory_space<vmem>>, vector<7x32xf32>,
    %376 = vector.extract_strided_slice %371 {offsets = [14, 0], sizes = [7, 32], strides = [1, 1]} : vector<21x32xf32> to vector<7x32xf32>
    %c63_409 = arith.constant 63 : index
    %c64_410 = arith.constant 64 : index
    %377 = vector.load %arg16[%c63_409, %c64_410] : memref<98x288xf32, #tpu.memory_space<vmem>>, vector<7x32xf32>
    tpu.vector_store %arg16[%c63_409, %c64_410], %376 {strides = array<i32>} : memref<98x288xf32, #tpu.memory_space<vmem>>, vector<7x32xf32>,
    %c1_411 = arith.constant 1 : index
    %c5_412 = arith.constant 5 : index
    %c0_413 = arith.constant 0 : index
    %c0_414 = arith.constant 0 : index
    %378 = vector.load %arg15[%c1_411, %c5_412, %c0_413, %c0_414] : memref<2x16x16x32xf32, #tpu.memory_space<vmem>>, vector<1x1x16x32xf32>
    %379 = vector.shape_cast %378 : vector<1x1x16x32xf32> to vector<16x32xf32>
    %cst_415 = arith.constant dense<0.000000e+00> : vector<21x32xf32>
    %380 = tpu.matmul %4, %379, %cst_415 {dimension_numbers = #tpu.dot_dimension_numbers<[1], [0], [0], [1], [0, 0, 1, 1], [], []>} : vector<21x16xf32>, vector<16x32xf32>, vector<21x32xf32> -> vector<21x32xf32>
    %381 = vector.extract_strided_slice %380 {offsets = [0, 0], sizes = [7, 32], strides = [1, 1]} : vector<21x32xf32> to vector<7x32xf32>
    %c63_416 = arith.constant 63 : index
    %c96_417 = arith.constant 96 : index
    %382 = vector.load %arg16[%c63_416, %c96_417] : memref<98x288xf32, #tpu.memory_space<vmem>>, vector<7x32xf32>
    tpu.vector_store %arg16[%c63_416, %c96_417], %381 {strides = array<i32>} : memref<98x288xf32, #tpu.memory_space<vmem>>, vector<7x32xf32>,
    %383 = vector.extract_strided_slice %380 {offsets = [7, 0], sizes = [7, 32], strides = [1, 1]} : vector<21x32xf32> to vector<7x32xf32>
    %c63_418 = arith.constant 63 : index
    %c128_419 = arith.constant 128 : index
    %384 = vector.load %arg16[%c63_418, %c128_419] : memref<98x288xf32, #tpu.memory_space<vmem>>, vector<7x32xf32>
    tpu.vector_store %arg16[%c63_418, %c128_419], %383 {strides = array<i32>} : memref<98x288xf32, #tpu.memory_space<vmem>>, vector<7x32xf32>,
    %385 = vector.extract_strided_slice %380 {offsets = [14, 0], sizes = [7, 32], strides = [1, 1]} : vector<21x32xf32> to vector<7x32xf32>
    %c63_420 = arith.constant 63 : index
    %c160_421 = arith.constant 160 : index
    %386 = vector.load %arg16[%c63_420, %c160_421] : memref<98x288xf32, #tpu.memory_space<vmem>>, vector<7x32xf32>
    tpu.vector_store %arg16[%c63_420, %c160_421], %385 {strides = array<i32>} : memref<98x288xf32, #tpu.memory_space<vmem>>, vector<7x32xf32>,
    %c1_422 = arith.constant 1 : index
    %c6_423 = arith.constant 6 : index
    %c0_424 = arith.constant 0 : index
    %c0_425 = arith.constant 0 : index
    %387 = vector.load %arg15[%c1_422, %c6_423, %c0_424, %c0_425] : memref<2x16x16x32xf32, #tpu.memory_space<vmem>>, vector<1x1x16x32xf32>
    %388 = vector.shape_cast %387 : vector<1x1x16x32xf32> to vector<16x32xf32>
    %cst_426 = arith.constant dense<0.000000e+00> : vector<21x32xf32>
    %389 = tpu.matmul %4, %388, %cst_426 {dimension_numbers = #tpu.dot_dimension_numbers<[1], [0], [0], [1], [0, 0, 1, 1], [], []>} : vector<21x16xf32>, vector<16x32xf32>, vector<21x32xf32> -> vector<21x32xf32>
    %390 = vector.extract_strided_slice %389 {offsets = [0, 0], sizes = [7, 32], strides = [1, 1]} : vector<21x32xf32> to vector<7x32xf32>
    %c63_427 = arith.constant 63 : index
    %c192_428 = arith.constant 192 : index
    %391 = vector.load %arg16[%c63_427, %c192_428] : memref<98x288xf32, #tpu.memory_space<vmem>>, vector<7x32xf32>
    tpu.vector_store %arg16[%c63_427, %c192_428], %390 {strides = array<i32>} : memref<98x288xf32, #tpu.memory_space<vmem>>, vector<7x32xf32>,
    %392 = vector.extract_strided_slice %389 {offsets = [7, 0], sizes = [7, 32], strides = [1, 1]} : vector<21x32xf32> to vector<7x32xf32>
    %c63_429 = arith.constant 63 : index
    %c224_430 = arith.constant 224 : index
    %393 = vector.load %arg16[%c63_429, %c224_430] : memref<98x288xf32, #tpu.memory_space<vmem>>, vector<7x32xf32>
    tpu.vector_store %arg16[%c63_429, %c224_430], %392 {strides = array<i32>} : memref<98x288xf32, #tpu.memory_space<vmem>>, vector<7x32xf32>,
    %394 = vector.extract_strided_slice %389 {offsets = [14, 0], sizes = [7, 32], strides = [1, 1]} : vector<21x32xf32> to vector<7x32xf32>
    %c63_431 = arith.constant 63 : index
    %c256_432 = arith.constant 256 : index
    %395 = vector.load %arg16[%c63_431, %c256_432] : memref<98x288xf32, #tpu.memory_space<vmem>>, vector<7x32xf32>
    tpu.vector_store %arg16[%c63_431, %c256_432], %394 {strides = array<i32>} : memref<98x288xf32, #tpu.memory_space<vmem>>, vector<7x32xf32>,
    %c1_433 = arith.constant 1 : index
    %c6_434 = arith.constant 6 : index
    %c0_435 = arith.constant 0 : index
    %c0_436 = arith.constant 0 : index
    %396 = vector.load %arg15[%c1_433, %c6_434, %c0_435, %c0_436] : memref<2x16x16x32xf32, #tpu.memory_space<vmem>>, vector<1x1x16x32xf32>
    %397 = vector.shape_cast %396 : vector<1x1x16x32xf32> to vector<16x32xf32>
    %cst_437 = arith.constant dense<0.000000e+00> : vector<21x32xf32>
    %398 = tpu.matmul %4, %397, %cst_437 {dimension_numbers = #tpu.dot_dimension_numbers<[1], [0], [0], [1], [0, 0, 1, 1], [], []>} : vector<21x16xf32>, vector<16x32xf32>, vector<21x32xf32> -> vector<21x32xf32>
    %399 = vector.extract_strided_slice %398 {offsets = [0, 0], sizes = [7, 32], strides = [1, 1]} : vector<21x32xf32> to vector<7x32xf32>
    %c70 = arith.constant 70 : index
    %c0_438 = arith.constant 0 : index
    %400 = vector.load %arg16[%c70, %c0_438] : memref<98x288xf32, #tpu.memory_space<vmem>>, vector<7x32xf32>
    tpu.vector_store %arg16[%c70, %c0_438], %399 {strides = array<i32>} : memref<98x288xf32, #tpu.memory_space<vmem>>, vector<7x32xf32>,
    %401 = vector.extract_strided_slice %398 {offsets = [7, 0], sizes = [7, 32], strides = [1, 1]} : vector<21x32xf32> to vector<7x32xf32>
    %c70_439 = arith.constant 70 : index
    %c32_440 = arith.constant 32 : index
    %402 = vector.load %arg16[%c70_439, %c32_440] : memref<98x288xf32, #tpu.memory_space<vmem>>, vector<7x32xf32>
    tpu.vector_store %arg16[%c70_439, %c32_440], %401 {strides = array<i32>} : memref<98x288xf32, #tpu.memory_space<vmem>>, vector<7x32xf32>,
    %403 = vector.extract_strided_slice %398 {offsets = [14, 0], sizes = [7, 32], strides = [1, 1]} : vector<21x32xf32> to vector<7x32xf32>
    %c70_441 = arith.constant 70 : index
    %c64_442 = arith.constant 64 : index
    %404 = vector.load %arg16[%c70_441, %c64_442] : memref<98x288xf32, #tpu.memory_space<vmem>>, vector<7x32xf32>
    tpu.vector_store %arg16[%c70_441, %c64_442], %403 {strides = array<i32>} : memref<98x288xf32, #tpu.memory_space<vmem>>, vector<7x32xf32>,
    %c1_443 = arith.constant 1 : index
    %c7_444 = arith.constant 7 : index
    %c0_445 = arith.constant 0 : index
    %c0_446 = arith.constant 0 : index
    %405 = vector.load %arg15[%c1_443, %c7_444, %c0_445, %c0_446] : memref<2x16x16x32xf32, #tpu.memory_space<vmem>>, vector<1x1x16x32xf32>
    %406 = vector.shape_cast %405 : vector<1x1x16x32xf32> to vector<16x32xf32>
    %cst_447 = arith.constant dense<0.000000e+00> : vector<21x32xf32>
    %407 = tpu.matmul %4, %406, %cst_447 {dimension_numbers = #tpu.dot_dimension_numbers<[1], [0], [0], [1], [0, 0, 1, 1], [], []>} : vector<21x16xf32>, vector<16x32xf32>, vector<21x32xf32> -> vector<21x32xf32>
    %408 = vector.extract_strided_slice %407 {offsets = [0, 0], sizes = [7, 32], strides = [1, 1]} : vector<21x32xf32> to vector<7x32xf32>
    %c70_448 = arith.constant 70 : index
    %c96_449 = arith.constant 96 : index
    %409 = vector.load %arg16[%c70_448, %c96_449] : memref<98x288xf32, #tpu.memory_space<vmem>>, vector<7x32xf32>
    tpu.vector_store %arg16[%c70_448, %c96_449], %408 {strides = array<i32>} : memref<98x288xf32, #tpu.memory_space<vmem>>, vector<7x32xf32>,
    %410 = vector.extract_strided_slice %407 {offsets = [7, 0], sizes = [7, 32], strides = [1, 1]} : vector<21x32xf32> to vector<7x32xf32>
    %c70_450 = arith.constant 70 : index
    %c128_451 = arith.constant 128 : index
    %411 = vector.load %arg16[%c70_450, %c128_451] : memref<98x288xf32, #tpu.memory_space<vmem>>, vector<7x32xf32>
    tpu.vector_store %arg16[%c70_450, %c128_451], %410 {strides = array<i32>} : memref<98x288xf32, #tpu.memory_space<vmem>>, vector<7x32xf32>,
    %412 = vector.extract_strided_slice %407 {offsets = [14, 0], sizes = [7, 32], strides = [1, 1]} : vector<21x32xf32> to vector<7x32xf32>
    %c70_452 = arith.constant 70 : index
    %c160_453 = arith.constant 160 : index
    %413 = vector.load %arg16[%c70_452, %c160_453] : memref<98x288xf32, #tpu.memory_space<vmem>>, vector<7x32xf32>
    tpu.vector_store %arg16[%c70_452, %c160_453], %412 {strides = array<i32>} : memref<98x288xf32, #tpu.memory_space<vmem>>, vector<7x32xf32>,
    %c1_454 = arith.constant 1 : index
    %c8_455 = arith.constant 8 : index
    %c0_456 = arith.constant 0 : index
    %c0_457 = arith.constant 0 : index
    %414 = vector.load %arg15[%c1_454, %c8_455, %c0_456, %c0_457] : memref<2x16x16x32xf32, #tpu.memory_space<vmem>>, vector<1x1x16x32xf32>
    %415 = vector.shape_cast %414 : vector<1x1x16x32xf32> to vector<16x32xf32>
    %cst_458 = arith.constant dense<0.000000e+00> : vector<21x32xf32>
    %416 = tpu.matmul %4, %415, %cst_458 {dimension_numbers = #tpu.dot_dimension_numbers<[1], [0], [0], [1], [0, 0, 1, 1], [], []>} : vector<21x16xf32>, vector<16x32xf32>, vector<21x32xf32> -> vector<21x32xf32>
    %417 = vector.extract_strided_slice %416 {offsets = [0, 0], sizes = [7, 32], strides = [1, 1]} : vector<21x32xf32> to vector<7x32xf32>
    %c70_459 = arith.constant 70 : index
    %c192_460 = arith.constant 192 : index
    %418 = vector.load %arg16[%c70_459, %c192_460] : memref<98x288xf32, #tpu.memory_space<vmem>>, vector<7x32xf32>
    tpu.vector_store %arg16[%c70_459, %c192_460], %417 {strides = array<i32>} : memref<98x288xf32, #tpu.memory_space<vmem>>, vector<7x32xf32>,
    %419 = vector.extract_strided_slice %416 {offsets = [7, 0], sizes = [7, 32], strides = [1, 1]} : vector<21x32xf32> to vector<7x32xf32>
    %c70_461 = arith.constant 70 : index
    %c224_462 = arith.constant 224 : index
    %420 = vector.load %arg16[%c70_461, %c224_462] : memref<98x288xf32, #tpu.memory_space<vmem>>, vector<7x32xf32>
    tpu.vector_store %arg16[%c70_461, %c224_462], %419 {strides = array<i32>} : memref<98x288xf32, #tpu.memory_space<vmem>>, vector<7x32xf32>,
    %421 = vector.extract_strided_slice %416 {offsets = [14, 0], sizes = [7, 32], strides = [1, 1]} : vector<21x32xf32> to vector<7x32xf32>
    %c70_463 = arith.constant 70 : index
    %c256_464 = arith.constant 256 : index
    %422 = vector.load %arg16[%c70_463, %c256_464] : memref<98x288xf32, #tpu.memory_space<vmem>>, vector<7x32xf32>
    tpu.vector_store %arg16[%c70_463, %c256_464], %421 {strides = array<i32>} : memref<98x288xf32, #tpu.memory_space<vmem>>, vector<7x32xf32>,
    %c1_465 = arith.constant 1 : index
    %c8_466 = arith.constant 8 : index
    %c0_467 = arith.constant 0 : index
    %c0_468 = arith.constant 0 : index
    %423 = vector.load %arg15[%c1_465, %c8_466, %c0_467, %c0_468] : memref<2x16x16x32xf32, #tpu.memory_space<vmem>>, vector<1x1x16x32xf32>
    %424 = vector.shape_cast %423 : vector<1x1x16x32xf32> to vector<16x32xf32>
    %cst_469 = arith.constant dense<0.000000e+00> : vector<21x32xf32>
    %425 = tpu.matmul %4, %424, %cst_469 {dimension_numbers = #tpu.dot_dimension_numbers<[1], [0], [0], [1], [0, 0, 1, 1], [], []>} : vector<21x16xf32>, vector<16x32xf32>, vector<21x32xf32> -> vector<21x32xf32>
    %426 = vector.extract_strided_slice %425 {offsets = [0, 0], sizes = [7, 32], strides = [1, 1]} : vector<21x32xf32> to vector<7x32xf32>
    %c77 = arith.constant 77 : index
    %c0_470 = arith.constant 0 : index
    %427 = vector.load %arg16[%c77, %c0_470] : memref<98x288xf32, #tpu.memory_space<vmem>>, vector<7x32xf32>
    tpu.vector_store %arg16[%c77, %c0_470], %426 {strides = array<i32>} : memref<98x288xf32, #tpu.memory_space<vmem>>, vector<7x32xf32>,
    %428 = vector.extract_strided_slice %425 {offsets = [7, 0], sizes = [7, 32], strides = [1, 1]} : vector<21x32xf32> to vector<7x32xf32>
    %c77_471 = arith.constant 77 : index
    %c32_472 = arith.constant 32 : index
    %429 = vector.load %arg16[%c77_471, %c32_472] : memref<98x288xf32, #tpu.memory_space<vmem>>, vector<7x32xf32>
    tpu.vector_store %arg16[%c77_471, %c32_472], %428 {strides = array<i32>} : memref<98x288xf32, #tpu.memory_space<vmem>>, vector<7x32xf32>,
    %430 = vector.extract_strided_slice %425 {offsets = [14, 0], sizes = [7, 32], strides = [1, 1]} : vector<21x32xf32> to vector<7x32xf32>
    %c77_473 = arith.constant 77 : index
    %c64_474 = arith.constant 64 : index
    %431 = vector.load %arg16[%c77_473, %c64_474] : memref<98x288xf32, #tpu.memory_space<vmem>>, vector<7x32xf32>
    tpu.vector_store %arg16[%c77_473, %c64_474], %430 {strides = array<i32>} : memref<98x288xf32, #tpu.memory_space<vmem>>, vector<7x32xf32>,
    %c1_475 = arith.constant 1 : index
    %c9_476 = arith.constant 9 : index
    %c0_477 = arith.constant 0 : index
    %c0_478 = arith.constant 0 : index
    %432 = vector.load %arg15[%c1_475, %c9_476, %c0_477, %c0_478] : memref<2x16x16x32xf32, #tpu.memory_space<vmem>>, vector<1x1x16x32xf32>
    %433 = vector.shape_cast %432 : vector<1x1x16x32xf32> to vector<16x32xf32>
    %cst_479 = arith.constant dense<0.000000e+00> : vector<21x32xf32>
    %434 = tpu.matmul %4, %433, %cst_479 {dimension_numbers = #tpu.dot_dimension_numbers<[1], [0], [0], [1], [0, 0, 1, 1], [], []>} : vector<21x16xf32>, vector<16x32xf32>, vector<21x32xf32> -> vector<21x32xf32>
    %435 = vector.extract_strided_slice %434 {offsets = [0, 0], sizes = [7, 32], strides = [1, 1]} : vector<21x32xf32> to vector<7x32xf32>
    %c77_480 = arith.constant 77 : index
    %c96_481 = arith.constant 96 : index
    %436 = vector.load %arg16[%c77_480, %c96_481] : memref<98x288xf32, #tpu.memory_space<vmem>>, vector<7x32xf32>
    tpu.vector_store %arg16[%c77_480, %c96_481], %435 {strides = array<i32>} : memref<98x288xf32, #tpu.memory_space<vmem>>, vector<7x32xf32>,
    %437 = vector.extract_strided_slice %434 {offsets = [7, 0], sizes = [7, 32], strides = [1, 1]} : vector<21x32xf32> to vector<7x32xf32>
    %c77_482 = arith.constant 77 : index
    %c128_483 = arith.constant 128 : index
    %438 = vector.load %arg16[%c77_482, %c128_483] : memref<98x288xf32, #tpu.memory_space<vmem>>, vector<7x32xf32>
    tpu.vector_store %arg16[%c77_482, %c128_483], %437 {strides = array<i32>} : memref<98x288xf32, #tpu.memory_space<vmem>>, vector<7x32xf32>,
    %439 = vector.extract_strided_slice %434 {offsets = [14, 0], sizes = [7, 32], strides = [1, 1]} : vector<21x32xf32> to vector<7x32xf32>
    %c77_484 = arith.constant 77 : index
    %c160_485 = arith.constant 160 : index
    %440 = vector.load %arg16[%c77_484, %c160_485] : memref<98x288xf32, #tpu.memory_space<vmem>>, vector<7x32xf32>
    tpu.vector_store %arg16[%c77_484, %c160_485], %439 {strides = array<i32>} : memref<98x288xf32, #tpu.memory_space<vmem>>, vector<7x32xf32>,
    %c1_486 = arith.constant 1 : index
    %c10_487 = arith.constant 10 : index
    %c0_488 = arith.constant 0 : index
    %c0_489 = arith.constant 0 : index
    %441 = vector.load %arg15[%c1_486, %c10_487, %c0_488, %c0_489] : memref<2x16x16x32xf32, #tpu.memory_space<vmem>>, vector<1x1x16x32xf32>
    %442 = vector.shape_cast %441 : vector<1x1x16x32xf32> to vector<16x32xf32>
    %cst_490 = arith.constant dense<0.000000e+00> : vector<21x32xf32>
    %443 = tpu.matmul %4, %442, %cst_490 {dimension_numbers = #tpu.dot_dimension_numbers<[1], [0], [0], [1], [0, 0, 1, 1], [], []>} : vector<21x16xf32>, vector<16x32xf32>, vector<21x32xf32> -> vector<21x32xf32>
    %444 = vector.extract_strided_slice %443 {offsets = [0, 0], sizes = [7, 32], strides = [1, 1]} : vector<21x32xf32> to vector<7x32xf32>
    %c77_491 = arith.constant 77 : index
    %c192_492 = arith.constant 192 : index
    %445 = vector.load %arg16[%c77_491, %c192_492] : memref<98x288xf32, #tpu.memory_space<vmem>>, vector<7x32xf32>
    tpu.vector_store %arg16[%c77_491, %c192_492], %444 {strides = array<i32>} : memref<98x288xf32, #tpu.memory_space<vmem>>, vector<7x32xf32>,
    %446 = vector.extract_strided_slice %443 {offsets = [7, 0], sizes = [7, 32], strides = [1, 1]} : vector<21x32xf32> to vector<7x32xf32>
    %c77_493 = arith.constant 77 : index
    %c224_494 = arith.constant 224 : index
    %447 = vector.load %arg16[%c77_493, %c224_494] : memref<98x288xf32, #tpu.memory_space<vmem>>, vector<7x32xf32>
    tpu.vector_store %arg16[%c77_493, %c224_494], %446 {strides = array<i32>} : memref<98x288xf32, #tpu.memory_space<vmem>>, vector<7x32xf32>,
    %448 = vector.extract_strided_slice %443 {offsets = [14, 0], sizes = [7, 32], strides = [1, 1]} : vector<21x32xf32> to vector<7x32xf32>
    %c77_495 = arith.constant 77 : index
    %c256_496 = arith.constant 256 : index
    %449 = vector.load %arg16[%c77_495, %c256_496] : memref<98x288xf32, #tpu.memory_space<vmem>>, vector<7x32xf32>
    tpu.vector_store %arg16[%c77_495, %c256_496], %448 {strides = array<i32>} : memref<98x288xf32, #tpu.memory_space<vmem>>, vector<7x32xf32>,
    %c1_497 = arith.constant 1 : index
    %c10_498 = arith.constant 10 : index
    %c0_499 = arith.constant 0 : index
    %c0_500 = arith.constant 0 : index
    %450 = vector.load %arg15[%c1_497, %c10_498, %c0_499, %c0_500] : memref<2x16x16x32xf32, #tpu.memory_space<vmem>>, vector<1x1x16x32xf32>
    %451 = vector.shape_cast %450 : vector<1x1x16x32xf32> to vector<16x32xf32>
    %cst_501 = arith.constant dense<0.000000e+00> : vector<21x32xf32>
    %452 = tpu.matmul %4, %451, %cst_501 {dimension_numbers = #tpu.dot_dimension_numbers<[1], [0], [0], [1], [0, 0, 1, 1], [], []>} : vector<21x16xf32>, vector<16x32xf32>, vector<21x32xf32> -> vector<21x32xf32>
    %453 = vector.extract_strided_slice %452 {offsets = [0, 0], sizes = [7, 32], strides = [1, 1]} : vector<21x32xf32> to vector<7x32xf32>
    %c84 = arith.constant 84 : index
    %c0_502 = arith.constant 0 : index
    %454 = vector.load %arg16[%c84, %c0_502] : memref<98x288xf32, #tpu.memory_space<vmem>>, vector<7x32xf32>
    tpu.vector_store %arg16[%c84, %c0_502], %453 {strides = array<i32>} : memref<98x288xf32, #tpu.memory_space<vmem>>, vector<7x32xf32>,
    %455 = vector.extract_strided_slice %452 {offsets = [7, 0], sizes = [7, 32], strides = [1, 1]} : vector<21x32xf32> to vector<7x32xf32>
    %c84_503 = arith.constant 84 : index
    %c32_504 = arith.constant 32 : index
    %456 = vector.load %arg16[%c84_503, %c32_504] : memref<98x288xf32, #tpu.memory_space<vmem>>, vector<7x32xf32>
    tpu.vector_store %arg16[%c84_503, %c32_504], %455 {strides = array<i32>} : memref<98x288xf32, #tpu.memory_space<vmem>>, vector<7x32xf32>,
    %457 = vector.extract_strided_slice %452 {offsets = [14, 0], sizes = [7, 32], strides = [1, 1]} : vector<21x32xf32> to vector<7x32xf32>
    %c84_505 = arith.constant 84 : index
    %c64_506 = arith.constant 64 : index
    %458 = vector.load %arg16[%c84_505, %c64_506] : memref<98x288xf32, #tpu.memory_space<vmem>>, vector<7x32xf32>
    tpu.vector_store %arg16[%c84_505, %c64_506], %457 {strides = array<i32>} : memref<98x288xf32, #tpu.memory_space<vmem>>, vector<7x32xf32>,
    %c1_507 = arith.constant 1 : index
    %c11_508 = arith.constant 11 : index
    %c0_509 = arith.constant 0 : index
    %c0_510 = arith.constant 0 : index
    %459 = vector.load %arg15[%c1_507, %c11_508, %c0_509, %c0_510] : memref<2x16x16x32xf32, #tpu.memory_space<vmem>>, vector<1x1x16x32xf32>
    %460 = vector.shape_cast %459 : vector<1x1x16x32xf32> to vector<16x32xf32>
    %cst_511 = arith.constant dense<0.000000e+00> : vector<21x32xf32>
    %461 = tpu.matmul %4, %460, %cst_511 {dimension_numbers = #tpu.dot_dimension_numbers<[1], [0], [0], [1], [0, 0, 1, 1], [], []>} : vector<21x16xf32>, vector<16x32xf32>, vector<21x32xf32> -> vector<21x32xf32>
    %462 = vector.extract_strided_slice %461 {offsets = [0, 0], sizes = [7, 32], strides = [1, 1]} : vector<21x32xf32> to vector<7x32xf32>
    %c84_512 = arith.constant 84 : index
    %c96_513 = arith.constant 96 : index
    %463 = vector.load %arg16[%c84_512, %c96_513] : memref<98x288xf32, #tpu.memory_space<vmem>>, vector<7x32xf32>
    tpu.vector_store %arg16[%c84_512, %c96_513], %462 {strides = array<i32>} : memref<98x288xf32, #tpu.memory_space<vmem>>, vector<7x32xf32>,
    %464 = vector.extract_strided_slice %461 {offsets = [7, 0], sizes = [7, 32], strides = [1, 1]} : vector<21x32xf32> to vector<7x32xf32>
    %c84_514 = arith.constant 84 : index
    %c128_515 = arith.constant 128 : index
    %465 = vector.load %arg16[%c84_514, %c128_515] : memref<98x288xf32, #tpu.memory_space<vmem>>, vector<7x32xf32>
    tpu.vector_store %arg16[%c84_514, %c128_515], %464 {strides = array<i32>} : memref<98x288xf32, #tpu.memory_space<vmem>>, vector<7x32xf32>,
    %466 = vector.extract_strided_slice %461 {offsets = [14, 0], sizes = [7, 32], strides = [1, 1]} : vector<21x32xf32> to vector<7x32xf32>
    %c84_516 = arith.constant 84 : index
    %c160_517 = arith.constant 160 : index
    %467 = vector.load %arg16[%c84_516, %c160_517] : memref<98x288xf32, #tpu.memory_space<vmem>>, vector<7x32xf32>
    tpu.vector_store %arg16[%c84_516, %c160_517], %466 {strides = array<i32>} : memref<98x288xf32, #tpu.memory_space<vmem>>, vector<7x32xf32>,
    %c1_518 = arith.constant 1 : index
    %c12_519 = arith.constant 12 : index
    %c0_520 = arith.constant 0 : index
    %c0_521 = arith.constant 0 : index
    %468 = vector.load %arg15[%c1_518, %c12_519, %c0_520, %c0_521] : memref<2x16x16x32xf32, #tpu.memory_space<vmem>>, vector<1x1x16x32xf32>
    %469 = vector.shape_cast %468 : vector<1x1x16x32xf32> to vector<16x32xf32>
    %cst_522 = arith.constant dense<0.000000e+00> : vector<21x32xf32>
    %470 = tpu.matmul %4, %469, %cst_522 {dimension_numbers = #tpu.dot_dimension_numbers<[1], [0], [0], [1], [0, 0, 1, 1], [], []>} : vector<21x16xf32>, vector<16x32xf32>, vector<21x32xf32> -> vector<21x32xf32>
    %471 = vector.extract_strided_slice %470 {offsets = [0, 0], sizes = [7, 32], strides = [1, 1]} : vector<21x32xf32> to vector<7x32xf32>
    %c84_523 = arith.constant 84 : index
    %c192_524 = arith.constant 192 : index
    %472 = vector.load %arg16[%c84_523, %c192_524] : memref<98x288xf32, #tpu.memory_space<vmem>>, vector<7x32xf32>
    tpu.vector_store %arg16[%c84_523, %c192_524], %471 {strides = array<i32>} : memref<98x288xf32, #tpu.memory_space<vmem>>, vector<7x32xf32>,
    %473 = vector.extract_strided_slice %470 {offsets = [7, 0], sizes = [7, 32], strides = [1, 1]} : vector<21x32xf32> to vector<7x32xf32>
    %c84_525 = arith.constant 84 : index
    %c224_526 = arith.constant 224 : index
    %474 = vector.load %arg16[%c84_525, %c224_526] : memref<98x288xf32, #tpu.memory_space<vmem>>, vector<7x32xf32>
    tpu.vector_store %arg16[%c84_525, %c224_526], %473 {strides = array<i32>} : memref<98x288xf32, #tpu.memory_space<vmem>>, vector<7x32xf32>,
    %475 = vector.extract_strided_slice %470 {offsets = [14, 0], sizes = [7, 32], strides = [1, 1]} : vector<21x32xf32> to vector<7x32xf32>
    %c84_527 = arith.constant 84 : index
    %c256_528 = arith.constant 256 : index
    %476 = vector.load %arg16[%c84_527, %c256_528] : memref<98x288xf32, #tpu.memory_space<vmem>>, vector<7x32xf32>
    tpu.vector_store %arg16[%c84_527, %c256_528], %475 {strides = array<i32>} : memref<98x288xf32, #tpu.memory_space<vmem>>, vector<7x32xf32>,
    %c1_529 = arith.constant 1 : index
    %c12_530 = arith.constant 12 : index
    %c0_531 = arith.constant 0 : index
    %c0_532 = arith.constant 0 : index
    %477 = vector.load %arg15[%c1_529, %c12_530, %c0_531, %c0_532] : memref<2x16x16x32xf32, #tpu.memory_space<vmem>>, vector<1x1x16x32xf32>
    %478 = vector.shape_cast %477 : vector<1x1x16x32xf32> to vector<16x32xf32>
    %cst_533 = arith.constant dense<0.000000e+00> : vector<21x32xf32>
    %479 = tpu.matmul %4, %478, %cst_533 {dimension_numbers = #tpu.dot_dimension_numbers<[1], [0], [0], [1], [0, 0, 1, 1], [], []>} : vector<21x16xf32>, vector<16x32xf32>, vector<21x32xf32> -> vector<21x32xf32>
    %480 = vector.extract_strided_slice %479 {offsets = [0, 0], sizes = [7, 32], strides = [1, 1]} : vector<21x32xf32> to vector<7x32xf32>
    %c91 = arith.constant 91 : index
    %c0_534 = arith.constant 0 : index
    %481 = vector.load %arg16[%c91, %c0_534] : memref<98x288xf32, #tpu.memory_space<vmem>>, vector<7x32xf32>
    tpu.vector_store %arg16[%c91, %c0_534], %480 {strides = array<i32>} : memref<98x288xf32, #tpu.memory_space<vmem>>, vector<7x32xf32>,
    %482 = vector.extract_strided_slice %479 {offsets = [7, 0], sizes = [7, 32], strides = [1, 1]} : vector<21x32xf32> to vector<7x32xf32>
    %c91_535 = arith.constant 91 : index
    %c32_536 = arith.constant 32 : index
    %483 = vector.load %arg16[%c91_535, %c32_536] : memref<98x288xf32, #tpu.memory_space<vmem>>, vector<7x32xf32>
    tpu.vector_store %arg16[%c91_535, %c32_536], %482 {strides = array<i32>} : memref<98x288xf32, #tpu.memory_space<vmem>>, vector<7x32xf32>,
    %484 = vector.extract_strided_slice %479 {offsets = [14, 0], sizes = [7, 32], strides = [1, 1]} : vector<21x32xf32> to vector<7x32xf32>
    %c91_537 = arith.constant 91 : index
    %c64_538 = arith.constant 64 : index
    %485 = vector.load %arg16[%c91_537, %c64_538] : memref<98x288xf32, #tpu.memory_space<vmem>>, vector<7x32xf32>
    tpu.vector_store %arg16[%c91_537, %c64_538], %484 {strides = array<i32>} : memref<98x288xf32, #tpu.memory_space<vmem>>, vector<7x32xf32>,
    %c1_539 = arith.constant 1 : index
    %c13_540 = arith.constant 13 : index
    %c0_541 = arith.constant 0 : index
    %c0_542 = arith.constant 0 : index
    %486 = vector.load %arg15[%c1_539, %c13_540, %c0_541, %c0_542] : memref<2x16x16x32xf32, #tpu.memory_space<vmem>>, vector<1x1x16x32xf32>
    %487 = vector.shape_cast %486 : vector<1x1x16x32xf32> to vector<16x32xf32>
    %cst_543 = arith.constant dense<0.000000e+00> : vector<21x32xf32>
    %488 = tpu.matmul %4, %487, %cst_543 {dimension_numbers = #tpu.dot_dimension_numbers<[1], [0], [0], [1], [0, 0, 1, 1], [], []>} : vector<21x16xf32>, vector<16x32xf32>, vector<21x32xf32> -> vector<21x32xf32>
    %489 = vector.extract_strided_slice %488 {offsets = [0, 0], sizes = [7, 32], strides = [1, 1]} : vector<21x32xf32> to vector<7x32xf32>
    %c91_544 = arith.constant 91 : index
    %c96_545 = arith.constant 96 : index
    %490 = vector.load %arg16[%c91_544, %c96_545] : memref<98x288xf32, #tpu.memory_space<vmem>>, vector<7x32xf32>
    tpu.vector_store %arg16[%c91_544, %c96_545], %489 {strides = array<i32>} : memref<98x288xf32, #tpu.memory_space<vmem>>, vector<7x32xf32>,
    %491 = vector.extract_strided_slice %488 {offsets = [7, 0], sizes = [7, 32], strides = [1, 1]} : vector<21x32xf32> to vector<7x32xf32>
    %c91_546 = arith.constant 91 : index
    %c128_547 = arith.constant 128 : index
    %492 = vector.load %arg16[%c91_546, %c128_547] : memref<98x288xf32, #tpu.memory_space<vmem>>, vector<7x32xf32>
    tpu.vector_store %arg16[%c91_546, %c128_547], %491 {strides = array<i32>} : memref<98x288xf32, #tpu.memory_space<vmem>>, vector<7x32xf32>,
    %493 = vector.extract_strided_slice %488 {offsets = [14, 0], sizes = [7, 32], strides = [1, 1]} : vector<21x32xf32> to vector<7x32xf32>
    %c91_548 = arith.constant 91 : index
    %c160_549 = arith.constant 160 : index
    %494 = vector.load %arg16[%c91_548, %c160_549] : memref<98x288xf32, #tpu.memory_space<vmem>>, vector<7x32xf32>
    tpu.vector_store %arg16[%c91_548, %c160_549], %493 {strides = array<i32>} : memref<98x288xf32, #tpu.memory_space<vmem>>, vector<7x32xf32>,
    %c1_550 = arith.constant 1 : index
    %c14_551 = arith.constant 14 : index
    %c0_552 = arith.constant 0 : index
    %c0_553 = arith.constant 0 : index
    %495 = vector.load %arg15[%c1_550, %c14_551, %c0_552, %c0_553] : memref<2x16x16x32xf32, #tpu.memory_space<vmem>>, vector<1x1x16x32xf32>
    %496 = vector.shape_cast %495 : vector<1x1x16x32xf32> to vector<16x32xf32>
    %cst_554 = arith.constant dense<0.000000e+00> : vector<21x32xf32>
    %497 = tpu.matmul %4, %496, %cst_554 {dimension_numbers = #tpu.dot_dimension_numbers<[1], [0], [0], [1], [0, 0, 1, 1], [], []>} : vector<21x16xf32>, vector<16x32xf32>, vector<21x32xf32> -> vector<21x32xf32>
    %498 = vector.extract_strided_slice %497 {offsets = [0, 0], sizes = [7, 32], strides = [1, 1]} : vector<21x32xf32> to vector<7x32xf32>
    %c91_555 = arith.constant 91 : index
    %c192_556 = arith.constant 192 : index
    %499 = vector.load %arg16[%c91_555, %c192_556] : memref<98x288xf32, #tpu.memory_space<vmem>>, vector<7x32xf32>
    tpu.vector_store %arg16[%c91_555, %c192_556], %498 {strides = array<i32>} : memref<98x288xf32, #tpu.memory_space<vmem>>, vector<7x32xf32>,
    %500 = vector.extract_strided_slice %497 {offsets = [7, 0], sizes = [7, 32], strides = [1, 1]} : vector<21x32xf32> to vector<7x32xf32>
    %c91_557 = arith.constant 91 : index
    %c224_558 = arith.constant 224 : index
    %501 = vector.load %arg16[%c91_557, %c224_558] : memref<98x288xf32, #tpu.memory_space<vmem>>, vector<7x32xf32>
    tpu.vector_store %arg16[%c91_557, %c224_558], %500 {strides = array<i32>} : memref<98x288xf32, #tpu.memory_space<vmem>>, vector<7x32xf32>,
    %502 = vector.extract_strided_slice %497 {offsets = [14, 0], sizes = [7, 32], strides = [1, 1]} : vector<21x32xf32> to vector<7x32xf32>
    %c91_559 = arith.constant 91 : index
    %c256_560 = arith.constant 256 : index
    %503 = vector.load %arg16[%c91_559, %c256_560] : memref<98x288xf32, #tpu.memory_space<vmem>>, vector<7x32xf32>
    tpu.vector_store %arg16[%c91_559, %c256_560], %502 {strides = array<i32>} : memref<98x288xf32, #tpu.memory_space<vmem>>, vector<7x32xf32>,
    %c0_561 = arith.constant 0 : index
    %c0_562 = arith.constant 0 : index
    %504 = vector.load %arg16[%c0_561, %c0_562] : memref<98x288xf32, #tpu.memory_space<vmem>>, vector<98x288xf32>
    %c0_563 = arith.constant 0 : index
    %c0_564 = arith.constant 0 : index
    %505 = vector.load %arg6[%c0_563, %c0_564] : memref<288x64xf32, #tpu.memory_space<vmem>>, vector<288x64xf32>
    %cst_565 = arith.constant dense<0.000000e+00> : vector<98x64xf32>
    %506 = tpu.matmul %504, %505, %cst_565 {dimension_numbers = #tpu.dot_dimension_numbers<[1], [0], [0], [1], [0, 0, 1, 1], [], []>} : vector<98x288xf32>, vector<288x64xf32>, vector<98x64xf32> -> vector<98x64xf32>
    %c0_566 = arith.constant 0 : index
    %c0_567 = arith.constant 0 : index
    %507 = vector.load %arg7[%c0_566, %c0_567] : memref<1x64xf32, #tpu.memory_space<vmem>>, vector<1x64xf32>
    %508 = vector.broadcast %507 : vector<1x64xf32> to vector<98x64xf32>
    %509 = arith.addf %506, %508 : vector<98x64xf32>
    %cst_568 = arith.constant 0.000000e+00 : f32
    %510 = vector.broadcast %cst_568 : f32 to vector<98x64xf32>
    %511 = arith.maximumf %509, %510 : vector<98x64xf32>
    %512 = vector.extract_strided_slice %511 {offsets = [0, 0], sizes = [7, 64], strides = [1, 1]} : vector<98x64xf32> to vector<7x64xf32>
    %c0_569 = arith.constant 0 : index
    %c1_570 = arith.constant 1 : index
    %c1_571 = arith.constant 1 : index
    %c0_572 = arith.constant 0 : index
    %513 = vector.load %arg17[%c0_569, %c1_570, %c1_571, %c0_572] : memref<2x9x9x64xf32, #tpu.memory_space<vmem>>, vector<1x1x7x64xf32>
    %514 = vector.shape_cast %513 : vector<1x1x7x64xf32> to vector<7x64xf32>
    %515 = vector.shape_cast %512 : vector<7x64xf32> to vector<1x1x7x64xf32>
    tpu.vector_store %arg17[%c0_569, %c1_570, %c1_571, %c0_572], %515 {strides = array<i32>} : memref<2x9x9x64xf32, #tpu.memory_space<vmem>>, vector<1x1x7x64xf32>,
    %516 = vector.extract_strided_slice %511 {offsets = [7, 0], sizes = [7, 64], strides = [1, 1]} : vector<98x64xf32> to vector<7x64xf32>
    %c0_573 = arith.constant 0 : index
    %c2_574 = arith.constant 2 : index
    %c1_575 = arith.constant 1 : index
    %c0_576 = arith.constant 0 : index
    %517 = vector.load %arg17[%c0_573, %c2_574, %c1_575, %c0_576] : memref<2x9x9x64xf32, #tpu.memory_space<vmem>>, vector<1x1x7x64xf32>
    %518 = vector.shape_cast %517 : vector<1x1x7x64xf32> to vector<7x64xf32>
    %519 = vector.shape_cast %516 : vector<7x64xf32> to vector<1x1x7x64xf32>
    tpu.vector_store %arg17[%c0_573, %c2_574, %c1_575, %c0_576], %519 {strides = array<i32>} : memref<2x9x9x64xf32, #tpu.memory_space<vmem>>, vector<1x1x7x64xf32>,
    %520 = vector.extract_strided_slice %511 {offsets = [14, 0], sizes = [7, 64], strides = [1, 1]} : vector<98x64xf32> to vector<7x64xf32>
    %c0_577 = arith.constant 0 : index
    %c3_578 = arith.constant 3 : index
    %c1_579 = arith.constant 1 : index
    %c0_580 = arith.constant 0 : index
    %521 = vector.load %arg17[%c0_577, %c3_578, %c1_579, %c0_580] : memref<2x9x9x64xf32, #tpu.memory_space<vmem>>, vector<1x1x7x64xf32>
    %522 = vector.shape_cast %521 : vector<1x1x7x64xf32> to vector<7x64xf32>
    %523 = vector.shape_cast %520 : vector<7x64xf32> to vector<1x1x7x64xf32>
    tpu.vector_store %arg17[%c0_577, %c3_578, %c1_579, %c0_580], %523 {strides = array<i32>} : memref<2x9x9x64xf32, #tpu.memory_space<vmem>>, vector<1x1x7x64xf32>,
    %524 = vector.extract_strided_slice %511 {offsets = [21, 0], sizes = [7, 64], strides = [1, 1]} : vector<98x64xf32> to vector<7x64xf32>
    %c0_581 = arith.constant 0 : index
    %c4_582 = arith.constant 4 : index
    %c1_583 = arith.constant 1 : index
    %c0_584 = arith.constant 0 : index
    %525 = vector.load %arg17[%c0_581, %c4_582, %c1_583, %c0_584] : memref<2x9x9x64xf32, #tpu.memory_space<vmem>>, vector<1x1x7x64xf32>
    %526 = vector.shape_cast %525 : vector<1x1x7x64xf32> to vector<7x64xf32>
    %527 = vector.shape_cast %524 : vector<7x64xf32> to vector<1x1x7x64xf32>
    tpu.vector_store %arg17[%c0_581, %c4_582, %c1_583, %c0_584], %527 {strides = array<i32>} : memref<2x9x9x64xf32, #tpu.memory_space<vmem>>, vector<1x1x7x64xf32>,
    %528 = vector.extract_strided_slice %511 {offsets = [28, 0], sizes = [7, 64], strides = [1, 1]} : vector<98x64xf32> to vector<7x64xf32>
    %c0_585 = arith.constant 0 : index
    %c5_586 = arith.constant 5 : index
    %c1_587 = arith.constant 1 : index
    %c0_588 = arith.constant 0 : index
    %529 = vector.load %arg17[%c0_585, %c5_586, %c1_587, %c0_588] : memref<2x9x9x64xf32, #tpu.memory_space<vmem>>, vector<1x1x7x64xf32>
    %530 = vector.shape_cast %529 : vector<1x1x7x64xf32> to vector<7x64xf32>
    %531 = vector.shape_cast %528 : vector<7x64xf32> to vector<1x1x7x64xf32>
    tpu.vector_store %arg17[%c0_585, %c5_586, %c1_587, %c0_588], %531 {strides = array<i32>} : memref<2x9x9x64xf32, #tpu.memory_space<vmem>>, vector<1x1x7x64xf32>,
    %532 = vector.extract_strided_slice %511 {offsets = [35, 0], sizes = [7, 64], strides = [1, 1]} : vector<98x64xf32> to vector<7x64xf32>
    %c0_589 = arith.constant 0 : index
    %c6_590 = arith.constant 6 : index
    %c1_591 = arith.constant 1 : index
    %c0_592 = arith.constant 0 : index
    %533 = vector.load %arg17[%c0_589, %c6_590, %c1_591, %c0_592] : memref<2x9x9x64xf32, #tpu.memory_space<vmem>>, vector<1x1x7x64xf32>
    %534 = vector.shape_cast %533 : vector<1x1x7x64xf32> to vector<7x64xf32>
    %535 = vector.shape_cast %532 : vector<7x64xf32> to vector<1x1x7x64xf32>
    tpu.vector_store %arg17[%c0_589, %c6_590, %c1_591, %c0_592], %535 {strides = array<i32>} : memref<2x9x9x64xf32, #tpu.memory_space<vmem>>, vector<1x1x7x64xf32>,
    %536 = vector.extract_strided_slice %511 {offsets = [42, 0], sizes = [7, 64], strides = [1, 1]} : vector<98x64xf32> to vector<7x64xf32>
    %c0_593 = arith.constant 0 : index
    %c7_594 = arith.constant 7 : index
    %c1_595 = arith.constant 1 : index
    %c0_596 = arith.constant 0 : index
    %537 = vector.load %arg17[%c0_593, %c7_594, %c1_595, %c0_596] : memref<2x9x9x64xf32, #tpu.memory_space<vmem>>, vector<1x1x7x64xf32>
    %538 = vector.shape_cast %537 : vector<1x1x7x64xf32> to vector<7x64xf32>
    %539 = vector.shape_cast %536 : vector<7x64xf32> to vector<1x1x7x64xf32>
    tpu.vector_store %arg17[%c0_593, %c7_594, %c1_595, %c0_596], %539 {strides = array<i32>} : memref<2x9x9x64xf32, #tpu.memory_space<vmem>>, vector<1x1x7x64xf32>,
    %540 = vector.extract_strided_slice %511 {offsets = [49, 0], sizes = [7, 64], strides = [1, 1]} : vector<98x64xf32> to vector<7x64xf32>
    %c1_597 = arith.constant 1 : index
    %c1_598 = arith.constant 1 : index
    %c1_599 = arith.constant 1 : index
    %c0_600 = arith.constant 0 : index
    %541 = vector.load %arg17[%c1_597, %c1_598, %c1_599, %c0_600] : memref<2x9x9x64xf32, #tpu.memory_space<vmem>>, vector<1x1x7x64xf32>
    %542 = vector.shape_cast %541 : vector<1x1x7x64xf32> to vector<7x64xf32>
    %543 = vector.shape_cast %540 : vector<7x64xf32> to vector<1x1x7x64xf32>
    tpu.vector_store %arg17[%c1_597, %c1_598, %c1_599, %c0_600], %543 {strides = array<i32>} : memref<2x9x9x64xf32, #tpu.memory_space<vmem>>, vector<1x1x7x64xf32>,
    %544 = vector.extract_strided_slice %511 {offsets = [56, 0], sizes = [7, 64], strides = [1, 1]} : vector<98x64xf32> to vector<7x64xf32>
    %c1_601 = arith.constant 1 : index
    %c2_602 = arith.constant 2 : index
    %c1_603 = arith.constant 1 : index
    %c0_604 = arith.constant 0 : index
    %545 = vector.load %arg17[%c1_601, %c2_602, %c1_603, %c0_604] : memref<2x9x9x64xf32, #tpu.memory_space<vmem>>, vector<1x1x7x64xf32>
    %546 = vector.shape_cast %545 : vector<1x1x7x64xf32> to vector<7x64xf32>
    %547 = vector.shape_cast %544 : vector<7x64xf32> to vector<1x1x7x64xf32>
    tpu.vector_store %arg17[%c1_601, %c2_602, %c1_603, %c0_604], %547 {strides = array<i32>} : memref<2x9x9x64xf32, #tpu.memory_space<vmem>>, vector<1x1x7x64xf32>,
    %548 = vector.extract_strided_slice %511 {offsets = [63, 0], sizes = [7, 64], strides = [1, 1]} : vector<98x64xf32> to vector<7x64xf32>
    %c1_605 = arith.constant 1 : index
    %c3_606 = arith.constant 3 : index
    %c1_607 = arith.constant 1 : index
    %c0_608 = arith.constant 0 : index
    %549 = vector.load %arg17[%c1_605, %c3_606, %c1_607, %c0_608] : memref<2x9x9x64xf32, #tpu.memory_space<vmem>>, vector<1x1x7x64xf32>
    %550 = vector.shape_cast %549 : vector<1x1x7x64xf32> to vector<7x64xf32>
    %551 = vector.shape_cast %548 : vector<7x64xf32> to vector<1x1x7x64xf32>
    tpu.vector_store %arg17[%c1_605, %c3_606, %c1_607, %c0_608], %551 {strides = array<i32>} : memref<2x9x9x64xf32, #tpu.memory_space<vmem>>, vector<1x1x7x64xf32>,
    %552 = vector.extract_strided_slice %511 {offsets = [70, 0], sizes = [7, 64], strides = [1, 1]} : vector<98x64xf32> to vector<7x64xf32>
    %c1_609 = arith.constant 1 : index
    %c4_610 = arith.constant 4 : index
    %c1_611 = arith.constant 1 : index
    %c0_612 = arith.constant 0 : index
    %553 = vector.load %arg17[%c1_609, %c4_610, %c1_611, %c0_612] : memref<2x9x9x64xf32, #tpu.memory_space<vmem>>, vector<1x1x7x64xf32>
    %554 = vector.shape_cast %553 : vector<1x1x7x64xf32> to vector<7x64xf32>
    %555 = vector.shape_cast %552 : vector<7x64xf32> to vector<1x1x7x64xf32>
    tpu.vector_store %arg17[%c1_609, %c4_610, %c1_611, %c0_612], %555 {strides = array<i32>} : memref<2x9x9x64xf32, #tpu.memory_space<vmem>>, vector<1x1x7x64xf32>,
    %556 = vector.extract_strided_slice %511 {offsets = [77, 0], sizes = [7, 64], strides = [1, 1]} : vector<98x64xf32> to vector<7x64xf32>
    %c1_613 = arith.constant 1 : index
    %c5_614 = arith.constant 5 : index
    %c1_615 = arith.constant 1 : index
    %c0_616 = arith.constant 0 : index
    %557 = vector.load %arg17[%c1_613, %c5_614, %c1_615, %c0_616] : memref<2x9x9x64xf32, #tpu.memory_space<vmem>>, vector<1x1x7x64xf32>
    %558 = vector.shape_cast %557 : vector<1x1x7x64xf32> to vector<7x64xf32>
    %559 = vector.shape_cast %556 : vector<7x64xf32> to vector<1x1x7x64xf32>
    tpu.vector_store %arg17[%c1_613, %c5_614, %c1_615, %c0_616], %559 {strides = array<i32>} : memref<2x9x9x64xf32, #tpu.memory_space<vmem>>, vector<1x1x7x64xf32>,
    %560 = vector.extract_strided_slice %511 {offsets = [84, 0], sizes = [7, 64], strides = [1, 1]} : vector<98x64xf32> to vector<7x64xf32>
    %c1_617 = arith.constant 1 : index
    %c6_618 = arith.constant 6 : index
    %c1_619 = arith.constant 1 : index
    %c0_620 = arith.constant 0 : index
    %561 = vector.load %arg17[%c1_617, %c6_618, %c1_619, %c0_620] : memref<2x9x9x64xf32, #tpu.memory_space<vmem>>, vector<1x1x7x64xf32>
    %562 = vector.shape_cast %561 : vector<1x1x7x64xf32> to vector<7x64xf32>
    %563 = vector.shape_cast %560 : vector<7x64xf32> to vector<1x1x7x64xf32>
    tpu.vector_store %arg17[%c1_617, %c6_618, %c1_619, %c0_620], %563 {strides = array<i32>} : memref<2x9x9x64xf32, #tpu.memory_space<vmem>>, vector<1x1x7x64xf32>,
    %564 = vector.extract_strided_slice %511 {offsets = [91, 0], sizes = [7, 64], strides = [1, 1]} : vector<98x64xf32> to vector<7x64xf32>
    %c1_621 = arith.constant 1 : index
    %c7_622 = arith.constant 7 : index
    %c1_623 = arith.constant 1 : index
    %c0_624 = arith.constant 0 : index
    %565 = vector.load %arg17[%c1_621, %c7_622, %c1_623, %c0_624] : memref<2x9x9x64xf32, #tpu.memory_space<vmem>>, vector<1x1x7x64xf32>
    %566 = vector.shape_cast %565 : vector<1x1x7x64xf32> to vector<7x64xf32>
    %567 = vector.shape_cast %564 : vector<7x64xf32> to vector<1x1x7x64xf32>
    tpu.vector_store %arg17[%c1_621, %c7_622, %c1_623, %c0_624], %567 {strides = array<i32>} : memref<2x9x9x64xf32, #tpu.memory_space<vmem>>, vector<1x1x7x64xf32>,
    %c0_625 = arith.constant 0 : index
    %c0_626 = arith.constant 0 : index
    %c0_627 = arith.constant 0 : index
    %c0_628 = arith.constant 0 : index
    %568 = vector.load %arg17[%c0_625, %c0_626, %c0_627, %c0_628] : memref<2x9x9x64xf32, #tpu.memory_space<vmem>>, vector<1x1x9x64xf32>
    %569 = vector.shape_cast %568 : vector<1x1x9x64xf32> to vector<9x64xf32>
    %cst_629 = arith.constant dense<0.000000e+00> : vector<12x64xf32>
    %570 = tpu.matmul %5, %569, %cst_629 {dimension_numbers = #tpu.dot_dimension_numbers<[1], [0], [0], [1], [0, 0, 1, 1], [], []>} : vector<12x9xf32>, vector<9x64xf32>, vector<12x64xf32> -> vector<12x64xf32>
    %571 = vector.extract_strided_slice %570 {offsets = [0, 0], sizes = [4, 64], strides = [1, 1]} : vector<12x64xf32> to vector<4x64xf32>
    %c0_630 = arith.constant 0 : index
    %c0_631 = arith.constant 0 : index
    %572 = vector.load %arg18[%c0_630, %c0_631] : memref<32x576xf32, #tpu.memory_space<vmem>>, vector<4x64xf32>
    tpu.vector_store %arg18[%c0_630, %c0_631], %571 {strides = array<i32>} : memref<32x576xf32, #tpu.memory_space<vmem>>, vector<4x64xf32>,
    %573 = vector.extract_strided_slice %570 {offsets = [4, 0], sizes = [4, 64], strides = [1, 1]} : vector<12x64xf32> to vector<4x64xf32>
    %c0_632 = arith.constant 0 : index
    %c64_633 = arith.constant 64 : index
    %574 = vector.load %arg18[%c0_632, %c64_633] : memref<32x576xf32, #tpu.memory_space<vmem>>, vector<4x64xf32>
    tpu.vector_store %arg18[%c0_632, %c64_633], %573 {strides = array<i32>} : memref<32x576xf32, #tpu.memory_space<vmem>>, vector<4x64xf32>,
    %575 = vector.extract_strided_slice %570 {offsets = [8, 0], sizes = [4, 64], strides = [1, 1]} : vector<12x64xf32> to vector<4x64xf32>
    %c0_634 = arith.constant 0 : index
    %c128_635 = arith.constant 128 : index
    %576 = vector.load %arg18[%c0_634, %c128_635] : memref<32x576xf32, #tpu.memory_space<vmem>>, vector<4x64xf32>
    tpu.vector_store %arg18[%c0_634, %c128_635], %575 {strides = array<i32>} : memref<32x576xf32, #tpu.memory_space<vmem>>, vector<4x64xf32>,
    %c0_636 = arith.constant 0 : index
    %c1_637 = arith.constant 1 : index
    %c0_638 = arith.constant 0 : index
    %c0_639 = arith.constant 0 : index
    %577 = vector.load %arg17[%c0_636, %c1_637, %c0_638, %c0_639] : memref<2x9x9x64xf32, #tpu.memory_space<vmem>>, vector<1x1x9x64xf32>
    %578 = vector.shape_cast %577 : vector<1x1x9x64xf32> to vector<9x64xf32>
    %cst_640 = arith.constant dense<0.000000e+00> : vector<12x64xf32>
    %579 = tpu.matmul %5, %578, %cst_640 {dimension_numbers = #tpu.dot_dimension_numbers<[1], [0], [0], [1], [0, 0, 1, 1], [], []>} : vector<12x9xf32>, vector<9x64xf32>, vector<12x64xf32> -> vector<12x64xf32>
    %580 = vector.extract_strided_slice %579 {offsets = [0, 0], sizes = [4, 64], strides = [1, 1]} : vector<12x64xf32> to vector<4x64xf32>
    %c0_641 = arith.constant 0 : index
    %c192_642 = arith.constant 192 : index
    %581 = vector.load %arg18[%c0_641, %c192_642] : memref<32x576xf32, #tpu.memory_space<vmem>>, vector<4x64xf32>
    tpu.vector_store %arg18[%c0_641, %c192_642], %580 {strides = array<i32>} : memref<32x576xf32, #tpu.memory_space<vmem>>, vector<4x64xf32>,
    %582 = vector.extract_strided_slice %579 {offsets = [4, 0], sizes = [4, 64], strides = [1, 1]} : vector<12x64xf32> to vector<4x64xf32>
    %c0_643 = arith.constant 0 : index
    %c256_644 = arith.constant 256 : index
    %583 = vector.load %arg18[%c0_643, %c256_644] : memref<32x576xf32, #tpu.memory_space<vmem>>, vector<4x64xf32>
    tpu.vector_store %arg18[%c0_643, %c256_644], %582 {strides = array<i32>} : memref<32x576xf32, #tpu.memory_space<vmem>>, vector<4x64xf32>,
    %584 = vector.extract_strided_slice %579 {offsets = [8, 0], sizes = [4, 64], strides = [1, 1]} : vector<12x64xf32> to vector<4x64xf32>
    %c0_645 = arith.constant 0 : index
    %c320 = arith.constant 320 : index
    %585 = vector.load %arg18[%c0_645, %c320] : memref<32x576xf32, #tpu.memory_space<vmem>>, vector<4x64xf32>
    tpu.vector_store %arg18[%c0_645, %c320], %584 {strides = array<i32>} : memref<32x576xf32, #tpu.memory_space<vmem>>, vector<4x64xf32>,
    %c0_646 = arith.constant 0 : index
    %c2_647 = arith.constant 2 : index
    %c0_648 = arith.constant 0 : index
    %c0_649 = arith.constant 0 : index
    %586 = vector.load %arg17[%c0_646, %c2_647, %c0_648, %c0_649] : memref<2x9x9x64xf32, #tpu.memory_space<vmem>>, vector<1x1x9x64xf32>
    %587 = vector.shape_cast %586 : vector<1x1x9x64xf32> to vector<9x64xf32>
    %cst_650 = arith.constant dense<0.000000e+00> : vector<12x64xf32>
    %588 = tpu.matmul %5, %587, %cst_650 {dimension_numbers = #tpu.dot_dimension_numbers<[1], [0], [0], [1], [0, 0, 1, 1], [], []>} : vector<12x9xf32>, vector<9x64xf32>, vector<12x64xf32> -> vector<12x64xf32>
    %589 = vector.extract_strided_slice %588 {offsets = [0, 0], sizes = [4, 64], strides = [1, 1]} : vector<12x64xf32> to vector<4x64xf32>
    %c0_651 = arith.constant 0 : index
    %c384 = arith.constant 384 : index
    %590 = vector.load %arg18[%c0_651, %c384] : memref<32x576xf32, #tpu.memory_space<vmem>>, vector<4x64xf32>
    tpu.vector_store %arg18[%c0_651, %c384], %589 {strides = array<i32>} : memref<32x576xf32, #tpu.memory_space<vmem>>, vector<4x64xf32>,
    %591 = vector.extract_strided_slice %588 {offsets = [4, 0], sizes = [4, 64], strides = [1, 1]} : vector<12x64xf32> to vector<4x64xf32>
    %c0_652 = arith.constant 0 : index
    %c448 = arith.constant 448 : index
    %592 = vector.load %arg18[%c0_652, %c448] : memref<32x576xf32, #tpu.memory_space<vmem>>, vector<4x64xf32>
    tpu.vector_store %arg18[%c0_652, %c448], %591 {strides = array<i32>} : memref<32x576xf32, #tpu.memory_space<vmem>>, vector<4x64xf32>,
    %593 = vector.extract_strided_slice %588 {offsets = [8, 0], sizes = [4, 64], strides = [1, 1]} : vector<12x64xf32> to vector<4x64xf32>
    %c0_653 = arith.constant 0 : index
    %c512 = arith.constant 512 : index
    %594 = vector.load %arg18[%c0_653, %c512] : memref<32x576xf32, #tpu.memory_space<vmem>>, vector<4x64xf32>
    tpu.vector_store %arg18[%c0_653, %c512], %593 {strides = array<i32>} : memref<32x576xf32, #tpu.memory_space<vmem>>, vector<4x64xf32>,
    %c0_654 = arith.constant 0 : index
    %c2_655 = arith.constant 2 : index
    %c0_656 = arith.constant 0 : index
    %c0_657 = arith.constant 0 : index
    %595 = vector.load %arg17[%c0_654, %c2_655, %c0_656, %c0_657] : memref<2x9x9x64xf32, #tpu.memory_space<vmem>>, vector<1x1x9x64xf32>
    %596 = vector.shape_cast %595 : vector<1x1x9x64xf32> to vector<9x64xf32>
    %cst_658 = arith.constant dense<0.000000e+00> : vector<12x64xf32>
    %597 = tpu.matmul %5, %596, %cst_658 {dimension_numbers = #tpu.dot_dimension_numbers<[1], [0], [0], [1], [0, 0, 1, 1], [], []>} : vector<12x9xf32>, vector<9x64xf32>, vector<12x64xf32> -> vector<12x64xf32>
    %598 = vector.extract_strided_slice %597 {offsets = [0, 0], sizes = [4, 64], strides = [1, 1]} : vector<12x64xf32> to vector<4x64xf32>
    %c4_659 = arith.constant 4 : index
    %c0_660 = arith.constant 0 : index
    %599 = vector.load %arg18[%c4_659, %c0_660] : memref<32x576xf32, #tpu.memory_space<vmem>>, vector<4x64xf32>
    tpu.vector_store %arg18[%c4_659, %c0_660], %598 {strides = array<i32>} : memref<32x576xf32, #tpu.memory_space<vmem>>, vector<4x64xf32>,
    %600 = vector.extract_strided_slice %597 {offsets = [4, 0], sizes = [4, 64], strides = [1, 1]} : vector<12x64xf32> to vector<4x64xf32>
    %c4_661 = arith.constant 4 : index
    %c64_662 = arith.constant 64 : index
    %601 = vector.load %arg18[%c4_661, %c64_662] : memref<32x576xf32, #tpu.memory_space<vmem>>, vector<4x64xf32>
    tpu.vector_store %arg18[%c4_661, %c64_662], %600 {strides = array<i32>} : memref<32x576xf32, #tpu.memory_space<vmem>>, vector<4x64xf32>,
    %602 = vector.extract_strided_slice %597 {offsets = [8, 0], sizes = [4, 64], strides = [1, 1]} : vector<12x64xf32> to vector<4x64xf32>
    %c4_663 = arith.constant 4 : index
    %c128_664 = arith.constant 128 : index
    %603 = vector.load %arg18[%c4_663, %c128_664] : memref<32x576xf32, #tpu.memory_space<vmem>>, vector<4x64xf32>
    tpu.vector_store %arg18[%c4_663, %c128_664], %602 {strides = array<i32>} : memref<32x576xf32, #tpu.memory_space<vmem>>, vector<4x64xf32>,
    %c0_665 = arith.constant 0 : index
    %c3_666 = arith.constant 3 : index
    %c0_667 = arith.constant 0 : index
    %c0_668 = arith.constant 0 : index
    %604 = vector.load %arg17[%c0_665, %c3_666, %c0_667, %c0_668] : memref<2x9x9x64xf32, #tpu.memory_space<vmem>>, vector<1x1x9x64xf32>
    %605 = vector.shape_cast %604 : vector<1x1x9x64xf32> to vector<9x64xf32>
    %cst_669 = arith.constant dense<0.000000e+00> : vector<12x64xf32>
    %606 = tpu.matmul %5, %605, %cst_669 {dimension_numbers = #tpu.dot_dimension_numbers<[1], [0], [0], [1], [0, 0, 1, 1], [], []>} : vector<12x9xf32>, vector<9x64xf32>, vector<12x64xf32> -> vector<12x64xf32>
    %607 = vector.extract_strided_slice %606 {offsets = [0, 0], sizes = [4, 64], strides = [1, 1]} : vector<12x64xf32> to vector<4x64xf32>
    %c4_670 = arith.constant 4 : index
    %c192_671 = arith.constant 192 : index
    %608 = vector.load %arg18[%c4_670, %c192_671] : memref<32x576xf32, #tpu.memory_space<vmem>>, vector<4x64xf32>
    tpu.vector_store %arg18[%c4_670, %c192_671], %607 {strides = array<i32>} : memref<32x576xf32, #tpu.memory_space<vmem>>, vector<4x64xf32>,
    %609 = vector.extract_strided_slice %606 {offsets = [4, 0], sizes = [4, 64], strides = [1, 1]} : vector<12x64xf32> to vector<4x64xf32>
    %c4_672 = arith.constant 4 : index
    %c256_673 = arith.constant 256 : index
    %610 = vector.load %arg18[%c4_672, %c256_673] : memref<32x576xf32, #tpu.memory_space<vmem>>, vector<4x64xf32>
    tpu.vector_store %arg18[%c4_672, %c256_673], %609 {strides = array<i32>} : memref<32x576xf32, #tpu.memory_space<vmem>>, vector<4x64xf32>,
    %611 = vector.extract_strided_slice %606 {offsets = [8, 0], sizes = [4, 64], strides = [1, 1]} : vector<12x64xf32> to vector<4x64xf32>
    %c4_674 = arith.constant 4 : index
    %c320_675 = arith.constant 320 : index
    %612 = vector.load %arg18[%c4_674, %c320_675] : memref<32x576xf32, #tpu.memory_space<vmem>>, vector<4x64xf32>
    tpu.vector_store %arg18[%c4_674, %c320_675], %611 {strides = array<i32>} : memref<32x576xf32, #tpu.memory_space<vmem>>, vector<4x64xf32>,
    %c0_676 = arith.constant 0 : index
    %c4_677 = arith.constant 4 : index
    %c0_678 = arith.constant 0 : index
    %c0_679 = arith.constant 0 : index
    %613 = vector.load %arg17[%c0_676, %c4_677, %c0_678, %c0_679] : memref<2x9x9x64xf32, #tpu.memory_space<vmem>>, vector<1x1x9x64xf32>
    %614 = vector.shape_cast %613 : vector<1x1x9x64xf32> to vector<9x64xf32>
    %cst_680 = arith.constant dense<0.000000e+00> : vector<12x64xf32>
    %615 = tpu.matmul %5, %614, %cst_680 {dimension_numbers = #tpu.dot_dimension_numbers<[1], [0], [0], [1], [0, 0, 1, 1], [], []>} : vector<12x9xf32>, vector<9x64xf32>, vector<12x64xf32> -> vector<12x64xf32>
    %616 = vector.extract_strided_slice %615 {offsets = [0, 0], sizes = [4, 64], strides = [1, 1]} : vector<12x64xf32> to vector<4x64xf32>
    %c4_681 = arith.constant 4 : index
    %c384_682 = arith.constant 384 : index
    %617 = vector.load %arg18[%c4_681, %c384_682] : memref<32x576xf32, #tpu.memory_space<vmem>>, vector<4x64xf32>
    tpu.vector_store %arg18[%c4_681, %c384_682], %616 {strides = array<i32>} : memref<32x576xf32, #tpu.memory_space<vmem>>, vector<4x64xf32>,
    %618 = vector.extract_strided_slice %615 {offsets = [4, 0], sizes = [4, 64], strides = [1, 1]} : vector<12x64xf32> to vector<4x64xf32>
    %c4_683 = arith.constant 4 : index
    %c448_684 = arith.constant 448 : index
    %619 = vector.load %arg18[%c4_683, %c448_684] : memref<32x576xf32, #tpu.memory_space<vmem>>, vector<4x64xf32>
    tpu.vector_store %arg18[%c4_683, %c448_684], %618 {strides = array<i32>} : memref<32x576xf32, #tpu.memory_space<vmem>>, vector<4x64xf32>,
    %620 = vector.extract_strided_slice %615 {offsets = [8, 0], sizes = [4, 64], strides = [1, 1]} : vector<12x64xf32> to vector<4x64xf32>
    %c4_685 = arith.constant 4 : index
    %c512_686 = arith.constant 512 : index
    %621 = vector.load %arg18[%c4_685, %c512_686] : memref<32x576xf32, #tpu.memory_space<vmem>>, vector<4x64xf32>
    tpu.vector_store %arg18[%c4_685, %c512_686], %620 {strides = array<i32>} : memref<32x576xf32, #tpu.memory_space<vmem>>, vector<4x64xf32>,
    %c0_687 = arith.constant 0 : index
    %c4_688 = arith.constant 4 : index
    %c0_689 = arith.constant 0 : index
    %c0_690 = arith.constant 0 : index
    %622 = vector.load %arg17[%c0_687, %c4_688, %c0_689, %c0_690] : memref<2x9x9x64xf32, #tpu.memory_space<vmem>>, vector<1x1x9x64xf32>
    %623 = vector.shape_cast %622 : vector<1x1x9x64xf32> to vector<9x64xf32>
    %cst_691 = arith.constant dense<0.000000e+00> : vector<12x64xf32>
    %624 = tpu.matmul %5, %623, %cst_691 {dimension_numbers = #tpu.dot_dimension_numbers<[1], [0], [0], [1], [0, 0, 1, 1], [], []>} : vector<12x9xf32>, vector<9x64xf32>, vector<12x64xf32> -> vector<12x64xf32>
    %625 = vector.extract_strided_slice %624 {offsets = [0, 0], sizes = [4, 64], strides = [1, 1]} : vector<12x64xf32> to vector<4x64xf32>
    %c8_692 = arith.constant 8 : index
    %c0_693 = arith.constant 0 : index
    %626 = vector.load %arg18[%c8_692, %c0_693] : memref<32x576xf32, #tpu.memory_space<vmem>>, vector<4x64xf32>
    tpu.vector_store %arg18[%c8_692, %c0_693], %625 {strides = array<i32>} : memref<32x576xf32, #tpu.memory_space<vmem>>, vector<4x64xf32>,
    %627 = vector.extract_strided_slice %624 {offsets = [4, 0], sizes = [4, 64], strides = [1, 1]} : vector<12x64xf32> to vector<4x64xf32>
    %c8_694 = arith.constant 8 : index
    %c64_695 = arith.constant 64 : index
    %628 = vector.load %arg18[%c8_694, %c64_695] : memref<32x576xf32, #tpu.memory_space<vmem>>, vector<4x64xf32>
    tpu.vector_store %arg18[%c8_694, %c64_695], %627 {strides = array<i32>} : memref<32x576xf32, #tpu.memory_space<vmem>>, vector<4x64xf32>,
    %629 = vector.extract_strided_slice %624 {offsets = [8, 0], sizes = [4, 64], strides = [1, 1]} : vector<12x64xf32> to vector<4x64xf32>
    %c8_696 = arith.constant 8 : index
    %c128_697 = arith.constant 128 : index
    %630 = vector.load %arg18[%c8_696, %c128_697] : memref<32x576xf32, #tpu.memory_space<vmem>>, vector<4x64xf32>
    tpu.vector_store %arg18[%c8_696, %c128_697], %629 {strides = array<i32>} : memref<32x576xf32, #tpu.memory_space<vmem>>, vector<4x64xf32>,
    %c0_698 = arith.constant 0 : index
    %c5_699 = arith.constant 5 : index
    %c0_700 = arith.constant 0 : index
    %c0_701 = arith.constant 0 : index
    %631 = vector.load %arg17[%c0_698, %c5_699, %c0_700, %c0_701] : memref<2x9x9x64xf32, #tpu.memory_space<vmem>>, vector<1x1x9x64xf32>
    %632 = vector.shape_cast %631 : vector<1x1x9x64xf32> to vector<9x64xf32>
    %cst_702 = arith.constant dense<0.000000e+00> : vector<12x64xf32>
    %633 = tpu.matmul %5, %632, %cst_702 {dimension_numbers = #tpu.dot_dimension_numbers<[1], [0], [0], [1], [0, 0, 1, 1], [], []>} : vector<12x9xf32>, vector<9x64xf32>, vector<12x64xf32> -> vector<12x64xf32>
    %634 = vector.extract_strided_slice %633 {offsets = [0, 0], sizes = [4, 64], strides = [1, 1]} : vector<12x64xf32> to vector<4x64xf32>
    %c8_703 = arith.constant 8 : index
    %c192_704 = arith.constant 192 : index
    %635 = vector.load %arg18[%c8_703, %c192_704] : memref<32x576xf32, #tpu.memory_space<vmem>>, vector<4x64xf32>
    tpu.vector_store %arg18[%c8_703, %c192_704], %634 {strides = array<i32>} : memref<32x576xf32, #tpu.memory_space<vmem>>, vector<4x64xf32>,
    %636 = vector.extract_strided_slice %633 {offsets = [4, 0], sizes = [4, 64], strides = [1, 1]} : vector<12x64xf32> to vector<4x64xf32>
    %c8_705 = arith.constant 8 : index
    %c256_706 = arith.constant 256 : index
    %637 = vector.load %arg18[%c8_705, %c256_706] : memref<32x576xf32, #tpu.memory_space<vmem>>, vector<4x64xf32>
    tpu.vector_store %arg18[%c8_705, %c256_706], %636 {strides = array<i32>} : memref<32x576xf32, #tpu.memory_space<vmem>>, vector<4x64xf32>,
    %638 = vector.extract_strided_slice %633 {offsets = [8, 0], sizes = [4, 64], strides = [1, 1]} : vector<12x64xf32> to vector<4x64xf32>
    %c8_707 = arith.constant 8 : index
    %c320_708 = arith.constant 320 : index
    %639 = vector.load %arg18[%c8_707, %c320_708] : memref<32x576xf32, #tpu.memory_space<vmem>>, vector<4x64xf32>
    tpu.vector_store %arg18[%c8_707, %c320_708], %638 {strides = array<i32>} : memref<32x576xf32, #tpu.memory_space<vmem>>, vector<4x64xf32>,
    %c0_709 = arith.constant 0 : index
    %c6_710 = arith.constant 6 : index
    %c0_711 = arith.constant 0 : index
    %c0_712 = arith.constant 0 : index
    %640 = vector.load %arg17[%c0_709, %c6_710, %c0_711, %c0_712] : memref<2x9x9x64xf32, #tpu.memory_space<vmem>>, vector<1x1x9x64xf32>
    %641 = vector.shape_cast %640 : vector<1x1x9x64xf32> to vector<9x64xf32>
    %cst_713 = arith.constant dense<0.000000e+00> : vector<12x64xf32>
    %642 = tpu.matmul %5, %641, %cst_713 {dimension_numbers = #tpu.dot_dimension_numbers<[1], [0], [0], [1], [0, 0, 1, 1], [], []>} : vector<12x9xf32>, vector<9x64xf32>, vector<12x64xf32> -> vector<12x64xf32>
    %643 = vector.extract_strided_slice %642 {offsets = [0, 0], sizes = [4, 64], strides = [1, 1]} : vector<12x64xf32> to vector<4x64xf32>
    %c8_714 = arith.constant 8 : index
    %c384_715 = arith.constant 384 : index
    %644 = vector.load %arg18[%c8_714, %c384_715] : memref<32x576xf32, #tpu.memory_space<vmem>>, vector<4x64xf32>
    tpu.vector_store %arg18[%c8_714, %c384_715], %643 {strides = array<i32>} : memref<32x576xf32, #tpu.memory_space<vmem>>, vector<4x64xf32>,
    %645 = vector.extract_strided_slice %642 {offsets = [4, 0], sizes = [4, 64], strides = [1, 1]} : vector<12x64xf32> to vector<4x64xf32>
    %c8_716 = arith.constant 8 : index
    %c448_717 = arith.constant 448 : index
    %646 = vector.load %arg18[%c8_716, %c448_717] : memref<32x576xf32, #tpu.memory_space<vmem>>, vector<4x64xf32>
    tpu.vector_store %arg18[%c8_716, %c448_717], %645 {strides = array<i32>} : memref<32x576xf32, #tpu.memory_space<vmem>>, vector<4x64xf32>,
    %647 = vector.extract_strided_slice %642 {offsets = [8, 0], sizes = [4, 64], strides = [1, 1]} : vector<12x64xf32> to vector<4x64xf32>
    %c8_718 = arith.constant 8 : index
    %c512_719 = arith.constant 512 : index
    %648 = vector.load %arg18[%c8_718, %c512_719] : memref<32x576xf32, #tpu.memory_space<vmem>>, vector<4x64xf32>
    tpu.vector_store %arg18[%c8_718, %c512_719], %647 {strides = array<i32>} : memref<32x576xf32, #tpu.memory_space<vmem>>, vector<4x64xf32>,
    %c0_720 = arith.constant 0 : index
    %c6_721 = arith.constant 6 : index
    %c0_722 = arith.constant 0 : index
    %c0_723 = arith.constant 0 : index
    %649 = vector.load %arg17[%c0_720, %c6_721, %c0_722, %c0_723] : memref<2x9x9x64xf32, #tpu.memory_space<vmem>>, vector<1x1x9x64xf32>
    %650 = vector.shape_cast %649 : vector<1x1x9x64xf32> to vector<9x64xf32>
    %cst_724 = arith.constant dense<0.000000e+00> : vector<12x64xf32>
    %651 = tpu.matmul %5, %650, %cst_724 {dimension_numbers = #tpu.dot_dimension_numbers<[1], [0], [0], [1], [0, 0, 1, 1], [], []>} : vector<12x9xf32>, vector<9x64xf32>, vector<12x64xf32> -> vector<12x64xf32>
    %652 = vector.extract_strided_slice %651 {offsets = [0, 0], sizes = [4, 64], strides = [1, 1]} : vector<12x64xf32> to vector<4x64xf32>
    %c12_725 = arith.constant 12 : index
    %c0_726 = arith.constant 0 : index
    %653 = vector.load %arg18[%c12_725, %c0_726] : memref<32x576xf32, #tpu.memory_space<vmem>>, vector<4x64xf32>
    tpu.vector_store %arg18[%c12_725, %c0_726], %652 {strides = array<i32>} : memref<32x576xf32, #tpu.memory_space<vmem>>, vector<4x64xf32>,
    %654 = vector.extract_strided_slice %651 {offsets = [4, 0], sizes = [4, 64], strides = [1, 1]} : vector<12x64xf32> to vector<4x64xf32>
    %c12_727 = arith.constant 12 : index
    %c64_728 = arith.constant 64 : index
    %655 = vector.load %arg18[%c12_727, %c64_728] : memref<32x576xf32, #tpu.memory_space<vmem>>, vector<4x64xf32>
    tpu.vector_store %arg18[%c12_727, %c64_728], %654 {strides = array<i32>} : memref<32x576xf32, #tpu.memory_space<vmem>>, vector<4x64xf32>,
    %656 = vector.extract_strided_slice %651 {offsets = [8, 0], sizes = [4, 64], strides = [1, 1]} : vector<12x64xf32> to vector<4x64xf32>
    %c12_729 = arith.constant 12 : index
    %c128_730 = arith.constant 128 : index
    %657 = vector.load %arg18[%c12_729, %c128_730] : memref<32x576xf32, #tpu.memory_space<vmem>>, vector<4x64xf32>
    tpu.vector_store %arg18[%c12_729, %c128_730], %656 {strides = array<i32>} : memref<32x576xf32, #tpu.memory_space<vmem>>, vector<4x64xf32>,
    %c0_731 = arith.constant 0 : index
    %c7_732 = arith.constant 7 : index
    %c0_733 = arith.constant 0 : index
    %c0_734 = arith.constant 0 : index
    %658 = vector.load %arg17[%c0_731, %c7_732, %c0_733, %c0_734] : memref<2x9x9x64xf32, #tpu.memory_space<vmem>>, vector<1x1x9x64xf32>
    %659 = vector.shape_cast %658 : vector<1x1x9x64xf32> to vector<9x64xf32>
    %cst_735 = arith.constant dense<0.000000e+00> : vector<12x64xf32>
    %660 = tpu.matmul %5, %659, %cst_735 {dimension_numbers = #tpu.dot_dimension_numbers<[1], [0], [0], [1], [0, 0, 1, 1], [], []>} : vector<12x9xf32>, vector<9x64xf32>, vector<12x64xf32> -> vector<12x64xf32>
    %661 = vector.extract_strided_slice %660 {offsets = [0, 0], sizes = [4, 64], strides = [1, 1]} : vector<12x64xf32> to vector<4x64xf32>
    %c12_736 = arith.constant 12 : index
    %c192_737 = arith.constant 192 : index
    %662 = vector.load %arg18[%c12_736, %c192_737] : memref<32x576xf32, #tpu.memory_space<vmem>>, vector<4x64xf32>
    tpu.vector_store %arg18[%c12_736, %c192_737], %661 {strides = array<i32>} : memref<32x576xf32, #tpu.memory_space<vmem>>, vector<4x64xf32>,
    %663 = vector.extract_strided_slice %660 {offsets = [4, 0], sizes = [4, 64], strides = [1, 1]} : vector<12x64xf32> to vector<4x64xf32>
    %c12_738 = arith.constant 12 : index
    %c256_739 = arith.constant 256 : index
    %664 = vector.load %arg18[%c12_738, %c256_739] : memref<32x576xf32, #tpu.memory_space<vmem>>, vector<4x64xf32>
    tpu.vector_store %arg18[%c12_738, %c256_739], %663 {strides = array<i32>} : memref<32x576xf32, #tpu.memory_space<vmem>>, vector<4x64xf32>,
    %665 = vector.extract_strided_slice %660 {offsets = [8, 0], sizes = [4, 64], strides = [1, 1]} : vector<12x64xf32> to vector<4x64xf32>
    %c12_740 = arith.constant 12 : index
    %c320_741 = arith.constant 320 : index
    %666 = vector.load %arg18[%c12_740, %c320_741] : memref<32x576xf32, #tpu.memory_space<vmem>>, vector<4x64xf32>
    tpu.vector_store %arg18[%c12_740, %c320_741], %665 {strides = array<i32>} : memref<32x576xf32, #tpu.memory_space<vmem>>, vector<4x64xf32>,
    %c0_742 = arith.constant 0 : index
    %c8_743 = arith.constant 8 : index
    %c0_744 = arith.constant 0 : index
    %c0_745 = arith.constant 0 : index
    %667 = vector.load %arg17[%c0_742, %c8_743, %c0_744, %c0_745] : memref<2x9x9x64xf32, #tpu.memory_space<vmem>>, vector<1x1x9x64xf32>
    %668 = vector.shape_cast %667 : vector<1x1x9x64xf32> to vector<9x64xf32>
    %cst_746 = arith.constant dense<0.000000e+00> : vector<12x64xf32>
    %669 = tpu.matmul %5, %668, %cst_746 {dimension_numbers = #tpu.dot_dimension_numbers<[1], [0], [0], [1], [0, 0, 1, 1], [], []>} : vector<12x9xf32>, vector<9x64xf32>, vector<12x64xf32> -> vector<12x64xf32>
    %670 = vector.extract_strided_slice %669 {offsets = [0, 0], sizes = [4, 64], strides = [1, 1]} : vector<12x64xf32> to vector<4x64xf32>
    %c12_747 = arith.constant 12 : index
    %c384_748 = arith.constant 384 : index
    %671 = vector.load %arg18[%c12_747, %c384_748] : memref<32x576xf32, #tpu.memory_space<vmem>>, vector<4x64xf32>
    tpu.vector_store %arg18[%c12_747, %c384_748], %670 {strides = array<i32>} : memref<32x576xf32, #tpu.memory_space<vmem>>, vector<4x64xf32>,
    %672 = vector.extract_strided_slice %669 {offsets = [4, 0], sizes = [4, 64], strides = [1, 1]} : vector<12x64xf32> to vector<4x64xf32>
    %c12_749 = arith.constant 12 : index
    %c448_750 = arith.constant 448 : index
    %673 = vector.load %arg18[%c12_749, %c448_750] : memref<32x576xf32, #tpu.memory_space<vmem>>, vector<4x64xf32>
    tpu.vector_store %arg18[%c12_749, %c448_750], %672 {strides = array<i32>} : memref<32x576xf32, #tpu.memory_space<vmem>>, vector<4x64xf32>,
    %674 = vector.extract_strided_slice %669 {offsets = [8, 0], sizes = [4, 64], strides = [1, 1]} : vector<12x64xf32> to vector<4x64xf32>
    %c12_751 = arith.constant 12 : index
    %c512_752 = arith.constant 512 : index
    %675 = vector.load %arg18[%c12_751, %c512_752] : memref<32x576xf32, #tpu.memory_space<vmem>>, vector<4x64xf32>
    tpu.vector_store %arg18[%c12_751, %c512_752], %674 {strides = array<i32>} : memref<32x576xf32, #tpu.memory_space<vmem>>, vector<4x64xf32>,
    %c1_753 = arith.constant 1 : index
    %c0_754 = arith.constant 0 : index
    %c0_755 = arith.constant 0 : index
    %c0_756 = arith.constant 0 : index
    %676 = vector.load %arg17[%c1_753, %c0_754, %c0_755, %c0_756] : memref<2x9x9x64xf32, #tpu.memory_space<vmem>>, vector<1x1x9x64xf32>
    %677 = vector.shape_cast %676 : vector<1x1x9x64xf32> to vector<9x64xf32>
    %cst_757 = arith.constant dense<0.000000e+00> : vector<12x64xf32>
    %678 = tpu.matmul %5, %677, %cst_757 {dimension_numbers = #tpu.dot_dimension_numbers<[1], [0], [0], [1], [0, 0, 1, 1], [], []>} : vector<12x9xf32>, vector<9x64xf32>, vector<12x64xf32> -> vector<12x64xf32>
    %679 = vector.extract_strided_slice %678 {offsets = [0, 0], sizes = [4, 64], strides = [1, 1]} : vector<12x64xf32> to vector<4x64xf32>
    %c16 = arith.constant 16 : index
    %c0_758 = arith.constant 0 : index
    %680 = vector.load %arg18[%c16, %c0_758] : memref<32x576xf32, #tpu.memory_space<vmem>>, vector<4x64xf32>
    tpu.vector_store %arg18[%c16, %c0_758], %679 {strides = array<i32>} : memref<32x576xf32, #tpu.memory_space<vmem>>, vector<4x64xf32>,
    %681 = vector.extract_strided_slice %678 {offsets = [4, 0], sizes = [4, 64], strides = [1, 1]} : vector<12x64xf32> to vector<4x64xf32>
    %c16_759 = arith.constant 16 : index
    %c64_760 = arith.constant 64 : index
    %682 = vector.load %arg18[%c16_759, %c64_760] : memref<32x576xf32, #tpu.memory_space<vmem>>, vector<4x64xf32>
    tpu.vector_store %arg18[%c16_759, %c64_760], %681 {strides = array<i32>} : memref<32x576xf32, #tpu.memory_space<vmem>>, vector<4x64xf32>,
    %683 = vector.extract_strided_slice %678 {offsets = [8, 0], sizes = [4, 64], strides = [1, 1]} : vector<12x64xf32> to vector<4x64xf32>
    %c16_761 = arith.constant 16 : index
    %c128_762 = arith.constant 128 : index
    %684 = vector.load %arg18[%c16_761, %c128_762] : memref<32x576xf32, #tpu.memory_space<vmem>>, vector<4x64xf32>
    tpu.vector_store %arg18[%c16_761, %c128_762], %683 {strides = array<i32>} : memref<32x576xf32, #tpu.memory_space<vmem>>, vector<4x64xf32>,
    %c1_763 = arith.constant 1 : index
    %c1_764 = arith.constant 1 : index
    %c0_765 = arith.constant 0 : index
    %c0_766 = arith.constant 0 : index
    %685 = vector.load %arg17[%c1_763, %c1_764, %c0_765, %c0_766] : memref<2x9x9x64xf32, #tpu.memory_space<vmem>>, vector<1x1x9x64xf32>
    %686 = vector.shape_cast %685 : vector<1x1x9x64xf32> to vector<9x64xf32>
    %cst_767 = arith.constant dense<0.000000e+00> : vector<12x64xf32>
    %687 = tpu.matmul %5, %686, %cst_767 {dimension_numbers = #tpu.dot_dimension_numbers<[1], [0], [0], [1], [0, 0, 1, 1], [], []>} : vector<12x9xf32>, vector<9x64xf32>, vector<12x64xf32> -> vector<12x64xf32>
    %688 = vector.extract_strided_slice %687 {offsets = [0, 0], sizes = [4, 64], strides = [1, 1]} : vector<12x64xf32> to vector<4x64xf32>
    %c16_768 = arith.constant 16 : index
    %c192_769 = arith.constant 192 : index
    %689 = vector.load %arg18[%c16_768, %c192_769] : memref<32x576xf32, #tpu.memory_space<vmem>>, vector<4x64xf32>
    tpu.vector_store %arg18[%c16_768, %c192_769], %688 {strides = array<i32>} : memref<32x576xf32, #tpu.memory_space<vmem>>, vector<4x64xf32>,
    %690 = vector.extract_strided_slice %687 {offsets = [4, 0], sizes = [4, 64], strides = [1, 1]} : vector<12x64xf32> to vector<4x64xf32>
    %c16_770 = arith.constant 16 : index
    %c256_771 = arith.constant 256 : index
    %691 = vector.load %arg18[%c16_770, %c256_771] : memref<32x576xf32, #tpu.memory_space<vmem>>, vector<4x64xf32>
    tpu.vector_store %arg18[%c16_770, %c256_771], %690 {strides = array<i32>} : memref<32x576xf32, #tpu.memory_space<vmem>>, vector<4x64xf32>,
    %692 = vector.extract_strided_slice %687 {offsets = [8, 0], sizes = [4, 64], strides = [1, 1]} : vector<12x64xf32> to vector<4x64xf32>
    %c16_772 = arith.constant 16 : index
    %c320_773 = arith.constant 320 : index
    %693 = vector.load %arg18[%c16_772, %c320_773] : memref<32x576xf32, #tpu.memory_space<vmem>>, vector<4x64xf32>
    tpu.vector_store %arg18[%c16_772, %c320_773], %692 {strides = array<i32>} : memref<32x576xf32, #tpu.memory_space<vmem>>, vector<4x64xf32>,
    %c1_774 = arith.constant 1 : index
    %c2_775 = arith.constant 2 : index
    %c0_776 = arith.constant 0 : index
    %c0_777 = arith.constant 0 : index
    %694 = vector.load %arg17[%c1_774, %c2_775, %c0_776, %c0_777] : memref<2x9x9x64xf32, #tpu.memory_space<vmem>>, vector<1x1x9x64xf32>
    %695 = vector.shape_cast %694 : vector<1x1x9x64xf32> to vector<9x64xf32>
    %cst_778 = arith.constant dense<0.000000e+00> : vector<12x64xf32>
    %696 = tpu.matmul %5, %695, %cst_778 {dimension_numbers = #tpu.dot_dimension_numbers<[1], [0], [0], [1], [0, 0, 1, 1], [], []>} : vector<12x9xf32>, vector<9x64xf32>, vector<12x64xf32> -> vector<12x64xf32>
    %697 = vector.extract_strided_slice %696 {offsets = [0, 0], sizes = [4, 64], strides = [1, 1]} : vector<12x64xf32> to vector<4x64xf32>
    %c16_779 = arith.constant 16 : index
    %c384_780 = arith.constant 384 : index
    %698 = vector.load %arg18[%c16_779, %c384_780] : memref<32x576xf32, #tpu.memory_space<vmem>>, vector<4x64xf32>
    tpu.vector_store %arg18[%c16_779, %c384_780], %697 {strides = array<i32>} : memref<32x576xf32, #tpu.memory_space<vmem>>, vector<4x64xf32>,
    %699 = vector.extract_strided_slice %696 {offsets = [4, 0], sizes = [4, 64], strides = [1, 1]} : vector<12x64xf32> to vector<4x64xf32>
    %c16_781 = arith.constant 16 : index
    %c448_782 = arith.constant 448 : index
    %700 = vector.load %arg18[%c16_781, %c448_782] : memref<32x576xf32, #tpu.memory_space<vmem>>, vector<4x64xf32>
    tpu.vector_store %arg18[%c16_781, %c448_782], %699 {strides = array<i32>} : memref<32x576xf32, #tpu.memory_space<vmem>>, vector<4x64xf32>,
    %701 = vector.extract_strided_slice %696 {offsets = [8, 0], sizes = [4, 64], strides = [1, 1]} : vector<12x64xf32> to vector<4x64xf32>
    %c16_783 = arith.constant 16 : index
    %c512_784 = arith.constant 512 : index
    %702 = vector.load %arg18[%c16_783, %c512_784] : memref<32x576xf32, #tpu.memory_space<vmem>>, vector<4x64xf32>
    tpu.vector_store %arg18[%c16_783, %c512_784], %701 {strides = array<i32>} : memref<32x576xf32, #tpu.memory_space<vmem>>, vector<4x64xf32>,
    %c1_785 = arith.constant 1 : index
    %c2_786 = arith.constant 2 : index
    %c0_787 = arith.constant 0 : index
    %c0_788 = arith.constant 0 : index
    %703 = vector.load %arg17[%c1_785, %c2_786, %c0_787, %c0_788] : memref<2x9x9x64xf32, #tpu.memory_space<vmem>>, vector<1x1x9x64xf32>
    %704 = vector.shape_cast %703 : vector<1x1x9x64xf32> to vector<9x64xf32>
    %cst_789 = arith.constant dense<0.000000e+00> : vector<12x64xf32>
    %705 = tpu.matmul %5, %704, %cst_789 {dimension_numbers = #tpu.dot_dimension_numbers<[1], [0], [0], [1], [0, 0, 1, 1], [], []>} : vector<12x9xf32>, vector<9x64xf32>, vector<12x64xf32> -> vector<12x64xf32>
    %706 = vector.extract_strided_slice %705 {offsets = [0, 0], sizes = [4, 64], strides = [1, 1]} : vector<12x64xf32> to vector<4x64xf32>
    %c20 = arith.constant 20 : index
    %c0_790 = arith.constant 0 : index
    %707 = vector.load %arg18[%c20, %c0_790] : memref<32x576xf32, #tpu.memory_space<vmem>>, vector<4x64xf32>
    tpu.vector_store %arg18[%c20, %c0_790], %706 {strides = array<i32>} : memref<32x576xf32, #tpu.memory_space<vmem>>, vector<4x64xf32>,
    %708 = vector.extract_strided_slice %705 {offsets = [4, 0], sizes = [4, 64], strides = [1, 1]} : vector<12x64xf32> to vector<4x64xf32>
    %c20_791 = arith.constant 20 : index
    %c64_792 = arith.constant 64 : index
    %709 = vector.load %arg18[%c20_791, %c64_792] : memref<32x576xf32, #tpu.memory_space<vmem>>, vector<4x64xf32>
    tpu.vector_store %arg18[%c20_791, %c64_792], %708 {strides = array<i32>} : memref<32x576xf32, #tpu.memory_space<vmem>>, vector<4x64xf32>,
    %710 = vector.extract_strided_slice %705 {offsets = [8, 0], sizes = [4, 64], strides = [1, 1]} : vector<12x64xf32> to vector<4x64xf32>
    %c20_793 = arith.constant 20 : index
    %c128_794 = arith.constant 128 : index
    %711 = vector.load %arg18[%c20_793, %c128_794] : memref<32x576xf32, #tpu.memory_space<vmem>>, vector<4x64xf32>
    tpu.vector_store %arg18[%c20_793, %c128_794], %710 {strides = array<i32>} : memref<32x576xf32, #tpu.memory_space<vmem>>, vector<4x64xf32>,
    %c1_795 = arith.constant 1 : index
    %c3_796 = arith.constant 3 : index
    %c0_797 = arith.constant 0 : index
    %c0_798 = arith.constant 0 : index
    %712 = vector.load %arg17[%c1_795, %c3_796, %c0_797, %c0_798] : memref<2x9x9x64xf32, #tpu.memory_space<vmem>>, vector<1x1x9x64xf32>
    %713 = vector.shape_cast %712 : vector<1x1x9x64xf32> to vector<9x64xf32>
    %cst_799 = arith.constant dense<0.000000e+00> : vector<12x64xf32>
    %714 = tpu.matmul %5, %713, %cst_799 {dimension_numbers = #tpu.dot_dimension_numbers<[1], [0], [0], [1], [0, 0, 1, 1], [], []>} : vector<12x9xf32>, vector<9x64xf32>, vector<12x64xf32> -> vector<12x64xf32>
    %715 = vector.extract_strided_slice %714 {offsets = [0, 0], sizes = [4, 64], strides = [1, 1]} : vector<12x64xf32> to vector<4x64xf32>
    %c20_800 = arith.constant 20 : index
    %c192_801 = arith.constant 192 : index
    %716 = vector.load %arg18[%c20_800, %c192_801] : memref<32x576xf32, #tpu.memory_space<vmem>>, vector<4x64xf32>
    tpu.vector_store %arg18[%c20_800, %c192_801], %715 {strides = array<i32>} : memref<32x576xf32, #tpu.memory_space<vmem>>, vector<4x64xf32>,
    %717 = vector.extract_strided_slice %714 {offsets = [4, 0], sizes = [4, 64], strides = [1, 1]} : vector<12x64xf32> to vector<4x64xf32>
    %c20_802 = arith.constant 20 : index
    %c256_803 = arith.constant 256 : index
    %718 = vector.load %arg18[%c20_802, %c256_803] : memref<32x576xf32, #tpu.memory_space<vmem>>, vector<4x64xf32>
    tpu.vector_store %arg18[%c20_802, %c256_803], %717 {strides = array<i32>} : memref<32x576xf32, #tpu.memory_space<vmem>>, vector<4x64xf32>,
    %719 = vector.extract_strided_slice %714 {offsets = [8, 0], sizes = [4, 64], strides = [1, 1]} : vector<12x64xf32> to vector<4x64xf32>
    %c20_804 = arith.constant 20 : index
    %c320_805 = arith.constant 320 : index
    %720 = vector.load %arg18[%c20_804, %c320_805] : memref<32x576xf32, #tpu.memory_space<vmem>>, vector<4x64xf32>
    tpu.vector_store %arg18[%c20_804, %c320_805], %719 {strides = array<i32>} : memref<32x576xf32, #tpu.memory_space<vmem>>, vector<4x64xf32>,
    %c1_806 = arith.constant 1 : index
    %c4_807 = arith.constant 4 : index
    %c0_808 = arith.constant 0 : index
    %c0_809 = arith.constant 0 : index
    %721 = vector.load %arg17[%c1_806, %c4_807, %c0_808, %c0_809] : memref<2x9x9x64xf32, #tpu.memory_space<vmem>>, vector<1x1x9x64xf32>
    %722 = vector.shape_cast %721 : vector<1x1x9x64xf32> to vector<9x64xf32>
    %cst_810 = arith.constant dense<0.000000e+00> : vector<12x64xf32>
    %723 = tpu.matmul %5, %722, %cst_810 {dimension_numbers = #tpu.dot_dimension_numbers<[1], [0], [0], [1], [0, 0, 1, 1], [], []>} : vector<12x9xf32>, vector<9x64xf32>, vector<12x64xf32> -> vector<12x64xf32>
    %724 = vector.extract_strided_slice %723 {offsets = [0, 0], sizes = [4, 64], strides = [1, 1]} : vector<12x64xf32> to vector<4x64xf32>
    %c20_811 = arith.constant 20 : index
    %c384_812 = arith.constant 384 : index
    %725 = vector.load %arg18[%c20_811, %c384_812] : memref<32x576xf32, #tpu.memory_space<vmem>>, vector<4x64xf32>
    tpu.vector_store %arg18[%c20_811, %c384_812], %724 {strides = array<i32>} : memref<32x576xf32, #tpu.memory_space<vmem>>, vector<4x64xf32>,
    %726 = vector.extract_strided_slice %723 {offsets = [4, 0], sizes = [4, 64], strides = [1, 1]} : vector<12x64xf32> to vector<4x64xf32>
    %c20_813 = arith.constant 20 : index
    %c448_814 = arith.constant 448 : index
    %727 = vector.load %arg18[%c20_813, %c448_814] : memref<32x576xf32, #tpu.memory_space<vmem>>, vector<4x64xf32>
    tpu.vector_store %arg18[%c20_813, %c448_814], %726 {strides = array<i32>} : memref<32x576xf32, #tpu.memory_space<vmem>>, vector<4x64xf32>,
    %728 = vector.extract_strided_slice %723 {offsets = [8, 0], sizes = [4, 64], strides = [1, 1]} : vector<12x64xf32> to vector<4x64xf32>
    %c20_815 = arith.constant 20 : index
    %c512_816 = arith.constant 512 : index
    %729 = vector.load %arg18[%c20_815, %c512_816] : memref<32x576xf32, #tpu.memory_space<vmem>>, vector<4x64xf32>
    tpu.vector_store %arg18[%c20_815, %c512_816], %728 {strides = array<i32>} : memref<32x576xf32, #tpu.memory_space<vmem>>, vector<4x64xf32>,
    %c1_817 = arith.constant 1 : index
    %c4_818 = arith.constant 4 : index
    %c0_819 = arith.constant 0 : index
    %c0_820 = arith.constant 0 : index
    %730 = vector.load %arg17[%c1_817, %c4_818, %c0_819, %c0_820] : memref<2x9x9x64xf32, #tpu.memory_space<vmem>>, vector<1x1x9x64xf32>
    %731 = vector.shape_cast %730 : vector<1x1x9x64xf32> to vector<9x64xf32>
    %cst_821 = arith.constant dense<0.000000e+00> : vector<12x64xf32>
    %732 = tpu.matmul %5, %731, %cst_821 {dimension_numbers = #tpu.dot_dimension_numbers<[1], [0], [0], [1], [0, 0, 1, 1], [], []>} : vector<12x9xf32>, vector<9x64xf32>, vector<12x64xf32> -> vector<12x64xf32>
    %733 = vector.extract_strided_slice %732 {offsets = [0, 0], sizes = [4, 64], strides = [1, 1]} : vector<12x64xf32> to vector<4x64xf32>
    %c24 = arith.constant 24 : index
    %c0_822 = arith.constant 0 : index
    %734 = vector.load %arg18[%c24, %c0_822] : memref<32x576xf32, #tpu.memory_space<vmem>>, vector<4x64xf32>
    tpu.vector_store %arg18[%c24, %c0_822], %733 {strides = array<i32>} : memref<32x576xf32, #tpu.memory_space<vmem>>, vector<4x64xf32>,
    %735 = vector.extract_strided_slice %732 {offsets = [4, 0], sizes = [4, 64], strides = [1, 1]} : vector<12x64xf32> to vector<4x64xf32>
    %c24_823 = arith.constant 24 : index
    %c64_824 = arith.constant 64 : index
    %736 = vector.load %arg18[%c24_823, %c64_824] : memref<32x576xf32, #tpu.memory_space<vmem>>, vector<4x64xf32>
    tpu.vector_store %arg18[%c24_823, %c64_824], %735 {strides = array<i32>} : memref<32x576xf32, #tpu.memory_space<vmem>>, vector<4x64xf32>,
    %737 = vector.extract_strided_slice %732 {offsets = [8, 0], sizes = [4, 64], strides = [1, 1]} : vector<12x64xf32> to vector<4x64xf32>
    %c24_825 = arith.constant 24 : index
    %c128_826 = arith.constant 128 : index
    %738 = vector.load %arg18[%c24_825, %c128_826] : memref<32x576xf32, #tpu.memory_space<vmem>>, vector<4x64xf32>
    tpu.vector_store %arg18[%c24_825, %c128_826], %737 {strides = array<i32>} : memref<32x576xf32, #tpu.memory_space<vmem>>, vector<4x64xf32>,
    %c1_827 = arith.constant 1 : index
    %c5_828 = arith.constant 5 : index
    %c0_829 = arith.constant 0 : index
    %c0_830 = arith.constant 0 : index
    %739 = vector.load %arg17[%c1_827, %c5_828, %c0_829, %c0_830] : memref<2x9x9x64xf32, #tpu.memory_space<vmem>>, vector<1x1x9x64xf32>
    %740 = vector.shape_cast %739 : vector<1x1x9x64xf32> to vector<9x64xf32>
    %cst_831 = arith.constant dense<0.000000e+00> : vector<12x64xf32>
    %741 = tpu.matmul %5, %740, %cst_831 {dimension_numbers = #tpu.dot_dimension_numbers<[1], [0], [0], [1], [0, 0, 1, 1], [], []>} : vector<12x9xf32>, vector<9x64xf32>, vector<12x64xf32> -> vector<12x64xf32>
    %742 = vector.extract_strided_slice %741 {offsets = [0, 0], sizes = [4, 64], strides = [1, 1]} : vector<12x64xf32> to vector<4x64xf32>
    %c24_832 = arith.constant 24 : index
    %c192_833 = arith.constant 192 : index
    %743 = vector.load %arg18[%c24_832, %c192_833] : memref<32x576xf32, #tpu.memory_space<vmem>>, vector<4x64xf32>
    tpu.vector_store %arg18[%c24_832, %c192_833], %742 {strides = array<i32>} : memref<32x576xf32, #tpu.memory_space<vmem>>, vector<4x64xf32>,
    %744 = vector.extract_strided_slice %741 {offsets = [4, 0], sizes = [4, 64], strides = [1, 1]} : vector<12x64xf32> to vector<4x64xf32>
    %c24_834 = arith.constant 24 : index
    %c256_835 = arith.constant 256 : index
    %745 = vector.load %arg18[%c24_834, %c256_835] : memref<32x576xf32, #tpu.memory_space<vmem>>, vector<4x64xf32>
    tpu.vector_store %arg18[%c24_834, %c256_835], %744 {strides = array<i32>} : memref<32x576xf32, #tpu.memory_space<vmem>>, vector<4x64xf32>,
    %746 = vector.extract_strided_slice %741 {offsets = [8, 0], sizes = [4, 64], strides = [1, 1]} : vector<12x64xf32> to vector<4x64xf32>
    %c24_836 = arith.constant 24 : index
    %c320_837 = arith.constant 320 : index
    %747 = vector.load %arg18[%c24_836, %c320_837] : memref<32x576xf32, #tpu.memory_space<vmem>>, vector<4x64xf32>
    tpu.vector_store %arg18[%c24_836, %c320_837], %746 {strides = array<i32>} : memref<32x576xf32, #tpu.memory_space<vmem>>, vector<4x64xf32>,
    %c1_838 = arith.constant 1 : index
    %c6_839 = arith.constant 6 : index
    %c0_840 = arith.constant 0 : index
    %c0_841 = arith.constant 0 : index
    %748 = vector.load %arg17[%c1_838, %c6_839, %c0_840, %c0_841] : memref<2x9x9x64xf32, #tpu.memory_space<vmem>>, vector<1x1x9x64xf32>
    %749 = vector.shape_cast %748 : vector<1x1x9x64xf32> to vector<9x64xf32>
    %cst_842 = arith.constant dense<0.000000e+00> : vector<12x64xf32>
    %750 = tpu.matmul %5, %749, %cst_842 {dimension_numbers = #tpu.dot_dimension_numbers<[1], [0], [0], [1], [0, 0, 1, 1], [], []>} : vector<12x9xf32>, vector<9x64xf32>, vector<12x64xf32> -> vector<12x64xf32>
    %751 = vector.extract_strided_slice %750 {offsets = [0, 0], sizes = [4, 64], strides = [1, 1]} : vector<12x64xf32> to vector<4x64xf32>
    %c24_843 = arith.constant 24 : index
    %c384_844 = arith.constant 384 : index
    %752 = vector.load %arg18[%c24_843, %c384_844] : memref<32x576xf32, #tpu.memory_space<vmem>>, vector<4x64xf32>
    tpu.vector_store %arg18[%c24_843, %c384_844], %751 {strides = array<i32>} : memref<32x576xf32, #tpu.memory_space<vmem>>, vector<4x64xf32>,
    %753 = vector.extract_strided_slice %750 {offsets = [4, 0], sizes = [4, 64], strides = [1, 1]} : vector<12x64xf32> to vector<4x64xf32>
    %c24_845 = arith.constant 24 : index
    %c448_846 = arith.constant 448 : index
    %754 = vector.load %arg18[%c24_845, %c448_846] : memref<32x576xf32, #tpu.memory_space<vmem>>, vector<4x64xf32>
    tpu.vector_store %arg18[%c24_845, %c448_846], %753 {strides = array<i32>} : memref<32x576xf32, #tpu.memory_space<vmem>>, vector<4x64xf32>,
    %755 = vector.extract_strided_slice %750 {offsets = [8, 0], sizes = [4, 64], strides = [1, 1]} : vector<12x64xf32> to vector<4x64xf32>
    %c24_847 = arith.constant 24 : index
    %c512_848 = arith.constant 512 : index
    %756 = vector.load %arg18[%c24_847, %c512_848] : memref<32x576xf32, #tpu.memory_space<vmem>>, vector<4x64xf32>
    tpu.vector_store %arg18[%c24_847, %c512_848], %755 {strides = array<i32>} : memref<32x576xf32, #tpu.memory_space<vmem>>, vector<4x64xf32>,
    %c1_849 = arith.constant 1 : index
    %c6_850 = arith.constant 6 : index
    %c0_851 = arith.constant 0 : index
    %c0_852 = arith.constant 0 : index
    %757 = vector.load %arg17[%c1_849, %c6_850, %c0_851, %c0_852] : memref<2x9x9x64xf32, #tpu.memory_space<vmem>>, vector<1x1x9x64xf32>
    %758 = vector.shape_cast %757 : vector<1x1x9x64xf32> to vector<9x64xf32>
    %cst_853 = arith.constant dense<0.000000e+00> : vector<12x64xf32>
    %759 = tpu.matmul %5, %758, %cst_853 {dimension_numbers = #tpu.dot_dimension_numbers<[1], [0], [0], [1], [0, 0, 1, 1], [], []>} : vector<12x9xf32>, vector<9x64xf32>, vector<12x64xf32> -> vector<12x64xf32>
    %760 = vector.extract_strided_slice %759 {offsets = [0, 0], sizes = [4, 64], strides = [1, 1]} : vector<12x64xf32> to vector<4x64xf32>
    %c28_854 = arith.constant 28 : index
    %c0_855 = arith.constant 0 : index
    %761 = vector.load %arg18[%c28_854, %c0_855] : memref<32x576xf32, #tpu.memory_space<vmem>>, vector<4x64xf32>
    tpu.vector_store %arg18[%c28_854, %c0_855], %760 {strides = array<i32>} : memref<32x576xf32, #tpu.memory_space<vmem>>, vector<4x64xf32>,
    %762 = vector.extract_strided_slice %759 {offsets = [4, 0], sizes = [4, 64], strides = [1, 1]} : vector<12x64xf32> to vector<4x64xf32>
    %c28_856 = arith.constant 28 : index
    %c64_857 = arith.constant 64 : index
    %763 = vector.load %arg18[%c28_856, %c64_857] : memref<32x576xf32, #tpu.memory_space<vmem>>, vector<4x64xf32>
    tpu.vector_store %arg18[%c28_856, %c64_857], %762 {strides = array<i32>} : memref<32x576xf32, #tpu.memory_space<vmem>>, vector<4x64xf32>,
    %764 = vector.extract_strided_slice %759 {offsets = [8, 0], sizes = [4, 64], strides = [1, 1]} : vector<12x64xf32> to vector<4x64xf32>
    %c28_858 = arith.constant 28 : index
    %c128_859 = arith.constant 128 : index
    %765 = vector.load %arg18[%c28_858, %c128_859] : memref<32x576xf32, #tpu.memory_space<vmem>>, vector<4x64xf32>
    tpu.vector_store %arg18[%c28_858, %c128_859], %764 {strides = array<i32>} : memref<32x576xf32, #tpu.memory_space<vmem>>, vector<4x64xf32>,
    %c1_860 = arith.constant 1 : index
    %c7_861 = arith.constant 7 : index
    %c0_862 = arith.constant 0 : index
    %c0_863 = arith.constant 0 : index
    %766 = vector.load %arg17[%c1_860, %c7_861, %c0_862, %c0_863] : memref<2x9x9x64xf32, #tpu.memory_space<vmem>>, vector<1x1x9x64xf32>
    %767 = vector.shape_cast %766 : vector<1x1x9x64xf32> to vector<9x64xf32>
    %cst_864 = arith.constant dense<0.000000e+00> : vector<12x64xf32>
    %768 = tpu.matmul %5, %767, %cst_864 {dimension_numbers = #tpu.dot_dimension_numbers<[1], [0], [0], [1], [0, 0, 1, 1], [], []>} : vector<12x9xf32>, vector<9x64xf32>, vector<12x64xf32> -> vector<12x64xf32>
    %769 = vector.extract_strided_slice %768 {offsets = [0, 0], sizes = [4, 64], strides = [1, 1]} : vector<12x64xf32> to vector<4x64xf32>
    %c28_865 = arith.constant 28 : index
    %c192_866 = arith.constant 192 : index
    %770 = vector.load %arg18[%c28_865, %c192_866] : memref<32x576xf32, #tpu.memory_space<vmem>>, vector<4x64xf32>
    tpu.vector_store %arg18[%c28_865, %c192_866], %769 {strides = array<i32>} : memref<32x576xf32, #tpu.memory_space<vmem>>, vector<4x64xf32>,
    %771 = vector.extract_strided_slice %768 {offsets = [4, 0], sizes = [4, 64], strides = [1, 1]} : vector<12x64xf32> to vector<4x64xf32>
    %c28_867 = arith.constant 28 : index
    %c256_868 = arith.constant 256 : index
    %772 = vector.load %arg18[%c28_867, %c256_868] : memref<32x576xf32, #tpu.memory_space<vmem>>, vector<4x64xf32>
    tpu.vector_store %arg18[%c28_867, %c256_868], %771 {strides = array<i32>} : memref<32x576xf32, #tpu.memory_space<vmem>>, vector<4x64xf32>,
    %773 = vector.extract_strided_slice %768 {offsets = [8, 0], sizes = [4, 64], strides = [1, 1]} : vector<12x64xf32> to vector<4x64xf32>
    %c28_869 = arith.constant 28 : index
    %c320_870 = arith.constant 320 : index
    %774 = vector.load %arg18[%c28_869, %c320_870] : memref<32x576xf32, #tpu.memory_space<vmem>>, vector<4x64xf32>
    tpu.vector_store %arg18[%c28_869, %c320_870], %773 {strides = array<i32>} : memref<32x576xf32, #tpu.memory_space<vmem>>, vector<4x64xf32>,
    %c1_871 = arith.constant 1 : index
    %c8_872 = arith.constant 8 : index
    %c0_873 = arith.constant 0 : index
    %c0_874 = arith.constant 0 : index
    %775 = vector.load %arg17[%c1_871, %c8_872, %c0_873, %c0_874] : memref<2x9x9x64xf32, #tpu.memory_space<vmem>>, vector<1x1x9x64xf32>
    %776 = vector.shape_cast %775 : vector<1x1x9x64xf32> to vector<9x64xf32>
    %cst_875 = arith.constant dense<0.000000e+00> : vector<12x64xf32>
    %777 = tpu.matmul %5, %776, %cst_875 {dimension_numbers = #tpu.dot_dimension_numbers<[1], [0], [0], [1], [0, 0, 1, 1], [], []>} : vector<12x9xf32>, vector<9x64xf32>, vector<12x64xf32> -> vector<12x64xf32>
    %778 = vector.extract_strided_slice %777 {offsets = [0, 0], sizes = [4, 64], strides = [1, 1]} : vector<12x64xf32> to vector<4x64xf32>
    %c28_876 = arith.constant 28 : index
    %c384_877 = arith.constant 384 : index
    %779 = vector.load %arg18[%c28_876, %c384_877] : memref<32x576xf32, #tpu.memory_space<vmem>>, vector<4x64xf32>
    tpu.vector_store %arg18[%c28_876, %c384_877], %778 {strides = array<i32>} : memref<32x576xf32, #tpu.memory_space<vmem>>, vector<4x64xf32>,
    %780 = vector.extract_strided_slice %777 {offsets = [4, 0], sizes = [4, 64], strides = [1, 1]} : vector<12x64xf32> to vector<4x64xf32>
    %c28_878 = arith.constant 28 : index
    %c448_879 = arith.constant 448 : index
    %781 = vector.load %arg18[%c28_878, %c448_879] : memref<32x576xf32, #tpu.memory_space<vmem>>, vector<4x64xf32>
    tpu.vector_store %arg18[%c28_878, %c448_879], %780 {strides = array<i32>} : memref<32x576xf32, #tpu.memory_space<vmem>>, vector<4x64xf32>,
    %782 = vector.extract_strided_slice %777 {offsets = [8, 0], sizes = [4, 64], strides = [1, 1]} : vector<12x64xf32> to vector<4x64xf32>
    %c28_880 = arith.constant 28 : index
    %c512_881 = arith.constant 512 : index
    %783 = vector.load %arg18[%c28_880, %c512_881] : memref<32x576xf32, #tpu.memory_space<vmem>>, vector<4x64xf32>
    tpu.vector_store %arg18[%c28_880, %c512_881], %782 {strides = array<i32>} : memref<32x576xf32, #tpu.memory_space<vmem>>, vector<4x64xf32>,
    %c0_882 = arith.constant 0 : index
    %c0_883 = arith.constant 0 : index
    %784 = vector.load %arg18[%c0_882, %c0_883] : memref<32x576xf32, #tpu.memory_space<vmem>>, vector<32x576xf32>
    %c0_884 = arith.constant 0 : index
    %c0_885 = arith.constant 0 : index
    %785 = vector.load %arg8[%c0_884, %c0_885] : memref<576x128xf32, #tpu.memory_space<vmem>>, vector<576x128xf32>
    %cst_886 = arith.constant dense<0.000000e+00> : vector<32x128xf32>
    %786 = tpu.matmul %784, %785, %cst_886 {dimension_numbers = #tpu.dot_dimension_numbers<[1], [0], [0], [1], [0, 0, 1, 1], [], []>} : vector<32x576xf32>, vector<576x128xf32>, vector<32x128xf32> -> vector<32x128xf32>
    %c0_887 = arith.constant 0 : index
    %c0_888 = arith.constant 0 : index
    %787 = vector.load %arg9[%c0_887, %c0_888] : memref<1x128xf32, #tpu.memory_space<vmem>>, vector<1x128xf32>
    %788 = vector.broadcast %787 : vector<1x128xf32> to vector<32x128xf32>
    %789 = arith.addf %786, %788 : vector<32x128xf32>
    %cst_889 = arith.constant 0.000000e+00 : f32
    %790 = vector.broadcast %cst_889 : f32 to vector<32x128xf32>
    %791 = arith.maximumf %789, %790 : vector<32x128xf32>
    %792 = vector.extract_strided_slice %791 {offsets = [0, 0], sizes = [1, 128], strides = [1, 1]} : vector<32x128xf32> to vector<1x128xf32>
    %c0_890 = arith.constant 0 : index
    %c0_891 = arith.constant 0 : index
    %793 = vector.load %arg19[%c0_890, %c0_891] : memref<2x2048xf32, #tpu.memory_space<vmem>>, vector<1x128xf32>
    tpu.vector_store %arg19[%c0_890, %c0_891], %792 {strides = array<i32>} : memref<2x2048xf32, #tpu.memory_space<vmem>>, vector<1x128xf32>,
    %794 = vector.extract_strided_slice %791 {offsets = [1, 0], sizes = [1, 128], strides = [1, 1]} : vector<32x128xf32> to vector<1x128xf32>
    %c0_892 = arith.constant 0 : index
    %c128_893 = arith.constant 128 : index
    %795 = vector.load %arg19[%c0_892, %c128_893] : memref<2x2048xf32, #tpu.memory_space<vmem>>, vector<1x128xf32>
    tpu.vector_store %arg19[%c0_892, %c128_893], %794 {strides = array<i32>} : memref<2x2048xf32, #tpu.memory_space<vmem>>, vector<1x128xf32>,
    %796 = vector.extract_strided_slice %791 {offsets = [2, 0], sizes = [1, 128], strides = [1, 1]} : vector<32x128xf32> to vector<1x128xf32>
    %c0_894 = arith.constant 0 : index
    %c256_895 = arith.constant 256 : index
    %797 = vector.load %arg19[%c0_894, %c256_895] : memref<2x2048xf32, #tpu.memory_space<vmem>>, vector<1x128xf32>
    tpu.vector_store %arg19[%c0_894, %c256_895], %796 {strides = array<i32>} : memref<2x2048xf32, #tpu.memory_space<vmem>>, vector<1x128xf32>,
    %798 = vector.extract_strided_slice %791 {offsets = [3, 0], sizes = [1, 128], strides = [1, 1]} : vector<32x128xf32> to vector<1x128xf32>
    %c0_896 = arith.constant 0 : index
    %c384_897 = arith.constant 384 : index
    %799 = vector.load %arg19[%c0_896, %c384_897] : memref<2x2048xf32, #tpu.memory_space<vmem>>, vector<1x128xf32>
    tpu.vector_store %arg19[%c0_896, %c384_897], %798 {strides = array<i32>} : memref<2x2048xf32, #tpu.memory_space<vmem>>, vector<1x128xf32>,
    %800 = vector.extract_strided_slice %791 {offsets = [4, 0], sizes = [1, 128], strides = [1, 1]} : vector<32x128xf32> to vector<1x128xf32>
    %c0_898 = arith.constant 0 : index
    %c512_899 = arith.constant 512 : index
    %801 = vector.load %arg19[%c0_898, %c512_899] : memref<2x2048xf32, #tpu.memory_space<vmem>>, vector<1x128xf32>
    tpu.vector_store %arg19[%c0_898, %c512_899], %800 {strides = array<i32>} : memref<2x2048xf32, #tpu.memory_space<vmem>>, vector<1x128xf32>,
    %802 = vector.extract_strided_slice %791 {offsets = [5, 0], sizes = [1, 128], strides = [1, 1]} : vector<32x128xf32> to vector<1x128xf32>
    %c0_900 = arith.constant 0 : index
    %c640 = arith.constant 640 : index
    %803 = vector.load %arg19[%c0_900, %c640] : memref<2x2048xf32, #tpu.memory_space<vmem>>, vector<1x128xf32>
    tpu.vector_store %arg19[%c0_900, %c640], %802 {strides = array<i32>} : memref<2x2048xf32, #tpu.memory_space<vmem>>, vector<1x128xf32>,
    %804 = vector.extract_strided_slice %791 {offsets = [6, 0], sizes = [1, 128], strides = [1, 1]} : vector<32x128xf32> to vector<1x128xf32>
    %c0_901 = arith.constant 0 : index
    %c768 = arith.constant 768 : index
    %805 = vector.load %arg19[%c0_901, %c768] : memref<2x2048xf32, #tpu.memory_space<vmem>>, vector<1x128xf32>
    tpu.vector_store %arg19[%c0_901, %c768], %804 {strides = array<i32>} : memref<2x2048xf32, #tpu.memory_space<vmem>>, vector<1x128xf32>,
    %806 = vector.extract_strided_slice %791 {offsets = [7, 0], sizes = [1, 128], strides = [1, 1]} : vector<32x128xf32> to vector<1x128xf32>
    %c0_902 = arith.constant 0 : index
    %c896 = arith.constant 896 : index
    %807 = vector.load %arg19[%c0_902, %c896] : memref<2x2048xf32, #tpu.memory_space<vmem>>, vector<1x128xf32>
    tpu.vector_store %arg19[%c0_902, %c896], %806 {strides = array<i32>} : memref<2x2048xf32, #tpu.memory_space<vmem>>, vector<1x128xf32>,
    %808 = vector.extract_strided_slice %791 {offsets = [8, 0], sizes = [1, 128], strides = [1, 1]} : vector<32x128xf32> to vector<1x128xf32>
    %c0_903 = arith.constant 0 : index
    %c1024 = arith.constant 1024 : index
    %809 = vector.load %arg19[%c0_903, %c1024] : memref<2x2048xf32, #tpu.memory_space<vmem>>, vector<1x128xf32>
    tpu.vector_store %arg19[%c0_903, %c1024], %808 {strides = array<i32>} : memref<2x2048xf32, #tpu.memory_space<vmem>>, vector<1x128xf32>,
    %810 = vector.extract_strided_slice %791 {offsets = [9, 0], sizes = [1, 128], strides = [1, 1]} : vector<32x128xf32> to vector<1x128xf32>
    %c0_904 = arith.constant 0 : index
    %c1152 = arith.constant 1152 : index
    %811 = vector.load %arg19[%c0_904, %c1152] : memref<2x2048xf32, #tpu.memory_space<vmem>>, vector<1x128xf32>
    tpu.vector_store %arg19[%c0_904, %c1152], %810 {strides = array<i32>} : memref<2x2048xf32, #tpu.memory_space<vmem>>, vector<1x128xf32>,
    %812 = vector.extract_strided_slice %791 {offsets = [10, 0], sizes = [1, 128], strides = [1, 1]} : vector<32x128xf32> to vector<1x128xf32>
    %c0_905 = arith.constant 0 : index
    %c1280 = arith.constant 1280 : index
    %813 = vector.load %arg19[%c0_905, %c1280] : memref<2x2048xf32, #tpu.memory_space<vmem>>, vector<1x128xf32>
    tpu.vector_store %arg19[%c0_905, %c1280], %812 {strides = array<i32>} : memref<2x2048xf32, #tpu.memory_space<vmem>>, vector<1x128xf32>,
    %814 = vector.extract_strided_slice %791 {offsets = [11, 0], sizes = [1, 128], strides = [1, 1]} : vector<32x128xf32> to vector<1x128xf32>
    %c0_906 = arith.constant 0 : index
    %c1408 = arith.constant 1408 : index
    %815 = vector.load %arg19[%c0_906, %c1408] : memref<2x2048xf32, #tpu.memory_space<vmem>>, vector<1x128xf32>
    tpu.vector_store %arg19[%c0_906, %c1408], %814 {strides = array<i32>} : memref<2x2048xf32, #tpu.memory_space<vmem>>, vector<1x128xf32>,
    %816 = vector.extract_strided_slice %791 {offsets = [12, 0], sizes = [1, 128], strides = [1, 1]} : vector<32x128xf32> to vector<1x128xf32>
    %c0_907 = arith.constant 0 : index
    %c1536 = arith.constant 1536 : index
    %817 = vector.load %arg19[%c0_907, %c1536] : memref<2x2048xf32, #tpu.memory_space<vmem>>, vector<1x128xf32>
    tpu.vector_store %arg19[%c0_907, %c1536], %816 {strides = array<i32>} : memref<2x2048xf32, #tpu.memory_space<vmem>>, vector<1x128xf32>,
    %818 = vector.extract_strided_slice %791 {offsets = [13, 0], sizes = [1, 128], strides = [1, 1]} : vector<32x128xf32> to vector<1x128xf32>
    %c0_908 = arith.constant 0 : index
    %c1664 = arith.constant 1664 : index
    %819 = vector.load %arg19[%c0_908, %c1664] : memref<2x2048xf32, #tpu.memory_space<vmem>>, vector<1x128xf32>
    tpu.vector_store %arg19[%c0_908, %c1664], %818 {strides = array<i32>} : memref<2x2048xf32, #tpu.memory_space<vmem>>, vector<1x128xf32>,
    %820 = vector.extract_strided_slice %791 {offsets = [14, 0], sizes = [1, 128], strides = [1, 1]} : vector<32x128xf32> to vector<1x128xf32>
    %c0_909 = arith.constant 0 : index
    %c1792 = arith.constant 1792 : index
    %821 = vector.load %arg19[%c0_909, %c1792] : memref<2x2048xf32, #tpu.memory_space<vmem>>, vector<1x128xf32>
    tpu.vector_store %arg19[%c0_909, %c1792], %820 {strides = array<i32>} : memref<2x2048xf32, #tpu.memory_space<vmem>>, vector<1x128xf32>,
    %822 = vector.extract_strided_slice %791 {offsets = [15, 0], sizes = [1, 128], strides = [1, 1]} : vector<32x128xf32> to vector<1x128xf32>
    %c0_910 = arith.constant 0 : index
    %c1920 = arith.constant 1920 : index
    %823 = vector.load %arg19[%c0_910, %c1920] : memref<2x2048xf32, #tpu.memory_space<vmem>>, vector<1x128xf32>
    tpu.vector_store %arg19[%c0_910, %c1920], %822 {strides = array<i32>} : memref<2x2048xf32, #tpu.memory_space<vmem>>, vector<1x128xf32>,
    %824 = vector.extract_strided_slice %791 {offsets = [16, 0], sizes = [1, 128], strides = [1, 1]} : vector<32x128xf32> to vector<1x128xf32>
    %c1_911 = arith.constant 1 : index
    %c0_912 = arith.constant 0 : index
    %825 = vector.load %arg19[%c1_911, %c0_912] : memref<2x2048xf32, #tpu.memory_space<vmem>>, vector<1x128xf32>
    tpu.vector_store %arg19[%c1_911, %c0_912], %824 {strides = array<i32>} : memref<2x2048xf32, #tpu.memory_space<vmem>>, vector<1x128xf32>,
    %826 = vector.extract_strided_slice %791 {offsets = [17, 0], sizes = [1, 128], strides = [1, 1]} : vector<32x128xf32> to vector<1x128xf32>
    %c1_913 = arith.constant 1 : index
    %c128_914 = arith.constant 128 : index
    %827 = vector.load %arg19[%c1_913, %c128_914] : memref<2x2048xf32, #tpu.memory_space<vmem>>, vector<1x128xf32>
    tpu.vector_store %arg19[%c1_913, %c128_914], %826 {strides = array<i32>} : memref<2x2048xf32, #tpu.memory_space<vmem>>, vector<1x128xf32>,
    %828 = vector.extract_strided_slice %791 {offsets = [18, 0], sizes = [1, 128], strides = [1, 1]} : vector<32x128xf32> to vector<1x128xf32>
    %c1_915 = arith.constant 1 : index
    %c256_916 = arith.constant 256 : index
    %829 = vector.load %arg19[%c1_915, %c256_916] : memref<2x2048xf32, #tpu.memory_space<vmem>>, vector<1x128xf32>
    tpu.vector_store %arg19[%c1_915, %c256_916], %828 {strides = array<i32>} : memref<2x2048xf32, #tpu.memory_space<vmem>>, vector<1x128xf32>,
    %830 = vector.extract_strided_slice %791 {offsets = [19, 0], sizes = [1, 128], strides = [1, 1]} : vector<32x128xf32> to vector<1x128xf32>
    %c1_917 = arith.constant 1 : index
    %c384_918 = arith.constant 384 : index
    %831 = vector.load %arg19[%c1_917, %c384_918] : memref<2x2048xf32, #tpu.memory_space<vmem>>, vector<1x128xf32>
    tpu.vector_store %arg19[%c1_917, %c384_918], %830 {strides = array<i32>} : memref<2x2048xf32, #tpu.memory_space<vmem>>, vector<1x128xf32>,
    %832 = vector.extract_strided_slice %791 {offsets = [20, 0], sizes = [1, 128], strides = [1, 1]} : vector<32x128xf32> to vector<1x128xf32>
    %c1_919 = arith.constant 1 : index
    %c512_920 = arith.constant 512 : index
    %833 = vector.load %arg19[%c1_919, %c512_920] : memref<2x2048xf32, #tpu.memory_space<vmem>>, vector<1x128xf32>
    tpu.vector_store %arg19[%c1_919, %c512_920], %832 {strides = array<i32>} : memref<2x2048xf32, #tpu.memory_space<vmem>>, vector<1x128xf32>,
    %834 = vector.extract_strided_slice %791 {offsets = [21, 0], sizes = [1, 128], strides = [1, 1]} : vector<32x128xf32> to vector<1x128xf32>
    %c1_921 = arith.constant 1 : index
    %c640_922 = arith.constant 640 : index
    %835 = vector.load %arg19[%c1_921, %c640_922] : memref<2x2048xf32, #tpu.memory_space<vmem>>, vector<1x128xf32>
    tpu.vector_store %arg19[%c1_921, %c640_922], %834 {strides = array<i32>} : memref<2x2048xf32, #tpu.memory_space<vmem>>, vector<1x128xf32>,
    %836 = vector.extract_strided_slice %791 {offsets = [22, 0], sizes = [1, 128], strides = [1, 1]} : vector<32x128xf32> to vector<1x128xf32>
    %c1_923 = arith.constant 1 : index
    %c768_924 = arith.constant 768 : index
    %837 = vector.load %arg19[%c1_923, %c768_924] : memref<2x2048xf32, #tpu.memory_space<vmem>>, vector<1x128xf32>
    tpu.vector_store %arg19[%c1_923, %c768_924], %836 {strides = array<i32>} : memref<2x2048xf32, #tpu.memory_space<vmem>>, vector<1x128xf32>,
    %838 = vector.extract_strided_slice %791 {offsets = [23, 0], sizes = [1, 128], strides = [1, 1]} : vector<32x128xf32> to vector<1x128xf32>
    %c1_925 = arith.constant 1 : index
    %c896_926 = arith.constant 896 : index
    %839 = vector.load %arg19[%c1_925, %c896_926] : memref<2x2048xf32, #tpu.memory_space<vmem>>, vector<1x128xf32>
    tpu.vector_store %arg19[%c1_925, %c896_926], %838 {strides = array<i32>} : memref<2x2048xf32, #tpu.memory_space<vmem>>, vector<1x128xf32>,
    %840 = vector.extract_strided_slice %791 {offsets = [24, 0], sizes = [1, 128], strides = [1, 1]} : vector<32x128xf32> to vector<1x128xf32>
    %c1_927 = arith.constant 1 : index
    %c1024_928 = arith.constant 1024 : index
    %841 = vector.load %arg19[%c1_927, %c1024_928] : memref<2x2048xf32, #tpu.memory_space<vmem>>, vector<1x128xf32>
    tpu.vector_store %arg19[%c1_927, %c1024_928], %840 {strides = array<i32>} : memref<2x2048xf32, #tpu.memory_space<vmem>>, vector<1x128xf32>,
    %842 = vector.extract_strided_slice %791 {offsets = [25, 0], sizes = [1, 128], strides = [1, 1]} : vector<32x128xf32> to vector<1x128xf32>
    %c1_929 = arith.constant 1 : index
    %c1152_930 = arith.constant 1152 : index
    %843 = vector.load %arg19[%c1_929, %c1152_930] : memref<2x2048xf32, #tpu.memory_space<vmem>>, vector<1x128xf32>
    tpu.vector_store %arg19[%c1_929, %c1152_930], %842 {strides = array<i32>} : memref<2x2048xf32, #tpu.memory_space<vmem>>, vector<1x128xf32>,
    %844 = vector.extract_strided_slice %791 {offsets = [26, 0], sizes = [1, 128], strides = [1, 1]} : vector<32x128xf32> to vector<1x128xf32>
    %c1_931 = arith.constant 1 : index
    %c1280_932 = arith.constant 1280 : index
    %845 = vector.load %arg19[%c1_931, %c1280_932] : memref<2x2048xf32, #tpu.memory_space<vmem>>, vector<1x128xf32>
    tpu.vector_store %arg19[%c1_931, %c1280_932], %844 {strides = array<i32>} : memref<2x2048xf32, #tpu.memory_space<vmem>>, vector<1x128xf32>,
    %846 = vector.extract_strided_slice %791 {offsets = [27, 0], sizes = [1, 128], strides = [1, 1]} : vector<32x128xf32> to vector<1x128xf32>
    %c1_933 = arith.constant 1 : index
    %c1408_934 = arith.constant 1408 : index
    %847 = vector.load %arg19[%c1_933, %c1408_934] : memref<2x2048xf32, #tpu.memory_space<vmem>>, vector<1x128xf32>
    tpu.vector_store %arg19[%c1_933, %c1408_934], %846 {strides = array<i32>} : memref<2x2048xf32, #tpu.memory_space<vmem>>, vector<1x128xf32>,
    %848 = vector.extract_strided_slice %791 {offsets = [28, 0], sizes = [1, 128], strides = [1, 1]} : vector<32x128xf32> to vector<1x128xf32>
    %c1_935 = arith.constant 1 : index
    %c1536_936 = arith.constant 1536 : index
    %849 = vector.load %arg19[%c1_935, %c1536_936] : memref<2x2048xf32, #tpu.memory_space<vmem>>, vector<1x128xf32>
    tpu.vector_store %arg19[%c1_935, %c1536_936], %848 {strides = array<i32>} : memref<2x2048xf32, #tpu.memory_space<vmem>>, vector<1x128xf32>,
    %850 = vector.extract_strided_slice %791 {offsets = [29, 0], sizes = [1, 128], strides = [1, 1]} : vector<32x128xf32> to vector<1x128xf32>
    %c1_937 = arith.constant 1 : index
    %c1664_938 = arith.constant 1664 : index
    %851 = vector.load %arg19[%c1_937, %c1664_938] : memref<2x2048xf32, #tpu.memory_space<vmem>>, vector<1x128xf32>
    tpu.vector_store %arg19[%c1_937, %c1664_938], %850 {strides = array<i32>} : memref<2x2048xf32, #tpu.memory_space<vmem>>, vector<1x128xf32>,
    %852 = vector.extract_strided_slice %791 {offsets = [30, 0], sizes = [1, 128], strides = [1, 1]} : vector<32x128xf32> to vector<1x128xf32>
    %c1_939 = arith.constant 1 : index
    %c1792_940 = arith.constant 1792 : index
    %853 = vector.load %arg19[%c1_939, %c1792_940] : memref<2x2048xf32, #tpu.memory_space<vmem>>, vector<1x128xf32>
    tpu.vector_store %arg19[%c1_939, %c1792_940], %852 {strides = array<i32>} : memref<2x2048xf32, #tpu.memory_space<vmem>>, vector<1x128xf32>,
    %854 = vector.extract_strided_slice %791 {offsets = [31, 0], sizes = [1, 128], strides = [1, 1]} : vector<32x128xf32> to vector<1x128xf32>
    %c1_941 = arith.constant 1 : index
    %c1920_942 = arith.constant 1920 : index
    %855 = vector.load %arg19[%c1_941, %c1920_942] : memref<2x2048xf32, #tpu.memory_space<vmem>>, vector<1x128xf32>
    tpu.vector_store %arg19[%c1_941, %c1920_942], %854 {strides = array<i32>} : memref<2x2048xf32, #tpu.memory_space<vmem>>, vector<1x128xf32>,
    %c0_943 = arith.constant 0 : index
    %c0_944 = arith.constant 0 : index
    %856 = vector.load %arg19[%c0_943, %c0_944] : memref<2x2048xf32, #tpu.memory_space<vmem>>, vector<2x2048xf32>
    %c0_945 = arith.constant 0 : index
    %c0_946 = arith.constant 0 : index
    %857 = vector.load %arg10[%c0_945, %c0_946] : memref<2048x48xf32, #tpu.memory_space<vmem>>, vector<2048x48xf32>
    %cst_947 = arith.constant dense<0.000000e+00> : vector<2x48xf32>
    %858 = tpu.matmul %856, %857, %cst_947 {dimension_numbers = #tpu.dot_dimension_numbers<[1], [0], [0], [1], [0, 0, 1, 1], [], []>} : vector<2x2048xf32>, vector<2048x48xf32>, vector<2x48xf32> -> vector<2x48xf32>
    %c0_948 = arith.constant 0 : index
    %c0_949 = arith.constant 0 : index
    %859 = vector.load %arg11[%c0_948, %c0_949] : memref<1x48xf32, #tpu.memory_space<vmem>>, vector<1x48xf32>
    %860 = vector.broadcast %859 : vector<1x48xf32> to vector<2x48xf32>
    %861 = arith.addf %858, %860 : vector<2x48xf32>
    %cst_950 = arith.constant 0.000000e+00 : f32
    %862 = vector.broadcast %cst_950 : f32 to vector<2x48xf32>
    %863 = arith.maximumf %861, %862 : vector<2x48xf32>
    %c0_951 = arith.constant 0 : index
    %c0_952 = arith.constant 0 : index
    %864 = vector.load %arg12[%c0_951, %c0_952] : memref<48x128xf32, #tpu.memory_space<vmem>>, vector<48x128xf32>
    %cst_953 = arith.constant dense<0.000000e+00> : vector<2x128xf32>
    %865 = tpu.matmul %863, %864, %cst_953 {dimension_numbers = #tpu.dot_dimension_numbers<[1], [0], [0], [1], [0, 0, 1, 1], [], []>} : vector<2x48xf32>, vector<48x128xf32>, vector<2x128xf32> -> vector<2x128xf32>
    %c0_954 = arith.constant 0 : index
    %c0_955 = arith.constant 0 : index
    %866 = vector.load %arg13[%c0_954, %c0_955] : memref<1x128xf32, #tpu.memory_space<vmem>>, vector<1x128xf32>
    %867 = vector.broadcast %866 : vector<1x128xf32> to vector<2x128xf32>
    %868 = arith.addf %865, %867 : vector<2x128xf32>
    %c0_956 = arith.constant 0 : index
    %c0_957 = arith.constant 0 : index
    %869 = vector.load %arg14[%c0_956, %c0_957] : memref<2x128xf32, #tpu.memory_space<vmem>>, vector<2x128xf32>
    tpu.vector_store %arg14[%c0_956, %c0_957], %868 {strides = array<i32>} : memref<2x128xf32, #tpu.memory_space<vmem>>, vector<2x128xf32>,
    return
  }
  func.func @transform_0(%arg0: i32) -> (i32, i32) {
    %c0_i32 = arith.constant 0 : i32
    %c0_i32_0 = arith.constant 0 : i32
    return %arg0, %c0_i32 : i32, i32
  }
  func.func @transform_1(%arg0: i32) -> (i32, i32) {
    %c0_i32 = arith.constant 0 : i32
    %c0_i32_0 = arith.constant 0 : i32
    %c0_i32_1 = arith.constant 0 : i32
    return %c0_i32, %c0_i32_0 : i32, i32
  }
  func.func @transform_2(%arg0: i32) -> (i32, i32) {
    %c0_i32 = arith.constant 0 : i32
    %c0_i32_0 = arith.constant 0 : i32
    %c0_i32_1 = arith.constant 0 : i32
    return %c0_i32, %c0_i32_0 : i32, i32
  }
  func.func @transform_3(%arg0: i32) -> (i32, i32) {
    %c0_i32 = arith.constant 0 : i32
    %c0_i32_0 = arith.constant 0 : i32
    %c0_i32_1 = arith.constant 0 : i32
    return %c0_i32, %c0_i32_0 : i32, i32
  }
  func.func @transform_4(%arg0: i32) -> (i32, i32) {
    %c0_i32 = arith.constant 0 : i32
    %c0_i32_0 = arith.constant 0 : i32
    %c0_i32_1 = arith.constant 0 : i32
    return %c0_i32, %c0_i32_0 : i32, i32
  }
  func.func @transform_5(%arg0: i32) -> (i32, i32) {
    %c0_i32 = arith.constant 0 : i32
    %c0_i32_0 = arith.constant 0 : i32
    %c0_i32_1 = arith.constant 0 : i32
    return %c0_i32, %c0_i32_0 : i32, i32
  }
  func.func @transform_6(%arg0: i32) -> (i32, i32) {
    %c0_i32 = arith.constant 0 : i32
    %c0_i32_0 = arith.constant 0 : i32
    %c0_i32_1 = arith.constant 0 : i32
    return %c0_i32, %c0_i32_0 : i32, i32
  }
  func.func @transform_7(%arg0: i32) -> (i32, i32) {
    %c0_i32 = arith.constant 0 : i32
    %c0_i32_0 = arith.constant 0 : i32
    %c0_i32_1 = arith.constant 0 : i32
    return %c0_i32, %c0_i32_0 : i32, i32
  }
  func.func @transform_8(%arg0: i32) -> (i32, i32) {
    %c0_i32 = arith.constant 0 : i32
    %c0_i32_0 = arith.constant 0 : i32
    %c0_i32_1 = arith.constant 0 : i32
    return %c0_i32, %c0_i32_0 : i32, i32
  }
  func.func @transform_9(%arg0: i32) -> (i32, i32) {
    %c0_i32 = arith.constant 0 : i32
    %c0_i32_0 = arith.constant 0 : i32
    %c0_i32_1 = arith.constant 0 : i32
    return %c0_i32, %c0_i32_0 : i32, i32
  }
  func.func @transform_10(%arg0: i32) -> (i32, i32) {
    %c0_i32 = arith.constant 0 : i32
    %c0_i32_0 = arith.constant 0 : i32
    %c0_i32_1 = arith.constant 0 : i32
    return %c0_i32, %c0_i32_0 : i32, i32
  }
  func.func @transform_11(%arg0: i32) -> (i32, i32) {
    %c0_i32 = arith.constant 0 : i32
    %c0_i32_0 = arith.constant 0 : i32
    %c0_i32_1 = arith.constant 0 : i32
    return %c0_i32, %c0_i32_0 : i32, i32
  }
  func.func @transform_12(%arg0: i32) -> (i32, i32) {
    %c0_i32 = arith.constant 0 : i32
    %c0_i32_0 = arith.constant 0 : i32
    %c0_i32_1 = arith.constant 0 : i32
    return %c0_i32, %c0_i32_0 : i32, i32
  }
  func.func @transform_13(%arg0: i32) -> (i32, i32) {
    %c0_i32 = arith.constant 0 : i32
    %c0_i32_0 = arith.constant 0 : i32
    return %arg0, %c0_i32 : i32, i32
  }
}

</mosaic_0001>

<bundles_post_ra>
// kernel: encoder_img_forward.1
= control target key start
LH: loop header
LB: loop body
LE: loop exit
PB: predicated region body
PF: predicated region fallthrough
CT: control target
= control target key end

     0   :  { %vm44_vm0 = vcmask 261120   ;;  %v5643_v17 = vmov 0.0   ;;  %vm675_vm1 = vcmask 130048   ;;  %vm571_vm2 = vcmask 259072   ;;  %s5644_s23 = smov 32   ;;  %s5645_s24 = smov 96   ;;  %s8859_s3 = inlined_call_operand.vmem [shape: f32[32,32], index: 3, kind: input, shape index: {}]   ;;  %s8860_s0 = inlined_call_operand.vmem [shape: f32[392,32], index: 0, kind: input, shape index: {}]   ;;  %s8861_s4 = inlined_call_operand.vmem [shape: f32[1,32], index: 4, kind: input, shape index: {}]   ;;  %s8862_s1 = inlined_call_operand.vmem [shape: f32[21,16], index: 1, kind: input, shape index: {}]   ;;  %s8863_s5 = inlined_call_operand.vmem [shape: f32[288,64], index: 5, kind: input, shape index: {}]   ;;  %s8864_s6 = inlined_call_operand.vmem [shape: f32[1,64], index: 6, kind: input, shape index: {}]   ;;  %s8865_s2 = inlined_call_operand.vmem [shape: f32[12,9], index: 2, kind: input, shape index: {}]   ;;  %s8866_s7 = inlined_call_operand.vmem [shape: f32[576,128], index: 7, kind: input, shape index: {}]   ;;  %s8867_s8 = inlined_call_operand.vmem [shape: f32[1,128], index: 8, kind: input, shape index: {}]   ;;  %s8868_s9 = inlined_call_operand.vmem [shape: f32[2048,48], index: 9, kind: input, shape index: {}]   ;;  %s8869_s10 = inlined_call_operand.vmem [shape: f32[1,48], index: 10, kind: input, shape index: {}]   ;;  %s8870_s12 = inlined_call_operand.vmem [shape: f32[1,128], index: 12, kind: input, shape index: {}]   ;;  %s8871_s11 = inlined_call_operand.vmem [shape: f32[48,128], index: 11, kind: input, shape index: {}]   ;;  %s8872_s13 = inlined_call_operand.vmem [shape: f32[2,128], index: 13, kind: output, shape index: {}]  }
   0x1   :  { %v204_v0 = vld [vmem:[%s8859_s3 + $0x18] sm:$0xff]  ;;  %v203_v1 = vld [vmem:[%s8859_s3 + $0x10] sm:$0xff]  ;;  %v202_v2 = vld [vmem:[%s8859_s3 + $0x8] sm:$0xff]  ;;  %47 = vst.msk [vmem:[#allocation2 + $0x10] sm:$0xff] %vm44_vm0, %v5643_v17  ;;  %vm8885_vm3 = vcmask 261126   ;;  %vm577_vm4 = vcmask 257024  }
   0x2   :  { %368 = vmatpush.msra.mxu0 %v204_v0  ;;  %v201_v3 = vld [vmem:[%s8859_s3] sm:$0xff]  ;;  %v153_v5 = vld [vmem:[%s8860_s0 + $0x8] sm:$0xff]  ;;  %v154_v6 = vld [vmem:[%s8860_s0 + $0x10] sm:$0xff]  ;;  %48 = vst.msk [vmem:[#allocation2 + $0x18] sm:$0xff] %vm44_vm0, %v5643_v17  ;;  %vm8901_vm5 = vcmask 261124   ;;  %vm8892_vm6 = vcmask 254976  }
   0x3   :  { %v152_v4 = vld [vmem:[%s8860_s0] sm:$0xff]  ;;  %v155_v7 = vld [vmem:[%s8860_s0 + $0x18] sm:$0xff]  ;;  %v157_v9 = vld [vmem:[%s8860_s0 + $0x28] sm:$0xff]  ;;  %49 = vst.msk [vmem:[#allocation2 + $0x20] sm:$0xff] %vm44_vm0, %v5643_v17  ;;  %vm586_vm7 = vcmask 261122   ;;  %vm8875_vm8 = vcmask 260096  }
   0x4   :  { %369 = vmatpush.msra.mxu0 %v203_v1  ;;  %v156_v8 = vld [vmem:[%s8860_s0 + $0x20] sm:$0xff]  ;;  %v158_v10 = vld [vmem:[%s8860_s0 + $0x30] sm:$0xff]  ;;  %v159_v11 = vld [vmem:[%s8860_s0 + $0x38] sm:$0xff]  ;;  %45 = vst.msk [vmem:[#allocation2] sm:$0xff] %vm44_vm0, %v5643_v17  ;;  %vm8876_vm9 = vcmask 1040384   ;;  %vm8877_vm10 = vcmask 1041408  }
   0x5   :  { %v160_v12 = vld [vmem:[%s8860_s0 + $0x40] sm:$0xff]  ;;  %v161_v13 = vld [vmem:[%s8860_s0 + $0x48] sm:$0xff]  ;;  %v162_v14 = vld [vmem:[%s8860_s0 + $0x50] sm:$0xff]  ;;  %46 = vst.msk [vmem:[#allocation2 + $0x8] sm:$0xff] %vm44_vm0, %v5643_v17  ;;  %s5646_s29 = smov 64   ;;  %vm8874_vm11 = vcmask 261127  }
   0x6   :  { %370 = vmatpush.msra.mxu0 %v202_v2  ;;  %v163_v15 = vld [vmem:[%s8860_s0 + $0x58] sm:$0xff]  ;;  %v164_v16 = vld [vmem:[%s8860_s0 + $0x60] sm:$0xff]  ;;  %v165_v18 = vld [vmem:[%s8860_s0 + $0x68] sm:$0xff]  ;;  %50 = vst.msk [vmem:[#allocation2 + $0x28] sm:$0xff] %vm44_vm0, %v5643_v17  ;;  %vm8884_vm12 = vcmask 1046528   ;;  %vm8873_vm13 = vcmask 258048  }
   0x7   :  { %51 = vst.msk [vmem:[#allocation2 + $0x30] sm:$0xff] %vm44_vm0, %v5643_v17  ;;  %v166_v19 = vld [vmem:[%s8860_s0 + $0x70] sm:$0xff]  ;;  %v167_v20 = vld [vmem:[%s8860_s0 + $0x78] sm:$0xff]  ;;  %v5838_v21 = vld [vmem:[%s8861_s4] ss:$0 sm:$0xff]  ;;  %vm8883_vm14 = vcmask 1045504  }
   0x8   :  { %371 = vmatpush.msra.mxu0 %v201_v3  ;;  %52 = vst.msk [vmem:[#allocation2 + $0x38] sm:$0xff] %vm44_vm0, %v5643_v17  ;;  %v168_v23 = vld [vmem:[%s8860_s0 + $0x80] sm:$0xff]  ;;  %v169_v30 = vld [vmem:[%s8860_s0 + $0x88] sm:$0xff]  ;;  %v170_v35 = vld [vmem:[%s8860_s0 + $0x90] sm:$0xff]  ;;  %vm8878_vm15 = vcmask 261125  }
   0x9   :  { %5345 = vmatmul.msk.f32.vlgmr.msra.gmra.mxu0 %vm44_vm0, %v152_v4  ;;  %53 = vst.msk [vmem:[#allocation2 + $0x40] sm:$0xff] %vm44_vm0, %v5643_v17  ;;  %v5869_v28 = vld [vmem:[%s8862_s1] sm:$0xff]  ;;  %v5892_v33 = vld [vmem:[%s8862_s1 + $0x8] sm:$0xff]  ;;  %v5918_v37 = vld [vmem:[%s8862_s1 + $0x10] sm:$0x1f] }
   0xa   :  { %54 = vst.msk [vmem:[#allocation2 + $0x48] sm:$0xff] %vm44_vm0, %v5643_v17  ;;  %v171_v40 = vld [vmem:[%s8860_s0 + $0x98] sm:$0xff]  ;;  %v172_v44 = vld [vmem:[%s8860_s0 + $0xa0] sm:$0xff]  ;;  %v173_v50 = vld [vmem:[%s8860_s0 + $0xa8] sm:$0xff] }
   0xb   :  { %55 = vst.msk [vmem:[#allocation2 + $0x50] sm:$0xff] %vm44_vm0, %v5643_v17  ;;  %v673_v27 = vld [vmem:[#allocation2] sm:$0xff]  ;;  %v174_v57 = vld [vmem:[%s8860_s0 + $0xb0] sm:$0xff]  ;;  %v175_v63 = vld [vmem:[%s8860_s0 + $0xb8] sm:$0xff] }
   0xc   :  { %56 = vst.msk [vmem:[#allocation2 + $0x58] sm:$0xff] %vm44_vm0, %v5643_v17  ;;  %v674_v26 = vld [vmem:[#allocation2 + $0x8] sm:$0xff] }
   0xd   :  { %57 = vst.msk [vmem:[#allocation2 + $0x60] sm:$0xff] %vm44_vm0, %v5643_v17  ;;  %699 = vmatpush.msra.mxu1 %v674_v26 }
   0xe   :  { %58 = vst.msk [vmem:[#allocation2 + $0x68] sm:$0xff] %vm44_vm0, %v5643_v17 }
   0xf   :  { %59 = vst.msk [vmem:[#allocation2 + $0x70] sm:$0xff] %vm44_vm0, %v5643_v17  ;;  %700 = vmatpush.msra.mxu1 %v673_v27  ;;  %v180_v27 = vld [vmem:[%s8860_s0 + $0xe0] sm:$0xff] }
  0x10   :  { %60 = vst.msk [vmem:[#allocation2 + $0x78] sm:$0xff] %vm44_vm0, %v5643_v17  ;;  %5394 = vmatmul.msk.f32.vlgmr.msra.gmra.mxu1 %vm675_vm1, %v5869_v28 }
  0x11   :  { %5346 = vmatmul.msk.f32.gmra.mxu0 %vm44_vm0, %v153_v5  ;;  %61 = vst.msk [vmem:[#allocation2 + $0x80] sm:$0xff] %vm44_vm0, %v5643_v17  ;;  %v176_v5 = vld [vmem:[%s8860_s0 + $0xc0] sm:$0xff] }
  0x12   :  { %62 = vst.msk [vmem:[#allocation2 + $0x88] sm:$0xff] %vm44_vm0, %v5643_v17 }
  0x13   :  { %63 = vst.msk [vmem:[#allocation2 + $0x90] sm:$0xff] %vm44_vm0, %v5643_v17 }
  0x14   :  { %64 = vst.msk [vmem:[#allocation2 + $0x98] sm:$0xff] %vm44_vm0, %v5643_v17 }
  0x15   :  { %65 = vst.msk [vmem:[#allocation2 + $0xa0] sm:$0xff] %vm44_vm0, %v5643_v17 }
  0x16   :  { %66 = vst.msk [vmem:[#allocation2 + $0xa8] sm:$0xff] %vm44_vm0, %v5643_v17 }
  0x17   :  { %67 = vst.msk [vmem:[#allocation2 + $0xb0] sm:$0xff] %vm44_vm0, %v5643_v17 }
  0x18   :  { %68 = vst.msk [vmem:[#allocation2 + $0xb8] sm:$0xff] %vm44_vm0, %v5643_v17  ;;  %5395 = vmatmul.msk.f32.gmra.mxu1 %vm675_vm1, %v5892_v33 }
  0x19   :  { %5347 = vmatmul.msk.f32.gmra.mxu0 %vm44_vm0, %v154_v6  ;;  %69 = vst.msk [vmem:[#allocation2 + $0xc0] sm:$0xff] %vm44_vm0, %v5643_v17 }
  0x1a   :  { %70 = vst.msk [vmem:[#allocation2 + $0xc8] sm:$0xff] %vm44_vm0, %v5643_v17 }
  0x1b   :  { %71 = vst.msk [vmem:[#allocation2 + $0xd0] sm:$0xff] %vm44_vm0, %v5643_v17 }
  0x1c   :  { %72 = vst.msk [vmem:[#allocation2 + $0xd8] sm:$0xff] %vm44_vm0, %v5643_v17 }
  0x1d   :  { %73 = vst.msk [vmem:[#allocation2 + $0xe0] sm:$0xff] %vm44_vm0, %v5643_v17 }
  0x1e   :  { %74 = vst.msk [vmem:[#allocation2 + $0xe8] sm:$0xff] %vm44_vm0, %v5643_v17 }
  0x1f   :  { %77 = vst.msk [vmem:[#allocation2 + $0x100] sm:$0xff] %vm44_vm0, %v5643_v17 }
  0x20   :  { %78 = vst.msk [vmem:[#allocation2 + $0x108] sm:$0xff] %vm44_vm0, %v5643_v17  ;;  %5396 = vmatmul.msk.f32.gmra.mxu1 %vm675_vm1, %v5918_v37 }
  0x21   :  { %5348 = vmatmul.msk.f32.gmra.mxu0 %vm44_vm0, %v155_v7  ;;  %79 = vst.msk [vmem:[#allocation2 + $0x110] sm:$0xff] %vm44_vm0, %v5643_v17 }
  0x22   :  { %80 = vst.msk [vmem:[#allocation2 + $0x118] sm:$0xff] %vm44_vm0, %v5643_v17 }
  0x23   :  { %81 = vst.msk [vmem:[#allocation2 + $0x120] sm:$0xff] %vm44_vm0, %v5643_v17 }
  0x24   :  { %82 = vst.msk [vmem:[#allocation2 + $0x128] sm:$0xff] %vm44_vm0, %v5643_v17 }
  0x25   :  { %83 = vst.msk [vmem:[#allocation2 + $0x130] sm:$0xff] %vm44_vm0, %v5643_v17 }
  0x26   :  { %84 = vst.msk [vmem:[#allocation2 + $0x138] sm:$0xff] %vm44_vm0, %v5643_v17 }
  0x27   :  { %85 = vst.msk [vmem:[#allocation2 + $0x140] sm:$0xff] %vm44_vm0, %v5643_v17 }
  0x28   :  { %86 = vst.msk [vmem:[#allocation2 + $0x148] sm:$0xff] %vm44_vm0, %v5643_v17 }
  0x29   :  { %5349 = vmatmul.msk.f32.gmra.mxu0 %vm44_vm0, %v156_v8  ;;  %87 = vst.msk [vmem:[#allocation2 + $0x150] sm:$0xff] %vm44_vm0, %v5643_v17 }
  0x2a   :  { %88 = vst.msk [vmem:[#allocation2 + $0x158] sm:$0xff] %vm44_vm0, %v5643_v17 }
  0x2b   :  { %89 = vst.msk [vmem:[#allocation2 + $0x160] sm:$0xff] %vm44_vm0, %v5643_v17 }
  0x2c   :  { %90 = vst.msk [vmem:[#allocation2 + $0x168] sm:$0xff] %vm44_vm0, %v5643_v17 }
  0x2d   :  { %91 = vst.msk [vmem:[#allocation2 + $0x170] sm:$0xff] %vm44_vm0, %v5643_v17 }
  0x2e   :  { %92 = vst.msk [vmem:[#allocation2 + $0x178] sm:$0xff] %vm44_vm0, %v5643_v17 }
  0x2f   :  { %93 = vst.msk [vmem:[#allocation2 + $0x180] sm:$0xff] %vm44_vm0, %v5643_v17 }
  0x30   :  { %94 = vst.msk [vmem:[#allocation2 + $0x188] sm:$0xff] %vm44_vm0, %v5643_v17 }
  0x31   :  { %5350 = vmatmul.msk.f32.gmra.mxu0 %vm44_vm0, %v157_v9  ;;  %95 = vst.msk [vmem:[#allocation2 + $0x190] sm:$0xff] %vm44_vm0, %v5643_v17  ;;  %v177_v9 = vld [vmem:[%s8860_s0 + $0xc8] sm:$0xff] }
  0x32   :  { %96 = vst.msk [vmem:[#allocation2 + $0x198] sm:$0xff] %vm44_vm0, %v5643_v17 }
  0x33   :  { %97 = vst.msk [vmem:[#allocation2 + $0x1a0] sm:$0xff] %vm44_vm0, %v5643_v17 }
  0x34   :  { %98 = vst.msk [vmem:[#allocation2 + $0x1a8] sm:$0xff] %vm44_vm0, %v5643_v17 }
  0x35   :  { %99 = vst.msk [vmem:[#allocation2 + $0x1b0] sm:$0xff] %vm44_vm0, %v5643_v17 }
  0x36   :  { %100 = vst.msk [vmem:[#allocation2 + $0x1b8] sm:$0xff] %vm44_vm0, %v5643_v17 }
  0x37   :  { %101 = vst.msk [vmem:[#allocation2 + $0x1c0] sm:$0xff] %vm44_vm0, %v5643_v17 }
  0x38   :  { %102 = vst.msk [vmem:[#allocation2 + $0x1c8] sm:$0xff] %vm44_vm0, %v5643_v17 }
  0x39   :  { %5351 = vmatmul.msk.f32.gmra.mxu0 %vm44_vm0, %v158_v10  ;;  %103 = vst.msk [vmem:[#allocation2 + $0x1d0] sm:$0xff] %vm44_vm0, %v5643_v17 }
  0x3a   :  { %104 = vst.msk [vmem:[#allocation2 + $0x1d8] sm:$0xff] %vm44_vm0, %v5643_v17 }
  0x3b   :  { %105 = vst.msk [vmem:[#allocation2 + $0x1e0] sm:$0xff] %vm44_vm0, %v5643_v17 }
  0x3c   :  { %106 = vst.msk [vmem:[#allocation2 + $0x1e8] sm:$0xff] %vm44_vm0, %v5643_v17 }
  0x41   :  { %5352 = vmatmul.msk.f32.gmra.mxu0 %vm44_vm0, %v159_v11 }
  0x49   :  { %5353 = vmatmul.msk.f32.gmra.mxu0 %vm44_vm0, %v160_v12 }
  0x51   :  { %5354 = vmatmul.msk.f32.gmra.mxu0 %vm44_vm0, %v161_v13 }
  0x59   :  { %5355 = vmatmul.msk.f32.gmra.mxu0 %vm44_vm0, %v162_v14 }
  0x61   :  { %5356 = vmatmul.msk.f32.gmra.mxu0 %vm44_vm0, %v163_v15  ;;  %v178_v15 = vld [vmem:[%s8860_s0 + $0xd0] sm:$0xff] }
  0x69   :  { %5357 = vmatmul.msk.f32.gmra.mxu0 %vm44_vm0, %v164_v16 }
  0x71   :  { %5358 = vmatmul.msk.f32.gmra.mxu0 %vm44_vm0, %v165_v18 }
  0x79   :  { %5359 = vmatmul.msk.f32.gmra.mxu0 %vm44_vm0, %v166_v19 }
  0x81   :  { %5360 = vmatmul.msk.f32.gmra.mxu0 %vm44_vm0, %v167_v20  ;;  %v179_v20 = vld [vmem:[%s8860_s0 + $0xd8] sm:$0xff] }
  0x86   :  { %v373_v22 = vpop.f32.mrf.mxu0 }
  0x87   :  { %v374_v24 = vadd.f32 %v5838_v21, %v373_v22 }
  0x89   :  { %v520_v25 = vmax.f32 %v374_v24, 0.0  ;;  %5361 = vmatmul.msk.f32.gmra.mxu0 %vm44_vm0, %v168_v23 }
  0x8b   :  { %570 = vst.msk [vmem:[#allocation2 + $0x11] sm:$0xff] %vm44_vm0, %v520_v25 }
  0x8e   :  { %v376_v29 = vpop.f32.mrf.mxu0 }
  0x8f   :  { %v377_v31 = vadd.f32 %v5838_v21, %v376_v29 }
  0x91   :  { %v521_v32 = vmax.f32 %v377_v31, 0.0  ;;  %5362 = vmatmul.msk.f32.gmra.mxu0 %vm44_vm0, %v169_v30 }
  0x92   :  { %v734_v38 = vld [vmem:[#allocation2 + $0x10] sm:$0xff] }
  0x93   :  { %572 = vst.msk [vmem:[#allocation2 + $0x19] sm:$0x3f] %vm571_vm2, %v521_v32 }
  0x94   :  { %575 = vst.msk [vmem:[#allocation2 + $0x1b] sm:$0xc0] %vm8885_vm3, %v521_v32  ;;  %v181_v32 = vld [vmem:[%s8860_s0 + $0xe8] sm:$0xff] }
  0x96   :  { %v379_v34 = vpop.f32.mrf.mxu0 }
  0x97   :  { %v380_v41 = vadd.f32 %v5838_v21, %v379_v34 }
  0x99   :  { %5363 = vmatmul.msk.f32.gmra.mxu0 %vm44_vm0, %v170_v35  ;;  %v522_v46 = vmax.f32 %v380_v41, 0.0 }
  0x9a   :  { %v735_v36 = vld [vmem:[#allocation2 + $0x18] sm:$0xff] }
  0x9b   :  { %750 = vmatpush.msra.mxu2 %v735_v36  ;;  %576 = vst.msk [vmem:[#allocation2 + $0x23] sm:$0xff] %vm44_vm0, %v522_v46  ;;  %v183_v46 = vld [vmem:[%s8860_s0 + $0xf8] sm:$0xff] }
  0x9d   :  { %751 = vmatpush.msra.mxu2 %v734_v38 }
  0x9e   :  { %v382_v39 = vpop.f32.mrf.mxu0  ;;  %5397 = vmatmul.msk.f32.vlgmr.msra.gmra.mxu2 %vm675_vm1, %v5869_v28 }
  0x9f   :  { %v383_v42 = vadd.f32 %v5838_v21, %v382_v39 }
  0xa1   :  { %5364 = vmatmul.msk.f32.gmra.mxu0 %vm44_vm0, %v171_v40  ;;  %v523_v47 = vmax.f32 %v383_v42, 0.0  ;;  %v182_v40 = vld [vmem:[%s8860_s0 + $0xf0] sm:$0xff] }
  0xa2   :  { %v782_v55 = vld [vmem:[#allocation2 + $0x20] sm:$0xff] }
  0xa3   :  { %578 = vst.msk [vmem:[#allocation2 + $0x2b] sm:$0xf] %vm577_vm4, %v523_v47 }
  0xa4   :  { %581 = vst.msk [vmem:[#allocation2 + $0x2d] sm:$0xf0] %vm8901_vm5, %v523_v47 }
  0xa6   :  { %v385_v43 = vpop.f32.mrf.mxu0  ;;  %5398 = vmatmul.msk.f32.gmra.mxu2 %vm675_vm1, %v5892_v33 }
  0xa7   :  { %v386_v45 = vadd.f32 %v5838_v21, %v385_v43 }
  0xa9   :  { %5365 = vmatmul.msk.f32.gmra.mxu0 %vm44_vm0, %v172_v44  ;;  %v524_v48 = vmax.f32 %v386_v45, 0.0 }
  0xaa   :  { %v783_v53 = vld [vmem:[#allocation2 + $0x28] sm:$0xff] }
  0xab   :  { %582 = vst.msk [vmem:[#allocation2 + $0x35] sm:$0xff] %vm44_vm0, %v524_v48  ;;  %798 = vmatpush.msra.mxu3 %v783_v53  ;;  %845 = vmatpush.msrb.mxu1 %v783_v53  ;;  %v702_v53 = vpop.f32.mrf.mxu1 }
  0xac   :  { %712 = vst.msk [vmem:[#allocation3] sm:$0x7f] %vm8875_vm8, %v702_v53 }
  0xad   :  { %799 = vmatpush.msra.mxu3 %v782_v55  ;;  %846 = vmatpush.msrb.mxu1 %v782_v55 }
  0xae   :  { %v388_v49 = vpop.f32.mrf.mxu0  ;;  %5399 = vmatmul.msk.f32.gmra.mxu2 %vm675_vm1, %v5918_v37  ;;  %5400 = vmatmul.msk.f32.vlgmr.msra.gmra.mxu3 %vm675_vm1, %v5869_v28 }
  0xaf   :  { %v389_v51 = vadd.f32 %v5838_v21, %v388_v49  ;;  %5403 = vmatmul.msk.f32.vlgmr.msrb.gmra.mxu1 %vm675_vm1, %v5869_v28 }
  0xb1   :  { %v525_v52 = vmax.f32 %v389_v51, 0.0  ;;  %5366 = vmatmul.msk.f32.gmra.mxu0 %vm44_vm0, %v173_v50  ;;  %v184_v50 = vld [vmem:[%s8860_s0 + $0x100] sm:$0xff] }
  0xb2   :  { %v888_v60 = vld [vmem:[#allocation2 + $0x30] sm:$0xff] }
  0xb3   :  { %584 = vst.msk [vmem:[#allocation2 + $0x3d] sm:$0x3] %vm8892_vm6, %v525_v52 }
  0xb4   :  { %587 = vst.msk [vmem:[#allocation2 + $0x3f] sm:$0xfc] %vm586_vm7, %v525_v52 }
  0xb6   :  { %v391_v54 = vpop.f32.mrf.mxu0  ;;  %5401 = vmatmul.msk.f32.gmra.mxu3 %vm675_vm1, %v5892_v33 }
  0xb7   :  { %v392_v56 = vadd.f32 %v5838_v21, %v391_v54  ;;  %5404 = vmatmul.msk.f32.gmra.mxu1 %vm675_vm1, %v5892_v33 }
  0xb9   :  { %v526_v58 = vmax.f32 %v392_v56, 0.0  ;;  %5367 = vmatmul.msk.f32.gmra.mxu0 %vm44_vm0, %v174_v57  ;;  %v185_v57 = vld [vmem:[%s8860_s0 + $0x108] sm:$0xff] }
  0xba   :  { %v889_v59 = vld [vmem:[#allocation2 + $0x38] sm:$0xff] }
  0xbb   :  { %588 = vst.msk [vmem:[#allocation2 + $0x47] sm:$0xff] %vm44_vm0, %v526_v58  ;;  %904 = vmatpush.msrb.mxu2 %v889_v59 }
  0xbd   :  { %905 = vmatpush.msrb.mxu2 %v888_v60 }
  0xbe   :  { %v394_v61 = vpop.f32.mrf.mxu0  ;;  %5406 = vmatmul.msk.f32.vlgmr.msrb.gmra.mxu2 %vm675_vm1, %v5869_v28  ;;  %5402 = vmatmul.msk.f32.gmra.mxu3 %vm675_vm1, %v5918_v37 }
  0xbf   :  { %v395_v62 = vadd.f32 %v5838_v21, %v394_v61  ;;  %5405 = vmatmul.msk.f32.gmra.mxu1 %vm675_vm1, %v5918_v37  ;;  %v186_v61 = vld [vmem:[%s8860_s0 + $0x110] sm:$0xff] }
  0xc1   :  { %v527_v0 = vmax.f32 %v395_v62, 0.0  ;;  %5368 = vmatmul.msk.f32.gmra.mxu0 %vm44_vm0, %v175_v63  ;;  %v705_v63 = vpop.f32.mrf.mxu1 }
  0xc2   :  { %v941_v1 = vld [vmem:[#allocation2 + $0x48] sm:$0xff]  ;;  %v940_v2 = vld [vmem:[#allocation2 + $0x40] sm:$0xff] }
  0xc3   :  { %590 = vst.msk [vmem:[#allocation2 + $0x51] sm:$0xff] %vm44_vm0, %v527_v0  ;;  %956 = vmatpush.msrb.mxu3 %v941_v1  ;;  %1008 = vmatpush.msra.mxu1 %v941_v1  ;;  %v716_v0 = vrot.slane %v702_v53, 7 }
  0xc5   :  { %957 = vmatpush.msrb.mxu3 %v940_v2  ;;  %1009 = vmatpush.msra.mxu1 %v940_v2  ;;  %v717_v2 = vrot.slane %v705_v63, 7 }
  0xc6   :  { %v397_v3 = vpop.f32.mrf.mxu0  ;;  %5407 = vmatmul.msk.f32.gmra.mxu2 %vm675_vm1, %v5892_v33  ;;  %5409 = vmatmul.msk.f32.vlgmr.msrb.gmra.mxu3 %vm675_vm1, %v5869_v28 }
  0xc7   :  { %v398_v4 = vadd.f32 %v5838_v21, %v397_v3  ;;  %5412 = vmatmul.msk.f32.vlgmr.msra.gmra.mxu1 %vm675_vm1, %v5869_v28 }
  0xc9   :  { %v528_v6 = vmax.f32 %v398_v4, 0.0  ;;  %5369 = vmatmul.msk.f32.gmra.mxu0 %vm44_vm0, %v176_v5  ;;  %v718_v5 = vsel %vm8876_vm9, %v716_v0, %v717_v2 }
  0xca   :  { %v1052_v12 = vld [vmem:[#allocation2 + $0x50] sm:$0xff]  ;;  %719 = vrot.lane.b32.xlu0 %v718_v5, %s5644_s23 }
  0xcb   :  { %591 = vst.msk [vmem:[#allocation2 + $0x59] sm:$0x3f] %vm571_vm2, %v528_v6 }
  0xcc   :  { %593 = vst.msk [vmem:[#allocation2 + $0x5b] sm:$0xc0] %vm8885_vm3, %v528_v6 }
  0xce   :  { %v400_v7 = vpop.f32.mrf.mxu0  ;;  %5408 = vmatmul.msk.f32.gmra.mxu2 %vm675_vm1, %v5918_v37  ;;  %5410 = vmatmul.msk.f32.gmra.mxu3 %vm675_vm1, %v5892_v33 }
  0xcf   :  { %v401_v8 = vadd.f32 %v5838_v21, %v400_v7  ;;  %5413 = vmatmul.msk.f32.gmra.mxu1 %vm675_vm1, %v5892_v33  ;;  %v187_v7 = vld [vmem:[%s8860_s0 + $0x118] sm:$0xff] }
  0xd1   :  { %v529_v10 = vmax.f32 %v401_v8, 0.0  ;;  %5370 = vmatmul.msk.f32.gmra.mxu0 %vm44_vm0, %v177_v9 }
  0xd2   :  { %v1053_v11 = vld [vmem:[#allocation2 + $0x58] sm:$0xff] }
  0xd3   :  { %594 = vst.msk [vmem:[#allocation2 + $0x63] sm:$0xff] %vm44_vm0, %v529_v10  ;;  %1068 = vmatpush.msra.mxu2 %v1053_v11 }
  0xd5   :  { %1069 = vmatpush.msra.mxu2 %v1052_v12  ;;  %v188_v12 = vld [vmem:[%s8860_s0 + $0x120] sm:$0xff] }
  0xd6   :  { %v403_v13 = vpop.f32.mrf.mxu0  ;;  %5415 = vmatmul.msk.f32.vlgmr.msra.gmra.mxu2 %vm675_vm1, %v5869_v28  ;;  %5411 = vmatmul.msk.f32.gmra.mxu3 %vm675_vm1, %v5918_v37 }
  0xd7   :  { %v404_v14 = vadd.f32 %v5838_v21, %v403_v13  ;;  %5414 = vmatmul.msk.f32.gmra.mxu1 %vm675_vm1, %v5918_v37 }
  0xd9   :  { %v530_v16 = vmax.f32 %v404_v14, 0.0  ;;  %5371 = vmatmul.msk.f32.gmra.mxu0 %vm44_vm0, %v178_v15 }
  0xda   :  { %v1106_v24 = vld [vmem:[#allocation2 + $0x60] sm:$0xff] }
  0xdb   :  { %595 = vst.msk [vmem:[#allocation2 + $0x6b] sm:$0xf] %vm577_vm4, %v530_v16 }
  0xdc   :  { %597 = vst.msk [vmem:[#allocation2 + $0x6d] sm:$0xf0] %vm8901_vm5, %v530_v16  ;;  %v708_v16 = vpop.f32.mrf.mxu1 }
  0xde   :  { %v406_v18 = vpop.f32.mrf.mxu0  ;;  %5416 = vmatmul.msk.f32.gmra.mxu2 %vm675_vm1, %v5892_v33 }
  0xdf   :  { %v407_v19 = vadd.f32 %v5838_v21, %v406_v18  ;;  %v726_v18 = vrot.slane %v705_v63, 6 }
  0xe1   :  { %v531_v22 = vmax.f32 %v407_v19, 0.0  ;;  %5372 = vmatmul.msk.f32.gmra.mxu0 %vm44_vm0, %v179_v20  ;;  %v727_v19 = vrot.slane %v708_v16, 6 }
  0xe2   :  { %v1107_v23 = vld [vmem:[#allocation2 + $0x68] sm:$0xff] }
  0xe3   :  { %598 = vst.msk [vmem:[#allocation2 + $0x75] sm:$0xff] %vm44_vm0, %v531_v22  ;;  %1122 = vmatpush.msra.mxu3 %v1107_v23  ;;  %1171 = vmatpush.msrb.mxu1 %v1107_v23 }
  0xe5   :  { %1123 = vmatpush.msra.mxu3 %v1106_v24  ;;  %1172 = vmatpush.msrb.mxu1 %v1106_v24  ;;  %v189_v24 = vld [vmem:[%s8860_s0 + $0x128] sm:$0xff] }
  0xe6   :  { %v409_v25 = vpop.f32.mrf.mxu0  ;;  %5417 = vmatmul.msk.f32.gmra.mxu2 %vm675_vm1, %v5918_v37  ;;  %5421 = vmatmul.msk.f32.vlgmr.msrb.gmra.mxu1 %vm675_vm1, %v5869_v28 }
  0xe7   :  { %v410_v26 = vadd.f32 %v5838_v21, %v409_v25  ;;  %5418 = vmatmul.msk.f32.vlgmr.msra.gmra.mxu3 %vm675_vm1, %v5869_v28 }
  0xe9   :  { %v532_v29 = vmax.f32 %v410_v26, 0.0  ;;  %5373 = vmatmul.msk.f32.gmra.mxu0 %vm44_vm0, %v180_v27  ;;  %v728_v26 = vsel %vm8877_vm10, %v726_v18, %v727_v19 }
  0xea   :  { %v1218_v36 = vld [vmem:[#allocation2 + $0x70] sm:$0xff]  ;;  %729 = vrot.lane.b32.xlu2 %v728_v26, %s5646_s29 }
  0xeb   :  { %599 = vst.msk [vmem:[#allocation2 + $0x7d] sm:$0x3] %vm8892_vm6, %v532_v29 }
  0xec   :  { %601 = vst.msk [vmem:[#allocation2 + $0x7f] sm:$0xfc] %vm586_vm7, %v532_v29 }
  0xee   :  { %v412_v30 = vpop.f32.mrf.mxu0  ;;  %5422 = vmatmul.msk.f32.gmra.mxu1 %vm675_vm1, %v5892_v33 }
  0xef   :  { %v413_v31 = vadd.f32 %v5838_v21, %v412_v30  ;;  %5419 = vmatmul.msk.f32.gmra.mxu3 %vm675_vm1, %v5892_v33 }
  0xf1   :  { %v533_v34 = vmax.f32 %v413_v31, 0.0  ;;  %5374 = vmatmul.msk.f32.gmra.mxu0 %vm44_vm0, %v181_v32 }
  0xf2   :  { %v1219_v35 = vld [vmem:[#allocation2 + $0x78] sm:$0xff] }
  0xf3   :  { %602 = vst.msk [vmem:[#allocation2 + $0x87] sm:$0xff] %vm44_vm0, %v533_v34  ;;  %1234 = vmatpush.msrb.mxu2 %v1219_v35  ;;  %v1857_v35 = vld [vmem:[#allocation2 + $0x108] sm:$0xff] }
  0xf5   :  { %1235 = vmatpush.msrb.mxu2 %v1218_v36 }
  0xf6   :  { %v415_v38 = vpop.f32.mrf.mxu0  ;;  %5424 = vmatmul.msk.f32.vlgmr.msrb.gmra.mxu2 %vm675_vm1, %v5869_v28  ;;  %5423 = vmatmul.msk.f32.gmra.mxu1 %vm675_vm1, %v5918_v37 }
  0xf7   :  { %v416_v39 = vadd.f32 %v5838_v21, %v415_v38  ;;  %5420 = vmatmul.msk.f32.gmra.mxu3 %vm675_vm1, %v5918_v37 }
  0xf9   :  { %v534_v41 = vmax.f32 %v416_v39, 0.0  ;;  %5375 = vmatmul.msk.f32.gmra.mxu0 %vm44_vm0, %v182_v40  ;;  %v190_v40 = vld [vmem:[%s8860_s0 + $0x130] sm:$0xff] }
  0xfa   :  { %v1276_v42 = vld [vmem:[#allocation2 + $0x88] sm:$0xff]  ;;  %v1275_v43 = vld [vmem:[#allocation2 + $0x80] sm:$0xff] }
  0xfb   :  { %604 = vst.msk [vmem:[#allocation2 + $0x91] sm:$0xff] %vm44_vm0, %v534_v41  ;;  %1291 = vmatpush.msrb.mxu3 %v1276_v42  ;;  %1346 = vmatpush.msra.mxu1 %v1276_v42  ;;  %v1856_v41 = vld [vmem:[#allocation2 + $0x100] sm:$0xff] }
  0xfd   :  { %1292 = vmatpush.msrb.mxu3 %v1275_v43  ;;  %1347 = vmatpush.msra.mxu1 %v1275_v43 }
  0xfe   :  { %v418_v44 = vpop.f32.mrf.mxu0  ;;  %5425 = vmatmul.msk.f32.gmra.mxu2 %vm675_vm1, %v5892_v33  ;;  %5430 = vmatmul.msk.f32.vlgmr.msra.gmra.mxu1 %vm675_vm1, %v5869_v28 }
  0xff   :  { %v419_v45 = vadd.f32 %v5838_v21, %v418_v44  ;;  %5427 = vmatmul.msk.f32.vlgmr.msrb.gmra.mxu3 %vm675_vm1, %v5869_v28 }
 0x101   :  { %v535_v47 = vmax.f32 %v419_v45, 0.0  ;;  %5376 = vmatmul.msk.f32.gmra.mxu0 %vm44_vm0, %v183_v46 }
 0x102   :  { %v1393_v54 = vld [vmem:[#allocation2 + $0x90] sm:$0xff] }
 0x103   :  { %605 = vst.msk [vmem:[#allocation2 + $0x99] sm:$0x3f] %vm571_vm2, %v535_v47 }
 0x104   :  { %607 = vst.msk [vmem:[#allocation2 + $0x9b] sm:$0xc0] %vm8885_vm3, %v535_v47 }
 0x106   :  { %v421_v48 = vpop.f32.mrf.mxu0  ;;  %5426 = vmatmul.msk.f32.gmra.mxu2 %vm675_vm1, %v5918_v37  ;;  %5431 = vmatmul.msk.f32.gmra.mxu1 %vm675_vm1, %v5892_v33 }
 0x107   :  { %v422_v49 = vadd.f32 %v5838_v21, %v421_v48  ;;  %5428 = vmatmul.msk.f32.gmra.mxu3 %vm675_vm1, %v5892_v33  ;;  %v191_v48 = vld [vmem:[%s8860_s0 + $0x138] sm:$0xff] }
 0x109   :  { %v536_v51 = vmax.f32 %v422_v49, 0.0  ;;  %5377 = vmatmul.msk.f32.gmra.mxu0 %vm44_vm0, %v184_v50 }
 0x10a   :  { %v1394_v52 = vld [vmem:[#allocation2 + $0x98] sm:$0xff] }
 0x10b   :  { %608 = vst.msk [vmem:[#allocation2 + $0xa3] sm:$0xff] %vm44_vm0, %v536_v51  ;;  %1409 = vmatpush.msra.mxu2 %v1394_v52 }
 0x10d   :  { %1410 = vmatpush.msra.mxu2 %v1393_v54 }
 0x10e   :  { %v424_v55 = vpop.f32.mrf.mxu0  ;;  %5433 = vmatmul.msk.f32.vlgmr.msra.gmra.mxu2 %vm675_vm1, %v5869_v28  ;;  %5432 = vmatmul.msk.f32.gmra.mxu1 %vm675_vm1, %v5918_v37 }
 0x10f   :  { %v425_v56 = vadd.f32 %v5838_v21, %v424_v55  ;;  %5429 = vmatmul.msk.f32.gmra.mxu3 %vm675_vm1, %v5918_v37 }
 0x111   :  { %v537_v58 = vmax.f32 %v425_v56, 0.0  ;;  %5378 = vmatmul.msk.f32.gmra.mxu0 %vm44_vm0, %v185_v57 }
 0x112   :  { %v1450_v3 = vld [vmem:[#allocation2 + $0xa0] sm:$0xff] }
 0x113   :  { %609 = vst.msk [vmem:[#allocation2 + $0xab] sm:$0xf] %vm577_vm4, %v537_v58 }
 0x114   :  { %611 = vst.msk [vmem:[#allocation2 + $0xad] sm:$0xf0] %vm8901_vm5, %v537_v58 }
 0x116   :  { %v427_v59 = vpop.f32.mrf.mxu0  ;;  %5434 = vmatmul.msk.f32.gmra.mxu2 %vm675_vm1, %v5892_v33 }
 0x117   :  { %v428_v60 = vadd.f32 %v5838_v21, %v427_v59 }
 0x119   :  { %v538_v62 = vmax.f32 %v428_v60, 0.0  ;;  %5379 = vmatmul.msk.f32.gmra.mxu0 %vm44_vm0, %v186_v61  ;;  %v192_v60 = vld [vmem:[%s8860_s0 + $0x140] sm:$0xff] }
 0x11a   :  { %v1451_v1 = vld [vmem:[#allocation2 + $0xa8] sm:$0xff] }
 0x11b   :  { %612 = vst.msk [vmem:[#allocation2 + $0xb5] sm:$0xff] %vm44_vm0, %v538_v62  ;;  %1466 = vmatpush.msra.mxu3 %v1451_v1  ;;  %1521 = vmatpush.msrb.mxu1 %v1451_v1 }
 0x11d   :  { %1467 = vmatpush.msra.mxu3 %v1450_v3  ;;  %1522 = vmatpush.msrb.mxu1 %v1450_v3 }
 0x11e   :  { %v430_v4 = vpop.f32.mrf.mxu0  ;;  %5435 = vmatmul.msk.f32.gmra.mxu2 %vm675_vm1, %v5918_v37  ;;  %5439 = vmatmul.msk.f32.vlgmr.msrb.gmra.mxu1 %vm675_vm1, %v5869_v28 }
 0x11f   :  { %v431_v6 = vadd.f32 %v5838_v21, %v430_v4  ;;  %5436 = vmatmul.msk.f32.vlgmr.msra.gmra.mxu3 %vm675_vm1, %v5869_v28 }
 0x121   :  { %v539_v8 = vmax.f32 %v431_v6, 0.0  ;;  %v6150_v9 = vpop.f32.mrf.mxu2  ;;  %5380 = vmatmul.msk.f32.gmra.mxu0 %vm44_vm0, %v187_v7 }
 0x122   :  { %763 = vrot.lane.b32.xlu1 %v6150_v9, %s5645_s24  ;;  %v1568_v20 = vld [vmem:[#allocation2 + $0xb0] sm:$0xff]  ;;  %v769_v1 = vrot.slane %v6150_v9, 7 }
 0x123   :  { %613 = vst.msk [vmem:[#allocation2 + $0xbd] sm:$0x3] %vm8892_vm6, %v539_v8 }
 0x124   :  { %615 = vst.msk [vmem:[#allocation2 + $0xbf] sm:$0xfc] %vm586_vm7, %v539_v8 }
 0x126   :  { %v433_v10 = vpop.f32.mrf.mxu0  ;;  %5440 = vmatmul.msk.f32.gmra.mxu1 %vm675_vm1, %v5892_v33 }
 0x127   :  { %v434_v11 = vadd.f32 %v5838_v21, %v433_v10  ;;  %5437 = vmatmul.msk.f32.gmra.mxu3 %vm675_vm1, %v5892_v33 }
 0x129   :  { %v540_v13 = vmax.f32 %v434_v11, 0.0  ;;  %v6165_v14 = vpop.f32.mrf.mxu2  ;;  %5381 = vmatmul.msk.f32.gmra.mxu0 %vm44_vm0, %v188_v12 }
 0x12a   :  { %v1569_v15 = vld [vmem:[#allocation2 + $0xb8] sm:$0xff]  ;;  %v775_v25 = vrot.slane %v6165_v14, 6  ;;  %v770_v2 = vrot.slane %v6165_v14, 7  ;;  %v193_v14 = vld [vmem:[%s8860_s0 + $0x148] sm:$0xff] }
 0x12b   :  { %616 = vst.msk [vmem:[#allocation2 + $0xc7] sm:$0xff] %vm44_vm0, %v540_v13  ;;  %1584 = vmatpush.msrb.mxu2 %v1569_v15 }
 0x12c   :  { %v848_v36 = vpop.f32.mrf.mxu1  ;;  %v771_v10 = vsel %vm8876_vm9, %v769_v1, %v770_v2 }
 0x12d   :  { %1585 = vmatpush.msrb.mxu2 %v1568_v20  ;;  %v858_v38 = vrot.slane %v848_v36, 1  ;;  %864 = vrot.lane.b32.xlu1 %v848_v36, %s5644_s23  ;;  %773 = vst.msk [vmem:[#allocation3 + $0x8] sm:$0x7f] %vm8875_vm8, %v771_v10  ;;  %v6371_v10 = vld [vmem:[%s8861_s4] ss:$0 sm:$0xff] }
 0x12e   :  { %v436_v22 = vpop.f32.mrf.mxu0  ;;  %5441 = vmatmul.msk.f32.gmra.mxu1 %vm675_vm1, %v5918_v37  ;;  %5442 = vmatmul.msk.f32.vlgmr.msrb.gmra.mxu2 %vm675_vm1, %v5869_v28 }
 0x12f   :  { %v437_v23 = vadd.f32 %v5838_v21, %v436_v22  ;;  %5438 = vmatmul.msk.f32.gmra.mxu3 %vm675_vm1, %v5918_v37  ;;  %862 = vst.msk [vmem:[#allocation3 + $0x18] sm:$0x3f] %vm571_vm2, %v858_v38 }
 0x130   :  { %861 = vst.msk [vmem:[#allocation3] sm:$0x80] %vm8874_vm11, %v858_v38 }
 0x131   :  { %v541_v27 = vmax.f32 %v437_v23, 0.0  ;;  %v759_v29 = vpop.f32.mrf.mxu2  ;;  %5382 = vmatmul.msk.f32.gmra.mxu0 %vm44_vm0, %v189_v24  ;;  %v801_v44 = vpop.f32.mrf.mxu3 }
 0x132   :  { %v1626_v30 = vld [vmem:[#allocation2 + $0xc8] sm:$0xff]  ;;  %v776_v31 = vrot.slane %v759_v29, 6  ;;  %v1625_v32 = vld [vmem:[#allocation2 + $0xc0] sm:$0xff]  ;;  %v816_v52 = vrot.slane %v801_v44, 7 }
 0x133   :  { %618 = vst.msk [vmem:[#allocation2 + $0xd1] sm:$0xff] %vm44_vm0, %v541_v27  ;;  %1641 = vmatpush.msrb.mxu3 %v1626_v30  ;;  %1696 = vmatpush.msra.mxu1 %v1626_v30  ;;  %v194_v27 = vld [vmem:[%s8860_s0 + $0x150] sm:$0xff] }
 0x134   :  { %v777_v34 = vsel %vm8877_vm10, %v775_v25, %v776_v31  ;;  %v851_v45 = vpop.f32.mrf.mxu1 }
 0x135   :  { %1642 = vmatpush.msrb.mxu3 %v1625_v32  ;;  %1697 = vmatpush.msra.mxu1 %v1625_v32  ;;  %v875_v46 = vrot.slane %v851_v45, 7 }
 0x136   :  { %5448 = vmatmul.msk.f32.vlgmr.msra.gmra.mxu1 %vm675_vm1, %v5869_v28  ;;  %5443 = vmatmul.msk.f32.gmra.mxu2 %vm675_vm1, %v5892_v33  ;;  %v439_v39 = vpop.f32.mrf.mxu0 }
 0x137   :  { %778 = vrot.lane.b32.xlu0 %v777_v34, %s5644_s23  ;;  %v440_v42 = vadd.f32 %v5838_v21, %v439_v39  ;;  %5445 = vmatmul.msk.f32.vlgmr.msrb.gmra.mxu3 %vm675_vm1, %v5869_v28 }
 0x138   :  { %1872 = vmatpush.msrb.mxu1 %v1857_v35  ;;  %811 = vrot.lane.b32.xlu1 %v801_v44, %s5646_s29 }
 0x139   :  { %v542_v43 = vmax.f32 %v440_v42, 0.0  ;;  %5383 = vmatmul.msk.f32.gmra.mxu0 %vm44_vm0, %v190_v40  ;;  %866 = vrot.lane.b32.xlu2 %v851_v45, %s5644_s23  ;;  %v804_v54 = vpop.f32.mrf.mxu3  ;;  %v195_v40 = vld [vmem:[%s8860_s0 + $0x158] sm:$0xff] }
 0x13a   :  { %1873 = vmatpush.msrb.mxu1 %v1856_v41  ;;  %v817_v55 = vrot.slane %v804_v54, 7  ;;  %v1743_v56 = vld [vmem:[#allocation2 + $0xd0] sm:$0xff]  ;;  %v824_v5 = vrot.slane %v804_v54, 6 }
 0x13b   :  { %619 = vst.msk [vmem:[#allocation2 + $0xd9] sm:$0x3f] %vm571_vm2, %v542_v43 }
 0x13c   :  { %621 = vst.msk [vmem:[#allocation2 + $0xdb] sm:$0xc0] %vm8885_vm3, %v542_v43  ;;  %v854_v57 = vpop.f32.mrf.mxu1  ;;  %v818_v61 = vsel %vm8876_vm9, %v816_v52, %v817_v55 }
 0x13d   :  { %v876_v58 = vrot.slane %v854_v57, 7 }
 0x13e   :  { %5449 = vmatmul.msk.f32.gmra.mxu1 %vm675_vm1, %v5892_v33  ;;  %5444 = vmatmul.msk.f32.gmra.mxu2 %vm675_vm1, %v5918_v37  ;;  %v442_v47 = vpop.f32.mrf.mxu0 }
 0x13f   :  { %v443_v49 = vadd.f32 %v5838_v21, %v442_v47  ;;  %5446 = vmatmul.msk.f32.gmra.mxu3 %vm675_vm1, %v5892_v33  ;;  %878 = vrot.lane.b32.xlu0 %v875_v46, %s5646_s29  ;;  %v877_v63 = vsel %vm8876_vm9, %v875_v46, %v876_v58 }
 0x140   :  { %880 = vrot.lane.b32.xlu1 %v877_v63, %s5646_s29 }
 0x141   :  { %v907_v50 = vpop.f32.mrf.mxu2  ;;  %v543_v51 = vmax.f32 %v443_v49, 0.0  ;;  %5384 = vmatmul.msk.f32.gmra.mxu0 %vm44_vm0, %v191_v48  ;;  %819 = vrot.lane.b32.xlu2 %v818_v61, %s5645_s24  ;;  %v807_v7 = vpop.f32.mrf.mxu3 }
 0x142   :  { %925 = vst.msk [vmem:[#allocation3 + $0x8] sm:$0x80] %vm8874_vm11, %v907_v50  ;;  %v1744_v53 = vld [vmem:[#allocation2 + $0xd8] sm:$0xff]  ;;  %v917_v6 = vrot.slane %v907_v50, 1  ;;  %v825_v8 = vrot.slane %v807_v7, 6 }
 0x143   :  { %622 = vst.msk [vmem:[#allocation2 + $0xe3] sm:$0xff] %vm44_vm0, %v543_v51  ;;  %1759 = vmatpush.msra.mxu2 %v1744_v53  ;;  %v196_v51 = vld [vmem:[%s8860_s0 + $0x160] sm:$0xff] }
 0x144   :  { %v6245_v9 = vpop.f32.mrf.mxu1  ;;  %v826_v11 = vsel %vm8877_vm10, %v824_v5, %v825_v8  ;;  %v198_v8 = vld [vmem:[%s8860_s0 + $0x170] sm:$0xff]  ;;  %vm8879_vm10 = vcmask 521472  }
 0x145   :  { %1760 = vmatpush.msra.mxu2 %v1743_v56  ;;  %v1021_v12 = vrot.slane %v6245_v9, 2  ;;  %828 = vst.msk [vmem:[#allocation3 + $0x10] sm:$0x7f] %vm8875_vm8, %v826_v11  ;;  %v1028_v31 = vrot.slane %v6245_v9, 1  ;;  %vm8882_vm8 = vcmask 784896  }
 0x146   :  { %5450 = vmatmul.msk.f32.gmra.mxu1 %vm675_vm1, %v5918_v37  ;;  %v445_v59 = vpop.f32.mrf.mxu0  ;;  %5451 = vmatmul.msk.f32.vlgmr.msra.gmra.mxu2 %vm675_vm1, %v5869_v28 }
 0x147   :  { %v446_v62 = vadd.f32 %v5838_v21, %v445_v59  ;;  %5447 = vmatmul.msk.f32.gmra.mxu3 %vm675_vm1, %v5918_v37  ;;  %1023 = vst.msk [vmem:[#allocation3 + $0x18] sm:$0xc0] %vm8885_vm3, %v1021_v12 }
 0x148   :  { %1025 = vst.msk [vmem:[#allocation3 + $0x30] sm:$0x1f] %vm8873_vm13, %v1021_v12 }
 0x149   :  { %v6231_v0 = vpop.f32.mrf.mxu2  ;;  %v544_v3 = vmax.f32 %v446_v62, 0.0  ;;  %5385 = vmatmul.msk.f32.gmra.mxu0 %vm44_vm0, %v192_v60  ;;  %918 = vrot.lane.b32.xlu2 %v917_v6, %s5645_s24  ;;  %v959_v20 = vpop.f32.mrf.mxu3 }
 0x14a   :  { %926 = vst.msk [vmem:[#allocation3 + $0x20] sm:$0x3f] %vm571_vm2, %v6231_v0  ;;  %v929_v4 = vrot.slane %v6231_v0, 7  ;;  %v969_v22 = vrot.slane %v959_v20, 1  ;;  %v1800_v23 = vld [vmem:[#allocation2 + $0xe0] sm:$0xff] }
 0x14b   :  { %623 = vst.msk [vmem:[#allocation2 + $0xeb] sm:$0xf] %vm577_vm4, %v544_v3 }
 0x14c   :  { %932 = vrot.lane.b32.xlu0 %v929_v4, %s5644_s23  ;;  %625 = vst.msk [vmem:[#allocation2 + $0x10d] sm:$0xf0] %vm8901_vm5, %v544_v3  ;;  %v1014_v24 = vpop.f32.mrf.mxu1  ;;  %970 = vrot.lane.b32.xlu1 %v969_v22, %s5646_s29  ;;  %v197_v3 = vld [vmem:[%s8860_s0 + $0x168] sm:$0xff] }
 0x14d   :  { %v1029_v25 = vrot.slane %v1014_v24, 1 }
 0x14e   :  { %5457 = vmatmul.msk.f32.vlgmr.msrb.gmra.mxu1 %vm675_vm1, %v5869_v28  ;;  %v448_v13 = vpop.f32.mrf.mxu0  ;;  %5452 = vmatmul.msk.f32.gmra.mxu2 %vm675_vm1, %v5892_v33 }
 0x14f   :  { %v449_v15 = vadd.f32 %v5838_v21, %v448_v13  ;;  %v1030_v38 = vsel %vm8884_vm12, %v1028_v31, %v1029_v25 }
 0x151   :  { %v6264_v16 = vpop.f32.mrf.mxu2  ;;  %v545_v18 = vmax.f32 %v449_v15, 0.0  ;;  %5386 = vmatmul.msk.f32.gmra.mxu0 %vm44_vm0, %v193_v14  ;;  %976 = vrot.lane.b32.xlu2 %v959_v20, %s5645_s24  ;;  %v962_v34 = vpop.f32.mrf.mxu3 }
 0x152   :  { %v1801_v19 = vld [vmem:[#allocation2 + $0xe8] sm:$0xff]  ;;  %v985_v35 = vrot.slane %v962_v34, 7  ;;  %v930_v55 = vrot.slane %v6264_v16, 7 }
 0x153   :  { %626 = vst.msk [vmem:[#allocation2 + $0x115] sm:$0xff] %vm44_vm0, %v545_v18  ;;  %1816 = vmatpush.msra.mxu3 %v1801_v19 }
 0x154   :  { %1033 = vrot.lane.b32.xlu0 %v1029_v25, %s5644_s23  ;;  %v1017_v36 = vpop.f32.mrf.mxu1  ;;  %990 = vst.msk [vmem:[#allocation3 + $0x10] sm:$0x80] %vm8874_vm11, %v985_v35  ;;  %v931_v63 = vsel %vm8876_vm9, %v929_v4, %v930_v55  ;;  %v6393_v25 = vld [vmem:[%s8862_s1] sm:$0xff]  ;;  %v730_v55 = vpop.permute.xlu2 %729  ;;  %vm8880_vm11 = vcmask 522496  }
 0x155   :  { %1817 = vmatpush.msra.mxu3 %v1800_v23 }
 0x156   :  { %5458 = vmatmul.msk.f32.gmra.mxu1 %vm675_vm1, %v5892_v33  ;;  %v451_v26 = vpop.f32.mrf.mxu0  ;;  %5454 = vmatmul.msk.f32.vlgmr.msra.gmra.mxu3 %vm675_vm1, %v5869_v28 }
 0x157   :  { %v452_v29 = vadd.f32 %v5838_v21, %v451_v26  ;;  %5453 = vmatmul.msk.f32.gmra.mxu2 %vm675_vm1, %v5918_v37  ;;  %v199_v26 = vld [vmem:[%s8860_s0 + $0x178] sm:$0xff] }
 0x159   :  { %v6281_v30 = vpop.f32.mrf.mxu2  ;;  %v546_v32 = vmax.f32 %v452_v29, 0.0  ;;  %5387 = vmatmul.msk.f32.gmra.mxu0 %vm44_vm0, %v194_v27  ;;  %1042 = vrot.lane.b32.xlu2 %v1014_v24, %s5646_s29  ;;  %v965_v45 = vpop.f32.mrf.mxu3 }
 0x15a   :  { %v1907_v46 = vld [vmem:[#allocation2 + $0x110] sm:$0xff]  ;;  %v986_v47 = vrot.slane %v965_v45, 7  ;;  %v1090_v13 = vrot.slane %v6281_v30, 1 }
 0x15b   :  { %627 = vst.msk [vmem:[#allocation2 + $0x11d] sm:$0x3] %vm8892_vm6, %v546_v32 }
 0x15c   :  { %629 = vst.msk [vmem:[#allocation2 + $0x11f] sm:$0xfc] %vm586_vm7, %v546_v32  ;;  %1031 = vrot.lane.b32.xlu0 %v1030_v38, %s5644_s23  ;;  %v987_v52 = vsel %vm8876_vm9, %v985_v35, %v986_v47  ;;  %vm8881_vm9 = vcmask 1047296  }
 0x15d   :  { %991 = vst.msk [vmem:[#allocation3 + $0x28] sm:$0x3f] %vm571_vm2, %v987_v52 }
 0x15e   :  { %5459 = vmatmul.msk.f32.gmra.mxu1 %vm675_vm1, %v5918_v37  ;;  %v454_v39 = vpop.f32.mrf.mxu0  ;;  %5455 = vmatmul.msk.f32.gmra.mxu3 %vm675_vm1, %v5892_v33 }
 0x15f   :  { %v455_v41 = vadd.f32 %v5838_v21, %v454_v39 }
 0x161   :  { %v6299_v42 = vpop.f32.mrf.mxu2  ;;  %v547_v43 = vmax.f32 %v455_v41, 0.0  ;;  %5388 = vmatmul.msk.f32.gmra.mxu0 %vm44_vm0, %v195_v40  ;;  %1044 = vrot.lane.b32.xlu2 %v1017_v36, %s5646_s29  ;;  %v6429_v40 = vld [vmem:[%s8862_s1 + $0x8] sm:$0xff]  ;;  %v200_v41 = vld [vmem:[%s8860_s0 + $0x180] sm:$0xff] }
 0x162   :  { %1098 = vrot.lane.b32.xlu1 %v6299_v42, %s5644_s23  ;;  %v1908_v44 = vld [vmem:[#allocation2 + $0x118] sm:$0xff]  ;;  %v1091_v58 = vrot.slane %v6299_v42, 1 }
 0x163   :  { %630 = vst.msk [vmem:[#allocation2 + $0x127] sm:$0xff] %vm44_vm0, %v547_v43  ;;  %1923 = vmatpush.msrb.mxu2 %v1908_v44  ;;  %v6305_v48 = vpop.f32.mrf.mxu1 }
 0x164   :  { %v1184_v49 = vrot.slane %v6305_v48, 3  ;;  %978 = vrot.lane.b32.xlu0 %v962_v34, %s5645_s24  ;;  %1096 = vst.msk [vmem:[#allocation3 + $0x38] sm:$0x1f] %vm8873_vm13, %v1091_v58  ;;  %v1191_v5 = vrot.slane %v6305_v48, 2  ;;  %v1092_v22 = vsel %vm8884_vm12, %v1090_v13, %v1091_v58 }
 0x165   :  { %1924 = vmatpush.msrb.mxu2 %v1907_v46  ;;  %1095 = vst.msk [vmem:[#allocation3 + $0x20] sm:$0xc0] %vm8885_vm3, %v1092_v22 }
 0x166   :  { %v457_v50 = vpop.f32.mrf.mxu0  ;;  %5456 = vmatmul.msk.f32.gmra.mxu3 %vm675_vm1, %v5918_v37  ;;  %5460 = vmatmul.msk.f32.vlgmr.msrb.gmra.mxu2 %vm675_vm1, %v5869_v28  ;;  %1188 = vst.msk [vmem:[#allocation3 + $0x48] sm:$0xf] %vm577_vm4, %v1184_v49 }
 0x167   :  { %v458_v53 = vadd.f32 %v5838_v21, %v457_v50  ;;  %1187 = vst.msk [vmem:[#allocation3 + $0x30] sm:$0xe0] %vm8878_vm15, %v1184_v49 }
 0x169   :  { %v1077_v54 = vpop.f32.mrf.mxu2  ;;  %v548_v56 = vmax.f32 %v458_v53, 0.0  ;;  %5389 = vmatmul.msk.f32.gmra.mxu0 %vm44_vm0, %v196_v51 }
 0x16a   :  { %1100 = vrot.lane.b32.xlu1 %v1077_v54, %s5644_s23  ;;  %v1957_v57 = vld [vmem:[#allocation2 + $0x128] sm:$0xff]  ;;  %v6328_v59 = vpop.f32.mrf.mxu3  ;;  %v1956_v60 = vld [vmem:[#allocation2 + $0x120] sm:$0xff] }
 0x16b   :  { %632 = vst.msk [vmem:[#allocation2 + $0x131] sm:$0xff] %vm44_vm0, %v548_v56  ;;  %1972 = vmatpush.msrb.mxu3 %v1957_v57  ;;  %2020 = vmatpush.msra.mxu1 %v1957_v57  ;;  %v1135_v61 = vrot.slane %v6328_v59, 2  ;;  %v6334_v62 = vpop.f32.mrf.mxu1  ;;  %v1142_v32 = vrot.slane %v6328_v59, 1  ;;  %v6457_v54 = vld [vmem:[%s8862_s1 + $0x10] sm:$0x1f]  ;;  %v720_v59 = vpop.permute.xlu0 %719 }
 0x16c   :  { %v1192_v1 = vrot.slane %v6334_v62, 2  ;;  %934 = vrot.lane.b32.xlu0 %v931_v63, %s5644_s23  ;;  %723 = vst.msk [vmem:[#allocation3] sm:$0x7f] %vm8880_vm11, %v720_v59 }
 0x16d   :  { %1973 = vmatpush.msrb.mxu3 %v1956_v60  ;;  %2021 = vmatpush.msra.mxu1 %v1956_v60  ;;  %733 = vst.msk [vmem:[#allocation3] sm:$0x7f] %vm8882_vm8, %v730_v55 }
 0x16e   :  { %v460_v2 = vpop.f32.mrf.mxu0  ;;  %5461 = vmatmul.msk.f32.gmra.mxu2 %vm675_vm1, %v5892_v33  ;;  %5463 = vmatmul.msk.f32.vlgmr.msrb.gmra.mxu3 %vm675_vm1, %v5869_v28  ;;  %v1193_v9 = vsel %vm8883_vm14, %v1191_v5, %v1192_v1 }
 0x16f   :  { %v461_v0 = vadd.f32 %v5838_v21, %v460_v2  ;;  %5466 = vmatmul.msk.f32.vlgmr.msra.gmra.mxu1 %vm675_vm1, %v5869_v28  ;;  %1136 = vrot.lane.b32.xlu2 %v1135_v61, %s5646_s29  ;;  %v1081_v21 = vrot.slane %v6281_v30, 2  ;;  %v1205_v30 = vrot.slane %v6334_v62, 1 }
 0x171   :  { %v549_v4 = vmax.f32 %v461_v0, 0.0  ;;  %5390 = vmatmul.msk.f32.gmra.mxu0 %vm44_vm0, %v197_v3 }
 0x172   :  { %1196 = vrot.lane.b32.xlu1 %v1192_v1, %s5644_s23  ;;  %v1128_v6 = vpop.f32.mrf.mxu3  ;;  %v2050_v19 = vld [vmem:[#allocation2 + $0x130] sm:$0xff] }
 0x173   :  { %633 = vst.msk [vmem:[#allocation2 + $0x139] sm:$0x3f] %vm571_vm2, %v549_v4  ;;  %v1180_v28 = vpop.f32.mrf.mxu1  ;;  %v1143_v20 = vrot.slane %v1128_v6, 1 }
 0x174   :  { %635 = vst.msk [vmem:[#allocation2 + $0x13b] sm:$0xc0] %vm8885_vm3, %v549_v4  ;;  %1082 = vrot.lane.b32.xlu0 %v1081_v21, %s5645_s24  ;;  %v1206_v18 = vrot.slane %v1180_v28, 1 }
 0x175   :  { %1153 = vst.msk [vmem:[#allocation3 + $0x28] sm:$0xc0] %vm8885_vm3, %v1128_v6  ;;  %v1144_v42 = vsel %vm8884_vm12, %v1142_v32, %v1143_v20 }
 0x176   :  { %v463_v7 = vpop.f32.mrf.mxu0  ;;  %5462 = vmatmul.msk.f32.gmra.mxu2 %vm675_vm1, %v5918_v37  ;;  %5464 = vmatmul.msk.f32.gmra.mxu3 %vm675_vm1, %v5892_v33  ;;  %v1207_v36 = vsel %vm8884_vm12, %v1205_v30, %v1206_v18 }
 0x177   :  { %v464_v11 = vadd.f32 %v6371_v10, %v463_v7  ;;  %5467 = vmatmul.msk.f32.gmra.mxu1 %vm675_vm1, %v5892_v33 }
 0x179   :  { %v6377_v12 = vpop.f32.mrf.mxu2  ;;  %v550_v14 = vmax.f32 %v464_v11, 0.0  ;;  %5391 = vmatmul.msk.f32.gmra.mxu0 %vm44_vm0, %v198_v8 }
 0x17a   :  { %1194 = vrot.lane.b32.xlu1 %v1193_v9, %s5644_s23  ;;  %v2051_v15 = vld [vmem:[#allocation2 + $0x138] sm:$0xff]  ;;  %v1131_v16 = vpop.f32.mrf.mxu3  ;;  %v1247_v51 = vrot.slane %v6377_v12, 3  ;;  %v1256_v60 = vrot.slane %v6377_v12, 2 }
 0x17b   :  { %636 = vst.msk [vmem:[#allocation2 + $0x143] sm:$0xff] %vm44_vm0, %v550_v14  ;;  %2066 = vmatpush.msra.mxu2 %v2051_v15  ;;  %v6384_v33 = vpop.f32.mrf.mxu1 }
 0x17c   :  { %1154 = vst.msk [vmem:[#allocation3 + $0x40] sm:$0x1f] %vm8873_vm13, %v1131_v16  ;;  %v1359_v23 = vrot.slane %v6384_v33, 4  ;;  %1210 = vrot.lane.b32.xlu0 %v1206_v18, %s5646_s29  ;;  %v1366_v45 = vrot.slane %v6384_v33, 3  ;;  %vm8899_vm13 = vcmask 1044480  }
 0x17d   :  { %2067 = vmatpush.msra.mxu2 %v2050_v19 }
 0x17e   :  { %v466_v24 = vpop.f32.mrf.mxu0  ;;  %5465 = vmatmul.msk.f32.gmra.mxu3 %vm675_vm1, %v5918_v37  ;;  %5469 = vmatmul.msk.f32.vlgmr.msra.gmra.mxu2 %vm675_vm1, %v6393_v25  ;;  %1361 = vst.msk [vmem:[#allocation3 + $0x48] sm:$0xf0] %vm8901_vm5, %v1359_v23 }
 0x17f   :  { %v467_v27 = vadd.f32 %v6371_v10, %v466_v24  ;;  %5468 = vmatmul.msk.f32.gmra.mxu1 %vm675_vm1, %v5918_v37 }
 0x181   :  { %v6407_v29 = vpop.f32.mrf.mxu2  ;;  %v551_v31 = vmax.f32 %v467_v27, 0.0  ;;  %5392 = vmatmul.msk.f32.gmra.mxu0 %vm44_vm0, %v199_v26 }
 0x182   :  { %1147 = vrot.lane.b32.xlu1 %v1143_v20, %s5645_s24  ;;  %v1257_v37 = vrot.slane %v6407_v29, 2  ;;  %v6416_v34 = vpop.f32.mrf.mxu3  ;;  %v2097_v49 = vld [vmem:[#allocation2 + $0x140] sm:$0xff]  ;;  %v1264_v24 = vrot.slane %v6407_v29, 1 }
 0x183   :  { %637 = vst.msk [vmem:[#allocation2 + $0x14b] sm:$0xf] %vm577_vm4, %v551_v31  ;;  %v6422_v35 = vpop.f32.mrf.mxu1  ;;  %v1304_v50 = vrot.slane %v6416_v34, 3 }
 0x184   :  { %639 = vst.msk [vmem:[#allocation2 + $0x14d] sm:$0xf0] %vm8901_vm5, %v551_v31  ;;  %v1367_v38 = vrot.slane %v6422_v35, 3  ;;  %1208 = vrot.lane.b32.xlu0 %v1207_v36, %s5646_s29  ;;  %v1258_v4 = vsel %vm8883_vm14, %v1256_v60, %v1257_v37  ;;  %v1380_v9 = vrot.slane %v6422_v35, 2 }
 0x185   :  { %1262 = vst.msk [vmem:[#allocation3 + $0x50] sm:$0xf] %vm577_vm4, %v1257_v37 }
 0x186   :  { %v469_v39 = vpop.f32.mrf.mxu0  ;;  %5470 = vmatmul.msk.f32.gmra.mxu2 %vm675_vm1, %v6429_v40  ;;  %1371 = vrot.lane.b32.xlu2 %v1367_v38, %s5644_s23  ;;  %v1368_v52 = vsel %vm8899_vm13, %v1366_v45, %v1367_v38  ;;  %1261 = vst.msk [vmem:[#allocation3 + $0x38] sm:$0xe0] %vm8878_vm15, %v1258_v4 }
 0x187   :  { %v470_v43 = vadd.f32 %v6371_v10, %v469_v39 }
 0x189   :  { %v6442_v44 = vpop.f32.mrf.mxu2  ;;  %v552_v46 = vmax.f32 %v470_v43, 0.0  ;;  %5393 = vmatmul.msk.f32.gmra.mxu0 %vm44_vm0, %v200_v41  ;;  %v1311_v41 = vrot.slane %v6416_v34, 2 }
 0x18a   :  { %1145 = vrot.lane.b32.xlu1 %v1144_v42, %s5645_s24  ;;  %v2098_v47 = vld [vmem:[#allocation2 + $0x148] sm:$0xff]  ;;  %v6449_v48 = vpop.f32.mrf.mxu3  ;;  %v1265_v1 = vrot.slane %v6442_v44, 1 }
 0x18b   :  { %640 = vst.msk [vmem:[#allocation2 + $0x155] sm:$0xff] %vm44_vm0, %v552_v46  ;;  %2113 = vmatpush.msra.mxu3 %v2098_v47  ;;  %2160 = vmatpush.msrb.mxu1 %v2098_v47  ;;  %v1355_v57 = vpop.f32.mrf.mxu1  ;;  %v1323_v62 = vrot.slane %v6449_v48, 1  ;;  %v1312_v14 = vrot.slane %v6449_v48, 2 }
 0x18c   :  { %1305 = vrot.lane.b32.xlu0 %v1304_v50, %s5646_s29  ;;  %v1381_v0 = vrot.slane %v1355_v57, 2  ;;  %v1266_v29 = vsel %vm8884_vm12, %v1264_v24, %v1265_v1 }
 0x18d   :  { %2114 = vmatpush.msra.mxu3 %v2097_v49  ;;  %2161 = vmatpush.msrb.mxu1 %v2097_v49  ;;  %v1313_v34 = vsel %vm8883_vm14, %v1311_v41, %v1312_v14 }
 0x18e   :  { %v472_v53 = vpop.f32.mrf.mxu0  ;;  %5471 = vmatmul.msk.f32.gmra.mxu2 %vm675_vm1, %v6457_v54  ;;  %5472 = vmatmul.msk.f32.vlgmr.msra.gmra.mxu3 %vm675_vm1, %v6393_v25  ;;  %v1382_v19 = vsel %vm8883_vm14, %v1380_v9, %v1381_v0 }
 0x18f   :  { %v473_v56 = vadd.f32 %v6371_v10, %v472_v53  ;;  %5475 = vmatmul.msk.f32.vlgmr.msrb.gmra.mxu1 %vm675_vm1, %v6393_v25  ;;  %1369 = vrot.lane.b32.xlu2 %v1368_v52, %s5644_s23 }
 0x191   :  { %v6467_v58 = vpop.f32.mrf.mxu2  ;;  %v553_v61 = vmax.f32 %v473_v56, 0.0 }
 0x192   :  { %1248 = vrot.lane.b32.xlu1 %v1247_v51, %s5645_s24  ;;  %v1300_v63 = vpop.f32.mrf.mxu3  ;;  %v2198_v15 = vld [vmem:[#allocation2 + $0x150] sm:$0xff]  ;;  %v1431_v42 = vrot.slane %v6467_v58, 3 }
 0x193   :  { %641 = vst.msk [vmem:[#allocation2 + $0x15d] sm:$0x3] %vm8892_vm6, %v553_v61  ;;  %v1324_v2 = vrot.slane %v1300_v63, 1  ;;  %v867_v7 = vpop.permute.xlu2 %866 }
 0x194   :  { %643 = vst.msk [vmem:[#allocation2 + $0x15f] sm:$0xfc] %vm586_vm7, %v553_v61  ;;  %v764_v3 = vpop.permute.xlu1 %763 }
 0x195   :  { %767 = vst.msk [vmem:[#allocation3] sm:$0x7f] %vm8881_vm9, %v764_v3  ;;  %v1325_v6 = vsel %vm8884_vm12, %v1323_v62, %v1324_v2  ;;  %vm8898_vm12 = vcmask 783872  }
 0x196   :  { %v475_v5 = vpop.f32.mrf.mxu0  ;;  %5473 = vmatmul.msk.f32.gmra.mxu3 %vm675_vm1, %v6429_v40  ;;  %1329 = vst.msk [vmem:[#allocation3 + $0x58] sm:$0xf] %vm577_vm4, %v1324_v2  ;;  %v1422_v2 = vrot.slane %v6467_v58, 4 }
 0x197   :  { %v476_v21 = vadd.f32 %v6371_v10, %v475_v5  ;;  %5476 = vmatmul.msk.f32.gmra.mxu1 %vm675_vm1, %v6429_v40  ;;  %1328 = vst.msk [vmem:[#allocation3 + $0x40] sm:$0xe0] %vm8878_vm15, %v1325_v6  ;;  %1269 = vrot.lane.b32.xlu2 %v1265_v1, %s5644_s23  ;;  %vm8886_vm15 = vcmask 256000  }
 0x198   :  { %873 = vst.msk [vmem:[#allocation3 + $0x18] sm:$0x3f] %vm8879_vm10, %v867_v7  ;;  %vm8887_vm10 = vcmask 523527  }
 0x199   :  { %v6491_v28 = vpop.f32.mrf.mxu2  ;;  %v554_v8 = vmax.f32 %v476_v21, 0.0  ;;  %1363 = vst.msk [vmem:[#allocation3 + $0x60] sm:$0x7] %vm8886_vm15, %v1359_v23 }
 0x19a   :  { %1385 = vrot.lane.b32.xlu1 %v1381_v0, %s5646_s29  ;;  %v2199_v12 = vld [vmem:[#allocation2 + $0x158] sm:$0xff]  ;;  %v1432_v16 = vrot.slane %v6491_v28, 3  ;;  %v1439_v37 = vrot.slane %v6491_v28, 2 }
 0x19b   :  { %v6497_v11 = vpop.f32.mrf.mxu1  ;;  %644 = vst.msk [vmem:[#allocation2 + $0x167] sm:$0xff] %vm44_vm0, %v554_v8  ;;  %2214 = vmatpush.msrb.mxu2 %v2199_v12  ;;  %v820_v33 = vpop.permute.xlu2 %819 }
 0x19c   :  { %v1534_v13 = vrot.slane %v6497_v11, 5  ;;  %1437 = vst.msk [vmem:[#allocation3 + $0x68] sm:$0x7] %vm8886_vm15, %v1432_v16  ;;  %v1433_v49 = vsel %vm8899_vm13, %v1431_v42, %v1432_v16  ;;  %v1541_v4 = vrot.slane %v6497_v11, 4 }
 0x19d   :  { %2215 = vmatpush.msrb.mxu2 %v2198_v15  ;;  %1436 = vst.msk [vmem:[#allocation3 + $0x50] sm:$0xf0] %vm8901_vm5, %v1433_v49 }
 0x19e   :  { %1538 = vst.msk [vmem:[#allocation3 + $0x78] sm:$0x3] %vm8892_vm6, %v1534_v13  ;;  %v478_v18 = vpop.f32.mrf.mxu0  ;;  %5474 = vmatmul.msk.f32.gmra.mxu3 %vm675_vm1, %v6457_v54  ;;  %5478 = vmatmul.msk.f32.vlgmr.msrb.gmra.mxu2 %vm675_vm1, %v6393_v25 }
 0x19f   :  { %v479_v20 = vadd.f32 %v6371_v10, %v478_v18  ;;  %5477 = vmatmul.msk.f32.gmra.mxu1 %vm675_vm1, %v6457_v54  ;;  %1316 = vrot.lane.b32.xlu2 %v1312_v14, %s5645_s24  ;;  %v865_v39 = vpop.permute.xlu1 %864 }
 0x1a0   :  { %871 = vst.msk [vmem:[#allocation3] sm:$0x80] %vm8887_vm10, %v865_v39 }
 0x1a1   :  { %v1418_v22 = vpop.f32.mrf.mxu2  ;;  %v555_v26 = vmax.f32 %v479_v20, 0.0 }
 0x1a2   :  { %v1440_v27 = vrot.slane %v1418_v22, 2  ;;  %1383 = vrot.lane.b32.xlu1 %v1382_v19, %s5646_s29  ;;  %v6521_v30 = vpop.f32.mrf.mxu3  ;;  %v2249_v32 = vld [vmem:[#allocation2 + $0x168] sm:$0xff]  ;;  %v2248_v23 = vld [vmem:[#allocation2 + $0x160] sm:$0xff] }
 0x1a3   :  { %v6523_v31 = vpop.f32.mrf.mxu1  ;;  %646 = vst.msk [vmem:[#allocation2 + $0x171] sm:$0xff] %vm44_vm0, %v555_v26  ;;  %2264 = vmatpush.msrb.mxu3 %v2249_v32  ;;  %2316 = vmatpush.msra.mxu1 %v2249_v32  ;;  %v1479_v35 = vrot.slane %v6521_v30, 4  ;;  %v6552_v48 = vpop.permute.xlu2 %918 }
 0x1a4   :  { %1444 = vrot.lane.b32.xlu0 %v1440_v27, %s5644_s23  ;;  %v1441_v44 = vsel %vm8883_vm14, %v1439_v37, %v1440_v27  ;;  %v1542_v52 = vrot.slane %v6523_v31, 4  ;;  %v1555_v24 = vrot.slane %v6523_v31, 3  ;;  %v1486_v31 = vrot.slane %v6521_v30, 3 }
 0x1a5   :  { %2265 = vmatpush.msrb.mxu3 %v2248_v23  ;;  %2317 = vmatpush.msra.mxu1 %v2248_v23 }
 0x1a6   :  { %v481_v36 = vpop.f32.mrf.mxu0  ;;  %5479 = vmatmul.msk.f32.gmra.mxu2 %vm675_vm1, %v6429_v40  ;;  %5481 = vmatmul.msk.f32.vlgmr.msrb.gmra.mxu3 %vm675_vm1, %v6393_v25 }
 0x1a7   :  { %v482_v38 = vadd.f32 %v6371_v10, %v481_v36  ;;  %5484 = vmatmul.msk.f32.vlgmr.msra.gmra.mxu1 %vm675_vm1, %v6393_v25  ;;  %1267 = vrot.lane.b32.xlu2 %v1266_v29, %s5644_s23 }
 0x1a9   :  { %v556_v43 = vmax.f32 %v482_v38, 0.0  ;;  %v779_v45 = vpop.permute.xlu0 %778 }
 0x1aa   :  { %v6542_v46 = vpop.f32.mrf.mxu3  ;;  %1480 = vrot.lane.b32.xlu1 %v1479_v35, %s5646_s29  ;;  %781 = vst.msk [vmem:[#allocation3 + $0x8] sm:$0x7f] %vm8880_vm11, %v779_v45  ;;  %v812_v53 = vpop.permute.xlu1 %811  ;;  %vm8890_vm11 = vcmask 785927   ;;  %v2354_v3 = vld [vmem:[#allocation2 + $0x170] sm:$0xff] }
 0x1ab   :  { %v6545_v47 = vpop.f32.mrf.mxu1  ;;  %647 = vst.msk [vmem:[#allocation2 + $0x179] sm:$0x3f] %vm571_vm2, %v556_v43  ;;  %v1498_v55 = vrot.slane %v6542_v46, 2  ;;  %v977_v6 = vpop.permute.xlu2 %976  ;;  %v1487_v19 = vrot.slane %v6542_v46, 3 }
 0x1ac   :  { %649 = vst.msk [vmem:[#allocation2 + $0x17b] sm:$0xc0] %vm8885_vm3, %v556_v43  ;;  %1442 = vrot.lane.b32.xlu0 %v1441_v44, %s5644_s23  ;;  %vm8897_vm3 = vcmask 1046272   ;;  %v1556_v14 = vrot.slane %v6545_v47, 3 }
 0x1ad   :  { %814 = vst.msk [vmem:[#allocation3 + $0x8] sm:$0x7f] %vm8882_vm8, %v812_v53  ;;  %vm1540_vm8 = vcmask 1043456   ;;  %v1488_v42 = vsel %vm8899_vm13, %v1486_v31, %v1487_v19 }
 0x1ae   :  { %v484_v50 = vpop.f32.mrf.mxu0  ;;  %5480 = vmatmul.msk.f32.gmra.mxu2 %vm675_vm1, %v6457_v54  ;;  %5482 = vmatmul.msk.f32.gmra.mxu3 %vm675_vm1, %v6429_v40  ;;  %822 = vst.msk [vmem:[#allocation3 + $0x8] sm:$0x7f] %vm8881_vm9, %v820_v33  ;;  %vm8889_vm9 = vcmask 1048327   ;;  %v1543_v7 = vsel %vm1540_vm8, %v1541_v4, %v1542_v52  ;;  %v1557_v35 = vsel %vm8899_vm13, %v1555_v24, %v1556_v14 }
 0x1af   :  { %v485_v51 = vadd.f32 %v6371_v10, %v484_v50  ;;  %5485 = vmatmul.msk.f32.gmra.mxu1 %vm675_vm1, %v6429_v40  ;;  %1314 = vrot.lane.b32.xlu2 %v1313_v34, %s5645_s24 }
 0x1b1   :  { %v6566_v56 = vpop.f32.mrf.mxu2  ;;  %v557_v57 = vmax.f32 %v485_v51, 0.0  ;;  %v879_v1 = vpop.permute.xlu0 %878 }
 0x1b2   :  { %v1475_v59 = vpop.f32.mrf.mxu3  ;;  %v2355_v61 = vld [vmem:[#allocation2 + $0x178] sm:$0xff]  ;;  %885 = vst.msk [vmem:[#allocation3] sm:$0x80] %vm8890_vm11, %v879_v1  ;;  %v881_v15 = vpop.permute.xlu1 %880  ;;  %v1597_v53 = vrot.slane %v6566_v56, 5 }
 0x1b3   :  { %v6570_v60 = vpop.f32.mrf.mxu1  ;;  %v1499_v62 = vrot.slane %v1475_v59, 2  ;;  %650 = vst.msk [vmem:[#allocation2 + $0x183] sm:$0xff] %vm44_vm0, %v557_v57  ;;  %2370 = vmatpush.msra.mxu2 %v2355_v61  ;;  %v6627_v27 = vpop.permute.xlu2 %1042 }
 0x1b4   :  { %v1709_v63 = vrot.slane %v6570_v60, 6  ;;  %1546 = vrot.lane.b32.xlu0 %v1542_v52, %s5644_s23  ;;  %922 = vst.msk [vmem:[#allocation3] sm:$0x80] %vm8889_vm9, %v6552_v48  ;;  %v1716_v20 = vrot.slane %v6570_v60, 5 }
 0x1b5   :  { %v1500_v0 = vsel %vm8883_vm14, %v1498_v55, %v1499_v62  ;;  %2371 = vmatpush.msra.mxu2 %v2354_v3  ;;  %vm8891_vm14 = vcmask 261123   ;;  %1504 = vst.msk [vmem:[#allocation3 + $0x70] sm:$0x7] %vm8886_vm15, %v1499_v62  ;;  %vm8888_vm15 = vcmask 1042432  }
 0x1b6   :  { %1711 = vst.msk [vmem:[#allocation3 + $0x78] sm:$0xfc] %vm586_vm7, %v1709_v63  ;;  %v487_v5 = vpop.f32.mrf.mxu0  ;;  %5487 = vmatmul.msk.f32.vlgmr.msra.gmra.mxu2 %vm675_vm1, %v6393_v25  ;;  %5483 = vmatmul.msk.f32.gmra.mxu3 %vm675_vm1, %v6457_v54 }
 0x1b7   :  { %v488_v58 = vadd.f32 %v6371_v10, %v487_v5  ;;  %1503 = vst.msk [vmem:[#allocation3 + $0x58] sm:$0xf0] %vm8901_vm5, %v1500_v0  ;;  %5486 = vmatmul.msk.f32.gmra.mxu1 %vm675_vm1, %v6457_v54  ;;  %1423 = vrot.lane.b32.xlu2 %v1422_v2, %s5645_s24 }
 0x1b8   :  { %1537 = vst.msk [vmem:[#allocation3 + $0x60] sm:$0xf8] %vm8891_vm14, %v1534_v13 }
 0x1b9   :  { %v6594_v21 = vpop.f32.mrf.mxu2  ;;  %v558_v28 = vmax.f32 %v488_v58, 0.0  ;;  %887 = vst.msk [vmem:[#allocation3 + $0x18] sm:$0x3f] %vm8898_vm12, %v881_v15 }
 0x1ba   :  { %v6602_v9 = vpop.f32.mrf.mxu3  ;;  %v1607_v11 = vrot.slane %v6594_v21, 4  ;;  %924 = vst.msk [vmem:[#allocation3 + $0x18] sm:$0x3f] %vm8897_vm3, %v6552_v48  ;;  %v2406_v37 = vld [vmem:[#allocation2 + $0x180] sm:$0xff] }
 0x1bb   :  { %v6600_v8 = vpop.f32.mrf.mxu1  ;;  %651 = vst.msk [vmem:[#allocation2 + $0x18b] sm:$0xf] %vm577_vm4, %v558_v28  ;;  %v1045_v47 = vpop.permute.xlu2 %1044  ;;  %v1654_v48 = vrot.slane %v6602_v9, 5 }
 0x1bc   :  { %v1717_v12 = vrot.slane %v6600_v8, 5  ;;  %653 = vst.msk [vmem:[#allocation2 + $0x18d] sm:$0xf0] %vm8901_vm5, %v558_v28  ;;  %1544 = vrot.lane.b32.xlu0 %v1543_v7, %s5644_s23  ;;  %v1614_v28 = vrot.slane %v6594_v21, 3 }
 0x1bd   :  { %1612 = vst.msk [vmem:[#allocation3 + $0x80] sm:$0x3] %vm8892_vm6, %v1607_v11 }
 0x1be   :  { %1721 = vrot.lane.b32.xlu1 %v1717_v12, %s5644_s23  ;;  %v490_v13 = vpop.f32.mrf.mxu0  ;;  %5488 = vmatmul.msk.f32.gmra.mxu2 %vm675_vm1, %v6429_v40  ;;  %v933_v18 = vpop.permute.xlu0 %932  ;;  %v1718_v29 = vsel %vm8888_vm15, %v1716_v20, %v1717_v12  ;;  %vm8895_vm15 = vcmask 782848  }
 0x1bf   :  { %v491_v16 = vadd.f32 %v6371_v10, %v490_v13  ;;  %938 = vst.msk [vmem:[#allocation3 + $0x8] sm:$0x80] %vm8887_vm10, %v933_v18  ;;  %1560 = vrot.lane.b32.xlu2 %v1556_v14, %s5646_s29  ;;  %v6646_v39 = vpop.permute.xlu1 %970  ;;  %vm8896_vm10 = vcmask 520448  }
 0x1c0   :  { %973 = vst.msk [vmem:[#allocation3 + $0x8] sm:$0x80] %vm8890_vm11, %v6646_v39  ;;  %vm8894_vm11 = vcmask 523526  }
 0x1c1   :  { %v6624_v22 = vpop.f32.mrf.mxu2  ;;  %v559_v26 = vmax.f32 %v491_v16, 0.0  ;;  %982 = vst.msk [vmem:[#allocation3 + $0x8] sm:$0x80] %vm8889_vm9, %v977_v6  ;;  %vm1712_vm9 = vcmask 253952  }
 0x1c2   :  { %v2407_v33 = vld [vmem:[#allocation2 + $0x188] sm:$0xff]  ;;  %v6631_v23 = vpop.f32.mrf.mxu3  ;;  %v1615_v46 = vrot.slane %v6624_v22, 3  ;;  %1713 = vst.msk [vmem:[#allocation3 + $0x90] sm:$0x1] %vm1712_vm9, %v1709_v63 }
 0x1c3   :  { %v6629_v32 = vpop.f32.mrf.mxu1  ;;  %654 = vst.msk [vmem:[#allocation2 + $0x195] sm:$0xff] %vm44_vm0, %v559_v26  ;;  %2422 = vmatpush.msra.mxu3 %v2407_v33  ;;  %2471 = vmatpush.msrb.mxu1 %v2407_v33  ;;  %v1673_v44 = vrot.slane %v6631_v23, 3  ;;  %v1662_v2 = vrot.slane %v6631_v23, 4  ;;  %v1730_v26 = vrot.slane %v6600_v8, 4  ;;  %v1661_v8 = vrot.slane %v6602_v9, 4 }
 0x1c4   :  { %1491 = vrot.lane.b32.xlu0 %v1487_v19, %s5645_s24  ;;  %v1731_v7 = vrot.slane %v6629_v32, 4  ;;  %v1616_v24 = vsel %vm8899_vm13, %v1614_v28, %v1615_v46 }
 0x1c5   :  { %2423 = vmatpush.msra.mxu3 %v2406_v37  ;;  %2472 = vmatpush.msrb.mxu1 %v2406_v37 }
 0x1c6   :  { %v493_v36 = vpop.f32.mrf.mxu0  ;;  %5489 = vmatmul.msk.f32.gmra.mxu2 %vm675_vm1, %v6457_v54  ;;  %5490 = vmatmul.msk.f32.vlgmr.msra.gmra.mxu3 %vm675_vm1, %v6393_v25  ;;  %v1034_v43 = vpop.permute.xlu0 %1033  ;;  %v1732_v31 = vsel %vm1540_vm8, %v1730_v26, %v1731_v7 }
 0x1c7   :  { %v494_v38 = vadd.f32 %v6371_v10, %v493_v36  ;;  %5493 = vmatmul.msk.f32.vlgmr.msrb.gmra.mxu1 %vm675_vm1, %v6393_v25  ;;  %1719 = vrot.lane.b32.xlu1 %v1718_v29, %s5644_s23  ;;  %1040 = vst.msk [vmem:[#allocation3 + $0x30] sm:$0x1f] %vm8896_vm10, %v1034_v43 }
 0x1c8   :  { %1558 = vrot.lane.b32.xlu2 %v1557_v35, %s5646_s29  ;;  %1051 = vst.msk [vmem:[#allocation3 + $0x30] sm:$0x1f] %vm8895_vm15, %v1045_v47 }
 0x1c9   :  { %v560_v30 = vmax.f32 %v494_v38, 0.0  ;;  %v6651_v41 = vpop.f32.mrf.mxu2  ;;  %v1137_v63 = vpop.permute.xlu2 %1136  ;;  %v1663_v38 = vsel %vm1540_vm8, %v1661_v8, %v1662_v2 }
 0x1ca   :  { %v1650_v34 = vpop.f32.mrf.mxu3  ;;  %v2512_v4 = vld [vmem:[#allocation2 + $0x190] sm:$0xff] }
 0x1cb   :  { %v6656_v45 = vpop.f32.mrf.mxu1  ;;  %655 = vst.msk [vmem:[#allocation2 + $0x19d] sm:$0x3] %vm8892_vm6, %v560_v30  ;;  %v1674_v49 = vrot.slane %v1650_v34, 3 }
 0x1cc   :  { %657 = vst.msk [vmem:[#allocation2 + $0x19f] sm:$0xfc] %vm586_vm7, %v560_v30  ;;  %1489 = vrot.lane.b32.xlu0 %v1488_v42, %s5645_s24  ;;  %v1890_v55 = vrot.slane %v6656_v45, 6 }
 0x1cd   :  { %v1675_v51 = vsel %vm8899_vm13, %v1673_v44, %v1674_v49  ;;  %1679 = vst.msk [vmem:[#allocation3 + $0x88] sm:$0x3] %vm8892_vm6, %v1674_v49  ;;  %vm8923_vm6 = vcmask 1041408   ;;  %vm8927_vm13 = vcmask 260096  }
 0x1ce   :  { %v496_v50 = vpop.f32.mrf.mxu0  ;;  %5491 = vmatmul.msk.f32.gmra.mxu3 %vm675_vm1, %v6429_v40  ;;  %1678 = vst.msk [vmem:[#allocation3 + $0x70] sm:$0xf8] %vm8891_vm14, %v1675_v51  ;;  %v1032_v61 = vpop.permute.xlu0 %1031  ;;  %vm8893_vm14 = vcmask 785926  }
 0x1cf   :  { %v497_v52 = vadd.f32 %v6371_v10, %v496_v50  ;;  %5494 = vmatmul.msk.f32.gmra.mxu1 %vm675_vm1, %v6429_v40  ;;  %1619 = vrot.lane.b32.xlu1 %v1615_v46, %s5644_s23  ;;  %1038 = vst.msk [vmem:[#allocation3 + $0x18] sm:$0xc0] %vm8894_vm11, %v1032_v61 }
 0x1d0   :  { %1655 = vrot.lane.b32.xlu2 %v1654_v48, %s5646_s29  ;;  %1049 = vst.msk [vmem:[#allocation3 + $0x18] sm:$0xc0] %vm8893_vm14, %v6627_v27 }
 0x1d1   :  { %v561_v57 = vmax.f32 %v497_v52, 0.0  ;;  %v6679_v59 = vpop.f32.mrf.mxu2 }
 0x1d2   :  { %v2513_v1 = vld [vmem:[#allocation2 + $0x198] sm:$0xff]  ;;  %v1782_v5 = vrot.slane %v6679_v59, 5  ;;  %v1789_v32 = vrot.slane %v6679_v59, 4  ;;  %v5641_v59 = vld [vmem:[%s8862_s1 + $0x8] sm:$0xff] }
 0x1d3   :  { %v6684_v62 = vpop.f32.mrf.mxu1  ;;  %658 = vst.msk [vmem:[#allocation2 + $0x1a7] sm:$0xff] %vm44_vm0, %v561_v57  ;;  %2528 = vmatpush.msrb.mxu2 %v2513_v1  ;;  %v1772_v1 = vrot.slane %v6651_v41, 6 }
 0x1d4   :  { %v1891_v3 = vrot.slane %v6684_v62, 6  ;;  %v1099_v0 = vpop.permute.xlu1 %1098  ;;  %1598 = vrot.lane.b32.xlu0 %v1597_v53, %s5645_s24  ;;  %1787 = vst.msk [vmem:[#allocation3 + $0x98] sm:$0x1] %vm1712_vm9, %v1782_v5 }
 0x1d5   :  { %1104 = vst.msk [vmem:[#allocation3 + $0x20] sm:$0xc0] %vm8894_vm11, %v1099_v0  ;;  %2529 = vmatpush.msrb.mxu2 %v2512_v4  ;;  %vm8925_vm11 = vcmask 521472   ;;  %v1899_v0 = vrot.slane %v6684_v62, 5 }
 0x1d6   :  { %v1892_v60 = vsel %vm8923_vm6, %v1890_v55, %v1891_v3  ;;  %v499_v58 = vpop.f32.mrf.mxu0  ;;  %5492 = vmatmul.msk.f32.gmra.mxu3 %vm675_vm1, %v6457_v54  ;;  %5496 = vmatmul.msk.f32.vlgmr.msrb.gmra.mxu2 %vm675_vm1, %v6393_v25  ;;  %1139 = vst.msk [vmem:[#allocation3 + $0x20] sm:$0xc0] %vm8893_vm14, %v1137_v63  ;;  %v979_v15 = vpop.permute.xlu0 %978  ;;  %vm8902_vm6 = vcmask 516096   ;;  %vm8924_vm14 = vcmask 261126  }
 0x1d7   :  { %v500_v6 = vadd.f32 %v6371_v10, %v499_v58  ;;  %5495 = vmatmul.msk.f32.gmra.mxu1 %vm675_vm1, %v6457_v54  ;;  %1666 = vrot.lane.b32.xlu1 %v1662_v2, %s5645_s24  ;;  %114 = vst.msk [vmem:[#allocation4 + $0x18] sm:$0x1] %vm8902_vm6, %v5643_v17 }
 0x1d8   :  { %1893 = vrot.lane.b32.xlu2 %v1892_v60, %s5644_s23  ;;  %112 = vst.msk [vmem:[#allocation4 + $0x8] sm:$0x1] %vm8902_vm6, %v5643_v17 }
 0x1d9   :  { %v562_v12 = vmax.f32 %v500_v6, 0.0  ;;  %v6713_v14 = vpop.f32.mrf.mxu3  ;;  %116 = vst.msk [vmem:[#allocation4 + $0x28] sm:$0x1] %vm8902_vm6, %v5643_v17 }
 0x1da   :  { %v2568_v13 = vld [vmem:[#allocation2 + $0x1a8] sm:$0xff]  ;;  %v1768_v16 = vpop.f32.mrf.mxu2  ;;  %v2567_v20 = vld [vmem:[#allocation2 + $0x1a0] sm:$0xff]  ;;  %118 = vst.msk [vmem:[#allocation4 + $0x38] sm:$0x1] %vm8902_vm6, %v5643_v17  ;;  %v1829_v44 = vrot.slane %v6713_v14, 6  ;;  %v1836_v60 = vrot.slane %v6713_v14, 5 }
 0x1db   :  { %660 = vst.msk [vmem:[#allocation2 + $0x1b1] sm:$0xff] %vm44_vm0, %v562_v12  ;;  %2583 = vmatpush.msrb.mxu3 %v2568_v13  ;;  %2638 = vmatpush.msra.mxu1 %v2568_v13  ;;  %v1790_v19 = vrot.slane %v1768_v16, 4  ;;  %v6742_v29 = vpop.f32.mrf.mxu1 }
 0x1dc   :  { %v1101_v18 = vpop.permute.xlu1 %1100  ;;  %1735 = vrot.lane.b32.xlu0 %v1731_v7, %s5646_s29  ;;  %120 = vst.msk [vmem:[#allocation4 + $0x48] sm:$0x1] %vm8902_vm6, %v5643_v17  ;;  %v1900_v4 = vrot.slane %v6742_v29, 5 }
 0x1dd   :  { %1105 = vst.msk [vmem:[#allocation3 + $0x38] sm:$0x1f] %vm8896_vm10, %v1101_v18  ;;  %2584 = vmatpush.msrb.mxu3 %v2567_v20  ;;  %2639 = vmatpush.msra.mxu1 %v2567_v20  ;;  %v1791_v30 = vsel %vm1540_vm8, %v1789_v32, %v1790_v19  ;;  %vm8911_vm10 = vcmask 1048326  }
 0x1de   :  { %1140 = vst.msk [vmem:[#allocation3 + $0x38] sm:$0x1f] %vm8895_vm15, %v1137_v63  ;;  %v502_v27 = vpop.f32.mrf.mxu0  ;;  %5497 = vmatmul.msk.f32.gmra.mxu2 %vm675_vm1, %v6429_v40  ;;  %5499 = vmatmul.msk.f32.vlgmr.msrb.gmra.mxu3 %vm675_vm1, %v6393_v25  ;;  %v935_v35 = vpop.permute.xlu0 %934  ;;  %vm1377_vm15 = vcmask 518400   ;;  %v3352_v42 = vld [vmem:[#allocation4 + $0x18] sm:$0x1] }
 0x1df   :  { %v503_v22 = vadd.f32 %v6371_v10, %v502_v27  ;;  %5502 = vmatmul.msk.f32.vlgmr.msra.gmra.mxu1 %vm675_vm1, %v6393_v25  ;;  %1617 = vrot.lane.b32.xlu1 %v1616_v24, %s5644_s23  ;;  %939 = vst.msk [vmem:[#allocation3 + $0x20] sm:$0x3f] %vm8925_vm11, %v935_v35  ;;  %vm8912_vm11 = vcmask 519424  }
 0x1e0   :  { %1794 = vrot.lane.b32.xlu2 %v1790_v19, %s5644_s23  ;;  %v1372_v36 = vpop.permute.xlu2 %1371  ;;  %974 = vst.msk [vmem:[#allocation3 + $0x20] sm:$0x3f] %vm8898_vm12, %v6646_v39  ;;  %vm8900_vm12 = vcmask 523524  }
 0x1e1   :  { %v563_v33 = vmax.f32 %v503_v22, 0.0  ;;  %v6740_v37 = vpop.f32.mrf.mxu3  ;;  %983 = vst.msk [vmem:[#allocation3 + $0x20] sm:$0x3f] %vm8897_vm3, %v979_v15  ;;  %vm8903_vm3 = vcmask 1045248  }
 0x1e2   :  { %1378 = vst.msk [vmem:[#allocation3 + $0x60] sm:$0x7] %vm1377_vm15, %v1372_v36  ;;  %v1848_v39 = vrot.slane %v6740_v37, 4  ;;  %v1837_v53 = vrot.slane %v6740_v37, 5  ;;  %v2679_v61 = vld [vmem:[#allocation2 + $0x1b0] sm:$0xff] }
 0x1e3   :  { %661 = vst.msk [vmem:[#allocation2 + $0x1b9] sm:$0x3f] %vm571_vm2, %v563_v33 }
 0x1e4   :  { %v1197_v9 = vpop.permute.xlu1 %1196  ;;  %663 = vst.msk [vmem:[#allocation2 + $0x1bb] sm:$0xc0] %vm8924_vm14, %v563_v33  ;;  %1733 = vrot.lane.b32.xlu0 %v1732_v31, %s5646_s29  ;;  %vm8926_vm14 = vcmask 1040384   ;;  %v3010_v31 = vld [vmem:[%s8863_s5 + $0x78] sm:$0xff] }
 0x1e5   :  { %5536 = vmatpush.msk.msrb.mxu0 %vm8926_vm14, %v3352_v42  ;;  %1203 = vst.msk [vmem:[#allocation3 + $0x48] sm:$0xf] %vm8912_vm11, %v1197_v9  ;;  %vm8908_vm14 = vcmask 523525  }
 0x1e6   :  { %v505_v43 = vpop.f32.mrf.mxu0  ;;  %5498 = vmatmul.msk.f32.gmra.mxu2 %vm675_vm1, %v6457_v54  ;;  %5500 = vmatmul.msk.f32.gmra.mxu3 %vm675_vm1, %v6429_v40  ;;  %v1083_v48 = vpop.permute.xlu0 %1082  ;;  %122 = vst.msk [vmem:[#allocation4 + $0x58] sm:$0x1] %vm8902_vm6, %v5643_v17 }
 0x1e7   :  { %v506_v23 = vadd.f32 %v6371_v10, %v505_v43  ;;  %5503 = vmatmul.msk.f32.gmra.mxu1 %vm675_vm1, %v6429_v40  ;;  %1664 = vrot.lane.b32.xlu1 %v1663_v38, %s5645_s24  ;;  %1086 = vst.msk [vmem:[#allocation3 + $0x18] sm:$0xc0] %vm8911_vm10, %v1083_v48  ;;  %v3008_v43 = vld [vmem:[%s8863_s5 + $0x68] sm:$0xff] }
 0x1e8   :  { %1792 = vrot.lane.b32.xlu2 %v1791_v30, %s5644_s23  ;;  %1088 = vst.msk [vmem:[#allocation3 + $0x30] sm:$0x1f] %vm8903_vm3, %v1083_v48  ;;  %v3009_v30 = vld [vmem:[%s8863_s5 + $0x70] sm:$0xff] }
 0x1e9   :  { %v564_v46 = vmax.f32 %v506_v23, 0.0  ;;  %v1825_v47 = vpop.f32.mrf.mxu3  ;;  %v6774_v34 = vpop.f32.mrf.mxu2  ;;  %124 = vst.msk [vmem:[#allocation4 + $0x68] sm:$0x1] %vm8902_vm6, %v5643_v17 }
 0x1ea   :  { %v1370_v49 = vpop.permute.xlu2 %1369  ;;  %v1849_v50 = vrot.slane %v1825_v47, 4  ;;  %v2680_v51 = vld [vmem:[#allocation2 + $0x1b8] sm:$0xff]  ;;  %126 = vst.msk [vmem:[#allocation4 + $0x78] sm:$0x1] %vm8902_vm6, %v5643_v17  ;;  %v1936_v35 = vrot.slane %v6774_v34, 7 }
 0x1eb   :  { %664 = vst.msk [vmem:[#allocation2 + $0x1c3] sm:$0xff] %vm44_vm0, %v564_v46  ;;  %2695 = vmatpush.msra.mxu2 %v2680_v51 }
 0x1ec   :  { %v1195_v52 = vpop.permute.xlu1 %1194  ;;  %v1850_v55 = vsel %vm1540_vm8, %v1848_v39, %v1849_v50  ;;  %v2023_v57 = vpop.f32.mrf.mxu1  ;;  %1830 = vrot.lane.b32.xlu0 %v1829_v44, %s5646_s29  ;;  %1376 = vst.msk [vmem:[#allocation3 + $0x48] sm:$0xf0] %vm8900_vm12, %v1370_v49  ;;  %vm8907_vm12 = vcmask 781824   ;;  %v3007_v49 = vld [vmem:[%s8863_s5 + $0x60] sm:$0xff] }
 0x1ed   :  { %2696 = vmatpush.msra.mxu2 %v2679_v61  ;;  %1853 = vst.msk [vmem:[#allocation3 + $0x88] sm:$0xfc] %vm586_vm7, %v1850_v55  ;;  %v2035_v28 = vrot.slane %v2023_v57, 7 }
 0x1ee   :  { %v508_v2 = vpop.f32.mrf.mxu0  ;;  %5501 = vmatmul.msk.f32.gmra.mxu3 %vm675_vm1, %v6457_v54  ;;  %5505 = vmatmul.msk.f32.vlgmr.msra.gmra.mxu2 %vm675_vm1, %v6393_v25  ;;  %1854 = vst.msk [vmem:[#allocation3 + $0xa0] sm:$0x1] %vm1712_vm9, %v1849_v50  ;;  %vm8928_vm9 = vcmask 1042432   ;;  %v1211_v18 = vpop.permute.xlu0 %1210 }
 0x1ef   :  { %v509_v3 = vadd.f32 %v6371_v10, %v508_v2  ;;  %1773 = vrot.lane.b32.xlu1 %v1772_v1, %s5645_s24  ;;  %5504 = vmatmul.msk.f32.gmra.mxu1 %vm675_vm1, %v6457_v54  ;;  %2032 = vst.msk [vmem:[#allocation3 + $0xa8] sm:$0x7f] %vm8927_vm13, %v2023_v57  ;;  %v1901_v14 = vsel %vm8928_vm9, %v1899_v0, %v1900_v4  ;;  %vm8929_vm13 = vmmov %vm8928_vm9  ;;  %v3005_v57 = vld [vmem:[%s8863_s5 + $0x50] sm:$0xff]  ;;  %v5639_v2 = vld [vmem:[%s8861_s4] ss:$0 sm:$0xff] }
 0x1f0   :  { %1841 = vrot.lane.b32.xlu2 %v1837_v53, %s5645_s24  ;;  %1201 = vst.msk [vmem:[#allocation3 + $0x30] sm:$0xe0] %vm8908_vm14, %v1195_v52  ;;  %v1838_v13 = vsel %vm8929_vm13, %v1836_v60, %v1837_v53  ;;  %v3006_v52 = vld [vmem:[%s8863_s5 + $0x58] sm:$0xff]  ;;  %vm8932_vm13 = vcmask 1041408   ;;  %v3004_v0 = vld [vmem:[%s8863_s5 + $0x48] sm:$0xff] }
 0x1f1   :  { %v565_v63 = vmax.f32 %v509_v3, 0.0  ;;  %v6801_v58 = vpop.f32.mrf.mxu2  ;;  %v6805_v62 = vpop.f32.mrf.mxu3  ;;  %1217 = vst.msk [vmem:[#allocation3 + $0x48] sm:$0xf] %vm8907_vm12, %v1211_v18 }
 0x1f2   :  { %v1270_v6 = vpop.permute.xlu2 %1269  ;;  %v1949_v24 = vrot.slane %v6801_v58, 5  ;;  %128 = vst.msk [vmem:[#allocation4 + $0x88] sm:$0x1] %vm8902_vm6, %v5643_v17  ;;  %v1985_v33 = vrot.slane %v6805_v62, 7  ;;  %v2734_v29 = vld [vmem:[#allocation2 + $0x1c0] sm:$0xff]  ;;  %v1991_v23 = vrot.slane %v6805_v62, 6 }
 0x1f3   :  { %665 = vst.msk [vmem:[#allocation2 + $0x1cb] sm:$0xf] %vm577_vm4, %v565_v63  ;;  %v3002_v62 = vld [vmem:[%s8863_s5 + $0x38] sm:$0xff] }
 0x1f4   :  { %v1148_v7 = vpop.permute.xlu1 %1147  ;;  %667 = vst.msk [vmem:[#allocation2 + $0x1cd] sm:$0xf0] %vm8901_vm5, %v565_v63  ;;  %v6808_v12 = vpop.f32.mrf.mxu1  ;;  %vm8930_vm5 = vcmask 1040384  }
 0x1f5   :  { %1274 = vst.msk [vmem:[#allocation3 + $0x50] sm:$0xf] %vm8912_vm11, %v1270_v6  ;;  %v2036_v15 = vrot.slane %v6808_v12, 7  ;;  %v2043_v46 = vrot.slane %v6808_v12, 6  ;;  %vm8950_vm11 = vcmask 1040384  }
 0x1f6   :  { %1152 = vst.msk [vmem:[#allocation3 + $0x38] sm:$0x1f] %vm8903_vm3, %v1148_v7  ;;  %v511_v16 = vpop.f32.mrf.mxu0  ;;  %5506 = vmatmul.msk.f32.gmra.mxu2 %vm675_vm1, %v6429_v40  ;;  %vm8904_vm3 = vcmask 1048325  }
 0x1f7   :  { %v512_v19 = vadd.f32 %v6371_v10, %v511_v16  ;;  %1902 = vrot.lane.b32.xlu1 %v1901_v14, %s5646_s29  ;;  %v2037_v20 = vsel %vm8930_vm5, %v2035_v28, %v2036_v15  ;;  %130 = vst.msk [vmem:[#allocation4 + $0x98] sm:$0x1] %vm8902_vm6, %v5643_v17  ;;  %vm8931_vm5 = vmmov %vm8928_vm9  ;;  %vm8906_vm9 = vcmask 785925   ;;  %v3003_v28 = vld [vmem:[%s8863_s5 + $0x40] sm:$0xff]  ;;  %v3001_v15 = vld [vmem:[%s8863_s5 + $0x30] sm:$0xff] }
 0x1f8   :  { %1839 = vrot.lane.b32.xlu2 %v1838_v13, %s5645_s24  ;;  %2038 = vrot.lane.b32.xlu0 %v2037_v20, %s5644_s23  ;;  %132 = vst.msk [vmem:[#allocation4 + $0xa8] sm:$0x1] %vm8902_vm6, %v5643_v17  ;;  %v3026_v16 = vld [vmem:[%s8863_s5 + $0xf8] sm:$0xff]  ;;  %v5640_v20 = vld [vmem:[%s8862_s1] sm:$0xff] }
 0x1f9   :  { %v566_v26 = vmax.f32 %v512_v19, 0.0  ;;  %v1932_v27 = vpop.f32.mrf.mxu2  ;;  %v6840_v36 = vpop.f32.mrf.mxu3  ;;  %134 = vst.msk [vmem:[#allocation4 + $0xb8] sm:$0x1] %vm8902_vm6, %v5643_v17  ;;  %v3000_v19 = vld [vmem:[%s8863_s5 + $0x28] sm:$0xff] }
 0x1fa   :  { %v6828_v22 = vpop.permute.xlu2 %1316  ;;  %v1950_v8 = vrot.slane %v1932_v27, 5  ;;  %v2735_v32 = vld [vmem:[#allocation2 + $0x1c8] sm:$0xff]  ;;  %136 = vst.msk [vmem:[#allocation4 + $0xc8] sm:$0x1] %vm8902_vm6, %v5643_v17  ;;  %v1992_v44 = vrot.slane %v6840_v36, 6 }
 0x1fb   :  { %668 = vst.msk [vmem:[#allocation2 + $0x1d5] sm:$0xff] %vm44_vm0, %v566_v26  ;;  %2750 = vmatpush.msra.mxu3 %v2735_v32  ;;  %2805 = vmatpush.msrb.mxu1 %v2735_v32 }
 0x1fc   :  { %v1146_v37 = vpop.permute.xlu1 %1145  ;;  %v1951_v9 = vsel %vm8931_vm5, %v1949_v24, %v1950_v8  ;;  %138 = vst.msk [vmem:[#allocation4 + $0xd8] sm:$0x1] %vm8902_vm6, %v5643_v17  ;;  %v2029_v39 = vpop.f32.mrf.mxu1  ;;  %v1993_v53 = vsel %vm8932_vm13, %v1991_v23, %v1992_v44  ;;  %vm8933_vm5 = vcmask 254976   ;;  %v3025_v24 = vld [vmem:[%s8863_s5 + $0xf0] sm:$0xff] }
 0x1fd   :  { %2751 = vmatpush.msra.mxu3 %v2734_v29  ;;  %2806 = vmatpush.msrb.mxu1 %v2734_v29  ;;  %140 = vst.msk [vmem:[#allocation4 + $0xe8] sm:$0x1] %vm8902_vm6, %v5643_v17  ;;  %v2044_v50 = vrot.slane %v2029_v39, 6  ;;  %v3024_v29 = vld [vmem:[%s8863_s5 + $0xe8] sm:$0xff]  ;;  %v2997_v44 = vld [vmem:[%s8863_s5 + $0x10] sm:$0xff]  ;;  %v3022_v39 = vld [vmem:[%s8863_s5 + $0xd8] sm:$0xff] }
 0x1fe   :  { %v514_v38 = vpop.f32.mrf.mxu0  ;;  %5507 = vmatmul.msk.f32.gmra.mxu2 %vm675_vm1, %v6457_v54  ;;  %5508 = vmatmul.msk.f32.vlgmr.msra.gmra.mxu3 %vm675_vm1, %v6393_v25  ;;  %142 = vst.msk [vmem:[#allocation4 + $0xf8] sm:$0x1] %vm8902_vm6, %v5643_v17 }
 0x1ff   :  { %v515_v42 = vadd.f32 %v6371_v10, %v514_v38  ;;  %3074 = vmatpush.msra.mxu1 %v3010_v31  ;;  %1986 = vrot.lane.b32.xlu1 %v1985_v33, %s5646_s29  ;;  %144 = vst.msk [vmem:[#allocation4 + $0x108] sm:$0x1] %vm8902_vm6, %v5643_v17  ;;  %v2998_v38 = vld [vmem:[%s8863_s5 + $0x18] sm:$0xff] }
 0x200   :  { %1952 = vrot.lane.b32.xlu0 %v1951_v9, %s5644_s23  ;;  %5511 = vmatmul.msk.f32.vlgmr.msrb.gmra.mxu1 %vm675_vm1, %v6393_v25  ;;  %v1209_v25 = vpop.permute.xlu0 %1208  ;;  %146 = vst.msk [vmem:[#allocation4 + $0x118] sm:$0x1] %vm8902_vm6, %v5643_v17  ;;  %vm8934_vm6 = vmmov %vm8932_vm13  ;;  %vm8905_vm13 = vcmask 1044224   ;;  %v1885_v9 = vrot.slane %v6656_v45, 7  ;;  %v3030_v45 = vld [vmem:[%s8863_s5 + $0x118] sm:$0xff] }
 0x201   :  { %3075 = vmatpush.msra.mxu1 %v3009_v30  ;;  %v6870_v10 = vpop.f32.mrf.mxu2  ;;  %1937 = vrot.lane.b32.xlu2 %v1936_v35, %s5645_s24  ;;  %v567_v47 = vmax.f32 %v515_v42, 0.0  ;;  %1151 = vst.msk [vmem:[#allocation3 + $0x20] sm:$0xc0] %vm8911_vm10, %v1146_v37  ;;  %v2045_v61 = vsel %vm8934_vm6, %v2043_v46, %v2044_v50  ;;  %v6896_v1 = vpop.f32.mrf.mxu3  ;;  %vm8909_vm6 = vcmask 780800   ;;  %v1781_v37 = vrot.slane %v6651_v41, 5  ;;  %v3023_v42 = vld [vmem:[%s8863_s5 + $0xe0] sm:$0xff] }
 0x202   :  { %v1268_v48 = vpop.permute.xlu2 %1267  ;;  %1215 = vst.msk [vmem:[#allocation3 + $0x30] sm:$0xe0] %vm8906_vm9, %v1209_v25  ;;  %v2846_v13 = vld [vmem:[#allocation2 + $0x1d0] sm:$0xff]  ;;  %v2000_v8 = vrot.slane %v6896_v1, 5  ;;  %v3029_v46 = vld [vmem:[%s8863_s5 + $0x110] sm:$0xff]  ;;  %vm1725_vm10 = vcmask 523522  }
 0x203   :  { %3076 = vmatpush.msra.mxu1 %v3008_v43  ;;  %669 = vst.msk [vmem:[#allocation2 + $0x1dd] sm:$0x3] %vm8933_vm5, %v567_v47  ;;  %vm8935_vm5 = vcmask 261127  }
 0x204   :  { %v1249_v51 = vpop.permute.xlu1 %1248  ;;  %671 = vst.msk [vmem:[#allocation2 + $0x1df] sm:$0xfc] %vm586_vm7, %v567_v47 }
 0x205   :  { %3077 = vmatpush.msra.mxu1 %v3007_v49  ;;  %1273 = vst.msk [vmem:[#allocation3 + $0x38] sm:$0xe0] %vm8908_vm14, %v1268_v48  ;;  %v2996_v48 = vld [vmem:[%s8863_s5 + $0x8] sm:$0xff]  ;;  %vm8939_vm14 = vcmask 1040384  }
 0x206   :  { %v517_v55 = vpop.f32.mrf.mxu0  ;;  %5509 = vmatmul.msk.f32.gmra.mxu3 %vm675_vm1, %v6429_v40  ;;  %1252 = vst.msk [vmem:[#allocation3 + $0x30] sm:$0xe0] %vm8904_vm3, %v1249_v51 }
 0x207   :  { %v518_v3 = vadd.f32 %v5639_v2, %v517_v55  ;;  %3078 = vmatpush.msra.mxu1 %v3006_v52  ;;  %2079 = vrot.lane.b32.xlu1 %v6870_v10, %s5645_s24  ;;  %1254 = vst.msk [vmem:[#allocation3 + $0x48] sm:$0xf] %vm8905_vm13, %v1249_v51  ;;  %v3028_v51 = vld [vmem:[%s8863_s5 + $0x108] sm:$0xff]  ;;  %v3019_v2 = vld [vmem:[%s8863_s5 + $0xc0] sm:$0xff] }
 0x208   :  { %1994 = vrot.lane.b32.xlu0 %v1993_v53, %s5645_s24  ;;  %5512 = vmatmul.msk.f32.gmra.mxu1 %vm675_vm1, %v6429_v40  ;;  %v1306_v63 = vpop.permute.xlu0 %1305  ;;  %v2995_v53 = vld [vmem:[%s8863_s5] sm:$0xff]  ;;  %v3020_v55 = vld [vmem:[%s8863_s5 + $0xc8] sm:$0xff] }
 0x209   :  { %v568_v4 = vmax.f32 %v518_v3, 0.0  ;;  %3079 = vmatpush.msra.mxu1 %v3005_v57  ;;  %v6911_v60 = vpop.f32.mrf.mxu2  ;;  %2046 = vrot.lane.b32.xlu2 %v2045_v61, %s5646_s29  ;;  %1308 = vst.msk [vmem:[#allocation3 + $0x38] sm:$0xe0] %vm8906_vm9, %v1306_v63  ;;  %vm8936_vm9 = vcmask 1041408   ;;  %v3027_v3 = vld [vmem:[%s8863_s5 + $0x100] sm:$0xff] }
 0x20a   :  { %v1315_v6 = vpop.permute.xlu2 %1314  ;;  %v2847_v12 = vld [vmem:[#allocation2 + $0x1d8] sm:$0xff]  ;;  %1309 = vst.msk [vmem:[#allocation3 + $0x50] sm:$0xf] %vm8907_vm12, %v1306_v63  ;;  %v2090_v18 = vrot.slane %v6911_v60, 6  ;;  %vm8937_vm12 = vcmask 1042432  }
 0x20b   :  { %3080 = vmatpush.msra.mxu1 %v3004_v0  ;;  %672 = vst.msk [vmem:[#allocation2 + $0x1e7] sm:$0xff] %vm44_vm0, %v568_v4  ;;  %2862 = vmatpush.msrb.mxu2 %v2847_v12  ;;  %v1783_v47 = vsel %vm8937_vm12, %v1781_v37, %v1782_v5  ;;  %v3021_v5 = vld [vmem:[%s8863_s5 + $0xd0] sm:$0xff]  ;;  %v2956_v0 = vld [vmem:[#allocation3] sm:$0xff] }
 0x20c   :  { %v1386_v40 = vpop.permute.xlu1 %1385  ;;  %v2163_v7 = vpop.f32.mrf.mxu1  ;;  %1321 = vst.msk [vmem:[#allocation3 + $0x50] sm:$0xf] %vm8905_vm13, %v6828_v22  ;;  %v1999_v22 = vrot.slane %v6840_v36, 5  ;;  %vm8910_vm13 = vcmask 785924   ;;  %v1606_v36 = vrot.slane %v6566_v56, 4 }
 0x20d   :  { %3081 = vmatpush.msra.mxu1 %v3003_v28  ;;  %v2173_v14 = vrot.slane %v2163_v7, 1  ;;  %1320 = vst.msk [vmem:[#allocation3 + $0x38] sm:$0xe0] %vm8904_vm3, %v1315_v6  ;;  %2863 = vmatpush.msrb.mxu2 %v2846_v13  ;;  %vm1428_vm3 = vcmask 1043200   ;;  %v3018_v6 = vld [vmem:[%s8863_s5 + $0xb8] sm:$0xff] }
 0x20e   :  { %5510 = vmatmul.msk.f32.gmra.mxu3 %vm675_vm1, %v6457_v54  ;;  %5514 = vmatmul.msk.f32.vlgmr.msrb.gmra.mxu2 %vm675_vm1, %v5640_v20  ;;  %1392 = vst.msk [vmem:[#allocation3 + $0x60] sm:$0x7] %vm8909_vm6, %v1386_v40  ;;  %v2001_v43 = vsel %vm8937_vm12, %v1999_v22, %v2000_v8  ;;  %v1608_v49 = vsel %vm1540_vm8, %v1606_v36, %v1607_v11  ;;  %vm8938_vm12 = vcmask 261123   ;;  %v5642_v40 = vld [vmem:[%s8862_s1 + $0x10] sm:$0x1f]  ;;  %v2959_v22 = vld [vmem:[#allocation3 + $0x18] sm:$0xff] }
 0x20f   :  { %3082 = vmatpush.msra.mxu1 %v3002_v62  ;;  %2178 = vrot.lane.b32.xlu1 %v2163_v7, %s5644_s23  ;;  %2175 = vst.msk [vmem:[#allocation3 + $0xa8] sm:$0x80] %vm8935_vm5, %v2173_v14  ;;  %vm1426_vm5 = vcmask 1048324   ;;  %v3017_v62 = vld [vmem:[%s8863_s5 + $0xb0] sm:$0xff]  ;;  %v3012_v36 = vld [vmem:[%s8863_s5 + $0x88] sm:$0xff] }
 0x210   :  { %5513 = vmatmul.msk.f32.gmra.mxu1 %vm675_vm1, %v6457_v54  ;;  %v2999_v54 = vld [vmem:[%s8863_s5 + $0x20] sm:$0xff]  ;;  %3130 = vmatpush.msra.mxu2 %v3026_v16  ;;  %2176 = vst.msk [vmem:[#allocation3 + $0xc0] sm:$0x3f] %vm571_vm2, %v2173_v14 }
 0x211   :  { %3083 = vmatpush.msra.mxu1 %v3001_v15  ;;  %v6950_v26 = vpop.f32.mrf.mxu3  ;;  %v2075_v27 = vpop.f32.mrf.mxu2  ;;  %1786 = vst.msk [vmem:[#allocation3 + $0x80] sm:$0xfc] %vm586_vm7, %v1783_v47  ;;  %vm8940_vm7 = vcmask 523524  }
 0x212   :  { %v2091_v32 = vrot.slane %v2075_v27, 6  ;;  %v1424_v33 = vpop.permute.xlu2 %1423  ;;  %2126 = vrot.lane.b32.xlu2 %v6950_v26, %s5646_s29  ;;  %v2902_v31 = vld [vmem:[#allocation2 + $0x1e8] sm:$0xff]  ;;  %3131 = vmatpush.msra.mxu2 %v3025_v24  ;;  %v2901_v56 = vld [vmem:[#allocation2 + $0x1e0] sm:$0xff]  ;;  %v2131_v25 = vrot.slane %v6950_v26, 7  ;;  %1611 = vst.msk [vmem:[#allocation3 + $0x68] sm:$0xf8] %vm8938_vm12, %v1608_v49 }
 0x213   :  { %3084 = vmatpush.msra.mxu1 %v3000_v19  ;;  %1429 = vst.msk [vmem:[#allocation3 + $0x60] sm:$0x7] %vm1428_vm3, %v1424_v33  ;;  %2917 = vmatpush.msrb.mxu3 %v2902_v31  ;;  %vm8942_vm12 = vcmask 1040384   ;;  %v3015_v24 = vld [vmem:[%s8863_s5 + $0xa0] sm:$0xff]  ;;  %v1943_v27 = vrot.slane %v6774_v34, 6  ;;  %v3013_v34 = vld [vmem:[%s8863_s5 + $0x90] sm:$0xff] }
 0x214   :  { %v1384_v35 = vpop.permute.xlu1 %1383  ;;  %v2092_v41 = vsel %vm8936_vm9, %v2090_v18, %v2091_v32  ;;  %v6973_v30 = vpop.f32.mrf.mxu1  ;;  %vm1887_vm9 = vcmask 261121   ;;  %3132 = vmatpush.msra.mxu2 %v3024_v29  ;;  %v3016_v18 = vld [vmem:[%s8863_s5 + $0xa8] sm:$0xff]  ;;  %v3014_v32 = vld [vmem:[%s8863_s5 + $0x98] sm:$0xff] }
 0x215   :  { %3085 = vmatpush.msra.mxu1 %v2999_v54  ;;  %2093 = vrot.lane.b32.xlu0 %v2092_v41, %s5644_s23  ;;  %1390 = vst.msk [vmem:[#allocation3 + $0x48] sm:$0xf0] %vm8910_vm13, %v1384_v35  ;;  %v2187_v11 = vrot.slane %v6973_v30, 7  ;;  %v1944_v54 = vrot.slane %v6801_v58, 6 }
 0x216   :  { %2918 = vmatpush.msrb.mxu3 %v2901_v56  ;;  %v1445_v23 = vpop.permute.xlu0 %1444  ;;  %1427 = vst.msk [vmem:[#allocation3 + $0x48] sm:$0xf0] %vm1426_vm5, %v1424_v33  ;;  %3133 = vmatpush.msra.mxu2 %v3023_v42 }
 0x217   :  { %5517 = vmatmul.msk.f32.vlgmr.msrb.gmra.mxu3 %vm675_vm1, %v5640_v20  ;;  %3086 = vmatpush.msra.mxu1 %v2998_v38  ;;  %1449 = vst.msk [vmem:[#allocation3 + $0x68] sm:$0x7] %vm1377_vm15, %v1445_v23  ;;  %v2962_v38 = vld [vmem:[#allocation3 + $0x30] sm:$0xff] }
 0x218   :  { %3198 = vmatpush.msra.mxu3 %v3030_v45  ;;  %1888 = vst.msk [vmem:[#allocation3 + $0x90] sm:$0xfe] %vm1887_vm9, %v1885_v9  ;;  %5515 = vmatmul.msk.f32.gmra.mxu2 %vm675_vm1, %v5641_v59  ;;  %v3011_v9 = vld [vmem:[%s8863_s5 + $0x80] sm:$0xff]  ;;  %v2957_v45 = vld [vmem:[#allocation3 + $0x8] sm:$0xff] }
 0x219   :  { %3087 = vmatpush.msra.mxu1 %v2997_v44  ;;  %v2119_v50 = vpop.f32.mrf.mxu3  ;;  %2003 = vst.msk [vmem:[#allocation3 + $0xa0] sm:$0xfe] %vm1887_vm9, %v2001_v43  ;;  %3134 = vmatpush.msra.mxu2 %v3022_v39 }
 0x21a   :  { %v2132_v21 = vrot.slane %v2119_v50, 7  ;;  %v7019_v52 = vpop.permute.xlu2 %1560  ;;  %3199 = vmatpush.msra.mxu3 %v3029_v46  ;;  %2180 = vrot.lane.b32.xlu2 %v6973_v30, %s5644_s23  ;;  %v2139_v28 = vrot.slane %v2119_v50, 6  ;;  %v2958_v30 = vld [vmem:[#allocation3 + $0x10] sm:$0xff] }
 0x21b   :  { %3088 = vmatpush.msra.mxu1 %v2996_v48  ;;  %3135 = vmatpush.msra.mxu2 %v3021_v5  ;;  %v2961_v48 = vld [vmem:[#allocation3 + $0x28] sm:$0xff] }
 0x21c   :  { %v1481_v57 = vpop.permute.xlu1 %1480  ;;  %v2133_v61 = vsel %vm8939_vm14, %v2131_v25, %v2132_v21  ;;  %v2169_v1 = vpop.f32.mrf.mxu1  ;;  %3200 = vmatpush.msra.mxu3 %v3028_v51  ;;  %vm8941_vm14 = vcmask 261127  }
 0x21d   :  { %1484 = vst.msk [vmem:[#allocation3 + $0x68] sm:$0x7] %vm8909_vm6, %v1481_v57  ;;  %3089 = vmatpush.msra.mxu1 %v2995_v53  ;;  %2134 = vrot.lane.b32.xlu1 %v2133_v61, %s5645_s24  ;;  %v2188_v63 = vrot.slane %v2169_v1, 7  ;;  %vm8915_vm6 = vcmask 517376   ;;  %v2965_v25 = vld [vmem:[#allocation3 + $0x48] sm:$0xff]  ;;  %v2084_v1 = vrot.slane %v6870_v10, 7 }
 0x21e   :  { %3136 = vmatpush.msra.mxu2 %v3020_v55  ;;  %2190 = vrot.lane.b32.xlu0 %v2187_v11, %s5646_s29  ;;  %v1443_v4 = vpop.permute.xlu0 %1442 }
 0x21f   :  { %3090 = vmatmul.f32.vlgmr.msra.gmra.mxu1 %v2956_v0  ;;  %5518 = vmatmul.msk.f32.gmra.mxu3 %vm675_vm1, %v5641_v59  ;;  %1448 = vst.msk [vmem:[#allocation3 + $0x50] sm:$0xf0] %vm8940_vm7, %v1443_v4  ;;  %v2189_v16 = vsel %vm8942_vm12, %v2187_v11, %v2188_v63  ;;  %vm8943_vm7 = vcmask 1041408   ;;  %vm8946_vm12 = vcmask 258048   ;;  %v2960_v59 = vld [vmem:[#allocation3 + $0x20] sm:$0xff] }
 0x220   :  { %3137 = vmatpush.msra.mxu2 %v3019_v2  ;;  %1483 = vst.msk [vmem:[#allocation3 + $0x50] sm:$0xf0] %vm8910_vm13, %v1481_v57  ;;  %3201 = vmatpush.msra.mxu3 %v3027_v3  ;;  %vm8944_vm13 = vcmask 260096   ;;  %v2964_v57 = vld [vmem:[#allocation3 + $0x40] sm:$0xff]  ;;  %v2085_v2 = vrot.slane %v6911_v60, 7  ;;  %v2963_v3 = vld [vmem:[#allocation3 + $0x38] sm:$0xff] }
 0x221   :  { %5516 = vmatmul.msk.f32.gmra.mxu2 %vm675_vm1, %v5642_v40  ;;  %v2122_v7 = vpop.f32.mrf.mxu3  ;;  %v2217_v12 = vpop.f32.mrf.mxu2 }
 0x222   :  { %3138 = vmatpush.msra.mxu2 %v3018_v6  ;;  %v2140_v14 = vrot.slane %v2122_v7, 6  ;;  %v2227_v15 = vrot.slane %v2217_v12, 1  ;;  %2233 = vst.msk [vmem:[#allocation3 + $0xb0] sm:$0x80] %vm8941_vm14, %v2217_v12  ;;  %v1559_v13 = vpop.permute.xlu2 %1558  ;;  %vm8914_vm14 = vcmask 779776  }
 0x224   :  { %3139 = vmatpush.msra.mxu2 %v3017_v62  ;;  %v2141_v19 = vsel %vm8943_vm7, %v2139_v28, %v2140_v14  ;;  %v7060_v20 = vpop.f32.mrf.mxu1  ;;  %2228 = vrot.lane.b32.xlu2 %v2227_v15, %s5645_s24 }
 0x225   :  { %2143 = vst.msk [vmem:[#allocation3 + $0xb8] sm:$0x7f] %vm8944_vm13, %v2141_v19  ;;  %2192 = vrot.lane.b32.xlu1 %v2189_v16, %s5646_s29  ;;  %v2329_v26 = vrot.slane %v7060_v20, 2  ;;  %vm8945_vm13 = vcmask 261126   ;;  %v2334_v47 = vrot.slane %v7060_v20, 1 }
 0x226   :  { %3140 = vmatpush.msra.mxu2 %v3016_v18  ;;  %v1547_v8 = vpop.permute.xlu0 %1546 }
 0x227   :  { %3093 = vmatmul.f32.gmra.mxu1 %v2959_v22  ;;  %5519 = vmatmul.msk.f32.gmra.mxu3 %vm675_vm1, %v5642_v40  ;;  %1553 = vst.msk [vmem:[#allocation3 + $0x78] sm:$0x3] %vm8915_vm6, %v1547_v8  ;;  %vm8947_vm1 = vmmov %vm8943_vm7  ;;  %vm1550_vm7 = vcmask 523523   ;;  %v2967_v40 = vld [vmem:[#allocation3 + $0x58] sm:$0xff] }
 0x228   :  { %3141 = vmatpush.msra.mxu2 %v3015_v24  ;;  %2331 = vst.msk [vmem:[#allocation3 + $0xc0] sm:$0xc0] %vm8945_vm13, %v2329_v26  ;;  %v1945_v35 = vsel %vm8947_vm1, %v1943_v27, %v1944_v54  ;;  %vm1564_vm13 = vcmask 785923   ;;  %vm8948_vm1 = vcmask 261127  }
 0x229   :  { %v7080_v58 = vpop.f32.mrf.mxu2  ;;  %v2267_v33 = vpop.f32.mrf.mxu3  ;;  %2332 = vst.msk [vmem:[#allocation3 + $0xd8] sm:$0x1f] %vm8946_vm12, %v2329_v26  ;;  %vm1896_vm12 = vcmask 523521   ;;  %v2970_v26 = vld [vmem:[#allocation3 + $0x70] sm:$0xff] }
 0x22a   :  { %3142 = vmatpush.msra.mxu2 %v3014_v32  ;;  %2234 = vst.msk [vmem:[#allocation3 + $0xc8] sm:$0x3f] %vm571_vm2, %v7080_v58  ;;  %v2237_v37 = vrot.slane %v7080_v58, 7  ;;  %v2277_v29 = vrot.slane %v2267_v33, 1  ;;  %v7086_v31 = vpop.permute.xlu2 %1655 }
 0x22b   :  { %1567 = vst.msk [vmem:[#allocation3 + $0x78] sm:$0x3] %vm8914_vm14, %v7019_v52 }
 0x22c   :  { %3143 = vmatpush.msra.mxu2 %v3013_v34  ;;  %2278 = vrot.lane.b32.xlu0 %v2277_v29, %s5646_s29  ;;  %1947 = vst.msk [vmem:[#allocation3 + $0x98] sm:$0xfe] %vm1887_vm9, %v1945_v35  ;;  %v2322_v41 = vpop.f32.mrf.mxu1  ;;  %vm1727_vm9 = vcmask 516352  }
 0x22d   :  { %2240 = vrot.lane.b32.xlu1 %v2237_v37, %s5644_s23  ;;  %2284 = vrot.lane.b32.xlu2 %v2267_v33, %s5645_s24  ;;  %v2335_v43 = vrot.slane %v2322_v41, 1 }
 0x22e   :  { %3144 = vmatpush.msra.mxu2 %v3012_v36  ;;  %v1545_v42 = vpop.permute.xlu0 %1544 }
 0x22f   :  { %3096 = vmatmul.f32.gmra.mxu1 %v2962_v38  ;;  %5520 = vmatmul.msk.f32.vlgmr.msra.gmra.mxu3 %vm44_vm0, %v2958_v30  ;;  %1551 = vst.msk [vmem:[#allocation3 + $0x60] sm:$0xf8] %vm1550_vm7, %v1545_v42 }
 0x230   :  { %v1722_v56 = vpop.permute.xlu1 %1721  ;;  %3145 = vmatpush.msra.mxu2 %v3011_v9  ;;  %1565 = vst.msk [vmem:[#allocation3 + $0x60] sm:$0xf8] %vm1564_vm13, %v1559_v13 }
 0x231   :  { %1728 = vst.msk [vmem:[#allocation3 + $0x90] sm:$0x1] %vm1727_vm9, %v1722_v56  ;;  %3146 = vmatmul.f32.vlgmr.msra.gmra.mxu2 %v2957_v45  ;;  %v7106_v23 = vpop.f32.mrf.mxu2  ;;  %v2270_v44 = vpop.f32.mrf.mxu3  ;;  %v2976_v45 = vld [vmem:[#allocation3 + $0xa0] sm:$0xff] }
 0x232   :  { %v2293_v39 = vrot.slane %v2270_v44, 7  ;;  %v1894_v46 = vpop.permute.xlu2 %1893  ;;  %v2238_v12 = vrot.slane %v7106_v23, 7 }
 0x233   :  { %1897 = vst.msk [vmem:[#allocation3 + $0x90] sm:$0xfe] %vm1896_vm12, %v1894_v46 }
 0x234   :  { %2298 = vst.msk [vmem:[#allocation3 + $0xb8] sm:$0x80] %vm8948_vm1, %v2293_v39  ;;  %2339 = vrot.lane.b32.xlu0 %v2335_v43, %s5644_s23  ;;  %v2325_v5 = vpop.f32.mrf.mxu1  ;;  %vm8949_vm1 = vcmask 1046528  }
 0x235   :  { %2346 = vrot.lane.b32.xlu2 %v2322_v41, %s5646_s29  ;;  %v2336_v21 = vsel %vm8949_vm1, %v2334_v47, %v2335_v43  ;;  %vm8953_vm1 = vcmask 260096  }
 0x236   :  { %v1492_v49 = vpop.permute.xlu0 %1491 }
 0x237   :  { %3099 = vmatmul.f32.gmra.mxu1 %v2965_v25  ;;  %5521 = vmatmul.msk.f32.gmra.mxu3 %vm44_vm0, %v2961_v48  ;;  %1496 = vst.msk [vmem:[#allocation3 + $0x68] sm:$0x7] %vm1428_vm3, %v1492_v49 }
 0x239   :  { %3149 = vmatmul.f32.gmra.mxu2 %v2960_v59  ;;  %v1720_v50 = vpop.permute.xlu1 %1719  ;;  %v7116_v51 = vpop.f32.mrf.mxu2 }
 0x23a   :  { %1726 = vst.msk [vmem:[#allocation3 + $0x78] sm:$0xfc] %vm1725_vm10, %v1720_v50  ;;  %v1795_v11 = vpop.permute.xlu2 %1794  ;;  %v2273_v52 = vpop.f32.mrf.mxu3  ;;  %v2383_v8 = vrot.slane %v7116_v51, 2 }
 0x23b   :  { %1799 = vst.msk [vmem:[#allocation3 + $0x98] sm:$0x1] %vm1727_vm9, %v1795_v11  ;;  %v2294_v53 = vrot.slane %v2273_v52, 7  ;;  %vm8916_vm9 = vcmask 1048323  }
 0x23c   :  { %2337 = vrot.lane.b32.xlu0 %v2336_v21, %s5644_s23  ;;  %v2979_v21 = vld [vmem:[#allocation3 + $0xb8] sm:$0xff] }
 0x23d   :  { %v2295_v55 = vsel %vm8950_vm11, %v2293_v39, %v2294_v53  ;;  %2348 = vrot.lane.b32.xlu2 %v2325_v5, %s5646_s29 }
 0x23e   :  { %v1490_v61 = vpop.permute.xlu0 %1489  ;;  %2299 = vst.msk [vmem:[#allocation3 + $0xd0] sm:$0x3f] %vm571_vm2, %v2295_v55  ;;  %vm8951_vm2 = vmmov %vm8950_vm11  ;;  %vm8952_vm11 = vcmask 258048  }
 0x23f   :  { %5522 = vmatmul.msk.f32.gmra.mxu3 %vm44_vm0, %v2964_v57  ;;  %1495 = vst.msk [vmem:[#allocation3 + $0x50] sm:$0xf0] %vm1426_vm5, %v1490_v61  ;;  %v2086_v10 = vsel %vm8951_vm2, %v2084_v1, %v2085_v2  ;;  %vm8913_vm2 = vcmask 1042176  }
 0x240   :  { %2088 = vst.msk [vmem:[#allocation3 + $0xb0] sm:$0x7f] %vm8953_vm1, %v2086_v10  ;;  %vm1741_vm1 = vcmask 778752  }
 0x241   :  { %3152 = vmatmul.f32.gmra.mxu2 %v2963_v3  ;;  %v1620_v0 = vpop.permute.xlu1 %1619  ;;  %v7129_v4 = vpop.f32.mrf.mxu2 }
 0x242   :  { %1624 = vst.msk [vmem:[#allocation3 + $0x80] sm:$0x3] %vm8915_vm6, %v1620_v0  ;;  %v2391_v63 = vrot.slane %v7129_v4, 1  ;;  %v1793_v6 = vpop.permute.xlu2 %1792  ;;  %2398 = vrot.lane.b32.xlu1 %v7129_v4, %s5644_s23  ;;  %vm1776_vm6 = vcmask 1048322  }
 0x243   :  { %1798 = vst.msk [vmem:[#allocation3 + $0x80] sm:$0xfc] %vm1725_vm10, %v1793_v6  ;;  %vm8954_vm10 = vcmask 261125  }
 0x244   :  { %2396 = vst.msk [vmem:[#allocation3 + $0xe0] sm:$0x1f] %vm8952_vm11, %v2391_v63  ;;  %v2474_v60 = vpop.f32.mrf.mxu1  ;;  %2286 = vrot.lane.b32.xlu0 %v2270_v44, %s5645_s24  ;;  %vm8955_vm11 = vcmask 1040384  }
 0x245   :  { %v2484_v28 = vrot.slane %v2474_v60, 3  ;;  %1659 = vst.msk [vmem:[#allocation3 + $0x80] sm:$0x3] %vm8914_vm14, %v7086_v31  ;;  %v2239_v19 = vsel %vm8955_vm11, %v2237_v37, %v2238_v12  ;;  %v2489_v58 = vrot.slane %v2474_v60, 2  ;;  %vm1739_vm11 = vcmask 785922   ;;  %v2973_v37 = vld [vmem:[#allocation3 + $0x88] sm:$0xff] }
 0x246   :  { %v1599_v62 = vpop.permute.xlu0 %1598  ;;  %v2966_v7 = vld [vmem:[#allocation3 + $0x50] sm:$0xff]  ;;  %vm8960_vm14 = vcmask 256000  }
 0x247   :  { %2486 = vst.msk [vmem:[#allocation3 + $0xd8] sm:$0xe0] %vm8954_vm10, %v2484_v28  ;;  %5523 = vmatmul.msk.f32.gmra.mxu3 %vm44_vm0, %v2967_v40  ;;  %vm8956_vm10 = vcmask 261126   ;;  %v2390_v40 = vrot.slane %v7116_v51, 1 }
 0x248   :  { %2487 = vst.msk [vmem:[#allocation3 + $0xf0] sm:$0xf] %vm577_vm4, %v2484_v28 }
 0x249   :  { %1602 = vst.msk [vmem:[#allocation3 + $0x60] sm:$0xf8] %vm8916_vm9, %v1599_v62  ;;  %3155 = vmatmul.f32.gmra.mxu2 %v2966_v7  ;;  %v1667_v14 = vpop.permute.xlu1 %1666  ;;  %v2379_v15 = vpop.f32.mrf.mxu2 }
 0x24a   :  { %1604 = vst.msk [vmem:[#allocation3 + $0x78] sm:$0x3] %vm8913_vm2, %v1599_v62  ;;  %v7150_v13 = vpop.f32.mrf.mxu3  ;;  %v7152_v16 = vpop.permute.xlu2 %1841  ;;  %2400 = vrot.lane.b32.xlu1 %v2379_v15, %s5644_s23 }
 0x24b   :  { %1671 = vst.msk [vmem:[#allocation3 + $0x80] sm:$0x3] %vm8913_vm2, %v1667_v14  ;;  %v2435_v18 = vrot.slane %v7150_v13, 2  ;;  %vm8957_vm2 = vcmask 1045504   ;;  %v2442_v59 = vrot.slane %v7150_v13, 1 }
 0x24c   :  { %v2477_v20 = vpop.f32.mrf.mxu1  ;;  %2242 = vrot.lane.b32.xlu0 %v2239_v19, %s5644_s23 }
 0x24d   :  { %2436 = vrot.lane.b32.xlu2 %v2435_v18, %s5646_s29  ;;  %v2490_v24 = vrot.slane %v2477_v20, 2  ;;  %v2501_v42 = vrot.slane %v2477_v20, 1 }
 0x24e   :  { %v1736_v27 = vpop.permute.xlu0 %1735 }
 0x24f   :  { %5524 = vmatmul.msk.f32.gmra.mxu3 %vm44_vm0, %v2970_v26  ;;  %1742 = vst.msk [vmem:[#allocation3 + $0x90] sm:$0x1] %vm1741_vm1, %v1736_v27  ;;  %v2491_v35 = vsel %vm8957_vm2, %v2489_v58, %v2490_v24  ;;  %vm8959_vm2 = vcmask 261124  }
 0x250   :  { %v2968_v54 = vld [vmem:[#allocation3 + $0x60] sm:$0xff] }
 0x251   :  { %3102 = vmatmul.f32.gmra.mxu1 %v2968_v54  ;;  %v1618_v22 = vpop.permute.xlu1 %1617 }
 0x252   :  { %1623 = vst.msk [vmem:[#allocation3 + $0x68] sm:$0xf8] %vm1550_vm7, %v1618_v22  ;;  %v7166_v32 = vpop.f32.mrf.mxu3  ;;  %v1840_v34 = vpop.permute.xlu2 %1839  ;;  %2494 = vrot.lane.b32.xlu1 %v2490_v24, %s5644_s23 }
 0x253   :  { %1658 = vst.msk [vmem:[#allocation3 + $0x68] sm:$0xf8] %vm1564_vm13, %v7086_v31  ;;  %v2443_v23 = vrot.slane %v7166_v32, 1 }
 0x254   :  { %2453 = vst.msk [vmem:[#allocation3 + $0xd0] sm:$0xc0] %vm8956_vm10, %v7166_v32  ;;  %v2480_v33 = vpop.f32.mrf.mxu1  ;;  %2384 = vrot.lane.b32.xlu0 %v2383_v8, %s5645_s24  ;;  %vm8958_vm10 = vcmask 258048  }
 0x255   :  { %v2502_v36 = vrot.slane %v2480_v33, 1 }
 0x256   :  { %v1734_v29 = vpop.permute.xlu0 %1733 }
 0x257   :  { %5525 = vmatmul.msk.f32.gmra.mxu3 %vm44_vm0, %v2973_v37  ;;  %1740 = vst.msk [vmem:[#allocation3 + $0x78] sm:$0xfc] %vm1739_vm11, %v1734_v29 }
 0x259   :  { %v1665_v9 = vpop.permute.xlu1 %1664  ;;  %v7177_v41 = vpop.f32.mrf.mxu2 }
 0x25a   :  { %1670 = vst.msk [vmem:[#allocation3 + $0x68] sm:$0xf8] %vm8916_vm9, %v1665_v9  ;;  %v2431_v31 = vpop.f32.mrf.mxu3  ;;  %2492 = vrot.lane.b32.xlu1 %v2491_v35, %s5644_s23  ;;  %vm1778_vm9 = vcmask 1041152   ;;  %v2541_v60 = vrot.slane %v7177_v41, 3 }
 0x25b   :  { %2454 = vst.msk [vmem:[#allocation3 + $0xe8] sm:$0x1f] %vm8958_vm10, %v2431_v31  ;;  %v1938_v38 = vpop.permute.xlu2 %1937  ;;  %vm8961_vm10 = vcmask 1046528   ;;  %v2982_v10 = vld [vmem:[#allocation3 + $0xd0] sm:$0xff] }
 0x25c   :  { %v2641_v30 = vpop.f32.mrf.mxu1  ;;  %2506 = vrot.lane.b32.xlu0 %v2502_v36, %s5646_s29  ;;  %v2503_v47 = vsel %vm8961_vm10, %v2501_v42, %v2502_v36 }
 0x25d   :  { %v2651_v56 = vrot.slane %v2641_v30, 4  ;;  %v2656_v11 = vrot.slane %v2641_v30, 3 }
 0x25e   :  { %v1831_v43 = vpop.permute.xlu0 %1830 }
 0x25f   :  { %2653 = vst.msk [vmem:[#allocation3 + $0xf0] sm:$0xf0] %vm8959_vm2, %v2651_v56  ;;  %5526 = vmatmul.msk.f32.gmra.mxu3 %vm44_vm0, %v2976_v45  ;;  %vm8965_vm2 = vcmask 784896  }
 0x260   :  { %2654 = vst.msk [vmem:[#allocation3 + $0x108] sm:$0x7] %vm8960_vm14, %v2651_v56  ;;  %vm1905_vm14 = vcmask 785921  }
 0x261   :  { %1833 = vst.msk [vmem:[#allocation3 + $0x80] sm:$0xfc] %vm1739_vm11, %v1831_v43  ;;  %v1774_v44 = vpop.permute.xlu1 %1773  ;;  %v7188_v39 = vpop.f32.mrf.mxu2  ;;  %v2969_v46 = vld [vmem:[#allocation3 + $0x68] sm:$0xff]  ;;  %vm8964_vm11 = vcmask 1044480  }
 0x262   :  { %1834 = vst.msk [vmem:[#allocation3 + $0x98] sm:$0x1] %vm1741_vm1, %v1831_v43  ;;  %v7192_v25 = vpop.f32.mrf.mxu3  ;;  %3158 = vmatmul.f32.gmra.mxu2 %v2969_v46  ;;  %2447 = vrot.lane.b32.xlu1 %v2443_v23, %s5645_s24  ;;  %v2549_v5 = vrot.slane %v7188_v39, 2  ;;  %vm1940_vm1 = vcmask 1048321   ;;  %v2556_v29 = vrot.slane %v7188_v39, 1 }
 0x263   :  { %1845 = vst.msk [vmem:[#allocation3 + $0x80] sm:$0xfc] %vm1776_vm6, %v1840_v34  ;;  %v2047_v48 = vpop.permute.xlu2 %2046  ;;  %v2596_v52 = vrot.slane %v7192_v25, 3  ;;  %v2603_v43 = vrot.slane %v7192_v25, 2 }
 0x264   :  { %1846 = vst.msk [vmem:[#allocation3 + $0x98] sm:$0x1] %vm1778_vm9, %v7152_v16  ;;  %v2644_v49 = vpop.f32.mrf.mxu1  ;;  %2504 = vrot.lane.b32.xlu0 %v2503_v47, %s5646_s29 }
 0x265   :  { %1777 = vst.msk [vmem:[#allocation3 + $0x78] sm:$0xfc] %vm1776_vm6, %v1774_v44  ;;  %v2657_v50 = vrot.slane %v2644_v49, 3  ;;  %vm8962_vm6 = vmmov %vm8961_vm10  ;;  %v2668_v16 = vrot.slane %v2644_v49, 2 }
 0x266   :  { %1779 = vst.msk [vmem:[#allocation3 + $0x90] sm:$0x1] %vm1778_vm9, %v1774_v44  ;;  %v2444_v57 = vsel %vm8962_vm6, %v2442_v59, %v2443_v23  ;;  %vm8963_vm9 = vcmask 522496   ;;  %vm8966_vm10 = vmmov %vm8962_vm6  ;;  %v2392_v24 = vsel %vm8962_vm6, %v2390_v40, %v2391_v63  ;;  %vm8975_vm6 = vcmask 523527  }
 0x267   :  { %2554 = vst.msk [vmem:[#allocation3 + $0xf8] sm:$0xf] %vm577_vm4, %v2549_v5  ;;  %5527 = vmatmul.msk.f32.gmra.mxu3 %vm44_vm0, %v2979_v21  ;;  %2661 = vrot.lane.b32.xlu2 %v2657_v50, %s5644_s23  ;;  %v2658_v0 = vsel %vm8964_vm11, %v2656_v11, %v2657_v50  ;;  %vm8970_vm11 = vcmask 261126  }
 0x268   :  { %2395 = vst.msk [vmem:[#allocation3 + $0xc8] sm:$0xc0] %vm8970_vm11, %v2392_v24  ;;  %vm8979_vm11 = vcmask 1045504  }
 0x269   :  { %v1903_v53 = vpop.permute.xlu1 %1902  ;;  %v7209_v55 = vpop.f32.mrf.mxu2 }
 0x26a   :  { %1906 = vst.msk [vmem:[#allocation3 + $0x90] sm:$0xfe] %vm1905_vm14, %v1903_v53  ;;  %v7213_v61 = vpop.f32.mrf.mxu3  ;;  %v2972_v1 = vld [vmem:[#allocation3 + $0x80] sm:$0xff]  ;;  %v2039_v2 = vpop.permute.xlu0 %2038  ;;  %2445 = vrot.lane.b32.xlu1 %v2444_v57, %s5645_s24  ;;  %v2557_v51 = vrot.slane %v7209_v55, 1 }
 0x26b   :  { %1941 = vst.msk [vmem:[#allocation3 + $0x90] sm:$0xfe] %vm1940_vm1, %v1938_v38  ;;  %3161 = vmatmul.f32.gmra.mxu2 %v2972_v1  ;;  %v2615_v62 = vrot.slane %v7213_v61, 1  ;;  %v2604_v63 = vrot.slane %v7213_v61, 2  ;;  %v2548_v38 = vrot.slane %v7177_v41, 2 }
 0x26c   :  { %v2971_v3 = vld [vmem:[#allocation3 + $0x78] sm:$0xff]  ;;  %2041 = vst.msk [vmem:[#allocation3 + $0xa8] sm:$0x7f] %vm8963_vm9, %v2039_v2  ;;  %2597 = vrot.lane.b32.xlu0 %v2596_v52, %s5646_s29  ;;  %v7220_v6 = vpop.permute.xlu2 %2126  ;;  %v7226_v28 = vpop.f32.mrf.mxu1  ;;  %vm8967_vm9 = vcmask 261125  }
 0x26d   :  { %3105 = vmatmul.f32.gmra.mxu1 %v2971_v3  ;;  %2049 = vst.msk [vmem:[#allocation3 + $0xa8] sm:$0x7f] %vm8965_vm2, %v2047_v48  ;;  %v2669_v19 = vrot.slane %v7226_v28, 2  ;;  %vm8972_vm2 = vcmask 256000   ;;  %v2550_v23 = vsel %vm8979_vm11, %v2548_v38, %v2549_v5 }
 0x26f   :  { %5528 = vmatmul.msk.f32.gmra.mxu3 %vm44_vm0, %v2982_v10  ;;  %2659 = vrot.lane.b32.xlu2 %v2658_v0, %s5644_s23 }
 0x271   :  { %v7230_v7 = vpop.f32.mrf.mxu2  ;;  %v1987_v12 = vpop.permute.xlu1 %1986 }
 0x272   :  { %v2592_v14 = vpop.f32.mrf.mxu3  ;;  %v1953_v15 = vpop.permute.xlu0 %1952  ;;  %2542 = vrot.lane.b32.xlu1 %v2541_v60, %s5645_s24  ;;  %v2974_v13 = vld [vmem:[#allocation3 + $0x90] sm:$0xff]  ;;  %v2708_v21 = vrot.slane %v7230_v7, 4 }
 0x273   :  { %v2616_v18 = vrot.slane %v2592_v14, 1  ;;  %1955 = vst.msk [vmem:[#allocation3 + $0x98] sm:$0xfe] %vm1896_vm12, %v1953_v15  ;;  %vm8968_vm12 = vcmask 1045504  }
 0x274   :  { %1989 = vst.msk [vmem:[#allocation3 + $0x98] sm:$0xfe] %vm1905_vm14, %v1987_v12  ;;  %v2181_v26 = vpop.permute.xlu2 %2180  ;;  %v2670_v27 = vsel %vm8968_vm12, %v2668_v16, %v2669_v19  ;;  %vm8969_vm14 = vcmask 521472   ;;  %vm8977_vm12 = vcmask 522496  }
 0x275   :  { %v2617_v20 = vsel %vm8966_vm10, %v2615_v62, %v2616_v18  ;;  %2621 = vst.msk [vmem:[#allocation3 + $0x100] sm:$0xf] %vm577_vm4, %v2616_v18  ;;  %3108 = vmatmul.f32.gmra.mxu1 %v2974_v13  ;;  %vm8971_vm4 = vcmask 1047296   ;;  %vm8973_vm10 = vcmask 261123  }
 0x276   :  { %2620 = vst.msk [vmem:[#allocation3 + $0xe8] sm:$0xe0] %vm8967_vm9, %v2617_v20  ;;  %vm8976_vm9 = vcmask 1046528  }
 0x277   :  { %2561 = vrot.lane.b32.xlu2 %v2557_v51, %s5644_s23  ;;  %2185 = vst.msk [vmem:[#allocation3 + $0xc0] sm:$0x3f] %vm8969_vm14, %v2181_v26  ;;  %v2558_v30 = vsel %vm8976_vm9, %v2556_v29, %v2557_v51  ;;  %vm8978_vm14 = vcmask 784896   ;;  %vm8985_vm9 = vcmask 1048327  }
 0x279   :  { %v7249_v54 = vpop.f32.mrf.mxu2  ;;  %v2080_v22 = vpop.permute.xlu1 %2079 }
 0x27a   :  { %v2716_v4 = vrot.slane %v7249_v54, 3  ;;  %v1995_v8 = vpop.permute.xlu0 %1994  ;;  %2671 = vrot.lane.b32.xlu1 %v2670_v27, %s5646_s29  ;;  %2082 = vst.msk [vmem:[#allocation3 + $0xa8] sm:$0x7f] %vm8971_vm4, %v2080_v22  ;;  %v2723_v42 = vrot.slane %v7249_v54, 2  ;;  %vm8980_vm4 = vmmov %vm8979_vm11  ;;  %vm8988_vm11 = vcmask 261124  }
 0x27b   :  { %1997 = vst.msk [vmem:[#allocation3 + $0x98] sm:$0xfe] %vm1940_vm1, %v1995_v8  ;;  %vm8974_vm1 = vcmask 254976  }
 0x27c   :  { %2721 = vst.msk [vmem:[#allocation3 + $0x110] sm:$0x7] %vm8972_vm2, %v2716_v4  ;;  %vm8981_vm2 = vcmask 261125  }
 0x27d   :  { %v2985_v32 = vld [vmem:[#allocation3 + $0xe8] sm:$0xff]  ;;  %v7259_v34 = vpop.f32.mrf.mxu1  ;;  %2553 = vst.msk [vmem:[#allocation3 + $0xe0] sm:$0xe0] %vm8981_vm2, %v2550_v23  ;;  %vm8989_vm2 = vcmask 783872  }
 0x27e   :  { %5529 = vmatmul.msk.f32.gmra.mxu3 %vm44_vm0, %v2985_v32  ;;  %v2818_v58 = vrot.slane %v7259_v34, 5  ;;  %v2229_v44 = vpop.permute.xlu2 %2228 }
 0x27f   :  { %2608 = vrot.lane.b32.xlu2 %v2604_v63, %s5645_s24 }
 0x280   :  { %2820 = vst.msk [vmem:[#allocation3 + $0x108] sm:$0xf8] %vm8973_vm10, %v2818_v58  ;;  %vm8982_vm10 = vmmov %vm8980_vm4 }
 0x281   :  { %v2704_v33 = vpop.f32.mrf.mxu2  ;;  %v2753_v37 = vpop.f32.mrf.mxu3  ;;  %2821 = vst.msk [vmem:[#allocation3 + $0x120] sm:$0x3] %vm8974_vm1, %v2818_v58  ;;  %v2605_v46 = vsel %vm8982_vm10, %v2603_v43, %v2604_v63  ;;  %vm8983_vm1 = vcmask 1047296   ;;  %vm8990_vm10 = vcmask 1046272  }
 0x282   :  { %v2724_v35 = vrot.slane %v2704_v33, 2  ;;  %v2763_v36 = vrot.slane %v2753_v37, 4  ;;  %v2975_v9 = vld [vmem:[#allocation3 + $0x98] sm:$0xff]  ;;  %v2179_v31 = vpop.permute.xlu1 %2178  ;;  %v2770_v53 = vrot.slane %v2753_v37, 3 }
 0x283   :  { %3164 = vmatmul.f32.gmra.mxu2 %v2975_v9  ;;  %2184 = vst.msk [vmem:[#allocation3 + $0xa8] sm:$0x80] %vm8975_vm6, %v2179_v31  ;;  %vm8984_vm6 = vcmask 785927   ;;  %v2715_v31 = vrot.slane %v7230_v7, 3 }
 0x284   :  { %2728 = vrot.lane.b32.xlu0 %v2724_v35, %s5644_s23  ;;  %2764 = vrot.lane.b32.xlu1 %v2763_v36, %s5646_s29  ;;  %v2725_v41 = vsel %vm8980_vm4, %v2723_v42, %v2724_v35  ;;  %v3429_v36 = vld [vmem:[#allocation4 + $0x28] sm:$0x1] }
 0x285   :  { %v7295_v11 = vpop.f32.mrf.mxu1 }
 0x286   :  { %v2824_v10 = vrot.slane %v7295_v11, 4  ;;  %v2835_v15 = vrot.slane %v7295_v11, 3 }
 0x287   :  { %2559 = vrot.lane.b32.xlu2 %v2558_v30, %s5644_s23  ;;  %v2094_v56 = vpop.permute.xlu0 %2093  ;;  %v2285_v52 = vpop.permute.xlu2 %2284  ;;  %v7385_v30 = vld [vmem:[%s8864_s6] ss:$0 sm:$0xff] }
 0x288   :  { %2096 = vst.msk [vmem:[#allocation3 + $0xb0] sm:$0x7f] %vm8977_vm12, %v2094_v56  ;;  %vm8986_vm12 = vmmov %vm8980_vm4  ;;  %vm8917_vm4 = vcmask 523264  }
 0x289   :  { %2129 = vst.msk [vmem:[#allocation3 + $0xb0] sm:$0x7f] %vm8978_vm14, %v7220_v6  ;;  %v2756_v45 = vpop.f32.mrf.mxu3  ;;  %vm8987_vm14 = vcmask 256000   ;;  %v2823_v6 = vrot.slane %v7259_v34, 4 }
 0x28a   :  { %v2782_v48 = vrot.slane %v2756_v45, 2  ;;  %v2771_v49 = vrot.slane %v2756_v45, 3  ;;  %113 = vst.msk [vmem:[#allocation4 + $0x10] sm:$0xff] %vm8917_vm4, %v5643_v17 }
 0x28b   :  { %115 = vst.msk [vmem:[#allocation4 + $0x20] sm:$0xff] %vm8917_vm4, %v5643_v17  ;;  %v2825_v16 = vsel %vm1540_vm8, %v2823_v6, %v2824_v10 }
 0x28c   :  { %2726 = vrot.lane.b32.xlu0 %v2725_v41, %s5644_s23  ;;  %110 = vst.msk [vmem:[#allocation4] sm:$0xff] %vm8917_vm4, %v5643_v17 }
 0x28d   :  { %117 = vst.msk [vmem:[#allocation4 + $0x30] sm:$0xff] %vm8917_vm4, %v5643_v17  ;;  %v7328_v12 = vpop.f32.mrf.mxu1 }
 0x28e   :  { %119 = vst.msk [vmem:[#allocation4 + $0x40] sm:$0xff] %vm8917_vm4, %v5643_v17  ;;  %v2836_v13 = vrot.slane %v7328_v12, 3 }
 0x28f   :  { %2606 = vrot.lane.b32.xlu2 %v2605_v46, %s5645_s24  ;;  %v2135_v47 = vpop.permute.xlu1 %2134  ;;  %v2347_v40 = vpop.permute.xlu2 %2346  ;;  %121 = vst.msk [vmem:[#allocation4 + $0x50] sm:$0xff] %vm8917_vm4, %v5643_v17 }
 0x290   :  { %2137 = vst.msk [vmem:[#allocation3 + $0xb0] sm:$0x7f] %vm8983_vm1, %v2135_v47  ;;  %v2191_v25 = vpop.permute.xlu0 %2190  ;;  %vm8991_vm1 = vcmask 1044480  }
 0x291   :  { %2196 = vst.msk [vmem:[#allocation3 + $0xa8] sm:$0x80] %vm8984_vm6, %v2191_v25  ;;  %v2759_v39 = vpop.f32.mrf.mxu3  ;;  %v7291_v50 = vpop.f32.mrf.mxu2  ;;  %v2772_v2 = vsel %vm8991_vm1, %v2770_v53, %v2771_v49  ;;  %vm8992_vm6 = vcmask 254976   ;;  %v3511_v25 = vld [vmem:[#allocation4 + $0x48] sm:$0x1] }
 0x292   :  { %2231 = vst.msk [vmem:[#allocation3 + $0xa8] sm:$0x80] %vm8985_vm9, %v2229_v44  ;;  %v2783_v59 = vrot.slane %v2759_v39, 2  ;;  %vm8993_vm9 = vcmask 523527   ;;  %v2875_v58 = vrot.slane %v7291_v50, 5 }
 0x293   :  { %123 = vst.msk [vmem:[#allocation4 + $0x60] sm:$0xff] %vm8917_vm4, %v5643_v17  ;;  %v3551_v39 = vld [vmem:[#allocation4 + $0x48] sm:$0x1] }
 0x294   :  { %v2784_v5 = vsel %vm8986_vm12, %v2782_v48, %v2783_v59  ;;  %2788 = vst.msk [vmem:[#allocation3 + $0x118] sm:$0x7] %vm8987_vm14, %v2783_v59  ;;  %2775 = vrot.lane.b32.xlu0 %v2771_v49, %s5645_s24  ;;  %vm8994_vm12 = vcmask 785927   ;;  %vm8995_vm14 = vcmask 1048327   ;;  %v3308_v48 = vld [vmem:[#allocation4 + $0x8] sm:$0x1] }
 0x295   :  { %2787 = vst.msk [vmem:[#allocation3 + $0x100] sm:$0xf0] %vm8988_vm11, %v2784_v5  ;;  %vm8996_vm11 = vmmov %vm8991_vm1 }
 0x296   :  { %125 = vst.msk [vmem:[#allocation4 + $0x70] sm:$0xff] %vm8917_vm4, %v5643_v17  ;;  %v2837_v20 = vsel %vm8996_vm11, %v2835_v15, %v2836_v13  ;;  %vm9004_vm11 = vcmask 523526  }
 0x297   :  { %2709 = vrot.lane.b32.xlu2 %v2708_v21, %s5645_s24  ;;  %v2193_v55 = vpop.permute.xlu1 %2192  ;;  %127 = vst.msk [vmem:[#allocation4 + $0x80] sm:$0xff] %vm8917_vm4, %v5643_v17  ;;  %v2349_v8 = vpop.permute.xlu2 %2348 }
 0x298   :  { %2197 = vst.msk [vmem:[#allocation3 + $0xc0] sm:$0x3f] %vm8989_vm2, %v2193_v55  ;;  %vm8997_vm2 = vmmov %vm8991_vm1  ;;  %vm8999_vm1 = vcmask 782848  }
 0x299   :  { %2232 = vst.msk [vmem:[#allocation3 + $0xc0] sm:$0x3f] %vm8990_vm10, %v2229_v44  ;;  %v2977_v57 = vld [vmem:[#allocation3 + $0xa8] sm:$0xff]  ;;  %vm8998_vm10 = vcmask 520448  }
 0x29a   :  { %v7305_v61 = vpop.f32.mrf.mxu3  ;;  %3111 = vmatmul.f32.gmra.mxu1 %v2977_v57  ;;  %129 = vst.msk [vmem:[#allocation4 + $0x90] sm:$0xff] %vm8917_vm4, %v5643_v17 }
 0x29b   :  { %v2930_v1 = vrot.slane %v7305_v61, 5  ;;  %v7313_v3 = vpop.f32.mrf.mxu2  ;;  %131 = vst.msk [vmem:[#allocation4 + $0xa0] sm:$0xff] %vm8917_vm4, %v5643_v17  ;;  %v2937_v37 = vrot.slane %v7305_v61, 4 }
 0x29c   :  { %2773 = vrot.lane.b32.xlu0 %v2772_v2, %s5645_s24  ;;  %v2988_v0 = vld [vmem:[#allocation3 + $0x100] sm:$0xff]  ;;  %v2883_v60 = vrot.slane %v7313_v3, 4  ;;  %v2890_v24 = vrot.slane %v7313_v3, 3  ;;  %v3091_v63 = vpop.f32.mrf.mxu1  ;;  %133 = vst.msk [vmem:[#allocation4 + $0xb0] sm:$0xff] %vm8917_vm4, %v5643_v17 }
 0x29d   :  { %5530 = vmatmul.msk.f32.gmra.mxu3 %vm44_vm0, %v2988_v0  ;;  %135 = vst.msk [vmem:[#allocation4 + $0xc0] sm:$0xff] %vm8917_vm4, %v5643_v17  ;;  %v3092_v45 = vadd.f32 %v7385_v30, %v3091_v63  ;;  %v7431_v0 = vld [vmem:[%s8865_s2] sm:$0xff] }
 0x29e   :  { %v7324_v62 = vpop.permute.xlu0 %2278  ;;  %2888 = vst.msk [vmem:[#allocation3 + $0x128] sm:$0x3] %vm8992_vm6, %v2883_v60  ;;  %vm9000_vm6 = vmmov %vm8997_vm2 }
 0x29f   :  { %2931 = vrot.lane.b32.xlu2 %v2930_v1, %s5646_s29  ;;  %v2241_v14 = vpop.permute.xlu1 %2240  ;;  %137 = vst.msk [vmem:[#allocation4 + $0xd0] sm:$0xff] %vm8917_vm4, %v5643_v17  ;;  %v3393_v1 = vld [vmem:[#allocation4 + $0x28] sm:$0x1] }
 0x2a0   :  { %2246 = vst.msk [vmem:[#allocation3 + $0xb0] sm:$0x80] %vm8993_vm9, %v2241_v14  ;;  %vm9001_vm9 = vcmask 254976  }
 0x2a1   :  { %2281 = vst.msk [vmem:[#allocation3 + $0xb0] sm:$0x80] %vm8994_vm12, %v7324_v62  ;;  %vm9002_vm12 = vcmask 1040384  }
 0x2a2   :  { %2290 = vst.msk [vmem:[#allocation3 + $0xb0] sm:$0x80] %vm8995_vm14, %v2285_v52  ;;  %v2923_v18 = vpop.f32.mrf.mxu3  ;;  %5542 = vmatpush.msk.msrb.mxu3 %vm9002_vm12, %v3429_v36  ;;  %vm9003_vm14 = vcmask 261123   ;;  %v3587_v36 = vld [vmem:[#allocation4 + $0x58] sm:$0x1] }
 0x2a3   :  { %v2949_v32 = vrot.slane %v2923_v18, 3  ;;  %v2938_v29 = vrot.slane %v2923_v18, 4  ;;  %139 = vst.msk [vmem:[#allocation4 + $0xe0] sm:$0xff] %vm8917_vm4, %v5643_v17 }
 0x2a4   :  { %v7345_v51 = vpop.f32.mrf.mxu2  ;;  %2826 = vrot.lane.b32.xlu0 %v2825_v16, %s5644_s23  ;;  %141 = vst.msk [vmem:[#allocation4 + $0xf0] sm:$0xff] %vm8917_vm4, %v5643_v17  ;;  %v3094_v43 = vpop.f32.mrf.mxu1 }
 0x2a5   :  { %v2891_v26 = vrot.slane %v7345_v51, 3  ;;  %v2939_v42 = vsel %vm1540_vm8, %v2937_v37, %v2938_v29  ;;  %143 = vst.msk [vmem:[#allocation4 + $0x100] sm:$0xff] %vm8917_vm4, %v5643_v17  ;;  %v3095_v5 = vadd.f32 %v7385_v30, %v3094_v43 }
 0x2a6   :  { %v2340_v27 = vpop.permute.xlu0 %2339  ;;  %145 = vst.msk [vmem:[#allocation4 + $0x110] sm:$0xff] %vm8917_vm4, %v5643_v17  ;;  %v3307_v17 = vld [vmem:[#allocation4] sm:$0xff]  ;;  %vm8920_vm4 = vcmask 523269  }
 0x2a7   :  { %v2892_v22 = vsel %vm8997_vm2, %v2890_v24, %v2891_v26  ;;  %2838 = vrot.lane.b32.xlu2 %v2837_v20, %s5646_s29  ;;  %2344 = vst.msk [vmem:[#allocation3 + $0xd8] sm:$0x1f] %vm8998_vm10, %v2340_v27  ;;  %vm9005_vm2 = vcmask 785926   ;;  %vm9006_vm10 = vmmov %vm9000_vm6  ;;  %v2437_v23 = vpop.permute.xlu2 %2436 }
 0x2a8   :  { %2893 = vrot.lane.b32.xlu1 %v2892_v22, %s5644_s23  ;;  %2353 = vst.msk [vmem:[#allocation3 + $0xd8] sm:$0x1f] %vm8999_vm1, %v2349_v8  ;;  %v2717_v56 = vsel %vm9006_vm10, %v2715_v31, %v2716_v4  ;;  %vm9007_vm1 = vcmask 261124  }
 0x2a9   :  { %v2978_v34 = vld [vmem:[#allocation3 + $0xb0] sm:$0xff]  ;;  %2720 = vst.msk [vmem:[#allocation3 + $0xf8] sm:$0xf0] %vm9007_vm1, %v2717_v56  ;;  %vm9013_vm1 = vcmask 520448  }
 0x2aa   :  { %v2926_v33 = vpop.f32.mrf.mxu3  ;;  %3167 = vmatmul.f32.gmra.mxu2 %v2978_v34 }
 0x2ab   :  { %v2950_v35 = vrot.slane %v2926_v33, 3 }
 0x2ac   :  { %2876 = vrot.lane.b32.xlu0 %v2875_v58, %s5645_s24  ;;  %v3097_v28 = vpop.f32.mrf.mxu1 }
 0x2ad   :  { %v2951_v9 = vsel %vm9000_vm6, %v2949_v32, %v2950_v35  ;;  %2955 = vst.msk [vmem:[#allocation3 + $0x130] sm:$0x3] %vm9001_vm9, %v2950_v35  ;;  %vm9008_vm6 = vmmov %vm9004_vm11  ;;  %v3098_v6 = vadd.f32 %v7385_v30, %v3097_v28  ;;  %v7467_v35 = vld [vmem:[%s8865_s2 + $0x8] sm:$0xf] }
 0x2ae   :  { %2954 = vst.msk [vmem:[#allocation3 + $0x118] sm:$0xf8] %vm9003_vm14, %v2951_v9  ;;  %v2338_v38 = vpop.permute.xlu0 %2337  ;;  %vm9009_vm9 = vmmov %vm9002_vm12  ;;  %vm3256_vm14 = vcmask 522240  }
 0x2af   :  { %2942 = vrot.lane.b32.xlu2 %v2938_v29, %s5645_s24  ;;  %2343 = vst.msk [vmem:[#allocation3 + $0xc0] sm:$0xc0] %vm9004_vm11, %v2338_v38  ;;  %5533 = vmatpush.msk.msrb.mxu2 %vm9009_vm9, %v3308_v48  ;;  %vm9010_vm12 = vmmov %vm9005_vm2  ;;  %vm3259_vm11 = vcmask 523271   ;;  %v3664_v38 = vld [vmem:[#allocation4 + $0x68] sm:$0x1] }
 0x2b0   :  { %2940 = vrot.lane.b32.xlu1 %v2939_v42, %s5645_s24  ;;  %2352 = vst.msk [vmem:[#allocation3 + $0xc0] sm:$0xc0] %vm9005_vm2, %v2347_v40  ;;  %vm9011_vm2 = vmmov %vm9009_vm9  ;;  %vm8922_vm9 = vcmask 521216  }
 0x2b1   :  { %3334 = vmatpush.msrb.mxu2 %v3307_v17  ;;  %5548 = vmatpush.msk.msrb.mxu1 %vm9011_vm2, %v3511_v25  ;;  %vm9012_vm10 = vmmov %vm9011_vm2  ;;  %vm8918_vm2 = vcmask 523270  }
 0x2b2   :  { %v3203_v7 = vpop.f32.mrf.mxu3 }
 0x2b3   :  { %5551 = vmatpush.msk.msra.mxu2 %vm9012_vm10, %v3551_v39  ;;  %vm9016_vm10 = vcmask 783872  }
 0x2b4   :  { %v3147_v41 = vpop.f32.mrf.mxu2  ;;  %2828 = vrot.lane.b32.xlu0 %v2824_v10, %s5644_s23  ;;  %v2399_v46 = vpop.permute.xlu1 %2398  ;;  %v2994_v21 = vld [vmem:[#allocation3 + $0x130] sm:$0x3]  ;;  %v2882_v10 = vrot.slane %v7291_v50, 4 }
 0x2b5   :  { %v3148_v44 = vadd.f32 %v3147_v41, %v3092_v45  ;;  %v2991_v47 = vld [vmem:[#allocation3 + $0x118] sm:$0xff]  ;;  %2404 = vst.msk [vmem:[#allocation3 + $0xc8] sm:$0xc0] %vm9008_vm6, %v2399_v46  ;;  %vm9014_vm6 = vcmask 782848   ;;  %v3100_v51 = vpop.f32.mrf.mxu1 }
 0x2b6   :  { %5531 = vmatmul.msk.f32.gmra.mxu3 %vm44_vm0, %v2991_v47  ;;  %v2287_v54 = vpop.permute.xlu0 %2286  ;;  %2439 = vst.msk [vmem:[#allocation3 + $0xc8] sm:$0xc0] %vm9010_vm12, %v2437_v23  ;;  %vm9015_vm12 = vcmask 521472   ;;  %v2884_v50 = vsel %vm1540_vm8, %v2882_v10, %v2883_v60  ;;  %v3101_v60 = vadd.f32 %v7385_v30, %v3100_v51  ;;  %vm9024_vm8 = vcmask 1040384  }
 0x2b7   :  { %v3204_v4 = vadd.f32 %v3203_v7, %v3148_v44  ;;  %v3628_v7 = vld [vmem:[#allocation4 + $0x68] sm:$0x1] }
 0x2b8   :  { %2673 = vrot.lane.b32.xlu1 %v2669_v19, %s5646_s29 }
 0x2b9   :  { %v3242_v49 = vmax.f32 %v3204_v4, 0.0 }
 0x2ba   :  { %v3206_v59 = vpop.f32.mrf.mxu3 }
 0x2bb   :  { %3257 = vst.msk [vmem:[#allocation4 + $0x11] sm:$0x7f] %vm3256_vm14, %v3242_v49 }
 0x2bc   :  { %3260 = vst.msk [vmem:[#allocation4 + $0x1a] sm:$0x80] %vm3259_vm11, %v3242_v49  ;;  %v3150_v11 = vpop.f32.mrf.mxu2  ;;  %v2401_v53 = vpop.permute.xlu1 %2400 }
 0x2bd   :  { %v3151_v52 = vadd.f32 %v3150_v11, %v3095_v5  ;;  %2405 = vst.msk [vmem:[#allocation3 + $0xe0] sm:$0x1f] %vm9013_vm1, %v2401_v53  ;;  %vm9017_vm1 = vcmask 1046272  }
 0x2be   :  { %5532 = vmatmul.msk.f32.gmra.mxu3 %vm44_vm0, %v2994_v21  ;;  %v2243_v19 = vpop.permute.xlu0 %2242  ;;  %2440 = vst.msk [vmem:[#allocation3 + $0xe0] sm:$0x1f] %vm9014_vm6, %v2437_v23  ;;  %vm3309_vm0 = vcmask 72704   ;;  %vm9018_vm6 = vcmask 1040384  }
 0x2bf   :  { %v3207_v55 = vadd.f32 %v3206_v59, %v3151_v52  ;;  %2247 = vst.msk [vmem:[#allocation3 + $0xc8] sm:$0x3f] %vm9015_vm12, %v2243_v19  ;;  %vm9019_vm12 = vcmask 519424  }
 0x2c0   :  { %2895 = vrot.lane.b32.xlu1 %v2891_v26, %s5644_s23  ;;  %2282 = vst.msk [vmem:[#allocation3 + $0xc8] sm:$0x3f] %vm9016_vm10, %v7324_v62  ;;  %vm9020_vm10 = vcmask 1048326   ;;  %v3470_v26 = vld [vmem:[#allocation4 + $0x38] sm:$0x1] }
 0x2c1   :  { %v3243_v57 = vmax.f32 %v3207_v55, 0.0  ;;  %v2662_v61 = vpop.permute.xlu2 %2661  ;;  %2291 = vst.msk [vmem:[#allocation3 + $0xc8] sm:$0x3f] %vm9017_vm1, %v2287_v54  ;;  %vm8921_vm1 = vcmask 520192  }
 0x2c2   :  { %v3351_v2 = vld [vmem:[#allocation4 + $0x10] sm:$0xff]  ;;  %v3209_v62 = vpop.f32.mrf.mxu3  ;;  %2666 = vst.msk [vmem:[#allocation3 + $0x108] sm:$0x7] %vm1377_vm15, %v2662_v61 }
 0x2c3   :  { %3262 = vst.msk [vmem:[#allocation4 + $0x22] sm:$0x3f] %vm8922_vm9, %v3243_v57  ;;  %3371 = vmatpush.msrb.mxu0 %v3351_v2  ;;  %vm9037_vm9 = vcmask 785925  }
 0x2c4   :  { %3265 = vst.msk [vmem:[#allocation4 + $0x2b] sm:$0xc0] %vm8918_vm2, %v3243_v57  ;;  %v3153_v40 = vpop.f32.mrf.mxu2  ;;  %v2495_v15 = vpop.permute.xlu1 %2494  ;;  %5537 = vmatmul.msk.f32.vlgmr.msrb.gmra.mxu0 %vm3309_vm0, %v7431_v0  ;;  %vm9023_vm2 = vcmask 523524  }
 0x2c5   :  { %5539 = vmatpush.msk.msra.mxu0 %vm9018_vm6, %v3393_v1  ;;  %v3154_v14 = vadd.f32 %v3153_v40, %v3098_v6  ;;  %2499 = vst.msk [vmem:[#allocation3 + $0xf0] sm:$0xf] %vm9019_vm12, %v2495_v15  ;;  %vm9021_vm6 = vcmask 1045248   ;;  %vm9022_vm12 = vcmask 261123  }
 0x2c6   :  { %v2385_v16 = vpop.permute.xlu0 %2384  ;;  %2887 = vst.msk [vmem:[#allocation3 + $0x110] sm:$0xf8] %vm9022_vm12, %v2884_v50  ;;  %vm8919_vm12 = vcmask 523268  }
 0x2c7   :  { %v3210_v18 = vadd.f32 %v3209_v62, %v3154_v14  ;;  %2387 = vst.msk [vmem:[#allocation3 + $0xc0] sm:$0xc0] %vm9020_vm10, %v2385_v16  ;;  %vm9025_vm10 = vcmask 523525  }
 0x2c8   :  { %2840 = vrot.lane.b32.xlu1 %v2836_v13, %s5646_s29  ;;  %2388 = vst.msk [vmem:[#allocation3 + $0xd8] sm:$0x1f] %vm9021_vm6, %v2385_v16  ;;  %vm3271_vm6 = vcmask 519168  }
 0x2c9   :  { %v3244_v20 = vmax.f32 %v3210_v18, 0.0  ;;  %v2660_v24 = vpop.permute.xlu2 %2659 }
 0x2ca   :  { %v3392_v3 = vld [vmem:[#allocation4 + $0x20] sm:$0xff]  ;;  %2665 = vst.msk [vmem:[#allocation3 + $0xf0] sm:$0xf0] %vm9023_vm2, %v2660_v24  ;;  %v3212_v22 = vpop.f32.mrf.mxu3  ;;  %vm9026_vm2 = vcmask 781824  }
 0x2cb   :  { %3267 = vst.msk [vmem:[#allocation4 + $0x33] sm:$0x1f] %vm8921_vm1, %v3244_v20  ;;  %3412 = vmatpush.msra.mxu0 %v3392_v3  ;;  %3448 = vmatpush.msrb.mxu3 %v3392_v3  ;;  %vm9036_vm1 = vcmask 523525  }
 0x2cc   :  { %3270 = vst.msk [vmem:[#allocation4 + $0x3c] sm:$0xe0] %vm8920_vm4, %v3244_v20  ;;  %v3156_v12 = vpop.f32.mrf.mxu2  ;;  %5543 = vmatmul.msk.f32.vlgmr.msrb.gmra.mxu3 %vm3309_vm0, %v7431_v0  ;;  %v2493_v27 = vpop.permute.xlu1 %2492  ;;  %5538 = vmatmul.msk.f32.gmra.mxu0 %vm3309_vm0, %v7467_v35 }
 0x2cd   :  { %5545 = vmatpush.msk.msrb.mxu0 %vm9024_vm8, %v3470_v26  ;;  %v3157_v13 = vadd.f32 %v3156_v12, %v3101_v60  ;;  %2498 = vst.msk [vmem:[#allocation3 + $0xd8] sm:$0xe0] %vm9025_vm10, %v2493_v27  ;;  %vm9027_vm8 = vcmask 519424   ;;  %vm9028_vm10 = vcmask 1045248   ;;  %v3746_v12 = vld [vmem:[#allocation4 + $0x88] sm:$0x1] }
 0x2ce   :  { %v2507_v8 = vpop.permute.xlu0 %2506  ;;  %v2980_v63 = vld [vmem:[#allocation3 + $0xc0] sm:$0xff]  ;;  %v3103_v45 = vpop.f32.mrf.mxu1 }
 0x2cf   :  { %v3213_v32 = vadd.f32 %v3212_v22, %v3157_v13  ;;  %2511 = vst.msk [vmem:[#allocation3 + $0xf0] sm:$0xf] %vm9026_vm2, %v2507_v8  ;;  %3114 = vmatmul.f32.gmra.mxu1 %v2980_v63  ;;  %vm9029_vm2 = vcmask 785925   ;;  %v3104_v23 = vadd.f32 %v7385_v30, %v3103_v45  ;;  %v3745_v13 = vld [vmem:[#allocation4 + $0x80] sm:$0xff]  ;;  %v3900_v22 = vld [vmem:[#allocation4 + $0xb8] sm:$0x1] }
 0x2d1   :  { %v3245_v34 = vmax.f32 %v3213_v32, 0.0  ;;  %v2562_v58 = vpop.permute.xlu2 %2561 }
 0x2d2   :  { %v3469_v33 = vld [vmem:[#allocation4 + $0x30] sm:$0xff]  ;;  %2566 = vst.msk [vmem:[#allocation3 + $0xf8] sm:$0xf] %vm9027_vm8, %v2562_v58  ;;  %vm9030_vm8 = vcmask 1040384   ;;  %v3215_v47 = vpop.f32.mrf.mxu3 }
 0x2d3   :  { %3272 = vst.msk [vmem:[#allocation4 + $0x44] sm:$0xf] %vm3271_vm6, %v3245_v34  ;;  %3489 = vmatpush.msrb.mxu0 %v3469_v33  ;;  %5554 = vmatpush.msk.msra.mxu3 %vm9030_vm8, %v3587_v36 }
 0x2d4   :  { %3275 = vst.msk [vmem:[#allocation4 + $0x4d] sm:$0xf0] %vm8919_vm12, %v3245_v34  ;;  %v2448_v37 = vpop.permute.xlu1 %2447  ;;  %5544 = vmatmul.msk.f32.gmra.mxu3 %vm3309_vm0, %v7467_v35  ;;  %vm9032_vm12 = vcmask 1048326   ;;  %5540 = vmatmul.msk.f32.vlgmr.msra.gmra.mxu0 %vm3309_vm0, %v7431_v0 }
 0x2d5   :  { %2452 = vst.msk [vmem:[#allocation3 + $0xe0] sm:$0x1f] %vm9028_vm10, %v2448_v37  ;;  %vm9031_vm10 = vmmov %vm9030_vm8  ;;  %vm9034_vm8 = vcmask 1044224  }
 0x2d6   :  { %v2505_v29 = vpop.permute.xlu0 %2504  ;;  %vm9035_vm4 = vmmov %vm9031_vm10 }
 0x2d7   :  { %2510 = vst.msk [vmem:[#allocation3 + $0xd8] sm:$0xe0] %vm9029_vm2, %v2505_v29  ;;  %vm9033_vm2 = vcmask 781824   ;;  %5557 = vmatpush.msk.msra.mxu0 %vm9035_vm4, %v3628_v7  ;;  %vm3276_vm4 = vcmask 518144  }
 0x2d9   :  { %v2609_v9 = vpop.permute.xlu2 %2608 }
 0x2da   :  { %v3510_v31 = vld [vmem:[#allocation4 + $0x40] sm:$0xff]  ;;  %v3218_v11 = vpop.f32.mrf.mxu3 }
 0x2db   :  { %3530 = vmatpush.msrb.mxu1 %v3510_v31  ;;  %3570 = vmatpush.msra.mxu2 %v3510_v31 }
 0x2dc   :  { %v2446_v42 = vpop.permute.xlu1 %2445  ;;  %5541 = vmatmul.msk.f32.gmra.mxu0 %vm3309_vm0, %v7467_v35 }
 0x2dd   :  { %5560 = vmatpush.msk.msra.mxu1 %vm9031_vm10, %v3664_v38  ;;  %2451 = vst.msk [vmem:[#allocation3 + $0xc8] sm:$0xc0] %vm9032_vm12, %v2446_v42  ;;  %vm9038_vm12 = vcmask 1048325   ;;  %vm9039_vm10 = vmmov %vm9034_vm8 }
 0x2de   :  { %v2598_v56 = vpop.permute.xlu0 %2597 }
 0x2df   :  { %2601 = vst.msk [vmem:[#allocation3 + $0xf8] sm:$0xf] %vm9033_vm2, %v2598_v56  ;;  %vm9041_vm2 = vcmask 785924  }
 0x2e0   :  { %2613 = vst.msk [vmem:[#allocation3 + $0xf8] sm:$0xf] %vm9034_vm8, %v2609_v9  ;;  %vm3281_vm8 = vcmask 517120   ;;  %v3787_v9 = vld [vmem:[#allocation4 + $0x98] sm:$0x1] }
 0x2e1   :  { %v2560_v43 = vpop.permute.xlu2 %2559 }
 0x2e2   :  { %2565 = vst.msk [vmem:[#allocation3 + $0xe0] sm:$0xe0] %vm9036_vm1, %v2560_v43  ;;  %vm9040_vm1 = vmmov %vm9038_vm12  ;;  %v3221_v16 = vpop.f32.mrf.mxu3 }
 0x2e3   :  { %2600 = vst.msk [vmem:[#allocation3 + $0xe0] sm:$0xe0] %vm9037_vm9, %v2598_v56  ;;  %vm3279_vm9 = vcmask 523267   ;;  %v3786_v56 = vld [vmem:[#allocation4 + $0x90] sm:$0xff] }
 0x2e4   :  { %v2543_v41 = vpop.permute.xlu1 %2542  ;;  %v2981_v46 = vld [vmem:[#allocation3 + $0xc8] sm:$0xff]  ;;  %5546 = vmatmul.msk.f32.vlgmr.msrb.gmra.mxu0 %vm3309_vm0, %v7431_v0 }
 0x2e5   :  { %v3159_v44 = vpop.f32.mrf.mxu2  ;;  %2545 = vst.msk [vmem:[#allocation3 + $0xd8] sm:$0xe0] %vm9038_vm12, %v2543_v41  ;;  %3170 = vmatmul.f32.gmra.mxu2 %v2981_v46  ;;  %vm3284_vm12 = vcmask 523266   ;;  %v3704_v46 = vld [vmem:[#allocation4 + $0x78] sm:$0x1] }
 0x2e6   :  { %v3160_v48 = vadd.f32 %v3159_v44, %v3104_v23  ;;  %2546 = vst.msk [vmem:[#allocation3 + $0xf0] sm:$0xf] %vm9039_vm10, %v2543_v41  ;;  %vm9042_vm10 = vcmask 780800  }
 0x2e8   :  { %v3216_v54 = vadd.f32 %v3215_v47, %v3160_v48  ;;  %v3823_v48 = vld [vmem:[#allocation4 + $0xa8] sm:$0x1] }
 0x2e9   :  { %v2607_v17 = vpop.permute.xlu2 %2606 }
 0x2ea   :  { %v3246_v4 = vmax.f32 %v3216_v54, 0.0  ;;  %v3106_v25 = vpop.f32.mrf.mxu1  ;;  %2612 = vst.msk [vmem:[#allocation3 + $0xe0] sm:$0xe0] %vm9040_vm1, %v2607_v17  ;;  %vm9043_vm1 = vcmask 523524   ;;  %v3224_v36 = vpop.f32.mrf.mxu3  ;;  %v3864_v17 = vld [vmem:[#allocation4 + $0xb8] sm:$0x1] }
 0x2eb   :  { %v3107_v39 = vadd.f32 %v7385_v30, %v3106_v25  ;;  %v3940_v25 = vld [vmem:[#allocation4 + $0xc8] sm:$0x1] }
 0x2ec   :  { %3277 = vst.msk [vmem:[#allocation4 + $0x55] sm:$0x7] %vm3276_vm4, %v3246_v4  ;;  %v2983_v49 = vld [vmem:[#allocation3 + $0xd8] sm:$0xff]  ;;  %v2672_v59 = vpop.permute.xlu1 %2671  ;;  %5547 = vmatmul.msk.f32.gmra.mxu0 %vm3309_vm0, %v7467_v35 }
 0x2ed   :  { %3280 = vst.msk [vmem:[#allocation4 + $0x5e] sm:$0xf8] %vm3279_vm9, %v3246_v4  ;;  %3117 = vmatmul.f32.gmra.mxu1 %v2983_v49 }
 0x2ee   :  { %v3162_v5 = vpop.f32.mrf.mxu2  ;;  %2677 = vst.msk [vmem:[#allocation3 + $0xf0] sm:$0xf0] %vm9041_vm2, %v2672_v59 }
 0x2ef   :  { %v3163_v21 = vadd.f32 %v3162_v5, %v3107_v39  ;;  %v3981_v39 = vld [vmem:[#allocation4 + $0xd8] sm:$0x1] }
 0x2f0   :  { %v4021_v5 = vld [vmem:[#allocation4 + $0xd8] sm:$0x1] }
 0x2f1   :  { %v3219_v52 = vadd.f32 %v3218_v11, %v3163_v21  ;;  %v7496_v53 = vpop.permute.xlu2 %2709  ;;  %v2984_v28 = vld [vmem:[#allocation3 + $0xe0] sm:$0xff] }
 0x2f2   :  { %2712 = vst.msk [vmem:[#allocation3 + $0xf0] sm:$0xf0] %vm1426_vm5, %v7496_v53  ;;  %3173 = vmatmul.f32.gmra.mxu2 %v2984_v28  ;;  %v3109_v10 = vpop.f32.mrf.mxu1  ;;  %v3227_v4 = vpop.f32.mrf.mxu3 }
 0x2f3   :  { %v3247_v19 = vmax.f32 %v3219_v52, 0.0  ;;  %v3586_v55 = vld [vmem:[#allocation4 + $0x50] sm:$0xff]  ;;  %v3110_v40 = vadd.f32 %v7385_v30, %v3109_v10 }
 0x2f4   :  { %3606 = vmatpush.msra.mxu3 %v3586_v55 }
 0x2f5   :  { %3282 = vst.msk [vmem:[#allocation4 + $0x66] sm:$0x3] %vm3281_vm8, %v3247_v19  ;;  %5555 = vmatmul.msk.f32.vlgmr.msra.gmra.mxu3 %vm3309_vm0, %v7431_v0 }
 0x2f6   :  { %3285 = vst.msk [vmem:[#allocation4 + $0x6f] sm:$0xfc] %vm3284_vm12, %v3247_v19  ;;  %v2729_v57 = vpop.permute.xlu0 %2728  ;;  %v2765_v61 = vpop.permute.xlu1 %2764  ;;  %vm9045_vm12 = vcmask 516096  }
 0x2f7   :  { %2733 = vst.msk [vmem:[#allocation3 + $0x110] sm:$0x7] %vm1377_vm15, %v2729_v57  ;;  %vm9044_vm15 = vmmov %vm9041_vm2  ;;  %vm3288_vm2 = vcmask 523265  }
 0x2f8   :  { %2768 = vst.msk [vmem:[#allocation3 + $0x110] sm:$0x7] %vm9042_vm10, %v2765_v61  ;;  %vm9046_vm10 = vcmask 1040384  }
 0x2f9   :  { %v2986_v1 = vld [vmem:[#allocation3 + $0xf0] sm:$0xff]  ;;  %v2932_v51 = vpop.permute.xlu2 %2931  ;;  %5566 = vmatpush.msk.msrb.mxu3 %vm9046_vm10, %v3746_v12 }
 0x2fa   :  { %3120 = vmatmul.f32.gmra.mxu1 %v2986_v1 }
 0x2fb   :  { %3765 = vmatpush.msrb.mxu3 %v3745_v13 }
 0x2fc   :  { %v3627_v2 = vld [vmem:[#allocation4 + $0x60] sm:$0xff] }
 0x2fd   :  { %3647 = vmatpush.msra.mxu0 %v3627_v2  ;;  %3683 = vmatpush.msra.mxu1 %v3627_v2 }
 0x2fe   :  { %v2727_v6 = vpop.permute.xlu0 %2726  ;;  %5556 = vmatmul.msk.f32.gmra.mxu3 %vm3309_vm0, %v7467_v35  ;;  %5558 = vmatmul.msk.f32.vlgmr.msra.gmra.mxu0 %vm3309_vm0, %v7431_v0 }
 0x2ff   :  { %2732 = vst.msk [vmem:[#allocation3 + $0xf8] sm:$0xf0] %vm9043_vm1, %v2727_v6  ;;  %vm9047_vm1 = vcmask 1048323  }
 0x300   :  { %2767 = vst.msk [vmem:[#allocation3 + $0xf8] sm:$0xf0] %vm9044_vm15, %v2765_v61  ;;  %vm9049_vm15 = vmmov %vm9047_vm1 }
 0x301   :  { %v2839_v3 = vpop.permute.xlu2 %2838  ;;  %v3230_v49 = vpop.f32.mrf.mxu3 }
 0x306   :  { %v3165_v62 = vpop.f32.mrf.mxu2  ;;  %v2776_v14 = vpop.permute.xlu0 %2775  ;;  %5559 = vmatmul.msk.f32.gmra.mxu0 %vm3309_vm0, %v7467_v35  ;;  %5567 = vmatmul.msk.f32.vlgmr.msrb.gmra.mxu3 %vm3309_vm0, %v7431_v0 }
 0x307   :  { %v3166_v15 = vadd.f32 %v3165_v62, %v3110_v40  ;;  %2780 = vst.msk [vmem:[#allocation3 + $0x110] sm:$0x7] %vm1428_vm3, %v2776_v14 }
 0x309   :  { %v3222_v50 = vadd.f32 %v3221_v16, %v3166_v15  ;;  %v2943_v45 = vpop.permute.xlu2 %2942 }
 0x30b   :  { %v3248_v18 = vmax.f32 %v3222_v50, 0.0 }
 0x30d   :  { %3286 = vst.msk [vmem:[#allocation4 + $0x77] sm:$0x1] %vm9045_vm12, %v3248_v18 }
 0x30e   :  { %3289 = vst.msk [vmem:[#allocation4 + $0xa0] sm:$0xfe] %vm3288_vm2, %v3248_v18  ;;  %v2774_v20 = vpop.permute.xlu0 %2773  ;;  %5568 = vmatmul.msk.f32.gmra.mxu3 %vm3309_vm0, %v7467_v35  ;;  %v4057_v18 = vld [vmem:[#allocation4 + $0xe8] sm:$0x1] }
 0x30f   :  { %2779 = vst.msk [vmem:[#allocation3 + $0xf8] sm:$0xf0] %vm1426_vm5, %v2774_v20  ;;  %vm9048_vm5 = vmmov %vm9046_vm10  ;;  %vm9055_vm10 = vcmask 1042176  }
 0x310   :  { %5578 = vmatpush.msk.msra.mxu3 %vm9048_vm5, %v3900_v22  ;;  %vm9052_vm2 = vmmov %vm9048_vm5 }
 0x311   :  { %5569 = vmatpush.msk.msrb.mxu0 %vm9052_vm2, %v3787_v9  ;;  %vm9057_vm5 = vmmov %vm9055_vm10 }
 0x313   :  { %3806 = vmatpush.msrb.mxu0 %v3786_v56 }
 0x314   :  { %5570 = vmatmul.msk.f32.vlgmr.msrb.gmra.mxu0 %vm3309_vm0, %v7431_v0  ;;  %v3703_v47 = vld [vmem:[#allocation4 + $0x70] sm:$0xff] }
 0x315   :  { %v3822_v54 = vld [vmem:[#allocation4 + $0xa0] sm:$0xff] }
 0x316   :  { %v2827_v24 = vpop.permute.xlu0 %2826  ;;  %v2987_v26 = vld [vmem:[#allocation3 + $0xf8] sm:$0xff] }
 0x317   :  { %2832 = vst.msk [vmem:[#allocation3 + $0x108] sm:$0xf8] %vm1550_vm7, %v2827_v24  ;;  %3176 = vmatmul.f32.gmra.mxu2 %v2987_v26  ;;  %v3112_v32 = vpop.f32.mrf.mxu1 }
 0x318   :  { %2844 = vst.msk [vmem:[#allocation3 + $0x108] sm:$0xf8] %vm1564_vm13, %v2839_v3  ;;  %v3113_v33 = vadd.f32 %v7385_v30, %v3112_v32 }
 0x31a   :  { %v2894_v60 = vpop.permute.xlu1 %2893 }
 0x31b   :  { %2899 = vst.msk [vmem:[#allocation3 + $0x110] sm:$0xf8] %vm1550_vm7, %v2894_v60  ;;  %vm9050_vm7 = vcmask 517376  }
 0x31c   :  { %2934 = vst.msk [vmem:[#allocation3 + $0x110] sm:$0xf8] %vm1564_vm13, %v2932_v51  ;;  %vm9051_vm13 = vcmask 780800   ;;  %vm9053_vm12 = vmmov %vm9050_vm7  ;;  %5571 = vmatmul.msk.f32.gmra.mxu0 %vm3309_vm0, %v7467_v35 }
 0x31e   :  { %v2877_v27 = vpop.permute.xlu0 %2876 }
 0x31f   :  { %2879 = vst.msk [vmem:[#allocation3 + $0x108] sm:$0xf8] %vm9047_vm1, %v2877_v27 }
 0x320   :  { %v3233_v11 = vpop.f32.mrf.mxu3 }
 0x322   :  { %v2941_v8 = vpop.permute.xlu1 %2940 }
 0x323   :  { %2946 = vst.msk [vmem:[#allocation3 + $0x110] sm:$0xf8] %vm9049_vm15, %v2941_v8  ;;  %vm9060_vm15 = vmmov %vm9052_vm2 }
 0x326   :  { %v2829_v63 = vpop.permute.xlu0 %2828 }
 0x327   :  { %2833 = vst.msk [vmem:[#allocation3 + $0x120] sm:$0x3] %vm9050_vm7, %v2829_v63  ;;  %vm9061_vm7 = vmmov %vm9052_vm2 }
 0x328   :  { %5581 = vmatpush.msk.msra.mxu0 %vm9061_vm7, %v3940_v25 }
 0x32a   :  { %v2674_v34 = vpop.permute.xlu1 %2673  ;;  %v2990_v58 = vld [vmem:[#allocation3 + $0x110] sm:$0xff] }
 0x32b   :  { %2678 = vst.msk [vmem:[#allocation3 + $0x108] sm:$0x7] %vm9051_vm13, %v2674_v34  ;;  %3179 = vmatmul.f32.gmra.mxu2 %v2990_v58  ;;  %vm9062_vm13 = vmmov %vm9052_vm2  ;;  %v4098_v34 = vld [vmem:[#allocation4 + $0xf8] sm:$0x1] }
 0x32c   :  { %2713 = vst.msk [vmem:[#allocation3 + $0x108] sm:$0x7] %vm1428_vm3, %v7496_v53  ;;  %vm9054_vm3 = vcmask 779776   ;;  %v4134_v58 = vld [vmem:[#allocation4 + $0xf8] sm:$0x1] }
 0x32d   :  { %v3168_v37 = vpop.f32.mrf.mxu2  ;;  %vm9056_vm1 = vmmov %vm9054_vm3 }
 0x32e   :  { %v3169_v29 = vadd.f32 %v3168_v37, %v3113_v33 }
 0x330   :  { %v3225_v31 = vadd.f32 %v3224_v36, %v3169_v29 }
 0x332   :  { %v3249_v38 = vmax.f32 %v3225_v31, 0.0  ;;  %v2896_v42 = vpop.permute.xlu1 %2895 }
 0x333   :  { %2900 = vst.msk [vmem:[#allocation3 + $0x128] sm:$0x3] %vm9053_vm12, %v2896_v42  ;;  %v2989_v7 = vld [vmem:[#allocation3 + $0x108] sm:$0xff]  ;;  %vm9063_vm12 = vcmask 521216  }
 0x334   :  { %3291 = vst.msk [vmem:[#allocation4 + $0xb1] sm:$0x7f] %vm3256_vm14, %v3249_v38  ;;  %3123 = vmatmul.f32.gmra.mxu1 %v2989_v7  ;;  %vm9058_vm14 = vmmov %vm9052_vm2 }
 0x335   :  { %3293 = vst.msk [vmem:[#allocation4 + $0xba] sm:$0x80] %vm3259_vm11, %v3249_v38  ;;  %vm9059_vm11 = vmmov %vm9052_vm2  ;;  %v4174_v38 = vld [vmem:[#allocation4 + $0x108] sm:$0x1] }
 0x336   :  { %2935 = vst.msk [vmem:[#allocation3 + $0x128] sm:$0x3] %vm9054_vm3, %v2932_v51  ;;  %vm9064_vm3 = vcmask 523270  }
 0x337   :  { %2947 = vst.msk [vmem:[#allocation3 + $0x128] sm:$0x3] %vm9055_vm10, %v2943_v45  ;;  %vm9065_vm10 = vcmask 520192  }
 0x339   :  { %v7585_v61 = vpop.f32.mrf.mxu3 }
 0x33a   :  { %v2841_v43 = vpop.permute.xlu1 %2840 }
 0x33b   :  { %2845 = vst.msk [vmem:[#allocation3 + $0x120] sm:$0x3] %vm9056_vm1, %v2841_v43  ;;  %v3899_v23 = vld [vmem:[#allocation4 + $0xb0] sm:$0xff]  ;;  %vm9066_vm1 = vcmask 523269  }
 0x33c   :  { %2880 = vst.msk [vmem:[#allocation3 + $0x120] sm:$0x3] %vm9057_vm5, %v2877_v27  ;;  %3919 = vmatpush.msra.mxu3 %v3899_v23  ;;  %vm9067_vm5 = vmmov %vm9052_vm2 }
 0x33d   :  { %5579 = vmatmul.msk.f32.vlgmr.msra.gmra.mxu3 %vm3309_vm0, %v7431_v0 }
 0x33e   :  { %v2993_v41 = vld [vmem:[#allocation3 + $0x128] sm:$0x3]  ;;  %5590 = vmatpush.msk.msrb.mxu3 %vm9067_vm5, %v4057_v18 }
 0x33f   :  { %3182 = vmatmul.f32.gmra.mxu2 %v2993_v41 }
 0x341   :  { %v7575_v21 = vpop.f32.mrf.mxu0  ;;  %v7594_v62 = vpop.f32.mrf.mxu3 }
 0x342   :  { %v3384_v53 = vrot.slane %v7575_v21, 4 }
 0x343   :  { %v2992_v44 = vld [vmem:[#allocation3 + $0x120] sm:$0x3] }
 0x344   :  { %3126 = vmatmul.f32.gmra.mxu1 %v2992_v44  ;;  %3386 = vst.msk [vmem:[#allocation5 + $0x10] sm:$0xf] %vm3271_vm6, %v3384_v53 }
 0x345   :  { %5580 = vmatmul.msk.f32.gmra.mxu3 %vm3309_vm0, %v7467_v35 }
 0x347   :  { %5534 = vmatmul.msk.f32.vlgmr.msrb.gmra.mxu2 %vm3309_vm0, %v7431_v0 }
 0x348   :  { %5563 = vmatpush.msk.msrb.mxu2 %vm9058_vm14, %v3704_v46  ;;  %vm9068_vm14 = vcmask 523268  }
 0x349   :  { %v7596_v15 = vpop.f32.mrf.mxu0 }
 0x34a   :  { %3723 = vmatpush.msrb.mxu2 %v3703_v47 }
 0x34c   :  { %5549 = vmatmul.msk.f32.vlgmr.msrb.gmra.mxu1 %vm3309_vm0, %v7431_v0  ;;  %v3115_v59 = vpop.f32.mrf.mxu1 }
 0x34d   :  { %5572 = vmatpush.msk.msrb.mxu1 %vm9059_vm11, %v3823_v48  ;;  %v3116_v52 = vadd.f32 %v7385_v30, %v3115_v59  ;;  %vm9069_vm11 = vmmov %vm9068_vm14 }
 0x34e   :  { %vm9071_vm7 = vmmov %vm9069_vm11 }
 0x34f   :  { %5535 = vmatmul.msk.f32.gmra.mxu2 %vm3309_vm0, %v7467_v35  ;;  %3842 = vmatpush.msrb.mxu1 %v3822_v54  ;;  %v3450_v51 = vpop.f32.mrf.mxu3 }
 0x350   :  { %v3457_v24 = vrot.slane %v3450_v51, 4  ;;  %3460 = vrot.lane.b32.xlu0 %v3450_v51, %s5646_s29 }
 0x351   :  { %v7606_v50 = vpop.f32.mrf.mxu0 }
 0x352   :  { %3420 = vst.msk [vmem:[#allocation5 + $0x18] sm:$0xf] %vm3271_vm6, %v7606_v50 }
 0x353   :  { %3459 = vst.msk [vmem:[#allocation5] sm:$0xf0] %vm9068_vm14, %v3457_v24 }
 0x354   :  { %5550 = vmatmul.msk.f32.gmra.mxu1 %vm3309_vm0, %v7467_v35 }
 0x357   :  { %5552 = vmatmul.msk.f32.vlgmr.msra.gmra.mxu2 %vm3309_vm0, %v7431_v0  ;;  %v3453_v22 = vpop.f32.mrf.mxu3 }
 0x358   :  { %5575 = vmatpush.msk.msra.mxu2 %vm9060_vm15, %v3864_v17  ;;  %v3466_v8 = vrot.slane %v3453_v22, 4  ;;  %vm9070_vm15 = vmmov %vm9069_vm11 }
 0x359   :  { %v3417_v26 = vpop.f32.mrf.mxu0 }
 0x35a   :  { %3883 = vmatpush.msra.mxu2 %v3899_v23  ;;  %3427 = vst.msk [vmem:[#allocation5 + $0x20] sm:$0xf] %vm3271_vm6, %v3417_v26 }
 0x35b   :  { %3468 = vst.msk [vmem:[#allocation5 + $0x8] sm:$0xf0] %vm9070_vm15, %v3466_v8 }
 0x35c   :  { %5561 = vmatmul.msk.f32.vlgmr.msra.gmra.mxu1 %vm3309_vm0, %v7431_v0 }
 0x35d   :  { %5584 = vmatpush.msk.msra.mxu1 %vm9062_vm13, %v3981_v39  ;;  %vm9072_vm13 = vmmov %vm9052_vm2 }
 0x35f   :  { %5553 = vmatmul.msk.f32.gmra.mxu2 %vm3309_vm0, %v7467_v35 }
 0x361   :  { %v7623_v27 = vpop.f32.mrf.mxu0 }
 0x362   :  { %3503 = vst.msk [vmem:[#allocation5 + $0x10] sm:$0xf0] %vm9069_vm11, %v7623_v27 }
 0x364   :  { %5562 = vmatmul.msk.f32.gmra.mxu1 %vm3309_vm0, %v7467_v35 }
 0x367   :  { %5564 = vmatmul.msk.f32.vlgmr.msrb.gmra.mxu2 %vm3309_vm0, %v7431_v0 }
 0x368   :  { %5587 = vmatpush.msk.msrb.mxu2 %vm9052_vm2, %v4021_v5  ;;  %v3171_v28 = vpop.f32.mrf.mxu2 }
 0x369   :  { %v3172_v19 = vadd.f32 %v3171_v28, %v3116_v52  ;;  %v3494_v33 = vpop.f32.mrf.mxu0 }
 0x36a   :  { %v3118_v1 = vpop.f32.mrf.mxu1  ;;  %v3505_v39 = vrot.slane %v3494_v33, 4 }
 0x36b   :  { %v3228_v55 = vadd.f32 %v3227_v4, %v3172_v19  ;;  %v3119_v2 = vadd.f32 %v7385_v30, %v3118_v1  ;;  %v4215_v1 = vld [vmem:[#allocation4 + $0x110] sm:$0xff] }
 0x36c   :  { %5573 = vmatmul.msk.f32.vlgmr.msrb.gmra.mxu1 %vm3309_vm0, %v7431_v0 }
 0x36d   :  { %v3250_v57 = vmax.f32 %v3228_v55, 0.0 }
 0x36f   :  { %5565 = vmatmul.msk.f32.gmra.mxu2 %vm3309_vm0, %v7467_v35  ;;  %3294 = vst.msk [vmem:[#allocation4 + $0xc2] sm:$0x3f] %vm9063_vm12, %v3250_v57  ;;  %vm9073_vm12 = vmmov %vm9052_vm2 }
 0x370   :  { %3296 = vst.msk [vmem:[#allocation4 + $0xcb] sm:$0xc0] %vm9064_vm3, %v3250_v57  ;;  %vm9074_vm3 = vmmov %vm9071_vm7 }
 0x371   :  { %vm9080_vm5 = vmmov %vm9074_vm3 }
 0x374   :  { %5574 = vmatmul.msk.f32.gmra.mxu1 %vm3309_vm0, %v7467_v35 }
 0x375   :  { %v3174_v6 = vpop.f32.mrf.mxu2 }
 0x376   :  { %v3175_v10 = vadd.f32 %v3174_v6, %v3119_v2  ;;  %v3939_v40 = vld [vmem:[#allocation4 + $0xc0] sm:$0xff] }
 0x377   :  { %5576 = vmatmul.msk.f32.vlgmr.msra.gmra.mxu2 %vm3309_vm0, %v7431_v0  ;;  %3959 = vmatpush.msra.mxu0 %v3939_v40  ;;  %v3121_v3 = vpop.f32.mrf.mxu1 }
 0x378   :  { %v3231_v14 = vadd.f32 %v3230_v49, %v3175_v10  ;;  %5582 = vmatmul.msk.f32.vlgmr.msra.gmra.mxu0 %vm3309_vm0, %v7431_v0  ;;  %v3122_v60 = vadd.f32 %v7385_v30, %v3121_v3  ;;  %v7630_v37 = vpop.f32.mrf.mxu3 }
 0x379   :  { %5593 = vmatpush.msk.msrb.mxu0 %vm9072_vm13, %v4098_v34  ;;  %v3619_v29 = vrot.slane %v7630_v37, 4  ;;  %vm3463_vm13 = vcmask 1048068  }
 0x37a   :  { %v3251_v16 = vmax.f32 %v3231_v14, 0.0 }
 0x37b   :  { %3621 = vst.msk [vmem:[#allocation5 + $0x38] sm:$0xf] %vm3271_vm6, %v3619_v29  ;;  %v7638_v9 = vpop.f32.mrf.mxu0 }
 0x37c   :  { %3297 = vst.msk [vmem:[#allocation4 + $0xd3] sm:$0x1f] %vm9065_vm10, %v3251_v16  ;;  %vm9075_vm10 = vmmov %vm9074_vm3 }
 0x37d   :  { %3299 = vst.msk [vmem:[#allocation4 + $0xdc] sm:$0xe0] %vm9066_vm1, %v3251_v16  ;;  %vm9078_vm1 = vmmov %vm9052_vm2 }
 0x37e   :  { %3655 = vst.msk [vmem:[#allocation5 + $0x40] sm:$0xf] %vm3271_vm6, %v7638_v9 }
 0x37f   :  { %5577 = vmatmul.msk.f32.gmra.mxu2 %vm3309_vm0, %v7467_v35 }
 0x380   :  { %5583 = vmatmul.msk.f32.gmra.mxu0 %vm3309_vm0, %v7467_v35 }
 0x381   :  { %v7640_v31 = vpop.f32.mrf.mxu3 }
 0x383   :  { %v3980_v20 = vld [vmem:[#allocation4 + $0xd0] sm:$0xff]  ;;  %v3652_v45 = vpop.f32.mrf.mxu0 }
 0x384   :  { %4000 = vmatpush.msra.mxu1 %v3980_v20  ;;  %4040 = vmatpush.msrb.mxu2 %v3980_v20  ;;  %3662 = vst.msk [vmem:[#allocation5 + $0x48] sm:$0xf] %vm3271_vm6, %v3652_v45 }
 0x385   :  { %5585 = vmatmul.msk.f32.vlgmr.msra.gmra.mxu1 %vm3309_vm0, %v7431_v0 }
 0x386   :  { %5596 = vmatpush.msk.msrb.mxu1 %vm9052_vm2, %v4134_v58  ;;  %5599 = vmatpush.msk.msra.mxu2 %vm9073_vm12, %v4174_v38  ;;  %v4322_v38 = vld [vmem:[%s8866_s7 + $0x178] sm:$0xff]  ;;  %vm3348_vm2 = vcmask 1043968  }
 0x387   :  { %5588 = vmatmul.msk.f32.vlgmr.msrb.gmra.mxu2 %vm3309_vm0, %v7431_v0 }
 0x389   :  { %v7648_v43 = vpop.f32.mrf.mxu3 }
 0x38a   :  { %v3774_v41 = vrot.slane %v7648_v43, 4 }
 0x38c   :  { %3776 = vst.msk [vmem:[#allocation5 + $0x40] sm:$0xf0] %vm9074_vm3, %v3774_v41  ;;  %v4290_v41 = vld [vmem:[%s8866_s7 + $0x78] sm:$0xff] }
 0x38d   :  { %5586 = vmatmul.msk.f32.gmra.mxu1 %vm3309_vm0, %v7467_v35 }
 0x38f   :  { %5589 = vmatmul.msk.f32.gmra.mxu2 %vm3309_vm0, %v7467_v35 }
 0x391   :  { %v3808_v47 = vpop.f32.mrf.mxu0  ;;  %v3770_v48 = vpop.f32.mrf.mxu3 }
 0x392   :  { %3814 = vst.msk [vmem:[#allocation5 + $0x50] sm:$0xf] %vm3271_vm6, %v3808_v47  ;;  %v3816_v54 = vrot.slane %v3808_v47, 4  ;;  %v3782_v17 = vrot.slane %v3770_v48, 4  ;;  %v4316_v47 = vld [vmem:[%s8866_s7 + $0x148] sm:$0xff] }
 0x393   :  { %v4288_v48 = vld [vmem:[%s8866_s7 + $0x68] sm:$0xff] }
 0x394   :  { %3784 = vst.msk [vmem:[#allocation5 + $0x48] sm:$0xf0] %vm9075_vm10, %v3782_v17  ;;  %3817 = vrot.lane.b32.xlu0 %v3816_v54, %s5646_s29  ;;  %v4338_v54 = vld [vmem:[%s8866_s7 + $0x1f8] sm:$0xff] }
 0x399   :  { %v3811_v20 = vpop.f32.mrf.mxu0 }
 0x39a   :  { %v3177_v12 = vpop.f32.mrf.mxu2  ;;  %3821 = vst.msk [vmem:[#allocation5 + $0x58] sm:$0xf] %vm3271_vm6, %v3811_v20 }
 0x39b   :  { %v3178_v13 = vadd.f32 %v3177_v12, %v3122_v60 }
 0x39c   :  { %3506 = vrot.lane.b32.xlu0 %v3505_v39, %s5646_s29  ;;  %v4314_v39 = vld [vmem:[%s8866_s7 + $0x138] sm:$0xff] }
 0x39d   :  { %v3234_v63 = vadd.f32 %v3233_v11, %v3178_v13 }
 0x39f   :  { %v3252_v32 = vmax.f32 %v3234_v63, 0.0 }
 0x3a1   :  { %3300 = vst.msk [vmem:[#allocation4 + $0xe4] sm:$0xf] %vm3271_vm6, %v3252_v32 }
 0x3a2   :  { %3302 = vst.msk [vmem:[#allocation4 + $0xed] sm:$0xf0] %vm9071_vm7, %v3252_v32 }
 0x3a8   :  { %v4056_v36 = vld [vmem:[#allocation4 + $0xe0] sm:$0xff] }
 0x3a9   :  { %4076 = vmatpush.msrb.mxu3 %v4056_v36  ;;  %v3498_v36 = vrot.slane %v7623_v27, 4  ;;  %v4320_v27 = vld [vmem:[%s8866_s7 + $0x168] sm:$0xff] }
 0x3aa   :  { %5591 = vmatmul.msk.f32.vlgmr.msrb.gmra.mxu3 %vm3309_vm0, %v7431_v0 }
 0x3ae   :  { %v3180_v7 = vpop.f32.mrf.mxu2 }
 0x3b1   :  { %v3124_v42 = vpop.f32.mrf.mxu1 }
 0x3b2   :  { %v3125_v56 = vadd.f32 %v7385_v30, %v3124_v42  ;;  %5592 = vmatmul.msk.f32.gmra.mxu3 %vm3309_vm0, %v7467_v35  ;;  %v4321_v42 = vld [vmem:[%s8866_s7 + $0x170] sm:$0xff] }
 0x3b4   :  { %v3181_v23 = vadd.f32 %v3180_v7, %v3125_v56  ;;  %v3657_v7 = vrot.slane %v7638_v9, 4  ;;  %v4319_v56 = vld [vmem:[%s8866_s7 + $0x160] sm:$0xff]  ;;  %v4318_v9 = vld [vmem:[%s8866_s7 + $0x158] sm:$0xff] }
 0x3b6   :  { %v3237_v44 = vadd.f32 %v7585_v61, %v3181_v23  ;;  %v4216_v61 = vld [vmem:[#allocation4 + $0x118] sm:$0x1] }
 0x3b7   :  { %5602 = vmatpush.msk.msra.mxu3 %vm9078_vm1, %v4216_v61  ;;  %v4283_v61 = vld [vmem:[%s8866_s7 + $0x40] sm:$0xff] }
 0x3b8   :  { %v3253_v46 = vmax.f32 %v3237_v44, 0.0  ;;  %v4317_v44 = vld [vmem:[%s8866_s7 + $0x150] sm:$0xff] }
 0x3b9   :  { %4235 = vmatpush.msra.mxu3 %v4215_v1 }
 0x3ba   :  { %3303 = vst.msk [vmem:[#allocation4 + $0xf5] sm:$0x7] %vm3276_vm4, %v3253_v46  ;;  %vm9076_vm4 = vmmov %vm9074_vm3  ;;  %5603 = vmatmul.msk.f32.vlgmr.msra.gmra.mxu3 %vm3309_vm0, %v7431_v0 }
 0x3bb   :  { %3305 = vst.msk [vmem:[#allocation4 + $0xfe] sm:$0xf8] %vm3279_vm9, %v3253_v46  ;;  %vm9077_vm9 = vmmov %vm9074_vm3  ;;  %v4289_v46 = vld [vmem:[%s8866_s7 + $0x70] sm:$0xff]  ;;  %4450 = vmatpush.msrb.mxu3 %v4338_v54 }
 0x3c0   :  { %v3921_v5 = vpop.f32.mrf.mxu3 }
 0x3c1   :  { %v3127_v4 = vpop.f32.mrf.mxu1  ;;  %v4097_v25 = vld [vmem:[#allocation4 + $0xf0] sm:$0xff]  ;;  %v3928_v52 = vrot.slane %v3921_v5, 4  ;;  %3931 = vrot.lane.b32.xlu1 %v3921_v5, %s5646_s29 }
 0x3c2   :  { %v3183_v49 = vpop.f32.mrf.mxu2  ;;  %v3128_v59 = vadd.f32 %v7385_v30, %v3127_v4  ;;  %4117 = vmatpush.msrb.mxu0 %v4097_v25  ;;  %4153 = vmatpush.msrb.mxu1 %v4097_v25  ;;  %v3461_v45 = vpop.permute.xlu0 %3460  ;;  %v4315_v4 = vld [vmem:[%s8866_s7 + $0x140] sm:$0xff] }
 0x3c3   :  { %5597 = vmatmul.msk.f32.vlgmr.msrb.gmra.mxu1 %vm3309_vm0, %v7431_v0  ;;  %5594 = vmatmul.msk.f32.vlgmr.msrb.gmra.mxu0 %vm3309_vm0, %v7431_v0  ;;  %3930 = vst.msk [vmem:[#allocation5 + $0x50] sm:$0xf0] %vm9076_vm4, %v3928_v52  ;;  %v4287_v25 = vld [vmem:[%s8866_s7 + $0x60] sm:$0xff]  ;;  %v4285_v52 = vld [vmem:[%s8866_s7 + $0x50] sm:$0xff] }
 0x3c4   :  { %v3184_v11 = vadd.f32 %v3183_v49, %v3128_v59  ;;  %5604 = vmatmul.msk.f32.gmra.mxu3 %vm3309_vm0, %v7467_v35  ;;  %3464 = vst.msk [vmem:[#allocation5] sm:$0xf0] %vm3463_vm13, %v3461_v45  ;;  %4363 = vmatpush.msra.mxu0 %v4290_v41  ;;  %v4286_v49 = vld [vmem:[%s8866_s7 + $0x58] sm:$0xff]  ;;  %v4337_v59 = vld [vmem:[%s8866_s7 + $0x1f0] sm:$0xff] }
 0x3c5   :  { %4451 = vmatpush.msrb.mxu3 %v4337_v59 }
 0x3c6   :  { %v3240_v53 = vadd.f32 %v7594_v62, %v3184_v11  ;;  %4364 = vmatpush.msra.mxu0 %v4289_v46  ;;  %v4313_v11 = vld [vmem:[%s8866_s7 + $0x130] sm:$0xff]  ;;  %v4323_v46 = vld [vmem:[%s8866_s7 + $0x180] sm:$0xff] }
 0x3c8   :  { %v3254_v30 = vmax.f32 %v3240_v53, 0.0  ;;  %4365 = vmatpush.msra.mxu0 %v4288_v48  ;;  %v4312_v53 = vld [vmem:[%s8866_s7 + $0x128] sm:$0xff]  ;;  %v4306_v48 = vld [vmem:[%s8866_s7 + $0xf8] sm:$0xff] }
 0x3c9   :  { %v3532_v28 = vpop.f32.mrf.mxu1  ;;  %4392 = vmatpush.msra.mxu1 %v4306_v48 }
 0x3ca   :  { %3306 = vst.msk [vmem:[#allocation4 + $0x106] sm:$0x3] %vm3281_vm8, %v3254_v30  ;;  %v3539_v19 = vrot.slane %v3532_v28, 4  ;;  %v3336_v55 = vpop.f32.mrf.mxu2  ;;  %vm9079_vm8 = vmmov %vm9074_vm3  ;;  %4366 = vmatpush.msra.mxu0 %v4287_v25  ;;  %v4336_v30 = vld [vmem:[%s8866_s7 + $0x1e8] sm:$0xff] }
 0x3cb   :  { %3342 = vst.msk [vmem:[#allocation5] sm:$0xf] %vm3271_vm6, %v3336_v55  ;;  %v3344_v57 = vrot.slane %v3336_v55, 4  ;;  %5598 = vmatmul.msk.f32.gmra.mxu1 %vm3309_vm0, %v7467_v35  ;;  %5595 = vmatmul.msk.f32.gmra.mxu0 %vm3309_vm0, %v7467_v35  ;;  %v4335_v55 = vld [vmem:[%s8866_s7 + $0x1e0] sm:$0xff] }
 0x3cc   :  { %3541 = vst.msk [vmem:[#allocation5 + $0x18] sm:$0xf0] %vm9077_vm9, %v3539_v19  ;;  %4367 = vmatpush.msra.mxu0 %v4286_v49  ;;  %v4284_v19 = vld [vmem:[%s8866_s7 + $0x48] sm:$0xff]  ;;  %4452 = vmatpush.msrb.mxu3 %v4336_v30  ;;  %v4303_v49 = vld [vmem:[%s8866_s7 + $0xe0] sm:$0xff]  ;;  %v4301_v30 = vld [vmem:[%s8866_s7 + $0xd0] sm:$0xff] }
 0x3cd   :  { %3345 = vrot.lane.b32.xlu2 %v3344_v57, %s5646_s29  ;;  %v4311_v57 = vld [vmem:[%s8866_s7 + $0x120] sm:$0xff] }
 0x3ce   :  { %4368 = vmatpush.msra.mxu0 %v4285_v52  ;;  %4453 = vmatpush.msrb.mxu3 %v4335_v55 }
 0x3d0   :  { %4369 = vmatpush.msra.mxu0 %v4284_v19  ;;  %v4299_v19 = vld [vmem:[%s8866_s7 + $0xc0] sm:$0xff] }
 0x3d1   :  { %v3535_v2 = vpop.f32.mrf.mxu1  ;;  %v4173_v6 = vld [vmem:[#allocation4 + $0x100] sm:$0xff] }
 0x3d2   :  { %v3547_v10 = vrot.slane %v3535_v2, 4  ;;  %v3339_v40 = vpop.f32.mrf.mxu2  ;;  %4193 = vmatpush.msra.mxu2 %v4173_v6  ;;  %v4334_v2 = vld [vmem:[%s8866_s7 + $0x1d8] sm:$0xff]  ;;  %4370 = vmatpush.msra.mxu0 %v4283_v61 }
 0x3d3   :  { %3350 = vst.msk [vmem:[#allocation5 + $0x8] sm:$0xf] %vm3271_vm6, %v3339_v40  ;;  %5600 = vmatmul.msk.f32.vlgmr.msra.gmra.mxu2 %vm3309_vm0, %v7431_v0  ;;  %v3422_v0 = vrot.slane %v7606_v50, 4  ;;  %v4282_v40 = vld [vmem:[%s8866_s7 + $0x38] sm:$0xff]  ;;  %4454 = vmatpush.msrb.mxu3 %v4334_v2  ;;  %v4297_v2 = vld [vmem:[%s8866_s7 + $0xb0] sm:$0xff] }
 0x3d4   :  { %3549 = vst.msk [vmem:[#allocation5 + $0x20] sm:$0xf0] %vm9079_vm8, %v3547_v10  ;;  %4421 = vmatpush.msrb.mxu2 %v4322_v38  ;;  %v4310_v10 = vld [vmem:[%s8866_s7 + $0x118] sm:$0xff]  ;;  %4371 = vmatpush.msra.mxu0 %v4282_v40  ;;  %v4295_v40 = vld [vmem:[%s8866_s7 + $0xa0] sm:$0xff] }
 0x3d6   :  { %4422 = vmatpush.msrb.mxu2 %v4321_v42 }
 0x3d8   :  { %4423 = vmatpush.msrb.mxu2 %v4320_v27 }
 0x3d9   :  { %v3685_v62 = vpop.f32.mrf.mxu1 }
 0x3da   :  { %v3692_v14 = vrot.slane %v3685_v62, 4  ;;  %v3572_v16 = vpop.f32.mrf.mxu2  ;;  %3695 = vrot.lane.b32.xlu2 %v3685_v62, %s5646_s29  ;;  %4424 = vmatpush.msrb.mxu2 %v4319_v56  ;;  %v4333_v62 = vld [vmem:[%s8866_s7 + $0x1d0] sm:$0xff] }
 0x3db   :  { %3578 = vst.msk [vmem:[#allocation5 + $0x28] sm:$0xf] %vm3271_vm6, %v3572_v16  ;;  %v3580_v18 = vrot.slane %v3572_v16, 4  ;;  %5601 = vmatmul.msk.f32.gmra.mxu2 %vm3309_vm0, %v7467_v35  ;;  %vm9081_vm0 = vmmov %vm9074_vm3  ;;  %v4281_v16 = vld [vmem:[%s8866_s7 + $0x30] sm:$0xff]  ;;  %4455 = vmatpush.msrb.mxu3 %v4333_v62 }
 0x3dc   :  { %3694 = vst.msk [vmem:[#allocation5 + $0x28] sm:$0xf0] %vm9080_vm5, %v3692_v14  ;;  %vm9082_vm14 = vmmov %vm9081_vm0  ;;  %4425 = vmatpush.msrb.mxu2 %v4318_v9  ;;  %v4309_v14 = vld [vmem:[%s8866_s7 + $0x110] sm:$0xff]  ;;  %4372 = vmatpush.msra.mxu0 %v4281_v16 }
 0x3dd   :  { %3581 = vrot.lane.b32.xlu1 %v3580_v18, %s5646_s29  ;;  %vm9083_vm11 = vmmov %vm9081_vm0  ;;  %v4293_v62 = vld [vmem:[%s8866_s7 + $0x90] sm:$0xff] }
 0x3de   :  { %vm9084_vm15 = vmmov %vm9081_vm0  ;;  %4426 = vmatpush.msrb.mxu2 %v4317_v44  ;;  %v4324_v44 = vld [vmem:[%s8866_s7 + $0x188] sm:$0xff] }
 0x3df   :  { %vm9085_vm7 = vmmov %vm9081_vm0 }
 0x3e0   :  { %4427 = vmatpush.msrb.mxu2 %v4316_v47  ;;  %vm9086_vm12 = vmmov %vm9081_vm0 }
 0x3e1   :  { %v3688_v35 = vpop.f32.mrf.mxu1  ;;  %vm9087_vm3 = vmmov %vm9081_vm0 }
 0x3e2   :  { %v3575_v51 = vpop.f32.mrf.mxu2  ;;  %3388 = vrot.lane.b32.xlu2 %v7596_v15, %s5646_s29  ;;  %v3700_v26 = vrot.slane %v3688_v35, 4  ;;  %4428 = vmatpush.msrb.mxu2 %v4315_v4  ;;  %v4307_v35 = vld [vmem:[%s8866_s7 + $0x100] sm:$0xff]  ;;  %v4305_v4 = vld [vmem:[%s8866_s7 + $0xf0] sm:$0xff]  ;;  %vm9088_vm10 = vmmov %vm9081_vm0 }
 0x3e3   :  { %3585 = vst.msk [vmem:[#allocation5 + $0x30] sm:$0xf] %vm3271_vm6, %v3575_v51  ;;  %v4308_v51 = vld [vmem:[%s8866_s7 + $0x108] sm:$0xff]  ;;  %4393 = vmatpush.msra.mxu1 %v4305_v4  ;;  %vm9089_vm4 = vmmov %vm9081_vm0 }
 0x3e4   :  { %3702 = vst.msk [vmem:[#allocation5 + $0x30] sm:$0xf0] %vm9082_vm14, %v3700_v26  ;;  %4429 = vmatpush.msrb.mxu2 %v4314_v39  ;;  %v4331_v26 = vld [vmem:[%s8866_s7 + $0x1c0] sm:$0xff]  ;;  %vm9090_vm9 = vmmov %vm9081_vm0  ;;  %vm5316_vm14 = vcmask 392192  }
 0x3e5   :  { %3423 = vrot.lane.b32.xlu1 %v3422_v0, %s5646_s29  ;;  %v4332_v0 = vld [vmem:[%s8866_s7 + $0x1c8] sm:$0xff]  ;;  %vm9091_vm1 = vmmov %vm9081_vm0 }
 0x3e6   :  { %4430 = vmatpush.msrb.mxu2 %v4313_v11  ;;  %4456 = vmatpush.msrb.mxu3 %v4332_v0 }
 0x3e8   :  { %4431 = vmatpush.msrb.mxu2 %v4312_v53  ;;  %4457 = vmatpush.msrb.mxu3 %v4331_v26  ;;  %v4346_v26 = vld [vmem:[%s8866_s7 + $0x238] sm:$0xff] }
 0x3e9   :  { %v3844_v15 = vpop.f32.mrf.mxu1 }
 0x3ea   :  { %v3725_v24 = vpop.f32.mrf.mxu2  ;;  %3542 = vrot.lane.b32.xlu2 %v3532_v28, %s5646_s29  ;;  %v3855_v12 = vrot.slane %v3844_v15, 4  ;;  %4432 = vmatpush.msrb.mxu2 %v4311_v57 }
 0x3eb   :  { %3737 = vst.msk [vmem:[#allocation5 + $0x38] sm:$0xf0] %vm9081_vm0, %v3725_v24  ;;  %v3732_v23 = vrot.slane %v3725_v24, 4  ;;  %v4280_v24 = vld [vmem:[%s8866_s7 + $0x28] sm:$0xff] }
 0x3ec   :  { %3857 = vst.msk [vmem:[#allocation5 + $0x60] sm:$0xf] %vm3271_vm6, %v3855_v12  ;;  %4433 = vmatpush.msrb.mxu2 %v4310_v10  ;;  %4373 = vmatpush.msra.mxu0 %v4280_v24  ;;  %v4330_v12 = vld [vmem:[%s8866_s7 + $0x1b8] sm:$0xff] }
 0x3ed   :  { %4458 = vmatpush.msrb.mxu3 %v4330_v12  ;;  %v4342_v12 = vld [vmem:[%s8866_s7 + $0x218] sm:$0xff] }
 0x3ee   :  { %4434 = vmatpush.msrb.mxu2 %v4309_v14  ;;  %v4292_v14 = vld [vmem:[%s8866_s7 + $0x88] sm:$0xff] }
 0x3f0   :  { %4435 = vmatpush.msrb.mxu2 %v4308_v51 }
 0x3f1   :  { %v7712_v22 = vpop.f32.mrf.mxu1 }
 0x3f2   :  { %v3728_v50 = vpop.f32.mrf.mxu2  ;;  %3380 = vrot.lane.b32.xlu2 %v7575_v21, %s5646_s29  ;;  %4436 = vmatpush.msrb.mxu2 %v4307_v35 }
 0x3f3   :  { %v3739_v3 = vrot.slane %v3728_v50, 4  ;;  %v3924_v50 = vpop.f32.mrf.mxu3 }
 0x3f5   :  { %v7702_v60 = vpop.f32.mrf.mxu0 }
 0x3f6   :  { %3973 = vst.msk [vmem:[#allocation5 + $0x60] sm:$0xf0] %vm9083_vm11, %v7702_v60  ;;  %v3968_v6 = vrot.slane %v7702_v60, 4  ;;  %v4279_v60 = vld [vmem:[%s8866_s7 + $0x20] sm:$0xff] }
 0x3f7   :  { %4374 = vmatpush.msra.mxu0 %v4279_v60  ;;  %v4343_v60 = vld [vmem:[%s8866_s7 + $0x220] sm:$0xff] }
 0x3fa   :  { %v7707_v13 = vpop.f32.mrf.mxu2  ;;  %3740 = vrot.lane.b32.xlu2 %v3739_v3, %s5646_s29  ;;  %v3936_v3 = vrot.slane %v3924_v50, 4  ;;  %v4345_v50 = vld [vmem:[%s8866_s7 + $0x230] sm:$0xff] }
 0x3fb   :  { %3891 = vst.msk [vmem:[#allocation5 + $0x68] sm:$0xf] %vm3271_vm6, %v7707_v13  ;;  %v3893_v5 = vrot.slane %v7707_v13, 4  ;;  %v4278_v13 = vld [vmem:[%s8866_s7 + $0x18] sm:$0xff] }
 0x3fc   :  { %3938 = vst.msk [vmem:[#allocation5 + $0x58] sm:$0xf0] %vm9086_vm12, %v3936_v3  ;;  %4375 = vmatpush.msra.mxu0 %v4278_v13  ;;  %v4341_v13 = vld [vmem:[%s8866_s7 + $0x210] sm:$0xff] }
 0x3fd   :  { %v3964_v8 = vpop.f32.mrf.mxu0 }
 0x3fe   :  { %v3975_v32 = vrot.slane %v3964_v8, 4  ;;  %v4277_v8 = vld [vmem:[%s8866_s7 + $0x10] sm:$0xff] }
 0x3ff   :  { %4376 = vmatpush.msra.mxu0 %v4277_v8 }
 0x402   :  { %v3888_v21 = vpop.f32.mrf.mxu2  ;;  %3615 = vrot.lane.b32.xlu2 %v7630_v37, %s5646_s29  ;;  %v7717_v63 = vpop.f32.mrf.mxu1 }
 0x403   :  { %3898 = vst.msk [vmem:[#allocation5 + $0x70] sm:$0xf] %vm3271_vm6, %v3888_v21  ;;  %v4009_v34 = vrot.slane %v7717_v63, 4  ;;  %v4329_v21 = vld [vmem:[%s8866_s7 + $0x1b0] sm:$0xff] }
 0x404   :  { %4459 = vmatpush.msrb.mxu3 %v4329_v21  ;;  %v4340_v21 = vld [vmem:[%s8866_s7 + $0x208] sm:$0xff] }
 0x405   :  { %4011 = vst.msk [vmem:[#allocation5 + $0x68] sm:$0xf0] %vm9084_vm15, %v4009_v34  ;;  %v4328_v34 = vld [vmem:[%s8866_s7 + $0x1a8] sm:$0xff] }
 0x406   :  { %v3818_v1 = vpop.permute.xlu0 %3817  ;;  %4460 = vmatpush.msrb.mxu3 %v4328_v34  ;;  %v4339_v34 = vld [vmem:[%s8866_s7 + $0x200] sm:$0xff] }
 0x407   :  { %3820 = vst.msk [vmem:[#allocation5 + $0x50] sm:$0xf] %vm3348_vm2, %v3818_v1 }
 0x40a   :  { %v4042_v58 = vpop.f32.mrf.mxu2  ;;  %3976 = vrot.lane.b32.xlu2 %v3975_v32, %s5646_s29  ;;  %v4005_v29 = vpop.f32.mrf.mxu1 }
 0x40b   :  { %4048 = vst.msk [vmem:[#allocation5 + $0x78] sm:$0xf] %vm3271_vm6, %v4042_v58  ;;  %v4050_v33 = vrot.slane %v4042_v58, 4  ;;  %v4017_v37 = vrot.slane %v4005_v29, 4  ;;  %v4276_v58 = vld [vmem:[%s8866_s7 + $0x8] sm:$0xff] }
 0x40c   :  { %4377 = vmatpush.msra.mxu0 %v4276_v58 }
 0x40d   :  { %4051 = vrot.lane.b32.xlu0 %v4050_v33, %s5646_s29  ;;  %4019 = vst.msk [vmem:[#allocation5 + $0x70] sm:$0xf0] %vm9085_vm7, %v4017_v37  ;;  %v4327_v33 = vld [vmem:[%s8866_s7 + $0x1a0] sm:$0xff] }
 0x40e   :  { %v4275_v37 = vld [vmem:[%s8866_s7] sm:$0xff]  ;;  %4461 = vmatpush.msrb.mxu3 %v4327_v33 }
 0x40f   :  { %4378 = vmatpush.msra.mxu0 %v4275_v37 }
 0x411   :  { %4487 = vmatpush.msrb.mxu0 %v4346_v26 }
 0x412   :  { %3851 = vrot.lane.b32.xlu2 %v3844_v15, %s5646_s29  ;;  %v4045_v28 = vpop.f32.mrf.mxu2  ;;  %v3507_v15 = vpop.permute.xlu0 %3506 }
 0x413   :  { %4055 = vst.msk [vmem:[#allocation5 + $0x80] sm:$0xf] %vm3271_vm6, %v4045_v28  ;;  %v4300_v28 = vld [vmem:[%s8866_s7 + $0xc8] sm:$0xff]  ;;  %4488 = vmatpush.msrb.mxu0 %v4345_v50 }
 0x414   :  { %3509 = vst.msk [vmem:[#allocation5 + $0x10] sm:$0xf0] %vm3463_vm13, %v3507_v15  ;;  %v4344_v15 = vld [vmem:[%s8866_s7 + $0x228] sm:$0xff] }
 0x415   :  { %3499 = vrot.lane.b32.xlu0 %v3498_v36, %s5646_s29  ;;  %4489 = vmatpush.msrb.mxu0 %v4344_v15 }
 0x417   :  { %4490 = vmatpush.msrb.mxu0 %v4343_v60 }
 0x419   :  { %4491 = vmatpush.msrb.mxu0 %v4342_v12 }
 0x41b   :  { %4492 = vmatpush.msrb.mxu0 %v4341_v13 }
 0x41d   :  { %3658 = vrot.lane.b32.xlu0 %v3657_v7, %s5646_s29  ;;  %v4326_v7 = vld [vmem:[%s8866_s7 + $0x198] sm:$0xff]  ;;  %4493 = vmatpush.msrb.mxu0 %v4340_v21 }
 0x41e   :  { %4462 = vmatpush.msrb.mxu3 %v4326_v7 }
 0x41f   :  { %4494 = vmatpush.msrb.mxu0 %v4339_v34 }
 0x425   :  { %3733 = vrot.lane.b32.xlu0 %v3732_v23, %s5646_s29  ;;  %v4325_v23 = vld [vmem:[%s8866_s7 + $0x190] sm:$0xff] }
 0x426   :  { %4463 = vmatpush.msrb.mxu3 %v4325_v23 }
 0x427   :  { %v3346_v17 = vpop.permute.xlu2 %3345 }
 0x428   :  { %3349 = vst.msk [vmem:[#allocation5] sm:$0xf] %vm3348_vm2, %v3346_v17  ;;  %4464 = vmatpush.msrb.mxu3 %v4324_v44  ;;  %v4259_v44 = vld [vmem:[#allocation5 + $0x20] sm:$0xff] }
 0x42a   :  { %4465 = vmatpush.msrb.mxu3 %v4323_v46 }
 0x42d   :  { %3894 = vrot.lane.b32.xlu0 %v3893_v5, %s5646_s29  ;;  %v7873_v29 = vpop.f32.mrf.mxu3 }
 0x42e   :  { %v4089_v42 = vrot.slane %v7873_v29, 4 }
 0x42f   :  { %v4255_v45 = vld [vmem:[#allocation5] sm:$0xff] }
 0x430   :  { %4091 = vst.msk [vmem:[#allocation5 + $0x88] sm:$0xf] %vm3271_vm6, %v4089_v42  ;;  %4379 = vmatmul.f32.vlgmr.msra.gmra.mxu0 %v4255_v45 }
 0x433   :  { %v3932_v20 = vpop.permute.xlu1 %3931 }
 0x434   :  { %v3696_v18 = vpop.permute.xlu2 %3695  ;;  %3934 = vst.msk [vmem:[#allocation5 + $0x50] sm:$0xf0] %vm3463_vm13, %v3932_v20 }
 0x435   :  { %3698 = vst.msk [vmem:[#allocation5 + $0x28] sm:$0xf0] %vm3463_vm13, %v3696_v18  ;;  %3969 = vrot.lane.b32.xlu0 %v3968_v6, %s5646_s29  ;;  %v4081_v47 = vpop.f32.mrf.mxu3  ;;  %v4296_v6 = vld [vmem:[%s8866_s7 + $0xa8] sm:$0xff]  ;;  %v4291_v18 = vld [vmem:[%s8866_s7 + $0x80] sm:$0xff] }
 0x43b   :  { %v4265_v20 = vld [vmem:[#allocation5 + $0x50] sm:$0xff] }
 0x43c   :  { %v3389_v32 = vpop.permute.xlu2 %3388 }
 0x43d   :  { %3391 = vst.msk [vmem:[#allocation5 + $0x10] sm:$0xf] %vm3348_vm2, %v3389_v32  ;;  %v4237_v25 = vpop.f32.mrf.mxu3 }
 0x43e   :  { %v4244_v39 = vrot.slane %v4237_v25, 4 }
 0x440   :  { %v4155_v36 = vpop.f32.mrf.mxu1  ;;  %v4119_v38 = vpop.f32.mrf.mxu0  ;;  %4246 = vst.msk [vmem:[#allocation5 + $0x90] sm:$0xf0] %vm9088_vm10, %v4244_v39 }
 0x441   :  { %v4162_v27 = vrot.slane %v4155_v36, 4  ;;  %4165 = vrot.lane.b32.xlu1 %v4155_v36, %s5646_s29  ;;  %4125 = vst.msk [vmem:[#allocation5 + $0x90] sm:$0xf] %vm3271_vm6, %v4119_v38  ;;  %v4127_v56 = vrot.slane %v4119_v38, 4 }
 0x443   :  { %4164 = vst.msk [vmem:[#allocation5 + $0x78] sm:$0xf0] %vm9087_vm3, %v4162_v27  ;;  %4128 = vrot.lane.b32.xlu0 %v4127_v56, %s5646_s29 }
 0x444   :  { %v3543_v9 = vpop.permute.xlu2 %3542  ;;  %v4257_v41 = vld [vmem:[#allocation5 + $0x10] sm:$0xff] }
 0x445   :  { %3545 = vst.msk [vmem:[#allocation5 + $0x18] sm:$0xf0] %vm3463_vm13, %v3543_v9  ;;  %4437 = vmatmul.f32.vlgmr.msrb.gmra.mxu2 %v4257_v41 }
 0x447   :  { %v4240_v45 = vpop.f32.mrf.mxu3 }
 0x448   :  { %v4158_v58 = vpop.f32.mrf.mxu1  ;;  %v4122_v42 = vpop.f32.mrf.mxu0  ;;  %v4252_v23 = vrot.slane %v4240_v45, 4 }
 0x449   :  { %3623 = vrot.lane.b32.xlu1 %v7640_v31, %s5646_s29  ;;  %v4304_v31 = vld [vmem:[%s8866_s7 + $0xe8] sm:$0xff]  ;;  %v4170_v33 = vrot.slane %v4158_v58, 4  ;;  %4132 = vst.msk [vmem:[#allocation5 + $0x98] sm:$0xf] %vm3271_vm6, %v4122_v42  ;;  %vm9092_vm6 = vcmask 523264  }
 0x44a   :  { %4394 = vmatpush.msra.mxu1 %v4304_v31  ;;  %4254 = vst.msk [vmem:[#allocation5 + $0x98] sm:$0xf0] %vm9091_vm1, %v4252_v23  ;;  %vm9093_vm8 = vmmov %vm9092_vm6 }
 0x44b   :  { %4172 = vst.msk [vmem:[#allocation5 + $0x80] sm:$0xf0] %vm9090_vm9, %v4170_v33  ;;  %vm9094_vm5 = vmmov %vm9092_vm6 }
 0x44c   :  { %v3381_v54 = vpop.permute.xlu2 %3380  ;;  %4395 = vmatpush.msra.mxu1 %v4303_v49  ;;  %vm9095_vm0 = vmmov %vm9094_vm5 }
 0x44d   :  { %3383 = vst.msk [vmem:[#allocation5 + $0x8] sm:$0xf] %vm3348_vm2, %v3381_v54 }
 0x44f   :  { %v3582_v17 = vpop.permute.xlu1 %3581 }
 0x450   :  { %3584 = vst.msk [vmem:[#allocation5 + $0x28] sm:$0xf] %vm3348_vm2, %v3582_v17  ;;  %v4264_v17 = vld [vmem:[#allocation5 + $0x48] sm:$0xff] }
 0x451   :  { %3777 = vrot.lane.b32.xlu1 %v7648_v43, %s5646_s29  ;;  %v4302_v43 = vld [vmem:[%s8866_s7 + $0xd8] sm:$0xff] }
 0x452   :  { %4396 = vmatpush.msra.mxu1 %v4302_v43  ;;  %v4274_v49 = vld [vmem:[#allocation5 + $0x98] sm:$0xff] }
 0x454   :  { %v3741_v59 = vpop.permute.xlu2 %3740  ;;  %4397 = vmatpush.msra.mxu1 %v4301_v30 }
 0x455   :  { %3743 = vst.msk [vmem:[#allocation5 + $0x38] sm:$0xf0] %vm3463_vm13, %v3741_v59 }
 0x456   :  { %v4195_v5 = vpop.f32.mrf.mxu2  ;;  %4398 = vmatpush.msra.mxu1 %v4300_v28 }
 0x457   :  { %v4202_v11 = vrot.slane %v4195_v5, 4  ;;  %4207 = vst.msk [vmem:[#allocation5 + $0x88] sm:$0xf0] %vm9089_vm4, %v4195_v5  ;;  %v3424_v52 = vpop.permute.xlu1 %3423  ;;  %v4260_v53 = vld [vmem:[#allocation5 + $0x28] sm:$0xff] }
 0x458   :  { %3426 = vst.msk [vmem:[#allocation5 + $0x18] sm:$0xf] %vm3348_vm2, %v3424_v52  ;;  %4382 = vmatmul.f32.gmra.mxu0 %v4260_v53  ;;  %4399 = vmatpush.msra.mxu1 %v4299_v19  ;;  %v5632_v19 = vld [vmem:[%s8867_s8] ss:$0 sm:$0xff] }
 0x459   :  { %3859 = vrot.lane.b32.xlu1 %v7712_v22, %s5646_s29  ;;  %4203 = vrot.lane.b32.xlu0 %v4202_v11, %s5646_s29  ;;  %v4298_v22 = vld [vmem:[%s8866_s7 + $0xb8] sm:$0xff] }
 0x45a   :  { %4400 = vmatpush.msra.mxu1 %v4298_v22 }
 0x45c   :  { %v3616_v55 = vpop.permute.xlu2 %3615  ;;  %4401 = vmatpush.msra.mxu1 %v4297_v2 }
 0x45d   :  { %3618 = vst.msk [vmem:[#allocation5 + $0x30] sm:$0xf] %vm3348_vm2, %v3616_v55 }
 0x45e   :  { %v4198_v57 = vpop.f32.mrf.mxu2  ;;  %4402 = vmatpush.msra.mxu1 %v4296_v6 }
 0x45f   :  { %v4209_v61 = vrot.slane %v4198_v57, 4  ;;  %v4258_v1 = vld [vmem:[#allocation5 + $0x18] sm:$0xff] }
 0x460   :  { %4466 = vmatmul.f32.vlgmr.msrb.gmra.mxu3 %v4258_v1  ;;  %4403 = vmatpush.msra.mxu1 %v4295_v40 }
 0x461   :  { %4012 = vrot.lane.b32.xlu1 %v7717_v63, %s5646_s29  ;;  %4210 = vrot.lane.b32.xlu2 %v4209_v61, %s5646_s29  ;;  %v4294_v63 = vld [vmem:[%s8866_s7 + $0x98] sm:$0xff] }
 0x462   :  { %4404 = vmatpush.msra.mxu1 %v4294_v63  ;;  %4385 = vmatmul.f32.gmra.mxu0 %v4265_v20 }
 0x464   :  { %v3977_v10 = vpop.permute.xlu2 %3976  ;;  %4405 = vmatpush.msra.mxu1 %v4293_v62 }
 0x465   :  { %3979 = vst.msk [vmem:[#allocation5 + $0x60] sm:$0xf0] %vm3463_vm13, %v3977_v10 }
 0x466   :  { %4406 = vmatpush.msra.mxu1 %v4292_v14 }
 0x468   :  { %4407 = vmatpush.msra.mxu1 %v4291_v18 }
 0x469   :  { %4093 = vrot.lane.b32.xlu1 %v4081_v47, %s5646_s29  ;;  %4085 = vrot.lane.b32.xlu2 %v7873_v29, %s5646_s29 }
 0x46c   :  { %v3852_v16 = vpop.permute.xlu2 %3851 }
 0x46d   :  { %3854 = vst.msk [vmem:[#allocation5 + $0x58] sm:$0xf] %vm3348_vm2, %v3852_v16 }
 0x471   :  { %4247 = vrot.lane.b32.xlu1 %v4237_v25, %s5646_s29  ;;  %v4269_v25 = vld [vmem:[#allocation5 + $0x70] sm:$0xff] }
 0x47f   :  { %v4052_v0 = vpop.permute.xlu0 %4051 }
 0x480   :  { %4054 = vst.msk [vmem:[#allocation5 + $0x78] sm:$0xf] %vm3348_vm2, %v4052_v0 }
 0x487   :  { %v3500_v51 = vpop.permute.xlu0 %3499 }
 0x488   :  { %3502 = vst.msk [vmem:[#allocation5 + $0x8] sm:$0xf0] %vm3463_vm13, %v3500_v51 }
 0x48f   :  { %v3659_v24 = vpop.permute.xlu0 %3658  ;;  %v4256_v35 = vld [vmem:[#allocation5 + $0x8] sm:$0xff] }
 0x490   :  { %3661 = vst.msk [vmem:[#allocation5 + $0x40] sm:$0xf] %vm3348_vm2, %v3659_v24  ;;  %4408 = vmatmul.f32.vlgmr.msra.gmra.mxu1 %v4256_v35 }
 0x497   :  { %v3734_v3 = vpop.permute.xlu0 %3733 }
 0x498   :  { %3736 = vst.msk [vmem:[#allocation5 + $0x30] sm:$0xf0] %vm3463_vm13, %v3734_v3 }
 0x49f   :  { %v3895_v8 = vpop.permute.xlu0 %3894  ;;  %v4261_v32 = vld [vmem:[#allocation5 + $0x30] sm:$0xff] }
 0x4a0   :  { %3897 = vst.msk [vmem:[#allocation5 + $0x68] sm:$0xf] %vm3348_vm2, %v3895_v8  ;;  %4411 = vmatmul.f32.gmra.mxu1 %v4261_v32 }
 0x4a7   :  { %v3970_v29 = vpop.permute.xlu0 %3969 }
 0x4a8   :  { %3972 = vst.msk [vmem:[#allocation5 + $0x58] sm:$0xf0] %vm3463_vm13, %v3970_v29 }
 0x4ad   :  { %v4380_v53 = vpop.f32.mrf.mxu0 }
 0x4ae   :  { %v4381_v57 = vadd.f32 %v5632_v19, %v4380_v53  ;;  %v4729_v53 = vld [vmem:[%s8868_s9 + $0x168] sm:$0xff] }
 0x4af   :  { %v4266_v37 = vld [vmem:[#allocation5 + $0x58] sm:$0xff] }
 0x4b0   :  { %4414 = vmatmul.f32.gmra.mxu1 %v4266_v37 }
 0x4b3   :  { %v4166_v36 = vpop.permute.xlu1 %4165 }
 0x4b4   :  { %4168 = vst.msk [vmem:[#allocation5 + $0x78] sm:$0xf0] %vm3463_vm13, %v4166_v36 }
 0x4b5   :  { %v4129_v38 = vpop.permute.xlu0 %4128 }
 0x4b6   :  { %4131 = vst.msk [vmem:[#allocation5 + $0x90] sm:$0xf] %vm3348_vm2, %v4129_v38 }
 0x4bb   :  { %v3624_v7 = vpop.permute.xlu1 %3623  ;;  %v4270_v27 = vld [vmem:[#allocation5 + $0x78] sm:$0xff]  ;;  %v4211_v56 = vpop.permute.xlu2 %4210 }
 0x4bc   :  { %3626 = vst.msk [vmem:[#allocation5 + $0x38] sm:$0xf] %vm3348_vm2, %v3624_v7  ;;  %4388 = vmatmul.f32.gmra.mxu0 %v4270_v27 }
 0x4bd   :  { %4213 = vst.msk [vmem:[#allocation5 + $0x88] sm:$0xf0] %vm3463_vm13, %v4211_v56 }
 0x4c3   :  { %v3778_v9 = vpop.permute.xlu1 %3777  ;;  %v4262_v41 = vld [vmem:[#allocation5 + $0x38] sm:$0xff]  ;;  %v4086_v46 = vpop.permute.xlu2 %4085 }
 0x4c4   :  { %3780 = vst.msk [vmem:[#allocation5 + $0x40] sm:$0xf0] %vm3463_vm13, %v3778_v9  ;;  %4440 = vmatmul.f32.gmra.mxu2 %v4262_v41  ;;  %5605 = vmatmul.msk.f32.vlgmr.msrb.gmra.mxu0 %vm9092_vm6, %v4259_v44 }
 0x4c5   :  { %4088 = vst.msk [vmem:[#allocation5 + $0x80] sm:$0xf] %vm3348_vm2, %v4086_v46 }
 0x4c8   :  { %v4438_v22 = vpop.f32.mrf.mxu2 }
 0x4cb   :  { %v3860_v47 = vpop.permute.xlu1 %3859  ;;  %v4204_v48 = vpop.permute.xlu0 %4203  ;;  %v4263_v54 = vld [vmem:[#allocation5 + $0x40] sm:$0xff] }
 0x4cc   :  { %3862 = vst.msk [vmem:[#allocation5 + $0x60] sm:$0xf] %vm3348_vm2, %v3860_v47  ;;  %4469 = vmatmul.f32.gmra.mxu3 %v4263_v54  ;;  %5606 = vmatmul.msk.f32.gmra.mxu0 %vm9093_vm8, %v4264_v17  ;;  %v4699_v47 = vld [vmem:[%s8868_s9 + $0x78] sm:$0xff] }
 0x4cd   :  { %4206 = vst.msk [vmem:[#allocation5 + $0x80] sm:$0xf0] %vm3463_vm13, %v4204_v48  ;;  %v4715_v48 = vld [vmem:[%s8868_s9 + $0xf8] sm:$0xff]  ;;  %4985 = vmatpush.msrb.mxu1 %v4699_v47 }
 0x4ce   :  { %5005 = vmatpush.msra.mxu2 %v4715_v48  ;;  %v4731_v54 = vld [vmem:[%s8868_s9 + $0x178] sm:$0xff] }
 0x4cf   :  { %v4747_v17 = vld [vmem:[%s8868_s9 + $0x1f8] sm:$0xff]  ;;  %5025 = vmatpush.msra.mxu3 %v4731_v54 }
 0x4d0   :  { %5045 = vmatpush.msra.mxu0 %v4747_v17  ;;  %v4703_v47 = vld [vmem:[%s8868_s9 + $0x98] sm:$0xff] }
 0x4d1   :  { %v4719_v54 = vld [vmem:[%s8868_s9 + $0x118] sm:$0xff] }
 0x4d2   :  { %v4735_v17 = vld [vmem:[%s8868_s9 + $0x198] sm:$0xff] }
 0x4d3   :  { %v4013_v4 = vpop.permute.xlu1 %4012  ;;  %v4267_v31 = vld [vmem:[#allocation5 + $0x60] sm:$0xff] }
 0x4d4   :  { %4015 = vst.msk [vmem:[#allocation5 + $0x68] sm:$0xf0] %vm3463_vm13, %v4013_v4  ;;  %v4271_v39 = vld [vmem:[#allocation5 + $0x80] sm:$0xff]  ;;  %4443 = vmatmul.f32.gmra.mxu2 %v4267_v31  ;;  %5607 = vmatmul.msk.f32.gmra.mxu0 %vm9094_vm5, %v4269_v25  ;;  %v4698_v4 = vld [vmem:[%s8868_s9 + $0x70] sm:$0xff] }
 0x4d5   :  { %4417 = vmatmul.f32.gmra.mxu1 %v4271_v39  ;;  %v4383_v30 = vpop.f32.mrf.mxu0  ;;  %v4714_v39 = vld [vmem:[%s8868_s9 + $0xf0] sm:$0xff] }
 0x4d6   :  { %v4384_v0 = vadd.f32 %v5632_v19, %v4383_v30  ;;  %4986 = vmatpush.msrb.mxu1 %v4698_v4  ;;  %5006 = vmatpush.msra.mxu2 %v4714_v39  ;;  %v4686_v4 = vld [vmem:[%s8868_s9 + $0x10] sm:$0xff]  ;;  %v4685_v39 = vld [vmem:[%s8868_s9 + $0x8] sm:$0xff] }
 0x4db   :  { %v4094_v59 = vpop.permute.xlu1 %4093  ;;  %v4268_v43 = vld [vmem:[#allocation5 + $0x68] sm:$0xff] }
 0x4dc   :  { %4096 = vst.msk [vmem:[#allocation5 + $0x88] sm:$0xf] %vm3348_vm2, %v4094_v59  ;;  %4472 = vmatmul.f32.gmra.mxu3 %v4268_v43  ;;  %5608 = vmatmul.msk.f32.gmra.mxu0 %vm9095_vm0, %v4274_v49  ;;  %v4730_v49 = vld [vmem:[%s8868_s9 + $0x170] sm:$0xff] }
 0x4dd   :  { %v4746_v59 = vld [vmem:[%s8868_s9 + $0x1f0] sm:$0xff]  ;;  %5026 = vmatpush.msra.mxu3 %v4730_v49  ;;  %v4701_v49 = vld [vmem:[%s8868_s9 + $0x88] sm:$0xff] }
 0x4de   :  { %5046 = vmatpush.msra.mxu0 %v4746_v59  ;;  %v4717_v59 = vld [vmem:[%s8868_s9 + $0x108] sm:$0xff] }
 0x4df   :  { %v4386_v28 = vpop.f32.mrf.mxu0  ;;  %5027 = vmatpush.msra.mxu3 %v4729_v53  ;;  %v4732_v53 = vld [vmem:[%s8868_s9 + $0x180] sm:$0xff] }
 0x4e0   :  { %v4387_v33 = vadd.f32 %v5632_v19, %v4386_v28 }
 0x4e3   :  { %v4248_v5 = vpop.permute.xlu1 %4247  ;;  %v4272_v11 = vld [vmem:[#allocation5 + $0x88] sm:$0xff]  ;;  %v4467_v6 = vpop.f32.mrf.mxu3 }
 0x4e4   :  { %4250 = vst.msk [vmem:[#allocation5 + $0x90] sm:$0xf0] %vm3463_vm13, %v4248_v5  ;;  %4446 = vmatmul.f32.gmra.mxu2 %v4272_v11  ;;  %v4697_v11 = vld [vmem:[%s8868_s9 + $0x68] sm:$0xff] }
 0x4e5   :  { %4987 = vmatpush.msrb.mxu1 %v4697_v11  ;;  %v4700_v11 = vld [vmem:[%s8868_s9 + $0x80] sm:$0xff] }
 0x4eb   :  { %v4273_v52 = vld [vmem:[#allocation5 + $0x90] sm:$0xff] }
 0x4ec   :  { %4475 = vmatmul.f32.gmra.mxu3 %v4273_v52  ;;  %v4713_v52 = vld [vmem:[%s8868_s9 + $0xe8] sm:$0xff] }
 0x4ed   :  { %5007 = vmatpush.msra.mxu2 %v4713_v52  ;;  %v4716_v52 = vld [vmem:[%s8868_s9 + $0x100] sm:$0xff] }
 0x50d   :  { %v4409_v55 = vpop.f32.mrf.mxu1 }
 0x50e   :  { %v4410_v61 = vadd.f32 %v4409_v55, %v4381_v57  ;;  %v4696_v55 = vld [vmem:[%s8868_s9 + $0x60] sm:$0xff] }
 0x50f   :  { %v4712_v57 = vld [vmem:[%s8868_s9 + $0xe0] sm:$0xff]  ;;  %4988 = vmatpush.msrb.mxu1 %v4696_v55  ;;  %v4795_v55 = vld [vmem:[%s8868_s9 + $0x378] sm:$0xff] }
 0x510   :  { %v4439_v2 = vadd.f32 %v4438_v22, %v4410_v61  ;;  %v4728_v61 = vld [vmem:[%s8868_s9 + $0x160] sm:$0xff]  ;;  %5008 = vmatpush.msra.mxu2 %v4712_v57  ;;  %v4811_v57 = vld [vmem:[%s8868_s9 + $0x3f8] sm:$0xff] }
 0x511   :  { %5028 = vmatpush.msra.mxu3 %v4728_v61  ;;  %v4762_v61 = vld [vmem:[%s8868_s9 + $0x270] sm:$0xff] }
 0x512   :  { %v4468_v10 = vadd.f32 %v4467_v6, %v4439_v2  ;;  %v4695_v2 = vld [vmem:[%s8868_s9 + $0x58] sm:$0xff] }
 0x513   :  { %v4711_v6 = vld [vmem:[%s8868_s9 + $0xd8] sm:$0xff]  ;;  %4989 = vmatpush.msrb.mxu1 %v4695_v2  ;;  %v4810_v2 = vld [vmem:[%s8868_s9 + $0x3f0] sm:$0xff] }
 0x514   :  { %5009 = vmatpush.msra.mxu2 %v4711_v6  ;;  %v4761_v6 = vld [vmem:[%s8868_s9 + $0x268] sm:$0xff] }
 0x51d   :  { %v4412_v18 = vpop.f32.mrf.mxu1 }
 0x51e   :  { %v4413_v51 = vadd.f32 %v4412_v18, %v4384_v0  ;;  %v4726_v18 = vld [vmem:[%s8868_s9 + $0x150] sm:$0xff] }
 0x51f   :  { %v4742_v0 = vld [vmem:[%s8868_s9 + $0x1d0] sm:$0xff] }
 0x52d   :  { %v4415_v58 = vpop.f32.mrf.mxu1 }
 0x52e   :  { %v4416_v36 = vadd.f32 %v4415_v58, %v4387_v33  ;;  %v4739_v58 = vld [vmem:[%s8868_s9 + $0x1b8] sm:$0xff]  ;;  %v4690_v33 = vld [vmem:[%s8868_s9 + $0x30] sm:$0xff] }
 0x539   :  { %v4389_v1 = vpop.f32.mrf.mxu0 }
 0x53a   :  { %v4390_v45 = vadd.f32 %v5632_v19, %v4389_v1  ;;  %v4745_v19 = vld [vmem:[%s8868_s9 + $0x1e8] sm:$0xff]  ;;  %v4744_v1 = vld [vmem:[%s8868_s9 + $0x1e0] sm:$0xff] }
 0x53b   :  { %5047 = vmatpush.msra.mxu0 %v4745_v19 }
 0x53d   :  { %5048 = vmatpush.msra.mxu0 %v4744_v1  ;;  %v4778_v1 = vld [vmem:[%s8868_s9 + $0x2f0] sm:$0xff] }
 0x541   :  { %v4496_v40 = vpop.f32.mrf.mxu0 }
 0x542   :  { %v4497_v63 = vadd.f32 %v4496_v40, %v4468_v10  ;;  %v4727_v40 = vld [vmem:[%s8868_s9 + $0x158] sm:$0xff] }
 0x543   :  { %5029 = vmatpush.msra.mxu3 %v4727_v40 }
 0x544   :  { %v4508_v62 = vmax.f32 %v4497_v63, 0.0  ;;  %v4743_v63 = vld [vmem:[%s8868_s9 + $0x1d8] sm:$0xff] }
 0x545   :  { %5049 = vmatpush.msra.mxu0 %v4743_v63  ;;  %5030 = vmatpush.msra.mxu3 %v4726_v18  ;;  %v4793_v63 = vld [vmem:[%s8868_s9 + $0x368] sm:$0xff]  ;;  %v4792_v18 = vld [vmem:[%s8868_s9 + $0x360] sm:$0xff] }
 0x546   :  { %4512 = vst [vmem:[#allocation6] sm:$0x1] %v4508_v62  ;;  %v5609_v14 = vrot.slane %v4508_v62, 9 }
 0x547   :  { %4518 = vst.sshfl [vmem:[#allocation1] sm:$0xff pattern:$0x73625140] %v4508_v62  ;;  %v4441_v24 = vpop.f32.mrf.mxu2  ;;  %5050 = vmatpush.msra.mxu0 %v4742_v0  ;;  %v4808_v0 = vld [vmem:[%s8868_s9 + $0x3e0] sm:$0xff] }
 0x548   :  { %4517 = vst [vmem:[#allocation6 + $0x2] sm:$0x1] %v5609_v14  ;;  %v4442_v35 = vadd.f32 %v4441_v24, %v4413_v51  ;;  %v4694_v14 = vld [vmem:[%s8868_s9 + $0x50] sm:$0xff]  ;;  %v4709_v24 = vld [vmem:[%s8868_s9 + $0xc8] sm:$0xff] }
 0x549   :  { %v4499_v15 = vpop.f32.mrf.mxu0  ;;  %4990 = vmatpush.msrb.mxu1 %v4694_v14  ;;  %v4809_v14 = vld [vmem:[%s8868_s9 + $0x3e8] sm:$0xff] }
 0x54e   :  { %v4520_v16 = vld [vmem:[#allocation1 + $0x1] ss:$4 sm:$0xff] }
 0x54f   :  { %4523 = vst.sshfl [vmem:[#allocation1] sm:$0xff pattern:$0x73625140] %v4508_v62  ;;  %v4470_v26 = vpop.f32.mrf.mxu3 }
 0x550   :  { %4522 = vst [vmem:[#allocation6 + $0x4] sm:$0x1] %v4520_v16  ;;  %v4471_v50 = vadd.f32 %v4470_v26, %v4442_v35  ;;  %v4710_v16 = vld [vmem:[%s8868_s9 + $0xd0] sm:$0xff]  ;;  %v4725_v35 = vld [vmem:[%s8868_s9 + $0x148] sm:$0xff] }
 0x551   :  { %v4502_v42 = vpop.f32.mrf.mxu0  ;;  %5010 = vmatpush.msra.mxu2 %v4710_v16  ;;  %v4741_v26 = vld [vmem:[%s8868_s9 + $0x1c8] sm:$0xff]  ;;  %5031 = vmatpush.msra.mxu3 %v4725_v35  ;;  %v4760_v16 = vld [vmem:[%s8868_s9 + $0x260] sm:$0xff]  ;;  %v4807_v35 = vld [vmem:[%s8868_s9 + $0x3d8] sm:$0xff] }
 0x552   :  { %v4500_v3 = vadd.f32 %v4499_v15, %v4471_v50  ;;  %v4418_v56 = vpop.f32.mrf.mxu1  ;;  %v4692_v50 = vld [vmem:[%s8868_s9 + $0x40] sm:$0xff]  ;;  %5051 = vmatpush.msra.mxu0 %v4741_v26  ;;  %v4758_v26 = vld [vmem:[%s8868_s9 + $0x250] sm:$0xff] }
 0x553   :  { %v4419_v41 = vadd.f32 %v4418_v56, %v4390_v45  ;;  %v4708_v15 = vld [vmem:[%s8868_s9 + $0xc0] sm:$0xff]  ;;  %5011 = vmatpush.msra.mxu2 %v4709_v24  ;;  %v4737_v56 = vld [vmem:[%s8868_s9 + $0x1a8] sm:$0xff]  ;;  %v4791_v24 = vld [vmem:[%s8868_s9 + $0x358] sm:$0xff] }
 0x554   :  { %v8019_v60 = vmax.f32 %v4500_v3, 0.0  ;;  %v4724_v3 = vld [vmem:[%s8868_s9 + $0x140] sm:$0xff] }
 0x555   :  { %5012 = vmatpush.msra.mxu2 %v4708_v15  ;;  %5032 = vmatpush.msra.mxu3 %v4724_v3  ;;  %v4688_v45 = vld [vmem:[%s8868_s9 + $0x20] sm:$0xff]  ;;  %v4790_v15 = vld [vmem:[%s8868_s9 + $0x350] sm:$0xff] }
 0x556   :  { %v4525_v20 = vld [vmem:[#allocation1 + $0x1] ss:$4 sm:$0xff]  ;;  %v5613_v13 = vrot.slane %v8019_v60, 9  ;;  %4554 = vst [vmem:[#allocation6 + $0x10] sm:$0x1] %v8019_v60 }
 0x557   :  { %4530 = vst.sshfl [vmem:[#allocation1] sm:$0xff pattern:$0x73625140] %v4508_v62  ;;  %v5610_v34 = vrot.slane %v4525_v20, 9  ;;  %v4444_v37 = vpop.f32.mrf.mxu2  ;;  %v4693_v20 = vld [vmem:[%s8868_s9 + $0x48] sm:$0xff]  ;;  %v4806_v3 = vld [vmem:[%s8868_s9 + $0x3d0] sm:$0xff] }
 0x558   :  { %4559 = vst [vmem:[#allocation6 + $0x12] sm:$0x1] %v5613_v13  ;;  %v4445_v38 = vadd.f32 %v4444_v37, %v4416_v36  ;;  %4991 = vmatpush.msrb.mxu1 %v4693_v20  ;;  %v4691_v13 = vld [vmem:[%s8868_s9 + $0x38] sm:$0xff]  ;;  %v4722_v37 = vld [vmem:[%s8868_s9 + $0x130] sm:$0xff] }
 0x559   :  { %4529 = vst [vmem:[#allocation6 + $0x6] sm:$0x1] %v5610_v34  ;;  %v4505_v5 = vpop.f32.mrf.mxu0  ;;  %v4723_v34 = vld [vmem:[%s8868_s9 + $0x138] sm:$0xff]  ;;  %v4738_v36 = vld [vmem:[%s8868_s9 + $0x1b0] sm:$0xff] }
 0x55a   :  { %4992 = vmatpush.msrb.mxu1 %v4692_v50  ;;  %5033 = vmatpush.msra.mxu3 %v4723_v34  ;;  %v4775_v20 = vld [vmem:[%s8868_s9 + $0x2d8] sm:$0xff]  ;;  %v4774_v50 = vld [vmem:[%s8868_s9 + $0x2d0] sm:$0xff]  ;;  %v4805_v34 = vld [vmem:[%s8868_s9 + $0x3c8] sm:$0xff] }
 0x55c   :  { %4993 = vmatpush.msrb.mxu1 %v4691_v13  ;;  %5034 = vmatpush.msra.mxu3 %v4722_v37  ;;  %v4773_v13 = vld [vmem:[%s8868_s9 + $0x2c8] sm:$0xff]  ;;  %v4788_v37 = vld [vmem:[%s8868_s9 + $0x340] sm:$0xff] }
 0x55e   :  { %v4532_v12 = vld [vmem:[#allocation1 + $0x2] ss:$4 sm:$0xff]  ;;  %4994 = vmatpush.msrb.mxu1 %v4690_v33 }
 0x55f   :  { %4535 = vst.sshfl [vmem:[#allocation1] sm:$0xff pattern:$0x73625140] %v4508_v62  ;;  %v4473_v7 = vpop.f32.mrf.mxu3  ;;  %v4772_v33 = vld [vmem:[%s8868_s9 + $0x2c0] sm:$0xff] }
 0x560   :  { %4534 = vst [vmem:[#allocation6 + $0x8] sm:$0x1] %v4532_v12  ;;  %v4474_v27 = vadd.f32 %v4473_v7, %v4445_v38  ;;  %v4740_v12 = vld [vmem:[%s8868_s9 + $0x1c0] sm:$0xff]  ;;  %v4689_v38 = vld [vmem:[%s8868_s9 + $0x28] sm:$0xff] }
 0x561   :  { %5052 = vmatpush.msra.mxu0 %v4740_v12  ;;  %4995 = vmatpush.msrb.mxu1 %v4689_v38  ;;  %v4757_v12 = vld [vmem:[%s8868_s9 + $0x248] sm:$0xff]  ;;  %v4755_v38 = vld [vmem:[%s8868_s9 + $0x238] sm:$0xff] }
 0x562   :  { %v4503_v23 = vadd.f32 %v4502_v42, %v4474_v27  ;;  %v4705_v42 = vld [vmem:[%s8868_s9 + $0xa8] sm:$0xff] }
 0x563   :  { %5053 = vmatpush.msra.mxu0 %v4739_v58  ;;  %v4721_v27 = vld [vmem:[%s8868_s9 + $0x128] sm:$0xff]  ;;  %4996 = vmatpush.msrb.mxu1 %v4688_v45  ;;  %v4756_v58 = vld [vmem:[%s8868_s9 + $0x240] sm:$0xff]  ;;  %v4770_v45 = vld [vmem:[%s8868_s9 + $0x2b0] sm:$0xff] }
 0x564   :  { %v8032_v44 = vmax.f32 %v4503_v23, 0.0  ;;  %v4720_v23 = vld [vmem:[%s8868_s9 + $0x120] sm:$0xff]  ;;  %5035 = vmatpush.msra.mxu3 %v4721_v27  ;;  %v4803_v27 = vld [vmem:[%s8868_s9 + $0x3b8] sm:$0xff] }
 0x565   :  { %5054 = vmatpush.msra.mxu0 %v4738_v36  ;;  %v4804_v36 = vld [vmem:[%s8868_s9 + $0x3c0] sm:$0xff] }
 0x566   :  { %v8023_v21 = vld [vmem:[#allocation1 + $0x2] ss:$4 sm:$0xff]  ;;  %4596 = vst [vmem:[#allocation6 + $0x1] sm:$0x1] %v8032_v44  ;;  %v5617_v31 = vrot.slane %v8032_v44, 9  ;;  %5036 = vmatpush.msra.mxu3 %v4720_v23 }
 0x567   :  { %4542 = vst.sshfl [vmem:[#allocation1] sm:$0xff pattern:$0x73625140] %v4508_v62  ;;  %v4447_v46 = vpop.f32.mrf.mxu2  ;;  %v5611_v30 = vrot.slane %v8023_v21, 9  ;;  %v4707_v21 = vld [vmem:[%s8868_s9 + $0xb8] sm:$0xff]  ;;  %5055 = vmatpush.msra.mxu0 %v4737_v56  ;;  %v4754_v56 = vld [vmem:[%s8868_s9 + $0x230] sm:$0xff] }
 0x568   :  { %v4448_v25 = vadd.f32 %v4447_v46, %v4419_v41  ;;  %4601 = vst [vmem:[#allocation6 + $0x3] sm:$0x1] %v5617_v31  ;;  %5013 = vmatpush.msra.mxu2 %v4707_v21  ;;  %v4736_v41 = vld [vmem:[%s8868_s9 + $0x1a0] sm:$0xff]  ;;  %v4687_v46 = vld [vmem:[%s8868_s9 + $0x18] sm:$0xff]  ;;  %v4702_v31 = vld [vmem:[%s8868_s9 + $0x90] sm:$0xff]  ;;  %5037 = vmatpush.msra.mxu3 %v4719_v54 }
 0x569   :  { %4541 = vst [vmem:[#allocation6 + $0xa] sm:$0x1] %v5611_v30  ;;  %5056 = vmatpush.msra.mxu0 %v4736_v41  ;;  %4997 = vmatpush.msrb.mxu1 %v4687_v46  ;;  %v4763_v30 = vld [vmem:[%s8868_s9 + $0x278] sm:$0xff]  ;;  %v4789_v21 = vld [vmem:[%s8868_s9 + $0x348] sm:$0xff]  ;;  %v4802_v23 = vld [vmem:[%s8868_s9 + $0x3b0] sm:$0xff] }
 0x56a   :  { %v4753_v41 = vld [vmem:[%s8868_s9 + $0x228] sm:$0xff] }
 0x56b   :  { %5057 = vmatpush.msra.mxu0 %v4735_v17  ;;  %4998 = vmatpush.msrb.mxu1 %v4686_v4  ;;  %v4769_v46 = vld [vmem:[%s8868_s9 + $0x2a8] sm:$0xff]  ;;  %v4752_v17 = vld [vmem:[%s8868_s9 + $0x220] sm:$0xff] }
 0x56c   :  { %v4801_v54 = vld [vmem:[%s8868_s9 + $0x3a8] sm:$0xff]  ;;  %v4784_v4 = vld [vmem:[%s8868_s9 + $0x320] sm:$0xff] }
 0x56d   :  { %4999 = vmatpush.msrb.mxu1 %v4685_v39  ;;  %v4767_v39 = vld [vmem:[%s8868_s9 + $0x298] sm:$0xff] }
 0x56e   :  { %v4544_v8 = vld [vmem:[#allocation1 + $0x3] ss:$4 sm:$0xff] }
 0x56f   :  { %4547 = vst.sshfl [vmem:[#allocation1] sm:$0xff pattern:$0x73625140] %v4508_v62  ;;  %v4476_v43 = vpop.f32.mrf.mxu3 }
 0x570   :  { %4546 = vst [vmem:[#allocation6 + $0xc] sm:$0x1] %v4544_v8  ;;  %v4477_v28 = vadd.f32 %v4476_v43, %v4448_v25  ;;  %v4718_v25 = vld [vmem:[%s8868_s9 + $0x110] sm:$0xff]  ;;  %v4733_v43 = vld [vmem:[%s8868_s9 + $0x188] sm:$0xff] }
 0x571   :  { %5038 = vmatpush.msra.mxu3 %v4718_v25 }
 0x572   :  { %v4506_v22 = vadd.f32 %v4505_v5, %v4477_v28  ;;  %v4684_v5 = vld [vmem:[%s8868_s9] sm:$0xff]  ;;  %v4779_v28 = vld [vmem:[%s8868_s9 + $0x2f8] sm:$0xff] }
 0x573   :  { %5039 = vmatpush.msra.mxu3 %v4717_v59  ;;  %5000 = vmatpush.msrb.mxu1 %v4684_v5  ;;  %v4783_v59 = vld [vmem:[%s8868_s9 + $0x318] sm:$0xff]  ;;  %v4750_v5 = vld [vmem:[%s8868_s9 + $0x210] sm:$0xff] }
 0x574   :  { %v8098_v62 = vmax.f32 %v4506_v22, 0.0  ;;  %v4794_v22 = vld [vmem:[%s8868_s9 + $0x370] sm:$0xff] }
 0x575   :  { %5040 = vmatpush.msra.mxu3 %v4716_v52  ;;  %5065 = vmatpush.msra.mxu1 %v4763_v30  ;;  %v4782_v52 = vld [vmem:[%s8868_s9 + $0x310] sm:$0xff]  ;;  %v4749_v30 = vld [vmem:[%s8868_s9 + $0x208] sm:$0xff] }
 0x576   :  { %v8025_v32 = vld [vmem:[#allocation1 + $0x3] ss:$4 sm:$0xff]  ;;  %4638 = vst [vmem:[#allocation6 + $0x11] sm:$0x1] %v8098_v62  ;;  %v5621_v51 = vrot.slane %v8098_v62, 9 }
 0x577   :  { %4560 = vst.sshfl [vmem:[#allocation1] sm:$0xff pattern:$0x73625140] %v8019_v60  ;;  %v5612_v7 = vrot.slane %v8025_v32, 9  ;;  %v4704_v32 = vld [vmem:[%s8868_s9 + $0xa0] sm:$0xff]  ;;  %5105 = vmatpush.msrb.mxu3 %v4795_v55  ;;  %5066 = vmatpush.msra.mxu1 %v4762_v61  ;;  %v4781_v55 = vld [vmem:[%s8868_s9 + $0x308] sm:$0xff] }
 0x578   :  { %4643 = vst [vmem:[#allocation6 + $0x13] sm:$0x1] %v5621_v51  ;;  %v4759_v51 = vld [vmem:[%s8868_s9 + $0x258] sm:$0xff]  ;;  %v4748_v61 = vld [vmem:[%s8868_s9 + $0x200] sm:$0xff] }
 0x579   :  { %4553 = vst [vmem:[#allocation6 + $0xe] sm:$0x1] %v5612_v7  ;;  %5106 = vmatpush.msrb.mxu3 %v4794_v22  ;;  %5067 = vmatpush.msra.mxu1 %v4761_v6  ;;  %v4787_v7 = vld [vmem:[%s8868_s9 + $0x338] sm:$0xff]  ;;  %v4780_v22 = vld [vmem:[%s8868_s9 + $0x300] sm:$0xff] }
 0x57b   :  { %5107 = vmatpush.msrb.mxu3 %v4793_v63  ;;  %5068 = vmatpush.msra.mxu1 %v4760_v16 }
 0x57d   :  { %5108 = vmatpush.msrb.mxu3 %v4792_v18  ;;  %5069 = vmatpush.msra.mxu1 %v4759_v51 }
 0x57e   :  { %v4562_v29 = vld [vmem:[#allocation1 + $0x1] ss:$4 sm:$0xff] }
 0x57f   :  { %4565 = vst.sshfl [vmem:[#allocation1] sm:$0xff pattern:$0x73625140] %v8019_v60  ;;  %5109 = vmatpush.msrb.mxu3 %v4791_v24  ;;  %5070 = vmatpush.msra.mxu1 %v4758_v26 }
 0x580   :  { %4564 = vst [vmem:[#allocation6 + $0x14] sm:$0x1] %v4562_v29  ;;  %v4706_v29 = vld [vmem:[%s8868_s9 + $0xb0] sm:$0xff] }
 0x581   :  { %5014 = vmatpush.msra.mxu2 %v4706_v29  ;;  %5110 = vmatpush.msrb.mxu3 %v4790_v15  ;;  %v4843_v15 = vld [vmem:[%s8868_s9 + $0x4f8] sm:$0xff] }
 0x582   :  { %5071 = vmatpush.msra.mxu1 %v4757_v12  ;;  %v4859_v12 = vld [vmem:[%s8868_s9 + $0x578] sm:$0xff] }
 0x583   :  { %5015 = vmatpush.msra.mxu2 %v4705_v42  ;;  %5111 = vmatpush.msrb.mxu3 %v4789_v21  ;;  %v4771_v42 = vld [vmem:[%s8868_s9 + $0x2b8] sm:$0xff] }
 0x584   :  { %5072 = vmatpush.msra.mxu1 %v4756_v58 }
 0x585   :  { %5016 = vmatpush.msra.mxu2 %v4704_v32  ;;  %5112 = vmatpush.msrb.mxu3 %v4788_v37  ;;  %v4786_v32 = vld [vmem:[%s8868_s9 + $0x330] sm:$0xff] }
 0x586   :  { %v8029_v9 = vld [vmem:[#allocation1 + $0x1] ss:$4 sm:$0xff]  ;;  %5073 = vmatpush.msra.mxu1 %v4755_v38 }
 0x587   :  { %4572 = vst.sshfl [vmem:[#allocation1] sm:$0xff pattern:$0x73625140] %v8019_v60  ;;  %5017 = vmatpush.msra.mxu2 %v4703_v47  ;;  %v5614_v40 = vrot.slane %v8029_v9, 9  ;;  %v4776_v9 = vld [vmem:[%s8868_s9 + $0x2e0] sm:$0xff]  ;;  %5113 = vmatpush.msrb.mxu3 %v4787_v7  ;;  %v4842_v37 = vld [vmem:[%s8868_s9 + $0x4f0] sm:$0xff] }
 0x588   :  { %5074 = vmatpush.msra.mxu1 %v4754_v56  ;;  %v4858_v38 = vld [vmem:[%s8868_s9 + $0x570] sm:$0xff]  ;;  %v4825_v7 = vld [vmem:[%s8868_s9 + $0x468] sm:$0xff] }
 0x589   :  { %5018 = vmatpush.msra.mxu2 %v4702_v31  ;;  %4571 = vst [vmem:[#allocation6 + $0x16] sm:$0x1] %v5614_v40  ;;  %5114 = vmatpush.msrb.mxu3 %v4786_v32  ;;  %v4800_v31 = vld [vmem:[%s8868_s9 + $0x3a0] sm:$0xff]  ;;  %v4857_v56 = vld [vmem:[%s8868_s9 + $0x568] sm:$0xff] }
 0x58a   :  { %5075 = vmatpush.msra.mxu1 %v4753_v41  ;;  %v4824_v32 = vld [vmem:[%s8868_s9 + $0x460] sm:$0xff] }
 0x58b   :  { %5019 = vmatpush.msra.mxu2 %v4701_v49  ;;  %v4856_v41 = vld [vmem:[%s8868_s9 + $0x560] sm:$0xff] }
 0x58c   :  { %5076 = vmatpush.msra.mxu1 %v4752_v17  ;;  %v4855_v17 = vld [vmem:[%s8868_s9 + $0x558] sm:$0xff] }
 0x58d   :  { %5020 = vmatpush.msra.mxu2 %v4700_v11  ;;  %v4766_v11 = vld [vmem:[%s8868_s9 + $0x290] sm:$0xff] }
 0x58e   :  { %v4574_v10 = vld [vmem:[#allocation1 + $0x2] ss:$4 sm:$0xff] }
 0x58f   :  { %4577 = vst.sshfl [vmem:[#allocation1] sm:$0xff pattern:$0x73625140] %v8019_v60  ;;  %5085 = vmatpush.msrb.mxu2 %v4779_v28  ;;  %v4765_v28 = vld [vmem:[%s8868_s9 + $0x288] sm:$0xff] }
 0x590   :  { %4576 = vst [vmem:[#allocation6 + $0x18] sm:$0x1] %v4574_v10  ;;  %v4777_v10 = vld [vmem:[%s8868_s9 + $0x2e8] sm:$0xff] }
 0x591   :  { %5086 = vmatpush.msrb.mxu2 %v4778_v1  ;;  %v4764_v1 = vld [vmem:[%s8868_s9 + $0x280] sm:$0xff] }
 0x593   :  { %5087 = vmatpush.msrb.mxu2 %v4777_v10 }
 0x595   :  { %5088 = vmatpush.msrb.mxu2 %v4776_v9 }
 0x596   :  { %v8144_v8 = vld [vmem:[#allocation1 + $0x2] ss:$4 sm:$0xff] }
 0x597   :  { %4584 = vst.sshfl [vmem:[#allocation1] sm:$0xff pattern:$0x73625140] %v8019_v60  ;;  %5089 = vmatpush.msrb.mxu2 %v4775_v20  ;;  %v5615_v47 = vrot.slane %v8144_v8, 9  ;;  %v4768_v8 = vld [vmem:[%s8868_s9 + $0x2a0] sm:$0xff] }
 0x599   :  { %5090 = vmatpush.msrb.mxu2 %v4774_v50  ;;  %4583 = vst [vmem:[#allocation6 + $0x1a] sm:$0x1] %v5615_v47  ;;  %v4827_v50 = vld [vmem:[%s8868_s9 + $0x478] sm:$0xff] }
 0x59a   :  { %v4823_v47 = vld [vmem:[%s8868_s9 + $0x458] sm:$0xff] }
 0x59b   :  { %5091 = vmatpush.msrb.mxu2 %v4773_v13 }
 0x59d   :  { %5092 = vmatpush.msrb.mxu2 %v4772_v33 }
 0x59e   :  { %v4586_v48 = vld [vmem:[#allocation1 + $0x3] ss:$4 sm:$0xff] }
 0x59f   :  { %4589 = vst.sshfl [vmem:[#allocation1] sm:$0xff pattern:$0x73625140] %v8019_v60  ;;  %v4734_v60 = vld [vmem:[%s8868_s9 + $0x190] sm:$0xff]  ;;  %5093 = vmatpush.msrb.mxu2 %v4771_v42 }
 0x5a0   :  { %4588 = vst [vmem:[#allocation6 + $0x1c] sm:$0x1] %v4586_v48  ;;  %5058 = vmatpush.msra.mxu0 %v4734_v60  ;;  %v4785_v48 = vld [vmem:[%s8868_s9 + $0x328] sm:$0xff]  ;;  %v4751_v60 = vld [vmem:[%s8868_s9 + $0x218] sm:$0xff]  ;;  %v4874_v42 = vld [vmem:[%s8868_s9 + $0x5f0] sm:$0xff] }
 0x5a1   :  { %5094 = vmatpush.msrb.mxu2 %v4770_v45  ;;  %5115 = vmatpush.msrb.mxu3 %v4785_v48  ;;  %v4873_v45 = vld [vmem:[%s8868_s9 + $0x5e8] sm:$0xff] }
 0x5a2   :  { %5059 = vmatpush.msra.mxu0 %v4733_v43  ;;  %v4799_v43 = vld [vmem:[%s8868_s9 + $0x398] sm:$0xff]  ;;  %5077 = vmatpush.msra.mxu1 %v4751_v60 }
 0x5a3   :  { %5095 = vmatpush.msrb.mxu2 %v4769_v46  ;;  %5116 = vmatpush.msrb.mxu3 %v4784_v4  ;;  %v4872_v46 = vld [vmem:[%s8868_s9 + $0x5e0] sm:$0xff]  ;;  %v4871_v60 = vld [vmem:[%s8868_s9 + $0x5d8] sm:$0xff] }
 0x5a4   :  { %5060 = vmatpush.msra.mxu0 %v4732_v53  ;;  %v4798_v53 = vld [vmem:[%s8868_s9 + $0x390] sm:$0xff]  ;;  %5078 = vmatpush.msra.mxu1 %v4750_v5  ;;  %v4821_v5 = vld [vmem:[%s8868_s9 + $0x448] sm:$0xff] }
 0x5a5   :  { %5096 = vmatpush.msrb.mxu2 %v4768_v8  ;;  %5117 = vmatpush.msrb.mxu3 %v4783_v59  ;;  %v4854_v59 = vld [vmem:[%s8868_s9 + $0x550] sm:$0xff] }
 0x5a6   :  { %v8245_v19 = vld [vmem:[#allocation1 + $0x3] ss:$4 sm:$0xff]  ;;  %5125 = vmatpush.msrb.mxu0 %v4811_v57  ;;  %5079 = vmatpush.msra.mxu1 %v4749_v30 }
 0x5a7   :  { %4602 = vst.sshfl [vmem:[#allocation1] sm:$0xff pattern:$0x73625140] %v8032_v44  ;;  %5097 = vmatpush.msrb.mxu2 %v4767_v39  ;;  %v4797_v57 = vld [vmem:[%s8868_s9 + $0x388] sm:$0xff]  ;;  %5118 = vmatpush.msrb.mxu3 %v4782_v52  ;;  %v5616_v10 = vrot.slane %v8245_v19, 9  ;;  %v4822_v39 = vld [vmem:[%s8868_s9 + $0x450] sm:$0xff] }
 0x5a8   :  { %5126 = vmatpush.msrb.mxu0 %v4810_v2  ;;  %v4796_v2 = vld [vmem:[%s8868_s9 + $0x380] sm:$0xff]  ;;  %5080 = vmatpush.msra.mxu1 %v4748_v61  ;;  %v4853_v52 = vld [vmem:[%s8868_s9 + $0x548] sm:$0xff]  ;;  %v4819_v61 = vld [vmem:[%s8868_s9 + $0x438] sm:$0xff] }
 0x5a9   :  { %5098 = vmatpush.msrb.mxu2 %v4766_v11  ;;  %5119 = vmatpush.msrb.mxu3 %v4781_v55  ;;  %4595 = vst [vmem:[#allocation6 + $0x1e] sm:$0x1] %v5616_v10  ;;  %v4837_v11 = vld [vmem:[%s8868_s9 + $0x4c8] sm:$0xff]  ;;  %v4820_v30 = vld [vmem:[%s8868_s9 + $0x440] sm:$0xff]  ;;  %v4834_v10 = vld [vmem:[%s8868_s9 + $0x4b0] sm:$0xff] }
 0x5aa   :  { %5127 = vmatpush.msrb.mxu0 %v4809_v14  ;;  %v4852_v55 = vld [vmem:[%s8868_s9 + $0x540] sm:$0xff] }
 0x5ab   :  { %5099 = vmatpush.msrb.mxu2 %v4765_v28  ;;  %5120 = vmatpush.msrb.mxu3 %v4780_v22  ;;  %v4836_v28 = vld [vmem:[%s8868_s9 + $0x4c0] sm:$0xff]  ;;  %v4851_v22 = vld [vmem:[%s8868_s9 + $0x538] sm:$0xff] }
 0x5ac   :  { %5128 = vmatpush.msrb.mxu0 %v4808_v0 }
 0x5ad   :  { %5100 = vmatpush.msrb.mxu2 %v4764_v1  ;;  %v4835_v1 = vld [vmem:[%s8868_s9 + $0x4b8] sm:$0xff] }
 0x5ae   :  { %5129 = vmatpush.msrb.mxu0 %v4807_v35  ;;  %v4604_v29 = vld [vmem:[#allocation1 + $0x1] ss:$4 sm:$0xff] }
 0x5af   :  { %4606 = vst [vmem:[#allocation6 + $0x5] sm:$0x1] %v4604_v29  ;;  %v4826_v29 = vld [vmem:[%s8868_s9 + $0x470] sm:$0xff] }
 0x5b0   :  { %5130 = vmatpush.msrb.mxu0 %v4806_v3  ;;  %4607 = vst.sshfl [vmem:[#allocation1] sm:$0xff pattern:$0x73625140] %v8032_v44 }
 0x5b2   :  { %5131 = vmatpush.msrb.mxu0 %v4805_v34 }
 0x5b4   :  { %5132 = vmatpush.msrb.mxu0 %v4804_v36 }
 0x5b6   :  { %5133 = vmatpush.msrb.mxu0 %v4803_v27  ;;  %v4841_v27 = vld [vmem:[%s8868_s9 + $0x4e8] sm:$0xff] }
 0x5b7   :  { %v4609_v25 = vld [vmem:[#allocation1 + $0x1] ss:$4 sm:$0xff] }
 0x5b8   :  { %5134 = vmatpush.msrb.mxu0 %v4802_v23  ;;  %v5618_v49 = vrot.slane %v4609_v25, 9  ;;  %4614 = vst.sshfl [vmem:[#allocation1] sm:$0xff pattern:$0x73625140] %v8032_v44  ;;  %v4840_v23 = vld [vmem:[%s8868_s9 + $0x4e0] sm:$0xff] }
 0x5ba   :  { %5135 = vmatpush.msrb.mxu0 %v4801_v54  ;;  %4613 = vst [vmem:[#allocation6 + $0x7] sm:$0x1] %v5618_v49  ;;  %v4839_v54 = vld [vmem:[%s8868_s9 + $0x4d8] sm:$0xff]  ;;  %v4838_v49 = vld [vmem:[%s8868_s9 + $0x4d0] sm:$0xff] }
 0x5bc   :  { %5136 = vmatpush.msrb.mxu0 %v4800_v31 }
 0x5be   :  { %5137 = vmatpush.msrb.mxu0 %v4799_v43  ;;  %v4870_v43 = vld [vmem:[%s8868_s9 + $0x5d0] sm:$0xff] }
 0x5bf   :  { %v4616_v6 = vld [vmem:[#allocation1 + $0x2] ss:$4 sm:$0xff] }
 0x5c0   :  { %5138 = vmatpush.msrb.mxu0 %v4798_v53  ;;  %4619 = vst.sshfl [vmem:[#allocation1] sm:$0xff pattern:$0x73625140] %v8032_v44  ;;  %v4869_v53 = vld [vmem:[%s8868_s9 + $0x5c8] sm:$0xff] }
 0x5c1   :  { %4618 = vst [vmem:[#allocation6 + $0x9] sm:$0x1] %v4616_v6  ;;  %v4680_v26 = vld [vmem:[#allocation6] sm:$0xff]  ;;  %v4818_v6 = vld [vmem:[%s8868_s9 + $0x430] sm:$0xff] }
 0x5c2   :  { %5139 = vmatpush.msrb.mxu0 %v4797_v57  ;;  %v4868_v57 = vld [vmem:[%s8868_s9 + $0x5c0] sm:$0xff] }
 0x5c4   :  { %5140 = vmatpush.msrb.mxu0 %v4796_v2  ;;  %v4867_v2 = vld [vmem:[%s8868_s9 + $0x5b8] sm:$0xff] }
 0x5c7   :  { %v4621_v40 = vld [vmem:[#allocation1 + $0x2] ss:$4 sm:$0xff] }
 0x5c8   :  { %4626 = vst.sshfl [vmem:[#allocation1] sm:$0xff pattern:$0x73625140] %v8032_v44  ;;  %v5619_v9 = vrot.slane %v4621_v40, 9  ;;  %v4850_v40 = vld [vmem:[%s8868_s9 + $0x530] sm:$0xff] }
 0x5ca   :  { %4625 = vst [vmem:[#allocation6 + $0xb] sm:$0x1] %v5619_v9  ;;  %v4849_v9 = vld [vmem:[%s8868_s9 + $0x528] sm:$0xff] }
 0x5cf   :  { %v4628_v63 = vld [vmem:[#allocation1 + $0x3] ss:$4 sm:$0xff] }
 0x5d0   :  { %4631 = vst.sshfl [vmem:[#allocation1] sm:$0xff pattern:$0x73625140] %v8032_v44 }
 0x5d1   :  { %4630 = vst [vmem:[#allocation6 + $0xd] sm:$0x1] %v4628_v63  ;;  %v4866_v63 = vld [vmem:[%s8868_s9 + $0x5b0] sm:$0xff] }
 0x5d7   :  { %v4633_v14 = vld [vmem:[#allocation1 + $0x3] ss:$4 sm:$0xff] }
 0x5d8   :  { %4644 = vst.sshfl [vmem:[#allocation1] sm:$0xff pattern:$0x73625140] %v8098_v62  ;;  %v5620_v44 = vrot.slane %v4633_v14, 9  ;;  %v4817_v14 = vld [vmem:[%s8868_s9 + $0x428] sm:$0xff] }
 0x5da   :  { %4637 = vst [vmem:[#allocation6 + $0xf] sm:$0x1] %v5620_v44  ;;  %v4848_v44 = vld [vmem:[%s8868_s9 + $0x520] sm:$0xff] }
 0x5df   :  { %v4646_v16 = vld [vmem:[#allocation1 + $0x1] ss:$4 sm:$0xff] }
 0x5e0   :  { %4649 = vst.sshfl [vmem:[#allocation1] sm:$0xff pattern:$0x73625140] %v8098_v62 }
 0x5e1   :  { %4648 = vst [vmem:[#allocation6 + $0x15] sm:$0x1] %v4646_v16  ;;  %v4681_v24 = vld [vmem:[#allocation6 + $0x8] sm:$0xff] }
 0x5e2   :  { %4950 = vst [vmem:[#allocation1 + $0x20] ss:$4 sm:$0xff] %v4681_v24  ;;  %v4833_v16 = vld [vmem:[%s8868_s9 + $0x4a8] sm:$0xff]  ;;  %v4831_v24 = vld [vmem:[%s8868_s9 + $0x498] sm:$0xff] }
 0x5e7   :  { %v4651_v18 = vld [vmem:[#allocation1 + $0x1] ss:$4 sm:$0xff] }
 0x5e8   :  { %4656 = vst.sshfl [vmem:[#allocation1] sm:$0xff pattern:$0x73625140] %v8098_v62  ;;  %v5622_v19 = vrot.slane %v4651_v18, 9  ;;  %v4865_v18 = vld [vmem:[%s8868_s9 + $0x5a8] sm:$0xff] }
 0x5e9   :  { %v4955_v48 = vld.sshfl [vmem:[#allocation1 + $0x20] sm:$0xff pattern:$0x73625140]  ;;  %v4956_v8 = vld.sshfl [vmem:[#allocation1 + $0x28] sm:$0xff pattern:$0x73625140] }
 0x5ea   :  { %4655 = vst [vmem:[#allocation6 + $0x17] sm:$0x1] %v5622_v19  ;;  %v4957_v4 = vld.sshfl [vmem:[#allocation1 + $0x30] sm:$0xff pattern:$0x73625140]  ;;  %v4816_v19 = vld [vmem:[%s8868_s9 + $0x420] sm:$0xff] }
 0x5eb   :  { %v4958_v25 = vld.sshfl [vmem:[#allocation1 + $0x38] sm:$0xff pattern:$0x73625140] }
 0x5ef   :  { %v4658_v0 = vld [vmem:[#allocation1 + $0x2] ss:$4 sm:$0xff] }
 0x5f0   :  { %4661 = vst.sshfl [vmem:[#allocation1] sm:$0xff pattern:$0x73625140] %v8098_v62 }
 0x5f1   :  { %4660 = vst [vmem:[#allocation6 + $0x19] sm:$0x1] %v4658_v0  ;;  %v4682_v3 = vld [vmem:[#allocation6 + $0x10] sm:$0xff]  ;;  %v4832_v0 = vld [vmem:[%s8868_s9 + $0x4a0] sm:$0xff] }
 0x5f7   :  { %v4663_v51 = vld [vmem:[#allocation1 + $0x2] ss:$4 sm:$0xff] }
 0x5f8   :  { %4668 = vst.sshfl [vmem:[#allocation1] sm:$0xff pattern:$0x73625140] %v8098_v62  ;;  %v5623_v20 = vrot.slane %v4663_v51, 9  ;;  %v4864_v51 = vld [vmem:[%s8868_s9 + $0x5a0] sm:$0xff] }
 0x5fa   :  { %4667 = vst [vmem:[#allocation6 + $0x1b] sm:$0x1] %v5623_v20  ;;  %v4815_v20 = vld [vmem:[%s8868_s9 + $0x418] sm:$0xff] }
 0x5ff   :  { %v4670_v35 = vld [vmem:[#allocation1 + $0x3] ss:$4 sm:$0xff] }
 0x600   :  { %4673 = vst.sshfl [vmem:[#allocation1] sm:$0xff pattern:$0x73625140] %v8098_v62  ;;  %v4875_v62 = vld [vmem:[%s8868_s9 + $0x5f8] sm:$0xff] }
 0x601   :  { %4948 = vst [vmem:[#allocation1] ss:$4 sm:$0xff] %v4680_v26  ;;  %v4863_v26 = vld [vmem:[%s8868_s9 + $0x598] sm:$0xff] }
 0x602   :  { %4672 = vst [vmem:[#allocation6 + $0x1d] sm:$0x1] %v4670_v35  ;;  %v4847_v35 = vld [vmem:[%s8868_s9 + $0x518] sm:$0xff] }
 0x607   :  { %v4675_v13 = vld [vmem:[#allocation1 + $0x3] ss:$4 sm:$0xff] }
 0x608   :  { %v4951_v21 = vld.sshfl [vmem:[#allocation1] sm:$0xff pattern:$0x73625140]  ;;  %v4952_v34 = vld.sshfl [vmem:[#allocation1 + $0x8] sm:$0xff pattern:$0x73625140] }
 0x609   :  { %5001 = vmatmul.f32.vlgmr.msrb.gmra.mxu1 %v4951_v21  ;;  %5021 = vmatmul.f32.vlgmr.msra.gmra.mxu2 %v4952_v34  ;;  %v4953_v58 = vld.sshfl [vmem:[#allocation1 + $0x10] sm:$0xff pattern:$0x73625140]  ;;  %v4954_v33 = vld.sshfl [vmem:[#allocation1 + $0x18] sm:$0xff pattern:$0x73625140] }
 0x60a   :  { %5041 = vmatmul.f32.vlgmr.msra.gmra.mxu3 %v4953_v58  ;;  %4959 = vst [vmem:[#allocation1] ss:$4 sm:$0xff] %v4682_v3  ;;  %5061 = vmatmul.f32.vlgmr.msra.gmra.mxu0 %v4954_v33  ;;  %v5624_v36 = vrot.slane %v4675_v13, 9  ;;  %v4846_v3 = vld [vmem:[%s8868_s9 + $0x510] sm:$0xff]  ;;  %v4829_v13 = vld [vmem:[%s8868_s9 + $0x488] sm:$0xff]  ;;  %v4812_v58 = vld [vmem:[%s8868_s9 + $0x400] sm:$0xff] }
 0x60b   :  { %5145 = vmatpush.msrb.mxu1 %v4827_v50  ;;  %5165 = vmatpush.msra.mxu2 %v4843_v15  ;;  %v4814_v50 = vld [vmem:[%s8868_s9 + $0x410] sm:$0xff]  ;;  %v4845_v21 = vld [vmem:[%s8868_s9 + $0x508] sm:$0xff]  ;;  %v4828_v33 = vld [vmem:[%s8868_s9 + $0x480] sm:$0xff] }
 0x60c   :  { %5185 = vmatpush.msra.mxu3 %v4859_v12  ;;  %5205 = vmatpush.msra.mxu0 %v4875_v62  ;;  %4679 = vst [vmem:[#allocation6 + $0x1f] sm:$0x1] %v5624_v36  ;;  %v4830_v15 = vld [vmem:[%s8868_s9 + $0x490] sm:$0xff]  ;;  %v4813_v62 = vld [vmem:[%s8868_s9 + $0x408] sm:$0xff]  ;;  %v4891_v36 = vld [vmem:[%s8868_s9 + $0x678] sm:$0xff] }
 0x60d   :  { %5146 = vmatpush.msrb.mxu1 %v4826_v29  ;;  %5166 = vmatpush.msra.mxu2 %v4842_v37  ;;  %v4862_v12 = vld [vmem:[%s8868_s9 + $0x590] sm:$0xff]  ;;  %v4861_v34 = vld [vmem:[%s8868_s9 + $0x588] sm:$0xff]  ;;  %v4844_v29 = vld [vmem:[%s8868_s9 + $0x500] sm:$0xff] }
 0x60e   :  { %5186 = vmatpush.msra.mxu3 %v4858_v38  ;;  %5206 = vmatpush.msra.mxu0 %v4874_v42  ;;  %v4860_v37 = vld [vmem:[%s8868_s9 + $0x580] sm:$0xff]  ;;  %v4907_v38 = vld [vmem:[%s8868_s9 + $0x6f8] sm:$0xff] }
 0x60f   :  { %5147 = vmatpush.msrb.mxu1 %v4825_v7  ;;  %5167 = vmatpush.msra.mxu2 %v4841_v27  ;;  %v4923_v42 = vld [vmem:[%s8868_s9 + $0x778] sm:$0xff] }
 0x610   :  { %5187 = vmatpush.msra.mxu3 %v4857_v56  ;;  %5207 = vmatpush.msra.mxu0 %v4873_v45  ;;  %v4939_v7 = vld [vmem:[%s8868_s9 + $0x7f8] sm:$0xff] }
 0x611   :  { %5148 = vmatpush.msrb.mxu1 %v4824_v32  ;;  %5168 = vmatpush.msra.mxu2 %v4840_v23  ;;  %v4961_v27 = vld.sshfl [vmem:[#allocation1] sm:$0xff pattern:$0x73625140]  ;;  %v4962_v56 = vld.sshfl [vmem:[#allocation1 + $0x8] sm:$0xff pattern:$0x73625140] }
 0x612   :  { %5188 = vmatpush.msra.mxu3 %v4856_v41  ;;  %5208 = vmatpush.msra.mxu0 %v4872_v46  ;;  %v4963_v45 = vld.sshfl [vmem:[#allocation1 + $0x10] sm:$0xff pattern:$0x73625140]  ;;  %v4964_v32 = vld.sshfl [vmem:[#allocation1 + $0x18] sm:$0xff pattern:$0x73625140] }
 0x613   :  { %5081 = vmatmul.f32.vlgmr.msra.gmra.mxu1 %v4955_v48  ;;  %5101 = vmatmul.f32.vlgmr.msrb.gmra.mxu2 %v4956_v8  ;;  %v4683_v31 = vld [vmem:[#allocation6 + $0x18] sm:$0xff]  ;;  %v4890_v23 = vld [vmem:[%s8868_s9 + $0x670] sm:$0xff]  ;;  %v4889_v48 = vld [vmem:[%s8868_s9 + $0x668] sm:$0xff] }
 0x614   :  { %5121 = vmatmul.f32.vlgmr.msrb.gmra.mxu3 %v4957_v4  ;;  %4960 = vst [vmem:[#allocation1 + $0x20] ss:$4 sm:$0xff] %v4683_v31  ;;  %5141 = vmatmul.f32.vlgmr.msrb.gmra.mxu0 %v4958_v25  ;;  %v4906_v41 = vld [vmem:[%s8868_s9 + $0x6f0] sm:$0xff]  ;;  %v4937_v8 = vld [vmem:[%s8868_s9 + $0x7e8] sm:$0xff]  ;;  %v4888_v4 = vld [vmem:[%s8868_s9 + $0x660] sm:$0xff] }
 0x615   :  { %5149 = vmatpush.msrb.mxu1 %v4823_v47  ;;  %5169 = vmatpush.msra.mxu2 %v4839_v54  ;;  %v4922_v46 = vld [vmem:[%s8868_s9 + $0x770] sm:$0xff]  ;;  %v4905_v54 = vld [vmem:[%s8868_s9 + $0x6e8] sm:$0xff]  ;;  %v4904_v31 = vld [vmem:[%s8868_s9 + $0x6e0] sm:$0xff] }
 0x616   :  { %5189 = vmatpush.msra.mxu3 %v4855_v17  ;;  %5209 = vmatpush.msra.mxu0 %v4871_v60  ;;  %v4938_v47 = vld [vmem:[%s8868_s9 + $0x7f0] sm:$0xff]  ;;  %v4921_v17 = vld [vmem:[%s8868_s9 + $0x768] sm:$0xff]  ;;  %v4920_v25 = vld [vmem:[%s8868_s9 + $0x760] sm:$0xff] }
 0x617   :  { %5150 = vmatpush.msrb.mxu1 %v4822_v39  ;;  %5170 = vmatpush.msra.mxu2 %v4838_v49  ;;  %v4936_v60 = vld [vmem:[%s8868_s9 + $0x7e0] sm:$0xff]  ;;  %v4887_v39 = vld [vmem:[%s8868_s9 + $0x658] sm:$0xff] }
 0x618   :  { %5190 = vmatpush.msra.mxu3 %v4854_v59  ;;  %5210 = vmatpush.msra.mxu0 %v4870_v43  ;;  %v4903_v49 = vld [vmem:[%s8868_s9 + $0x6d8] sm:$0xff] }
 0x619   :  { %5151 = vmatpush.msrb.mxu1 %v4821_v5  ;;  %5171 = vmatpush.msra.mxu2 %v4837_v11  ;;  %v4919_v59 = vld [vmem:[%s8868_s9 + $0x758] sm:$0xff]  ;;  %v4886_v5 = vld [vmem:[%s8868_s9 + $0x650] sm:$0xff] }
 0x61a   :  { %5191 = vmatpush.msra.mxu3 %v4853_v52  ;;  %5211 = vmatpush.msra.mxu0 %v4869_v53  ;;  %v4935_v43 = vld [vmem:[%s8868_s9 + $0x7d8] sm:$0xff]  ;;  %v4902_v11 = vld [vmem:[%s8868_s9 + $0x6d0] sm:$0xff] }
 0x61b   :  { %5152 = vmatpush.msrb.mxu1 %v4820_v30  ;;  %5172 = vmatpush.msra.mxu2 %v4836_v28  ;;  %v4918_v52 = vld [vmem:[%s8868_s9 + $0x750] sm:$0xff]  ;;  %v4885_v30 = vld [vmem:[%s8868_s9 + $0x648] sm:$0xff] }
 0x61c   :  { %5192 = vmatpush.msra.mxu3 %v4852_v55  ;;  %5212 = vmatpush.msra.mxu0 %v4868_v57  ;;  %v4934_v53 = vld [vmem:[%s8868_s9 + $0x7d0] sm:$0xff]  ;;  %v4901_v28 = vld [vmem:[%s8868_s9 + $0x6c8] sm:$0xff] }
 0x61d   :  { %5153 = vmatpush.msrb.mxu1 %v4819_v61  ;;  %5173 = vmatpush.msra.mxu2 %v4835_v1  ;;  %v4917_v55 = vld [vmem:[%s8868_s9 + $0x748] sm:$0xff]  ;;  %v4884_v61 = vld [vmem:[%s8868_s9 + $0x640] sm:$0xff] }
 0x61e   :  { %5193 = vmatpush.msra.mxu3 %v4851_v22  ;;  %5213 = vmatpush.msra.mxu0 %v4867_v2  ;;  %v4933_v57 = vld [vmem:[%s8868_s9 + $0x7c8] sm:$0xff]  ;;  %v4900_v1 = vld [vmem:[%s8868_s9 + $0x6c0] sm:$0xff] }
 0x61f   :  { %5154 = vmatpush.msrb.mxu1 %v4818_v6  ;;  %5174 = vmatpush.msra.mxu2 %v4834_v10  ;;  %v4916_v22 = vld [vmem:[%s8868_s9 + $0x740] sm:$0xff]  ;;  %v4883_v6 = vld [vmem:[%s8868_s9 + $0x638] sm:$0xff] }
 0x620   :  { %5194 = vmatpush.msra.mxu3 %v4850_v40  ;;  %5214 = vmatpush.msra.mxu0 %v4866_v63  ;;  %v4932_v2 = vld [vmem:[%s8868_s9 + $0x7c0] sm:$0xff]  ;;  %v4899_v10 = vld [vmem:[%s8868_s9 + $0x6b8] sm:$0xff] }
 0x621   :  { %5155 = vmatpush.msrb.mxu1 %v4817_v14  ;;  %5175 = vmatpush.msra.mxu2 %v4833_v16  ;;  %v4915_v40 = vld [vmem:[%s8868_s9 + $0x738] sm:$0xff]  ;;  %v4882_v14 = vld [vmem:[%s8868_s9 + $0x630] sm:$0xff] }
 0x622   :  { %5195 = vmatpush.msra.mxu3 %v4849_v9  ;;  %5215 = vmatpush.msra.mxu0 %v4865_v18  ;;  %v4931_v63 = vld [vmem:[%s8868_s9 + $0x7b8] sm:$0xff]  ;;  %v4898_v16 = vld [vmem:[%s8868_s9 + $0x6b0] sm:$0xff] }
 0x623   :  { %5156 = vmatpush.msrb.mxu1 %v4816_v19  ;;  %5176 = vmatpush.msra.mxu2 %v4832_v0  ;;  %v4914_v9 = vld [vmem:[%s8868_s9 + $0x730] sm:$0xff]  ;;  %v4881_v19 = vld [vmem:[%s8868_s9 + $0x628] sm:$0xff] }
 0x624   :  { %5196 = vmatpush.msra.mxu3 %v4848_v44  ;;  %5216 = vmatpush.msra.mxu0 %v4864_v51  ;;  %v4930_v18 = vld [vmem:[%s8868_s9 + $0x7b0] sm:$0xff]  ;;  %v4897_v0 = vld [vmem:[%s8868_s9 + $0x6a8] sm:$0xff] }
 0x625   :  { %5157 = vmatpush.msrb.mxu1 %v4815_v20  ;;  %5177 = vmatpush.msra.mxu2 %v4831_v24  ;;  %v4913_v44 = vld [vmem:[%s8868_s9 + $0x728] sm:$0xff]  ;;  %v4880_v20 = vld [vmem:[%s8868_s9 + $0x620] sm:$0xff] }
 0x626   :  { %5197 = vmatpush.msra.mxu3 %v4847_v35  ;;  %5217 = vmatpush.msra.mxu0 %v4863_v26  ;;  %v4929_v51 = vld [vmem:[%s8868_s9 + $0x7a8] sm:$0xff]  ;;  %v4896_v24 = vld [vmem:[%s8868_s9 + $0x6a0] sm:$0xff] }
 0x627   :  { %5158 = vmatpush.msrb.mxu1 %v4814_v50  ;;  %5178 = vmatpush.msra.mxu2 %v4830_v15  ;;  %v4912_v35 = vld [vmem:[%s8868_s9 + $0x720] sm:$0xff]  ;;  %v4879_v50 = vld [vmem:[%s8868_s9 + $0x618] sm:$0xff] }
 0x628   :  { %5198 = vmatpush.msra.mxu3 %v4846_v3  ;;  %5218 = vmatpush.msra.mxu0 %v4862_v12  ;;  %v4928_v26 = vld [vmem:[%s8868_s9 + $0x7a0] sm:$0xff]  ;;  %v4895_v15 = vld [vmem:[%s8868_s9 + $0x698] sm:$0xff] }
 0x629   :  { %5159 = vmatpush.msrb.mxu1 %v4813_v62  ;;  %5179 = vmatpush.msra.mxu2 %v4829_v13  ;;  %v4911_v3 = vld [vmem:[%s8868_s9 + $0x718] sm:$0xff]  ;;  %v4878_v62 = vld [vmem:[%s8868_s9 + $0x610] sm:$0xff] }
 0x62a   :  { %5199 = vmatpush.msra.mxu3 %v4845_v21  ;;  %5219 = vmatpush.msra.mxu0 %v4861_v34  ;;  %v4927_v12 = vld [vmem:[%s8868_s9 + $0x798] sm:$0xff]  ;;  %v4894_v13 = vld [vmem:[%s8868_s9 + $0x690] sm:$0xff] }
 0x62b   :  { %5160 = vmatpush.msrb.mxu1 %v4812_v58  ;;  %5180 = vmatpush.msra.mxu2 %v4828_v33  ;;  %v4910_v21 = vld [vmem:[%s8868_s9 + $0x710] sm:$0xff]  ;;  %v4877_v58 = vld [vmem:[%s8868_s9 + $0x608] sm:$0xff] }
 0x62c   :  { %5200 = vmatpush.msra.mxu3 %v4844_v29  ;;  %5220 = vmatpush.msra.mxu0 %v4860_v37  ;;  %v4926_v34 = vld [vmem:[%s8868_s9 + $0x790] sm:$0xff]  ;;  %v4893_v33 = vld [vmem:[%s8868_s9 + $0x688] sm:$0xff] }
 0x62d   :  { %5161 = vmatmul.f32.vlgmr.msrb.gmra.mxu1 %v4961_v27  ;;  %5181 = vmatmul.f32.vlgmr.msra.gmra.mxu2 %v4962_v56  ;;  %v4909_v29 = vld [vmem:[%s8868_s9 + $0x708] sm:$0xff]  ;;  %v4965_v27 = vld.sshfl [vmem:[#allocation1 + $0x20] sm:$0xff pattern:$0x73625140] }
 0x62e   :  { %5201 = vmatmul.f32.vlgmr.msra.gmra.mxu3 %v4963_v45  ;;  %5221 = vmatmul.f32.vlgmr.msra.gmra.mxu0 %v4964_v32  ;;  %v4925_v37 = vld [vmem:[%s8868_s9 + $0x788] sm:$0xff]  ;;  %v4967_v45 = vld.sshfl [vmem:[#allocation1 + $0x30] sm:$0xff pattern:$0x73625140] }
 0x62f   :  { %5225 = vmatpush.msra.mxu1 %v4891_v36  ;;  %5245 = vmatpush.msrb.mxu2 %v4907_v38  ;;  %v4876_v36 = vld [vmem:[%s8868_s9 + $0x600] sm:$0xff]  ;;  %v4966_v56 = vld.sshfl [vmem:[#allocation1 + $0x28] sm:$0xff pattern:$0x73625140] }
 0x630   :  { %5265 = vmatpush.msrb.mxu3 %v4923_v42  ;;  %5285 = vmatpush.msrb.mxu0 %v4939_v7  ;;  %v4892_v38 = vld [vmem:[%s8868_s9 + $0x680] sm:$0xff]  ;;  %v4968_v32 = vld.sshfl [vmem:[#allocation1 + $0x38] sm:$0xff pattern:$0x73625140] }
 0x631   :  { %5226 = vmatpush.msra.mxu1 %v4890_v23  ;;  %5246 = vmatpush.msrb.mxu2 %v4906_v41  ;;  %v4908_v42 = vld [vmem:[%s8868_s9 + $0x700] sm:$0xff] }
 0x632   :  { %5266 = vmatpush.msrb.mxu3 %v4922_v46  ;;  %5286 = vmatpush.msrb.mxu0 %v4938_v47  ;;  %v4924_v7 = vld [vmem:[%s8868_s9 + $0x780] sm:$0xff] }
 0x633   :  { %5227 = vmatpush.msra.mxu1 %v4889_v48  ;;  %5247 = vmatpush.msrb.mxu2 %v4905_v54  ;;  %v5633_v23 = vld [vmem:[%s8869_s10] ss:$0 sm:$0xff]  ;;  %v5311_v54 = vld [vmem:[%s8871_s11 + $0x28] sm:$0xff] }
 0x634   :  { %5267 = vmatpush.msrb.mxu3 %v4921_v17  ;;  %5287 = vmatpush.msrb.mxu0 %v4937_v8 }
 0x635   :  { %5228 = vmatpush.msra.mxu1 %v4888_v4  ;;  %5248 = vmatpush.msrb.mxu2 %v4904_v31 }
 0x636   :  { %5268 = vmatpush.msrb.mxu3 %v4920_v25  ;;  %5288 = vmatpush.msrb.mxu0 %v4936_v60 }
 0x637   :  { %5229 = vmatpush.msra.mxu1 %v4887_v39  ;;  %5249 = vmatpush.msrb.mxu2 %v4903_v49  ;;  %v5310_v49 = vld [vmem:[%s8871_s11 + $0x20] sm:$0xff] }
 0x638   :  { %5269 = vmatpush.msrb.mxu3 %v4919_v59  ;;  %5289 = vmatpush.msrb.mxu0 %v4935_v43  ;;  %v5309_v59 = vld [vmem:[%s8871_s11 + $0x18] sm:$0xff] }
 0x639   :  { %5230 = vmatpush.msra.mxu1 %v4886_v5  ;;  %5250 = vmatpush.msrb.mxu2 %v4902_v11  ;;  %v5308_v5 = vld [vmem:[%s8871_s11 + $0x10] sm:$0xff]  ;;  %v5307_v11 = vld [vmem:[%s8871_s11 + $0x8] sm:$0xff] }
 0x63a   :  { %5270 = vmatpush.msrb.mxu3 %v4918_v52  ;;  %5290 = vmatpush.msrb.mxu0 %v4934_v53 }
 0x63b   :  { %5231 = vmatpush.msra.mxu1 %v4885_v30  ;;  %5251 = vmatpush.msrb.mxu2 %v4901_v28  ;;  %v5306_v30 = vld [vmem:[%s8871_s11] sm:$0xff] }
 0x63c   :  { %5271 = vmatpush.msrb.mxu3 %v4917_v55  ;;  %5291 = vmatpush.msrb.mxu0 %v4933_v57 }
 0x63d   :  { %5232 = vmatpush.msra.mxu1 %v4884_v61  ;;  %5252 = vmatpush.msrb.mxu2 %v4900_v1 }
 0x63e   :  { %5272 = vmatpush.msrb.mxu3 %v4916_v22  ;;  %5292 = vmatpush.msrb.mxu0 %v4932_v2 }
 0x63f   :  { %5233 = vmatpush.msra.mxu1 %v4883_v6  ;;  %5253 = vmatpush.msrb.mxu2 %v4899_v10 }
 0x640   :  { %5273 = vmatpush.msrb.mxu3 %v4915_v40  ;;  %5293 = vmatpush.msrb.mxu0 %v4931_v63 }
 0x641   :  { %5234 = vmatpush.msra.mxu1 %v4882_v14  ;;  %5254 = vmatpush.msrb.mxu2 %v4898_v16 }
 0x642   :  { %5274 = vmatpush.msrb.mxu3 %v4914_v9  ;;  %5294 = vmatpush.msrb.mxu0 %v4930_v18 }
 0x643   :  { %5235 = vmatpush.msra.mxu1 %v4881_v19  ;;  %5255 = vmatpush.msrb.mxu2 %v4897_v0 }
 0x644   :  { %5275 = vmatpush.msrb.mxu3 %v4913_v44  ;;  %5295 = vmatpush.msrb.mxu0 %v4929_v51 }
 0x645   :  { %5236 = vmatpush.msra.mxu1 %v4880_v20  ;;  %5256 = vmatpush.msrb.mxu2 %v4896_v24  ;;  %v5634_v20 = vld [vmem:[%s8870_s12] ss:$0 sm:$0xff] }
 0x646   :  { %5276 = vmatpush.msrb.mxu3 %v4912_v35  ;;  %5296 = vmatpush.msrb.mxu0 %v4928_v26 }
 0x647   :  { %5237 = vmatpush.msra.mxu1 %v4879_v50  ;;  %5257 = vmatpush.msrb.mxu2 %v4895_v15 }
 0x648   :  { %5277 = vmatpush.msrb.mxu3 %v4911_v3  ;;  %5297 = vmatpush.msrb.mxu0 %v4927_v12 }
 0x649   :  { %5238 = vmatpush.msra.mxu1 %v4878_v62  ;;  %5258 = vmatpush.msrb.mxu2 %v4894_v13 }
 0x64a   :  { %5278 = vmatpush.msrb.mxu3 %v4910_v21  ;;  %5298 = vmatpush.msrb.mxu0 %v4926_v34 }
 0x64b   :  { %5239 = vmatpush.msra.mxu1 %v4877_v58  ;;  %5259 = vmatpush.msrb.mxu2 %v4893_v33 }
 0x64c   :  { %5279 = vmatpush.msrb.mxu3 %v4909_v29  ;;  %5299 = vmatpush.msrb.mxu0 %v4925_v37 }
 0x64d   :  { %5240 = vmatpush.msra.mxu1 %v4876_v36  ;;  %5260 = vmatpush.msrb.mxu2 %v4892_v38 }
 0x64e   :  { %5280 = vmatpush.msrb.mxu3 %v4908_v42  ;;  %5300 = vmatpush.msrb.mxu0 %v4924_v7 }
 0x64f   :  { %5241 = vmatmul.f32.vlgmr.msra.gmra.mxu1 %v4965_v27  ;;  %5261 = vmatmul.f32.vlgmr.msrb.gmra.mxu2 %v4966_v56 }
 0x650   :  { %5281 = vmatmul.f32.vlgmr.msrb.gmra.mxu3 %v4967_v45  ;;  %5301 = vmatmul.f32.vlgmr.msrb.gmra.mxu0 %v4968_v32 }
 0x651   :  { %5330 = vmatpush.msrb.mxu1 %v5311_v54 }
 0x653   :  { %5331 = vmatpush.msrb.mxu1 %v5310_v49 }
 0x655   :  { %5332 = vmatpush.msrb.mxu1 %v5309_v59 }
 0x657   :  { %5333 = vmatpush.msrb.mxu1 %v5308_v5 }
 0x659   :  { %5334 = vmatpush.msrb.mxu1 %v5307_v11 }
 0x65b   :  { %5335 = vmatpush.msrb.mxu1 %v5306_v30 }
 0x686   :  { %v5002_v41 = vpop.f32.mrf.mxu1 }
 0x687   :  { %v5003_v47 = vadd.f32 %v5633_v23, %v5002_v41  ;;  %v5062_v4 = vpop.f32.mrf.mxu0 }
 0x68c   :  { %v5022_v46 = vpop.f32.mrf.mxu2 }
 0x68d   :  { %v5023_v48 = vadd.f32 %v5022_v46, %v5003_v47  ;;  %v5042_v17 = vpop.f32.mrf.mxu3 }
 0x68f   :  { %v5043_v8 = vadd.f32 %v5042_v17, %v5023_v48 }
 0x690   :  { %v5082_v25 = vpop.f32.mrf.mxu1 }
 0x691   :  { %v5063_v31 = vadd.f32 %v5062_v4, %v5043_v8  ;;  %v5142_v28 = vpop.f32.mrf.mxu0 }
 0x693   :  { %v5083_v60 = vadd.f32 %v5082_v25, %v5063_v31 }
 0x696   :  { %v5102_v39 = vpop.f32.mrf.mxu2 }
 0x697   :  { %v5103_v43 = vadd.f32 %v5102_v39, %v5083_v60  ;;  %v5122_v52 = vpop.f32.mrf.mxu3 }
 0x699   :  { %v5123_v53 = vadd.f32 %v5122_v52, %v5103_v43 }
 0x69b   :  { %v5143_v57 = vadd.f32 %v5142_v28, %v5123_v53 }
 0x6aa   :  { %v5162_v55 = vpop.f32.mrf.mxu1 }
 0x6ab   :  { %v5163_v1 = vadd.f32 %v5162_v55, %v5143_v57  ;;  %v5222_v10 = vpop.f32.mrf.mxu0 }
 0x6b0   :  { %v5182_v61 = vpop.f32.mrf.mxu2 }
 0x6b1   :  { %v5183_v22 = vadd.f32 %v5182_v61, %v5163_v1  ;;  %v5202_v2 = vpop.f32.mrf.mxu3 }
 0x6b3   :  { %v5203_v6 = vadd.f32 %v5202_v2, %v5183_v22 }
 0x6b5   :  { %v5223_v63 = vadd.f32 %v5222_v10, %v5203_v6 }
 0x6cc   :  { %v5242_v40 = vpop.f32.mrf.mxu1 }
 0x6cd   :  { %v5243_v14 = vadd.f32 %v5242_v40, %v5223_v63  ;;  %v5302_v0 = vpop.f32.mrf.mxu0 }
 0x6d2   :  { %v5262_v16 = vpop.f32.mrf.mxu2 }
 0x6d3   :  { %v5263_v9 = vadd.f32 %v5262_v16, %v5243_v14  ;;  %v5282_v18 = vpop.f32.mrf.mxu3 }
 0x6d5   :  { %v5283_v19 = vadd.f32 %v5282_v18, %v5263_v9 }
 0x6d7   :  { %v5303_v44 = vadd.f32 %v5302_v0, %v5283_v19 }
 0x6d9   :  { %v5305_v51 = vmax.f32 %v5303_v44, 0.0 }
 0x6db   :  { %5625 = vmatmul.msk.f32.vlgmr.msrb.gmra.mxu1 %vm5316_vm14, %v5305_v51 }
 0x758   :  { %v5337_v24 = vpop.f32.mrf.mxu1 }
 0x759   :  { %v5338_v35 = vadd.f32 %v5634_v20, %v5337_v24 }
 0x75b   :  { %5340 = vst [vmem:[%s8872_s13] sm:$0x3] %v5338_v35 }

</bundles_post_ra>
